<compile_context>
chip_gen: v5e
topology: v5e:2x2
jax: 0.10.0
libtpu: 0.0.40
codegen_flags: <defaults>
</compile_context>

<pallas_src>
import jax
import jax.numpy as jnp
from jax.experimental import pallas as pl
from jax.experimental.pallas import tpu as pltpu


def _pick_tm(m, cap=512):
    """Largest multiple-of-8 divisor of m (<= cap); prefer >=2 grid steps (v7x 2 TCs)."""
    best = None
    for t in range(min(m, cap), 7, -1):
        if m % t == 0 and t % 8 == 0:
            best = t
            break
    if best is None:
        return m                      # full-extent block is always legal
    if m // best == 1 and m >= 16 and (m // 2) % 8 == 0:
        best = m // 2                 # give the 2nd TensorCore something to do
    return best


# ------------------ kernel 1: deconv matmul + fused BN1 stats ------------------ #

def _deconv_kernel(x_ref, w_ref, y_ref, s_ref, ss_ref):
    acc = jnp.dot(x_ref[...], w_ref[...], preferred_element_type=jnp.float32)
    y_ref[...] = acc.astype(y_ref.dtype)
    # per-tile column sum / sum-of-squares -> BN statistics for free (VPU slack)
    s_ref[0, :, :] = jnp.sum(acc, axis=0, keepdims=True)
    ss_ref[0, :, :] = jnp.sum(acc * acc, axis=0, keepdims=True)


def deconv_matmul_stats(x, w):
    """(M, K) @ (K, N) -> bf16 (M, N) plus per-tile (sum, sumsq) f32 outputs."""
    m, k = x.shape
    _, n = w.shape
    tm = _pick_tm(m)
    gm = m // tm
    return pl.pallas_call(
        _deconv_kernel,
        out_shape=(
            jax.ShapeDtypeStruct((m, n), jnp.bfloat16),
            jax.ShapeDtypeStruct((gm, 1, n), jnp.float32),
            jax.ShapeDtypeStruct((gm, 1, n), jnp.float32),
        ),
        grid_spec=pltpu.PrefetchScalarGridSpec(
            num_scalar_prefetch=0,
            grid=(gm,),
            in_specs=[
                pl.BlockSpec((tm, k), lambda i: (i, 0)),
                pl.BlockSpec((k, n), lambda i: (0, 0)),   # RHS resident
            ],
            out_specs=(
                pl.BlockSpec((tm, n), lambda i: (i, 0)),
                pl.BlockSpec((1, 1, n), lambda i: (i, 0, 0)),
                pl.BlockSpec((1, 1, n), lambda i: (i, 0, 0)),
            ),
        ),
        compiler_params=pltpu.CompilerParams(dimension_semantics=("parallel",)),
    )(x, w)


# --------- kernel 2: 3x3x3 conv (in-kernel 27-tap accum) + fused BN2 stats ----- #

def _make_conv_kernel(H2, W2, Ca, Cb, OUT):
    Wp = W2 + 2
    HWW = H2 * Wp                       # "wide" rows: W2 valid + 2 junk cols per row

    def kernel(a0, a1, a2, b0, b1, b2, wa_ref, wb_ref,
               z_ref, s_ref, ss_ref, acc_ref):
        a_planes = (a0, a1, a2)
        b_planes = (b0, b1, b2)
        acc_ref[...] = jnp.zeros_like(acc_ref)
        for kd in range(3):
            a_ref = a_planes[kd]
            b_ref = b_planes[kd]
            for kh in range(3):
                for kw in range(3):
                    off = kh * Wp + kw
                    t = (kd * 3 + kh) * 3 + kw
                    pa = a_ref[0, 0, off:off + HWW, :]     # (HWW, Ca) bf16
                    pb = b_ref[0, 0, off:off + HWW, :]     # (HWW, Cb) bf16
                    acc_ref[...] += (
                        jnp.dot(pa, wa_ref[t], preferred_element_type=jnp.float32)
                        + jnp.dot(pb, wb_ref[t], preferred_element_type=jnp.float32)
                    )
        acc = acc_ref[...]
        z_ref[0, 0, :, :] = acc.astype(z_ref.dtype)
        # BN2 statistics over the *valid* W2 columns of each wide row only.
        col = jax.lax.broadcasted_iota(jnp.int32, (HWW, 1), 0) % Wp
        accm = jnp.where(col < W2, acc, 0.0)
        s_ref[0, 0, :, :] = jnp.sum(accm, axis=0, keepdims=True)
        ss_ref[0, 0, :, :] = jnp.sum(accm * accm, axis=0, keepdims=True)

    return kernel


def conv3x3_proj(xa_pad, xb_pad, w_a, w_b, H2, W2):
    """xa_pad/xb_pad: (N, D2+2, Lp, C) zero-padded, (H,W)-flattened planes (bf16).
    w_a: (27, Ca, OUT), w_b: (27, Cb, OUT) bf16.  Returns (z_wide, sum, sumsq)."""
    N, Dp, Lp, Ca = xa_pad.shape
    Cb = xb_pad.shape[-1]
    OUT = w_a.shape[-1]
    D2 = Dp - 2
    Wp = W2 + 2
    HWW = H2 * Wp
    assert Lp == (H2 + 3) * Wp

    kernel = _make_conv_kernel(H2, W2, Ca, Cb, OUT)

    def plane_spec(kd, c):
        return pl.BlockSpec((1, 1, Lp, c),
                            lambda n, d, kd=kd: (n, d + kd, 0, 0))

    in_specs = (
        [plane_spec(kd, Ca) for kd in range(3)]
        + [plane_spec(kd, Cb) for kd in range(3)]
        + [pl.BlockSpec((27, Ca, OUT), lambda n, d: (0, 0, 0)),    # weights resident
           pl.BlockSpec((27, Cb, OUT), lambda n, d: (0, 0, 0))]
    )
    out_shape = (
        jax.ShapeDtypeStruct((N, D2, HWW, OUT), jnp.float32),
        jax.ShapeDtypeStruct((N, D2, 1, OUT), jnp.float32),
        jax.ShapeDtypeStruct((N, D2, 1, OUT), jnp.float32),
    )
    out_specs = (
        pl.BlockSpec((1, 1, HWW, OUT), lambda n, d: (n, d, 0, 0)),
        pl.BlockSpec((1, 1, 1, OUT), lambda n, d: (n, d, 0, 0)),
        pl.BlockSpec((1, 1, 1, OUT), lambda n, d: (n, d, 0, 0)),
    )
    # NOTE: per-step VMEM (a few tens of KiB here) is far below the default
    # scoped limit on v5e/v6e/v7x, so no vmem_limit_bytes override is needed.
    return pl.pallas_call(
        kernel,
        out_shape=out_shape,
        grid_spec=pltpu.PrefetchScalarGridSpec(
            num_scalar_prefetch=0,
            grid=(N, D2),
            in_specs=in_specs,
            out_specs=out_specs,
            scratch_shapes=[pltpu.VMEM((HWW, OUT), jnp.float32)],
        ),
        compiler_params=pltpu.CompilerParams(
            dimension_semantics=("parallel", "parallel")),
    )(xa_pad, xa_pad, xa_pad, xb_pad, xb_pad, xb_pad, w_a, w_b)


# -------------------- kernel 3: fused BN + ReLU (lane-dense) ------------------- #

def _bn_relu_kernel(x_ref, scale_ref, bias_ref, o_ref):
    o_ref[...] = jnp.maximum(
        x_ref[...] * scale_ref[...] + bias_ref[...], 0.0
    ).astype(o_ref.dtype)


def bn_relu(x, scale, bias):
    """Per-channel affine (folded BN) + ReLU on (M, C); output minor dim packed
    to 128 lanes when possible so stores are unmasked."""
    m, c = x.shape
    k = 1
    if c < 128 and 128 % c == 0 and m % (128 // c) == 0:
        k = 128 // c
    xp = x.reshape(m // k, k * c).astype(jnp.float32)
    sp = jnp.tile(scale.astype(jnp.float32), k).reshape(1, k * c)
    bp = jnp.tile(bias.astype(jnp.float32), k).reshape(1, k * c)
    mp, cp = xp.shape
    tm = _pick_tm(mp, cap=1024)
    out = pl.pallas_call(
        _bn_relu_kernel,
        out_shape=jax.ShapeDtypeStruct((mp, cp), jnp.float32),
        grid_spec=pltpu.PrefetchScalarGridSpec(
            num_scalar_prefetch=0,
            grid=(mp // tm,),
            in_specs=[
                pl.BlockSpec((tm, cp), lambda i: (i, 0)),
                pl.BlockSpec((1, cp), lambda i: (0, 0)),
                pl.BlockSpec((1, cp), lambda i: (0, 0)),
            ],
            out_specs=pl.BlockSpec((tm, cp), lambda i: (i, 0)),
        ),
        compiler_params=pltpu.CompilerParams(dimension_semantics=("parallel",)),
    )(xp, sp, bp)
    return out.reshape(m, c)


# --------------------------------- Forward pass -------------------------------- #

def resnet_like_tu_forward(x_a, x_b, params, eps=1e-5):
    """x_a: (N, D, H, W, Ca) low-res; x_b: (N, 2D, 2H, 2W, Cb) high-res."""
    N, D, H, W, Ca = x_a.shape
    D2, H2, W2 = 2 * D, 2 * H, 2 * W
    assert x_b.shape[:4] == (N, D2, H2, W2)
    Cb = x_b.shape[-1]
    w_deconv = params["w_deconv"]            # (2, 2, 2, Ca, Ca)
    w_proj = params["w_proj"]                # (3, 3, 3, Ca + Cb, out_dim)
    OUT = w_proj.shape[-1]

    # ---- conv_a: ConvTranspose3d(k=2, s=2) == one bf16 matmul (stats fused) ----
    M1 = N * D * H * W
    x_flat = x_a.reshape(M1, Ca).astype(jnp.bfloat16)
    w_full = jnp.transpose(w_deconv, (3, 0, 1, 2, 4)).reshape(Ca, 8 * Ca)
    y, s1, ss1 = deconv_matmul_stats(x_flat, w_full.astype(jnp.bfloat16))

    cnt1 = jnp.float32(8 * M1)               # number of upsampled voxels
    ch_sum = s1.reshape(-1, 8, Ca).sum(axis=(0, 1))
    ch_ssq = ss1.reshape(-1, 8, Ca).sum(axis=(0, 1))
    mean1 = ch_sum / cnt1
    var1 = ch_ssq / cnt1 - mean1 * mean1     # biased var == PyTorch training BN
    scale1 = jax.lax.rsqrt(var1 + eps)
    bias1 = -mean1 * scale1

    # ---- glue (one fused XLA pass): 2x2x2 interleave to the upsampled grid,
    #      BN1 affine + ReLU folded in, cast bf16, zero-pad for the 3^3 conv,
    #      flatten (H, W) so the conv kernel only ever touches 2-D slabs.
    Wp = W2 + 2
    Lp = (H2 + 3) * Wp                       # +1 extra zero row: wide-slab overrun
    y8 = y.reshape(N, D, H, W, 2, 2, 2, Ca)
    xa_up = jnp.transpose(y8, (0, 1, 4, 2, 5, 3, 6, 7)).reshape(N, D2, H2, W2, Ca)
    xa_up = jnp.maximum(xa_up.astype(jnp.float32) * scale1 + bias1, 0.0)
    xa_pad = jnp.pad(xa_up.astype(jnp.bfloat16),
                     ((0, 0), (1, 1), (1, 2), (1, 1), (0, 0)))
    xa_pad = xa_pad.reshape(N, D2 + 2, Lp, Ca)
    xb_pad = jnp.pad(x_b.astype(jnp.bfloat16),
                     ((0, 0), (1, 1), (1, 2), (1, 1), (0, 0)))
    xb_pad = xb_pad.reshape(N, D2 + 2, Lp, Cb)

    # ---- conv_proj: 3x3x3 conv, in-kernel 27-tap accumulation (no im2col),
    #      weight split per input so the channel concat is never materialized.
    w_a = w_proj[:, :, :, :Ca, :].reshape(27, Ca, OUT).astype(jnp.bfloat16)
    w_b = w_proj[:, :, :, Ca:, :].reshape(27, Cb, OUT).astype(jnp.bfloat16)
    z_wide, s2, ss2 = conv3x3_proj(xa_pad, xb_pad, w_a, w_b, H2, W2)

    cnt2 = jnp.float32(N * D2 * H2 * W2)
    mean2 = s2.reshape(-1, OUT).sum(axis=0) / cnt2
    var2 = ss2.reshape(-1, OUT).sum(axis=0) / cnt2 - mean2 * mean2
    scale2 = jax.lax.rsqrt(var2 + eps)
    bias2 = -mean2 * scale2

    # Drop the 2 junk columns per wide row, then fused BN2 + ReLU (lane-packed).
    z = z_wide.reshape(N, D2, H2, Wp, OUT)[:, :, :, :W2, :]
    out = bn_relu(z.reshape(-1, OUT), scale2, bias2)
    return out.reshape(N, D2, H2, W2, OUT)


# ------------------------------------- Main ------------------------------------ #

if __name__ == "__main__":
    # Small shapes: batch=2, input_a_dim=8, input_b_dim=8, out_dim=16,
    # x_a spatial 4^3 (low-res), x_b spatial 8^3 (high-res).
    N, D, Ca, Cb, OUT = 2, 4, 8, 8, 16

    key = jax.random.PRNGKey(0)
    k_xa, k_xb, k_wd, k_wp = jax.random.split(key, 4)

    x_a = jax.random.normal(k_xa, (N, D, D, D, Ca), dtype=jnp.float32)
    x_b = jax.random.normal(k_xb, (N, 2 * D, 2 * D, 2 * D, Cb), dtype=jnp.float32)

    params = {
        "w_deconv": 0.1 * jax.random.normal(k_wd, (2, 2, 2, Ca, Ca), dtype=jnp.float32),
        "w_proj": 0.1 * jax.random.normal(k_wp, (3, 3, 3, Ca + Cb, OUT), dtype=jnp.float32),
    }

    fwd = jax.jit(resnet_like_tu_forward)
    out = fwd(x_a, x_b, params)
    jax.block_until_ready(out)
    assert out.shape == (N, 2 * D, 2 * D, 2 * D, OUT)
    assert bool(jnp.all(jnp.isfinite(out)))
    print("KERNEL_OK")
</pallas_src>

<mosaic_0001>
module attributes {stable_mosaic.version = 11 : i64} {
  func.func @_deconv_kernel(%arg0: i32, %arg1: memref<64x8xbf16, #tpu.memory_space<vmem>>, %arg2: memref<8x64xbf16, #tpu.memory_space<vmem>>, %arg3: memref<64x64xbf16, #tpu.memory_space<vmem>>, %arg4: memref<1x1x64xf32, #tpu.memory_space<vmem>>, %arg5: memref<1x1x64xf32, #tpu.memory_space<vmem>>) attributes {dimension_semantics = [#tpu.dimension_semantics<parallel>], iteration_bounds = array<i64: 2>, scalar_prefetch = 0 : i64, scratch_operands = 0 : i64, tpu.core_type = #tpu.core_type<tc>, window_params = [{transform_indices = @transform_0, window_bounds = array<i64: 64, 8>}, {pipeline_mode = #tpu.pipeline_mode<synchronous>, transform_indices = @transform_1, window_bounds = array<i64: 8, 64>}, {transform_indices = @transform_2, window_bounds = array<i64: 64, 64>}, {transform_indices = @transform_3, window_bounds = array<i64: 1, 1, 64>}, {transform_indices = @transform_4, window_bounds = array<i64: 1, 1, 64>}]} {
    %c0 = arith.constant 0 : index
    %c0_0 = arith.constant 0 : index
    %0 = vector.load %arg1[%c0, %c0_0] : memref<64x8xbf16, #tpu.memory_space<vmem>>, vector<64x8xbf16>
    %c0_1 = arith.constant 0 : index
    %c0_2 = arith.constant 0 : index
    %1 = vector.load %arg2[%c0_1, %c0_2] : memref<8x64xbf16, #tpu.memory_space<vmem>>, vector<8x64xbf16>
    %cst = arith.constant dense<0.000000e+00> : vector<64x64xf32>
    %2 = tpu.matmul %0, %1, %cst {dimension_numbers = #tpu.dot_dimension_numbers<[1], [0], [0], [1], [0, 0, 1, 1], [], []>} : vector<64x8xbf16>, vector<8x64xbf16>, vector<64x64xf32> -> vector<64x64xf32>
    %3 = arith.truncf %2 : vector<64x64xf32> to vector<64x64xbf16>
    %c0_3 = arith.constant 0 : index
    %c0_4 = arith.constant 0 : index
    %4 = vector.load %arg3[%c0_3, %c0_4] : memref<64x64xbf16, #tpu.memory_space<vmem>>, vector<64x64xbf16>
    tpu.vector_store %arg3[%c0_3, %c0_4], %3 {strides = array<i32>} : memref<64x64xbf16, #tpu.memory_space<vmem>>, vector<64x64xbf16>,
    %cst_5 = arith.constant dense<0.000000e+00> : vector<64xf32>
    %5 = vector.multi_reduction <add>, %2, %cst_5 [0] : vector<64x64xf32> to vector<64xf32>
    %6 = vector.shape_cast %5 : vector<64xf32> to vector<1x64xf32>
    %c0_6 = arith.constant 0 : index
    %c0_7 = arith.constant 0 : index
    %c0_8 = arith.constant 0 : index
    %7 = vector.load %arg4[%c0_6, %c0_7, %c0_8] : memref<1x1x64xf32, #tpu.memory_space<vmem>>, vector<1x1x64xf32>
    %8 = vector.shape_cast %7 : vector<1x1x64xf32> to vector<1x64xf32>
    %9 = vector.shape_cast %6 : vector<1x64xf32> to vector<1x1x64xf32>
    tpu.vector_store %arg4[%c0_6, %c0_7, %c0_8], %9 {strides = array<i32>} : memref<1x1x64xf32, #tpu.memory_space<vmem>>, vector<1x1x64xf32>,
    %10 = arith.mulf %2, %2 : vector<64x64xf32>
    %cst_9 = arith.constant dense<0.000000e+00> : vector<64xf32>
    %11 = vector.multi_reduction <add>, %10, %cst_9 [0] : vector<64x64xf32> to vector<64xf32>
    %12 = vector.shape_cast %11 : vector<64xf32> to vector<1x64xf32>
    %c0_10 = arith.constant 0 : index
    %c0_11 = arith.constant 0 : index
    %c0_12 = arith.constant 0 : index
    %13 = vector.load %arg5[%c0_10, %c0_11, %c0_12] : memref<1x1x64xf32, #tpu.memory_space<vmem>>, vector<1x1x64xf32>
    %14 = vector.shape_cast %13 : vector<1x1x64xf32> to vector<1x64xf32>
    %15 = vector.shape_cast %12 : vector<1x64xf32> to vector<1x1x64xf32>
    tpu.vector_store %arg5[%c0_10, %c0_11, %c0_12], %15 {strides = array<i32>} : memref<1x1x64xf32, #tpu.memory_space<vmem>>, vector<1x1x64xf32>,
    return
  }
  func.func @transform_0(%arg0: i32) -> (i32, i32) {
    %c0_i32 = arith.constant 0 : i32
    %c0_i32_0 = arith.constant 0 : i32
    return %arg0, %c0_i32 : i32, i32
  }
  func.func @transform_1(%arg0: i32) -> (i32, i32) {
    %c0_i32 = arith.constant 0 : i32
    %c0_i32_0 = arith.constant 0 : i32
    %c0_i32_1 = arith.constant 0 : i32
    return %c0_i32, %c0_i32_0 : i32, i32
  }
  func.func @transform_2(%arg0: i32) -> (i32, i32) {
    %c0_i32 = arith.constant 0 : i32
    %c0_i32_0 = arith.constant 0 : i32
    return %arg0, %c0_i32 : i32, i32
  }
  func.func @transform_3(%arg0: i32) -> (i32, i32, i32) {
    %c0_i32 = arith.constant 0 : i32
    %c0_i32_0 = arith.constant 0 : i32
    %c0_i32_1 = arith.constant 0 : i32
    return %arg0, %c0_i32, %c0_i32_0 : i32, i32, i32
  }
  func.func @transform_4(%arg0: i32) -> (i32, i32, i32) {
    %c0_i32 = arith.constant 0 : i32
    %c0_i32_0 = arith.constant 0 : i32
    %c0_i32_1 = arith.constant 0 : i32
    return %arg0, %c0_i32, %c0_i32_0 : i32, i32, i32
  }
}

module attributes {stable_mosaic.version = 11 : i64} {
  func.func @kernel(%arg0: i32, %arg1: i32, %arg2: memref<1x1x110x8xbf16, #tpu.memory_space<vmem>>, %arg3: memref<1x1x110x8xbf16, #tpu.memory_space<vmem>>, %arg4: memref<1x1x110x8xbf16, #tpu.memory_space<vmem>>, %arg5: memref<1x1x110x8xbf16, #tpu.memory_space<vmem>>, %arg6: memref<1x1x110x8xbf16, #tpu.memory_space<vmem>>, %arg7: memref<1x1x110x8xbf16, #tpu.memory_space<vmem>>, %arg8: memref<27x8x16xbf16, #tpu.memory_space<vmem>>, %arg9: memref<27x8x16xbf16, #tpu.memory_space<vmem>>, %arg10: memref<1x1x80x16xf32, #tpu.memory_space<vmem>>, %arg11: memref<1x1x1x16xf32, #tpu.memory_space<vmem>>, %arg12: memref<1x1x1x16xf32, #tpu.memory_space<vmem>>, %arg13: memref<80x16xf32, #tpu.memory_space<vmem>>) attributes {dimension_semantics = [#tpu.dimension_semantics<parallel>, #tpu.dimension_semantics<parallel>], iteration_bounds = array<i64: 2, 8>, scalar_prefetch = 0 : i64, scratch_operands = 1 : i64, tpu.core_type = #tpu.core_type<tc>, window_params = [{transform_indices = @transform_0, window_bounds = array<i64: 1, 1, 110, 8>}, {transform_indices = @transform_1, window_bounds = array<i64: 1, 1, 110, 8>}, {transform_indices = @transform_2, window_bounds = array<i64: 1, 1, 110, 8>}, {transform_indices = @transform_3, window_bounds = array<i64: 1, 1, 110, 8>}, {transform_indices = @transform_4, window_bounds = array<i64: 1, 1, 110, 8>}, {transform_indices = @transform_5, window_bounds = array<i64: 1, 1, 110, 8>}, {pipeline_mode = #tpu.pipeline_mode<synchronous>, transform_indices = @transform_6, window_bounds = array<i64: 27, 8, 16>}, {pipeline_mode = #tpu.pipeline_mode<synchronous>, transform_indices = @transform_7, window_bounds = array<i64: 27, 8, 16>}, {transform_indices = @transform_8, window_bounds = array<i64: 1, 1, 80, 16>}, {transform_indices = @transform_9, window_bounds = array<i64: 1, 1, 1, 16>}, {transform_indices = @transform_10, window_bounds = array<i64: 1, 1, 1, 16>}]} {
    %cst = arith.constant 0.000000e+00 : f32
    %0 = vector.broadcast %cst : f32 to vector<80x16xf32>
    %c0 = arith.constant 0 : index
    %c0_0 = arith.constant 0 : index
    %1 = vector.load %arg13[%c0, %c0_0] : memref<80x16xf32, #tpu.memory_space<vmem>>, vector<80x16xf32>
    tpu.vector_store %arg13[%c0, %c0_0], %0 {strides = array<i32>} : memref<80x16xf32, #tpu.memory_space<vmem>>, vector<80x16xf32>,
    %c0_1 = arith.constant 0 : index
    %c0_2 = arith.constant 0 : index
    %c0_3 = arith.constant 0 : index
    %c0_4 = arith.constant 0 : index
    %2 = vector.load %arg2[%c0_1, %c0_2, %c0_3, %c0_4] : memref<1x1x110x8xbf16, #tpu.memory_space<vmem>>, vector<1x1x80x8xbf16>
    %3 = vector.shape_cast %2 : vector<1x1x80x8xbf16> to vector<80x8xbf16>
    %c0_5 = arith.constant 0 : index
    %c0_6 = arith.constant 0 : index
    %c0_7 = arith.constant 0 : index
    %c0_8 = arith.constant 0 : index
    %4 = vector.load %arg5[%c0_5, %c0_6, %c0_7, %c0_8] : memref<1x1x110x8xbf16, #tpu.memory_space<vmem>>, vector<1x1x80x8xbf16>
    %5 = vector.shape_cast %4 : vector<1x1x80x8xbf16> to vector<80x8xbf16>
    %c0_9 = arith.constant 0 : index
    %c0_10 = arith.constant 0 : index
    %6 = vector.load %arg13[%c0_9, %c0_10] : memref<80x16xf32, #tpu.memory_space<vmem>>, vector<80x16xf32>
    %c0_11 = arith.constant 0 : index
    %c0_12 = arith.constant 0 : index
    %c0_13 = arith.constant 0 : index
    %7 = vector.load %arg8[%c0_11, %c0_12, %c0_13] : memref<27x8x16xbf16, #tpu.memory_space<vmem>>, vector<1x8x16xbf16>
    %8 = vector.shape_cast %7 : vector<1x8x16xbf16> to vector<8x16xbf16>
    %cst_14 = arith.constant dense<0.000000e+00> : vector<80x16xf32>
    %9 = tpu.matmul %3, %8, %cst_14 {dimension_numbers = #tpu.dot_dimension_numbers<[1], [0], [0], [1], [0, 0, 1, 1], [], []>} : vector<80x8xbf16>, vector<8x16xbf16>, vector<80x16xf32> -> vector<80x16xf32>
    %c0_15 = arith.constant 0 : index
    %c0_16 = arith.constant 0 : index
    %c0_17 = arith.constant 0 : index
    %10 = vector.load %arg9[%c0_15, %c0_16, %c0_17] : memref<27x8x16xbf16, #tpu.memory_space<vmem>>, vector<1x8x16xbf16>
    %11 = vector.shape_cast %10 : vector<1x8x16xbf16> to vector<8x16xbf16>
    %cst_18 = arith.constant dense<0.000000e+00> : vector<80x16xf32>
    %12 = tpu.matmul %5, %11, %cst_18 {dimension_numbers = #tpu.dot_dimension_numbers<[1], [0], [0], [1], [0, 0, 1, 1], [], []>} : vector<80x8xbf16>, vector<8x16xbf16>, vector<80x16xf32> -> vector<80x16xf32>
    %13 = arith.addf %9, %12 : vector<80x16xf32>
    %14 = arith.addf %6, %13 : vector<80x16xf32>
    %c0_19 = arith.constant 0 : index
    %c0_20 = arith.constant 0 : index
    %15 = vector.load %arg13[%c0_19, %c0_20] : memref<80x16xf32, #tpu.memory_space<vmem>>, vector<80x16xf32>
    tpu.vector_store %arg13[%c0_19, %c0_20], %14 {strides = array<i32>} : memref<80x16xf32, #tpu.memory_space<vmem>>, vector<80x16xf32>,
    %c0_21 = arith.constant 0 : index
    %c0_22 = arith.constant 0 : index
    %c1 = arith.constant 1 : index
    %c0_23 = arith.constant 0 : index
    %16 = vector.load %arg2[%c0_21, %c0_22, %c1, %c0_23] : memref<1x1x110x8xbf16, #tpu.memory_space<vmem>>, vector<1x1x80x8xbf16>
    %17 = vector.shape_cast %16 : vector<1x1x80x8xbf16> to vector<80x8xbf16>
    %c0_24 = arith.constant 0 : index
    %c0_25 = arith.constant 0 : index
    %c1_26 = arith.constant 1 : index
    %c0_27 = arith.constant 0 : index
    %18 = vector.load %arg5[%c0_24, %c0_25, %c1_26, %c0_27] : memref<1x1x110x8xbf16, #tpu.memory_space<vmem>>, vector<1x1x80x8xbf16>
    %19 = vector.shape_cast %18 : vector<1x1x80x8xbf16> to vector<80x8xbf16>
    %c0_28 = arith.constant 0 : index
    %c0_29 = arith.constant 0 : index
    %20 = vector.load %arg13[%c0_28, %c0_29] : memref<80x16xf32, #tpu.memory_space<vmem>>, vector<80x16xf32>
    %c1_30 = arith.constant 1 : index
    %c0_31 = arith.constant 0 : index
    %c0_32 = arith.constant 0 : index
    %21 = vector.load %arg8[%c1_30, %c0_31, %c0_32] : memref<27x8x16xbf16, #tpu.memory_space<vmem>>, vector<1x8x16xbf16>
    %22 = vector.shape_cast %21 : vector<1x8x16xbf16> to vector<8x16xbf16>
    %cst_33 = arith.constant dense<0.000000e+00> : vector<80x16xf32>
    %23 = tpu.matmul %17, %22, %cst_33 {dimension_numbers = #tpu.dot_dimension_numbers<[1], [0], [0], [1], [0, 0, 1, 1], [], []>} : vector<80x8xbf16>, vector<8x16xbf16>, vector<80x16xf32> -> vector<80x16xf32>
    %c1_34 = arith.constant 1 : index
    %c0_35 = arith.constant 0 : index
    %c0_36 = arith.constant 0 : index
    %24 = vector.load %arg9[%c1_34, %c0_35, %c0_36] : memref<27x8x16xbf16, #tpu.memory_space<vmem>>, vector<1x8x16xbf16>
    %25 = vector.shape_cast %24 : vector<1x8x16xbf16> to vector<8x16xbf16>
    %cst_37 = arith.constant dense<0.000000e+00> : vector<80x16xf32>
    %26 = tpu.matmul %19, %25, %cst_37 {dimension_numbers = #tpu.dot_dimension_numbers<[1], [0], [0], [1], [0, 0, 1, 1], [], []>} : vector<80x8xbf16>, vector<8x16xbf16>, vector<80x16xf32> -> vector<80x16xf32>
    %27 = arith.addf %23, %26 : vector<80x16xf32>
    %28 = arith.addf %20, %27 : vector<80x16xf32>
    %c0_38 = arith.constant 0 : index
    %c0_39 = arith.constant 0 : index
    %29 = vector.load %arg13[%c0_38, %c0_39] : memref<80x16xf32, #tpu.memory_space<vmem>>, vector<80x16xf32>
    tpu.vector_store %arg13[%c0_38, %c0_39], %28 {strides = array<i32>} : memref<80x16xf32, #tpu.memory_space<vmem>>, vector<80x16xf32>,
    %c0_40 = arith.constant 0 : index
    %c0_41 = arith.constant 0 : index
    %c2 = arith.constant 2 : index
    %c0_42 = arith.constant 0 : index
    %30 = vector.load %arg2[%c0_40, %c0_41, %c2, %c0_42] : memref<1x1x110x8xbf16, #tpu.memory_space<vmem>>, vector<1x1x80x8xbf16>
    %31 = vector.shape_cast %30 : vector<1x1x80x8xbf16> to vector<80x8xbf16>
    %c0_43 = arith.constant 0 : index
    %c0_44 = arith.constant 0 : index
    %c2_45 = arith.constant 2 : index
    %c0_46 = arith.constant 0 : index
    %32 = vector.load %arg5[%c0_43, %c0_44, %c2_45, %c0_46] : memref<1x1x110x8xbf16, #tpu.memory_space<vmem>>, vector<1x1x80x8xbf16>
    %33 = vector.shape_cast %32 : vector<1x1x80x8xbf16> to vector<80x8xbf16>
    %c0_47 = arith.constant 0 : index
    %c0_48 = arith.constant 0 : index
    %34 = vector.load %arg13[%c0_47, %c0_48] : memref<80x16xf32, #tpu.memory_space<vmem>>, vector<80x16xf32>
    %c2_49 = arith.constant 2 : index
    %c0_50 = arith.constant 0 : index
    %c0_51 = arith.constant 0 : index
    %35 = vector.load %arg8[%c2_49, %c0_50, %c0_51] : memref<27x8x16xbf16, #tpu.memory_space<vmem>>, vector<1x8x16xbf16>
    %36 = vector.shape_cast %35 : vector<1x8x16xbf16> to vector<8x16xbf16>
    %cst_52 = arith.constant dense<0.000000e+00> : vector<80x16xf32>
    %37 = tpu.matmul %31, %36, %cst_52 {dimension_numbers = #tpu.dot_dimension_numbers<[1], [0], [0], [1], [0, 0, 1, 1], [], []>} : vector<80x8xbf16>, vector<8x16xbf16>, vector<80x16xf32> -> vector<80x16xf32>
    %c2_53 = arith.constant 2 : index
    %c0_54 = arith.constant 0 : index
    %c0_55 = arith.constant 0 : index
    %38 = vector.load %arg9[%c2_53, %c0_54, %c0_55] : memref<27x8x16xbf16, #tpu.memory_space<vmem>>, vector<1x8x16xbf16>
    %39 = vector.shape_cast %38 : vector<1x8x16xbf16> to vector<8x16xbf16>
    %cst_56 = arith.constant dense<0.000000e+00> : vector<80x16xf32>
    %40 = tpu.matmul %33, %39, %cst_56 {dimension_numbers = #tpu.dot_dimension_numbers<[1], [0], [0], [1], [0, 0, 1, 1], [], []>} : vector<80x8xbf16>, vector<8x16xbf16>, vector<80x16xf32> -> vector<80x16xf32>
    %41 = arith.addf %37, %40 : vector<80x16xf32>
    %42 = arith.addf %34, %41 : vector<80x16xf32>
    %c0_57 = arith.constant 0 : index
    %c0_58 = arith.constant 0 : index
    %43 = vector.load %arg13[%c0_57, %c0_58] : memref<80x16xf32, #tpu.memory_space<vmem>>, vector<80x16xf32>
    tpu.vector_store %arg13[%c0_57, %c0_58], %42 {strides = array<i32>} : memref<80x16xf32, #tpu.memory_space<vmem>>, vector<80x16xf32>,
    %c0_59 = arith.constant 0 : index
    %c0_60 = arith.constant 0 : index
    %c10 = arith.constant 10 : index
    %c0_61 = arith.constant 0 : index
    %44 = vector.load %arg2[%c0_59, %c0_60, %c10, %c0_61] : memref<1x1x110x8xbf16, #tpu.memory_space<vmem>>, vector<1x1x80x8xbf16>
    %45 = vector.shape_cast %44 : vector<1x1x80x8xbf16> to vector<80x8xbf16>
    %c0_62 = arith.constant 0 : index
    %c0_63 = arith.constant 0 : index
    %c10_64 = arith.constant 10 : index
    %c0_65 = arith.constant 0 : index
    %46 = vector.load %arg5[%c0_62, %c0_63, %c10_64, %c0_65] : memref<1x1x110x8xbf16, #tpu.memory_space<vmem>>, vector<1x1x80x8xbf16>
    %47 = vector.shape_cast %46 : vector<1x1x80x8xbf16> to vector<80x8xbf16>
    %c0_66 = arith.constant 0 : index
    %c0_67 = arith.constant 0 : index
    %48 = vector.load %arg13[%c0_66, %c0_67] : memref<80x16xf32, #tpu.memory_space<vmem>>, vector<80x16xf32>
    %c3 = arith.constant 3 : index
    %c0_68 = arith.constant 0 : index
    %c0_69 = arith.constant 0 : index
    %49 = vector.load %arg8[%c3, %c0_68, %c0_69] : memref<27x8x16xbf16, #tpu.memory_space<vmem>>, vector<1x8x16xbf16>
    %50 = vector.shape_cast %49 : vector<1x8x16xbf16> to vector<8x16xbf16>
    %cst_70 = arith.constant dense<0.000000e+00> : vector<80x16xf32>
    %51 = tpu.matmul %45, %50, %cst_70 {dimension_numbers = #tpu.dot_dimension_numbers<[1], [0], [0], [1], [0, 0, 1, 1], [], []>} : vector<80x8xbf16>, vector<8x16xbf16>, vector<80x16xf32> -> vector<80x16xf32>
    %c3_71 = arith.constant 3 : index
    %c0_72 = arith.constant 0 : index
    %c0_73 = arith.constant 0 : index
    %52 = vector.load %arg9[%c3_71, %c0_72, %c0_73] : memref<27x8x16xbf16, #tpu.memory_space<vmem>>, vector<1x8x16xbf16>
    %53 = vector.shape_cast %52 : vector<1x8x16xbf16> to vector<8x16xbf16>
    %cst_74 = arith.constant dense<0.000000e+00> : vector<80x16xf32>
    %54 = tpu.matmul %47, %53, %cst_74 {dimension_numbers = #tpu.dot_dimension_numbers<[1], [0], [0], [1], [0, 0, 1, 1], [], []>} : vector<80x8xbf16>, vector<8x16xbf16>, vector<80x16xf32> -> vector<80x16xf32>
    %55 = arith.addf %51, %54 : vector<80x16xf32>
    %56 = arith.addf %48, %55 : vector<80x16xf32>
    %c0_75 = arith.constant 0 : index
    %c0_76 = arith.constant 0 : index
    %57 = vector.load %arg13[%c0_75, %c0_76] : memref<80x16xf32, #tpu.memory_space<vmem>>, vector<80x16xf32>
    tpu.vector_store %arg13[%c0_75, %c0_76], %56 {strides = array<i32>} : memref<80x16xf32, #tpu.memory_space<vmem>>, vector<80x16xf32>,
    %c0_77 = arith.constant 0 : index
    %c0_78 = arith.constant 0 : index
    %c11 = arith.constant 11 : index
    %c0_79 = arith.constant 0 : index
    %58 = vector.load %arg2[%c0_77, %c0_78, %c11, %c0_79] : memref<1x1x110x8xbf16, #tpu.memory_space<vmem>>, vector<1x1x80x8xbf16>
    %59 = vector.shape_cast %58 : vector<1x1x80x8xbf16> to vector<80x8xbf16>
    %c0_80 = arith.constant 0 : index
    %c0_81 = arith.constant 0 : index
    %c11_82 = arith.constant 11 : index
    %c0_83 = arith.constant 0 : index
    %60 = vector.load %arg5[%c0_80, %c0_81, %c11_82, %c0_83] : memref<1x1x110x8xbf16, #tpu.memory_space<vmem>>, vector<1x1x80x8xbf16>
    %61 = vector.shape_cast %60 : vector<1x1x80x8xbf16> to vector<80x8xbf16>
    %c0_84 = arith.constant 0 : index
    %c0_85 = arith.constant 0 : index
    %62 = vector.load %arg13[%c0_84, %c0_85] : memref<80x16xf32, #tpu.memory_space<vmem>>, vector<80x16xf32>
    %c4 = arith.constant 4 : index
    %c0_86 = arith.constant 0 : index
    %c0_87 = arith.constant 0 : index
    %63 = vector.load %arg8[%c4, %c0_86, %c0_87] : memref<27x8x16xbf16, #tpu.memory_space<vmem>>, vector<1x8x16xbf16>
    %64 = vector.shape_cast %63 : vector<1x8x16xbf16> to vector<8x16xbf16>
    %cst_88 = arith.constant dense<0.000000e+00> : vector<80x16xf32>
    %65 = tpu.matmul %59, %64, %cst_88 {dimension_numbers = #tpu.dot_dimension_numbers<[1], [0], [0], [1], [0, 0, 1, 1], [], []>} : vector<80x8xbf16>, vector<8x16xbf16>, vector<80x16xf32> -> vector<80x16xf32>
    %c4_89 = arith.constant 4 : index
    %c0_90 = arith.constant 0 : index
    %c0_91 = arith.constant 0 : index
    %66 = vector.load %arg9[%c4_89, %c0_90, %c0_91] : memref<27x8x16xbf16, #tpu.memory_space<vmem>>, vector<1x8x16xbf16>
    %67 = vector.shape_cast %66 : vector<1x8x16xbf16> to vector<8x16xbf16>
    %cst_92 = arith.constant dense<0.000000e+00> : vector<80x16xf32>
    %68 = tpu.matmul %61, %67, %cst_92 {dimension_numbers = #tpu.dot_dimension_numbers<[1], [0], [0], [1], [0, 0, 1, 1], [], []>} : vector<80x8xbf16>, vector<8x16xbf16>, vector<80x16xf32> -> vector<80x16xf32>
    %69 = arith.addf %65, %68 : vector<80x16xf32>
    %70 = arith.addf %62, %69 : vector<80x16xf32>
    %c0_93 = arith.constant 0 : index
    %c0_94 = arith.constant 0 : index
    %71 = vector.load %arg13[%c0_93, %c0_94] : memref<80x16xf32, #tpu.memory_space<vmem>>, vector<80x16xf32>
    tpu.vector_store %arg13[%c0_93, %c0_94], %70 {strides = array<i32>} : memref<80x16xf32, #tpu.memory_space<vmem>>, vector<80x16xf32>,
    %c0_95 = arith.constant 0 : index
    %c0_96 = arith.constant 0 : index
    %c12 = arith.constant 12 : index
    %c0_97 = arith.constant 0 : index
    %72 = vector.load %arg2[%c0_95, %c0_96, %c12, %c0_97] : memref<1x1x110x8xbf16, #tpu.memory_space<vmem>>, vector<1x1x80x8xbf16>
    %73 = vector.shape_cast %72 : vector<1x1x80x8xbf16> to vector<80x8xbf16>
    %c0_98 = arith.constant 0 : index
    %c0_99 = arith.constant 0 : index
    %c12_100 = arith.constant 12 : index
    %c0_101 = arith.constant 0 : index
    %74 = vector.load %arg5[%c0_98, %c0_99, %c12_100, %c0_101] : memref<1x1x110x8xbf16, #tpu.memory_space<vmem>>, vector<1x1x80x8xbf16>
    %75 = vector.shape_cast %74 : vector<1x1x80x8xbf16> to vector<80x8xbf16>
    %c0_102 = arith.constant 0 : index
    %c0_103 = arith.constant 0 : index
    %76 = vector.load %arg13[%c0_102, %c0_103] : memref<80x16xf32, #tpu.memory_space<vmem>>, vector<80x16xf32>
    %c5 = arith.constant 5 : index
    %c0_104 = arith.constant 0 : index
    %c0_105 = arith.constant 0 : index
    %77 = vector.load %arg8[%c5, %c0_104, %c0_105] : memref<27x8x16xbf16, #tpu.memory_space<vmem>>, vector<1x8x16xbf16>
    %78 = vector.shape_cast %77 : vector<1x8x16xbf16> to vector<8x16xbf16>
    %cst_106 = arith.constant dense<0.000000e+00> : vector<80x16xf32>
    %79 = tpu.matmul %73, %78, %cst_106 {dimension_numbers = #tpu.dot_dimension_numbers<[1], [0], [0], [1], [0, 0, 1, 1], [], []>} : vector<80x8xbf16>, vector<8x16xbf16>, vector<80x16xf32> -> vector<80x16xf32>
    %c5_107 = arith.constant 5 : index
    %c0_108 = arith.constant 0 : index
    %c0_109 = arith.constant 0 : index
    %80 = vector.load %arg9[%c5_107, %c0_108, %c0_109] : memref<27x8x16xbf16, #tpu.memory_space<vmem>>, vector<1x8x16xbf16>
    %81 = vector.shape_cast %80 : vector<1x8x16xbf16> to vector<8x16xbf16>
    %cst_110 = arith.constant dense<0.000000e+00> : vector<80x16xf32>
    %82 = tpu.matmul %75, %81, %cst_110 {dimension_numbers = #tpu.dot_dimension_numbers<[1], [0], [0], [1], [0, 0, 1, 1], [], []>} : vector<80x8xbf16>, vector<8x16xbf16>, vector<80x16xf32> -> vector<80x16xf32>
    %83 = arith.addf %79, %82 : vector<80x16xf32>
    %84 = arith.addf %76, %83 : vector<80x16xf32>
    %c0_111 = arith.constant 0 : index
    %c0_112 = arith.constant 0 : index
    %85 = vector.load %arg13[%c0_111, %c0_112] : memref<80x16xf32, #tpu.memory_space<vmem>>, vector<80x16xf32>
    tpu.vector_store %arg13[%c0_111, %c0_112], %84 {strides = array<i32>} : memref<80x16xf32, #tpu.memory_space<vmem>>, vector<80x16xf32>,
    %c0_113 = arith.constant 0 : index
    %c0_114 = arith.constant 0 : index
    %c20 = arith.constant 20 : index
    %c0_115 = arith.constant 0 : index
    %86 = vector.load %arg2[%c0_113, %c0_114, %c20, %c0_115] : memref<1x1x110x8xbf16, #tpu.memory_space<vmem>>, vector<1x1x80x8xbf16>
    %87 = vector.shape_cast %86 : vector<1x1x80x8xbf16> to vector<80x8xbf16>
    %c0_116 = arith.constant 0 : index
    %c0_117 = arith.constant 0 : index
    %c20_118 = arith.constant 20 : index
    %c0_119 = arith.constant 0 : index
    %88 = vector.load %arg5[%c0_116, %c0_117, %c20_118, %c0_119] : memref<1x1x110x8xbf16, #tpu.memory_space<vmem>>, vector<1x1x80x8xbf16>
    %89 = vector.shape_cast %88 : vector<1x1x80x8xbf16> to vector<80x8xbf16>
    %c0_120 = arith.constant 0 : index
    %c0_121 = arith.constant 0 : index
    %90 = vector.load %arg13[%c0_120, %c0_121] : memref<80x16xf32, #tpu.memory_space<vmem>>, vector<80x16xf32>
    %c6 = arith.constant 6 : index
    %c0_122 = arith.constant 0 : index
    %c0_123 = arith.constant 0 : index
    %91 = vector.load %arg8[%c6, %c0_122, %c0_123] : memref<27x8x16xbf16, #tpu.memory_space<vmem>>, vector<1x8x16xbf16>
    %92 = vector.shape_cast %91 : vector<1x8x16xbf16> to vector<8x16xbf16>
    %cst_124 = arith.constant dense<0.000000e+00> : vector<80x16xf32>
    %93 = tpu.matmul %87, %92, %cst_124 {dimension_numbers = #tpu.dot_dimension_numbers<[1], [0], [0], [1], [0, 0, 1, 1], [], []>} : vector<80x8xbf16>, vector<8x16xbf16>, vector<80x16xf32> -> vector<80x16xf32>
    %c6_125 = arith.constant 6 : index
    %c0_126 = arith.constant 0 : index
    %c0_127 = arith.constant 0 : index
    %94 = vector.load %arg9[%c6_125, %c0_126, %c0_127] : memref<27x8x16xbf16, #tpu.memory_space<vmem>>, vector<1x8x16xbf16>
    %95 = vector.shape_cast %94 : vector<1x8x16xbf16> to vector<8x16xbf16>
    %cst_128 = arith.constant dense<0.000000e+00> : vector<80x16xf32>
    %96 = tpu.matmul %89, %95, %cst_128 {dimension_numbers = #tpu.dot_dimension_numbers<[1], [0], [0], [1], [0, 0, 1, 1], [], []>} : vector<80x8xbf16>, vector<8x16xbf16>, vector<80x16xf32> -> vector<80x16xf32>
    %97 = arith.addf %93, %96 : vector<80x16xf32>
    %98 = arith.addf %90, %97 : vector<80x16xf32>
    %c0_129 = arith.constant 0 : index
    %c0_130 = arith.constant 0 : index
    %99 = vector.load %arg13[%c0_129, %c0_130] : memref<80x16xf32, #tpu.memory_space<vmem>>, vector<80x16xf32>
    tpu.vector_store %arg13[%c0_129, %c0_130], %98 {strides = array<i32>} : memref<80x16xf32, #tpu.memory_space<vmem>>, vector<80x16xf32>,
    %c0_131 = arith.constant 0 : index
    %c0_132 = arith.constant 0 : index
    %c21 = arith.constant 21 : index
    %c0_133 = arith.constant 0 : index
    %100 = vector.load %arg2[%c0_131, %c0_132, %c21, %c0_133] : memref<1x1x110x8xbf16, #tpu.memory_space<vmem>>, vector<1x1x80x8xbf16>
    %101 = vector.shape_cast %100 : vector<1x1x80x8xbf16> to vector<80x8xbf16>
    %c0_134 = arith.constant 0 : index
    %c0_135 = arith.constant 0 : index
    %c21_136 = arith.constant 21 : index
    %c0_137 = arith.constant 0 : index
    %102 = vector.load %arg5[%c0_134, %c0_135, %c21_136, %c0_137] : memref<1x1x110x8xbf16, #tpu.memory_space<vmem>>, vector<1x1x80x8xbf16>
    %103 = vector.shape_cast %102 : vector<1x1x80x8xbf16> to vector<80x8xbf16>
    %c0_138 = arith.constant 0 : index
    %c0_139 = arith.constant 0 : index
    %104 = vector.load %arg13[%c0_138, %c0_139] : memref<80x16xf32, #tpu.memory_space<vmem>>, vector<80x16xf32>
    %c7 = arith.constant 7 : index
    %c0_140 = arith.constant 0 : index
    %c0_141 = arith.constant 0 : index
    %105 = vector.load %arg8[%c7, %c0_140, %c0_141] : memref<27x8x16xbf16, #tpu.memory_space<vmem>>, vector<1x8x16xbf16>
    %106 = vector.shape_cast %105 : vector<1x8x16xbf16> to vector<8x16xbf16>
    %cst_142 = arith.constant dense<0.000000e+00> : vector<80x16xf32>
    %107 = tpu.matmul %101, %106, %cst_142 {dimension_numbers = #tpu.dot_dimension_numbers<[1], [0], [0], [1], [0, 0, 1, 1], [], []>} : vector<80x8xbf16>, vector<8x16xbf16>, vector<80x16xf32> -> vector<80x16xf32>
    %c7_143 = arith.constant 7 : index
    %c0_144 = arith.constant 0 : index
    %c0_145 = arith.constant 0 : index
    %108 = vector.load %arg9[%c7_143, %c0_144, %c0_145] : memref<27x8x16xbf16, #tpu.memory_space<vmem>>, vector<1x8x16xbf16>
    %109 = vector.shape_cast %108 : vector<1x8x16xbf16> to vector<8x16xbf16>
    %cst_146 = arith.constant dense<0.000000e+00> : vector<80x16xf32>
    %110 = tpu.matmul %103, %109, %cst_146 {dimension_numbers = #tpu.dot_dimension_numbers<[1], [0], [0], [1], [0, 0, 1, 1], [], []>} : vector<80x8xbf16>, vector<8x16xbf16>, vector<80x16xf32> -> vector<80x16xf32>
    %111 = arith.addf %107, %110 : vector<80x16xf32>
    %112 = arith.addf %104, %111 : vector<80x16xf32>
    %c0_147 = arith.constant 0 : index
    %c0_148 = arith.constant 0 : index
    %113 = vector.load %arg13[%c0_147, %c0_148] : memref<80x16xf32, #tpu.memory_space<vmem>>, vector<80x16xf32>
    tpu.vector_store %arg13[%c0_147, %c0_148], %112 {strides = array<i32>} : memref<80x16xf32, #tpu.memory_space<vmem>>, vector<80x16xf32>,
    %c0_149 = arith.constant 0 : index
    %c0_150 = arith.constant 0 : index
    %c22 = arith.constant 22 : index
    %c0_151 = arith.constant 0 : index
    %114 = vector.load %arg2[%c0_149, %c0_150, %c22, %c0_151] : memref<1x1x110x8xbf16, #tpu.memory_space<vmem>>, vector<1x1x80x8xbf16>
    %115 = vector.shape_cast %114 : vector<1x1x80x8xbf16> to vector<80x8xbf16>
    %c0_152 = arith.constant 0 : index
    %c0_153 = arith.constant 0 : index
    %c22_154 = arith.constant 22 : index
    %c0_155 = arith.constant 0 : index
    %116 = vector.load %arg5[%c0_152, %c0_153, %c22_154, %c0_155] : memref<1x1x110x8xbf16, #tpu.memory_space<vmem>>, vector<1x1x80x8xbf16>
    %117 = vector.shape_cast %116 : vector<1x1x80x8xbf16> to vector<80x8xbf16>
    %c0_156 = arith.constant 0 : index
    %c0_157 = arith.constant 0 : index
    %118 = vector.load %arg13[%c0_156, %c0_157] : memref<80x16xf32, #tpu.memory_space<vmem>>, vector<80x16xf32>
    %c8 = arith.constant 8 : index
    %c0_158 = arith.constant 0 : index
    %c0_159 = arith.constant 0 : index
    %119 = vector.load %arg8[%c8, %c0_158, %c0_159] : memref<27x8x16xbf16, #tpu.memory_space<vmem>>, vector<1x8x16xbf16>
    %120 = vector.shape_cast %119 : vector<1x8x16xbf16> to vector<8x16xbf16>
    %cst_160 = arith.constant dense<0.000000e+00> : vector<80x16xf32>
    %121 = tpu.matmul %115, %120, %cst_160 {dimension_numbers = #tpu.dot_dimension_numbers<[1], [0], [0], [1], [0, 0, 1, 1], [], []>} : vector<80x8xbf16>, vector<8x16xbf16>, vector<80x16xf32> -> vector<80x16xf32>
    %c8_161 = arith.constant 8 : index
    %c0_162 = arith.constant 0 : index
    %c0_163 = arith.constant 0 : index
    %122 = vector.load %arg9[%c8_161, %c0_162, %c0_163] : memref<27x8x16xbf16, #tpu.memory_space<vmem>>, vector<1x8x16xbf16>
    %123 = vector.shape_cast %122 : vector<1x8x16xbf16> to vector<8x16xbf16>
    %cst_164 = arith.constant dense<0.000000e+00> : vector<80x16xf32>
    %124 = tpu.matmul %117, %123, %cst_164 {dimension_numbers = #tpu.dot_dimension_numbers<[1], [0], [0], [1], [0, 0, 1, 1], [], []>} : vector<80x8xbf16>, vector<8x16xbf16>, vector<80x16xf32> -> vector<80x16xf32>
    %125 = arith.addf %121, %124 : vector<80x16xf32>
    %126 = arith.addf %118, %125 : vector<80x16xf32>
    %c0_165 = arith.constant 0 : index
    %c0_166 = arith.constant 0 : index
    %127 = vector.load %arg13[%c0_165, %c0_166] : memref<80x16xf32, #tpu.memory_space<vmem>>, vector<80x16xf32>
    tpu.vector_store %arg13[%c0_165, %c0_166], %126 {strides = array<i32>} : memref<80x16xf32, #tpu.memory_space<vmem>>, vector<80x16xf32>,
    %c0_167 = arith.constant 0 : index
    %c0_168 = arith.constant 0 : index
    %c0_169 = arith.constant 0 : index
    %c0_170 = arith.constant 0 : index
    %128 = vector.load %arg3[%c0_167, %c0_168, %c0_169, %c0_170] : memref<1x1x110x8xbf16, #tpu.memory_space<vmem>>, vector<1x1x80x8xbf16>
    %129 = vector.shape_cast %128 : vector<1x1x80x8xbf16> to vector<80x8xbf16>
    %c0_171 = arith.constant 0 : index
    %c0_172 = arith.constant 0 : index
    %c0_173 = arith.constant 0 : index
    %c0_174 = arith.constant 0 : index
    %130 = vector.load %arg6[%c0_171, %c0_172, %c0_173, %c0_174] : memref<1x1x110x8xbf16, #tpu.memory_space<vmem>>, vector<1x1x80x8xbf16>
    %131 = vector.shape_cast %130 : vector<1x1x80x8xbf16> to vector<80x8xbf16>
    %c0_175 = arith.constant 0 : index
    %c0_176 = arith.constant 0 : index
    %132 = vector.load %arg13[%c0_175, %c0_176] : memref<80x16xf32, #tpu.memory_space<vmem>>, vector<80x16xf32>
    %c9 = arith.constant 9 : index
    %c0_177 = arith.constant 0 : index
    %c0_178 = arith.constant 0 : index
    %133 = vector.load %arg8[%c9, %c0_177, %c0_178] : memref<27x8x16xbf16, #tpu.memory_space<vmem>>, vector<1x8x16xbf16>
    %134 = vector.shape_cast %133 : vector<1x8x16xbf16> to vector<8x16xbf16>
    %cst_179 = arith.constant dense<0.000000e+00> : vector<80x16xf32>
    %135 = tpu.matmul %129, %134, %cst_179 {dimension_numbers = #tpu.dot_dimension_numbers<[1], [0], [0], [1], [0, 0, 1, 1], [], []>} : vector<80x8xbf16>, vector<8x16xbf16>, vector<80x16xf32> -> vector<80x16xf32>
    %c9_180 = arith.constant 9 : index
    %c0_181 = arith.constant 0 : index
    %c0_182 = arith.constant 0 : index
    %136 = vector.load %arg9[%c9_180, %c0_181, %c0_182] : memref<27x8x16xbf16, #tpu.memory_space<vmem>>, vector<1x8x16xbf16>
    %137 = vector.shape_cast %136 : vector<1x8x16xbf16> to vector<8x16xbf16>
    %cst_183 = arith.constant dense<0.000000e+00> : vector<80x16xf32>
    %138 = tpu.matmul %131, %137, %cst_183 {dimension_numbers = #tpu.dot_dimension_numbers<[1], [0], [0], [1], [0, 0, 1, 1], [], []>} : vector<80x8xbf16>, vector<8x16xbf16>, vector<80x16xf32> -> vector<80x16xf32>
    %139 = arith.addf %135, %138 : vector<80x16xf32>
    %140 = arith.addf %132, %139 : vector<80x16xf32>
    %c0_184 = arith.constant 0 : index
    %c0_185 = arith.constant 0 : index
    %141 = vector.load %arg13[%c0_184, %c0_185] : memref<80x16xf32, #tpu.memory_space<vmem>>, vector<80x16xf32>
    tpu.vector_store %arg13[%c0_184, %c0_185], %140 {strides = array<i32>} : memref<80x16xf32, #tpu.memory_space<vmem>>, vector<80x16xf32>,
    %c0_186 = arith.constant 0 : index
    %c0_187 = arith.constant 0 : index
    %c1_188 = arith.constant 1 : index
    %c0_189 = arith.constant 0 : index
    %142 = vector.load %arg3[%c0_186, %c0_187, %c1_188, %c0_189] : memref<1x1x110x8xbf16, #tpu.memory_space<vmem>>, vector<1x1x80x8xbf16>
    %143 = vector.shape_cast %142 : vector<1x1x80x8xbf16> to vector<80x8xbf16>
    %c0_190 = arith.constant 0 : index
    %c0_191 = arith.constant 0 : index
    %c1_192 = arith.constant 1 : index
    %c0_193 = arith.constant 0 : index
    %144 = vector.load %arg6[%c0_190, %c0_191, %c1_192, %c0_193] : memref<1x1x110x8xbf16, #tpu.memory_space<vmem>>, vector<1x1x80x8xbf16>
    %145 = vector.shape_cast %144 : vector<1x1x80x8xbf16> to vector<80x8xbf16>
    %c0_194 = arith.constant 0 : index
    %c0_195 = arith.constant 0 : index
    %146 = vector.load %arg13[%c0_194, %c0_195] : memref<80x16xf32, #tpu.memory_space<vmem>>, vector<80x16xf32>
    %c10_196 = arith.constant 10 : index
    %c0_197 = arith.constant 0 : index
    %c0_198 = arith.constant 0 : index
    %147 = vector.load %arg8[%c10_196, %c0_197, %c0_198] : memref<27x8x16xbf16, #tpu.memory_space<vmem>>, vector<1x8x16xbf16>
    %148 = vector.shape_cast %147 : vector<1x8x16xbf16> to vector<8x16xbf16>
    %cst_199 = arith.constant dense<0.000000e+00> : vector<80x16xf32>
    %149 = tpu.matmul %143, %148, %cst_199 {dimension_numbers = #tpu.dot_dimension_numbers<[1], [0], [0], [1], [0, 0, 1, 1], [], []>} : vector<80x8xbf16>, vector<8x16xbf16>, vector<80x16xf32> -> vector<80x16xf32>
    %c10_200 = arith.constant 10 : index
    %c0_201 = arith.constant 0 : index
    %c0_202 = arith.constant 0 : index
    %150 = vector.load %arg9[%c10_200, %c0_201, %c0_202] : memref<27x8x16xbf16, #tpu.memory_space<vmem>>, vector<1x8x16xbf16>
    %151 = vector.shape_cast %150 : vector<1x8x16xbf16> to vector<8x16xbf16>
    %cst_203 = arith.constant dense<0.000000e+00> : vector<80x16xf32>
    %152 = tpu.matmul %145, %151, %cst_203 {dimension_numbers = #tpu.dot_dimension_numbers<[1], [0], [0], [1], [0, 0, 1, 1], [], []>} : vector<80x8xbf16>, vector<8x16xbf16>, vector<80x16xf32> -> vector<80x16xf32>
    %153 = arith.addf %149, %152 : vector<80x16xf32>
    %154 = arith.addf %146, %153 : vector<80x16xf32>
    %c0_204 = arith.constant 0 : index
    %c0_205 = arith.constant 0 : index
    %155 = vector.load %arg13[%c0_204, %c0_205] : memref<80x16xf32, #tpu.memory_space<vmem>>, vector<80x16xf32>
    tpu.vector_store %arg13[%c0_204, %c0_205], %154 {strides = array<i32>} : memref<80x16xf32, #tpu.memory_space<vmem>>, vector<80x16xf32>,
    %c0_206 = arith.constant 0 : index
    %c0_207 = arith.constant 0 : index
    %c2_208 = arith.constant 2 : index
    %c0_209 = arith.constant 0 : index
    %156 = vector.load %arg3[%c0_206, %c0_207, %c2_208, %c0_209] : memref<1x1x110x8xbf16, #tpu.memory_space<vmem>>, vector<1x1x80x8xbf16>
    %157 = vector.shape_cast %156 : vector<1x1x80x8xbf16> to vector<80x8xbf16>
    %c0_210 = arith.constant 0 : index
    %c0_211 = arith.constant 0 : index
    %c2_212 = arith.constant 2 : index
    %c0_213 = arith.constant 0 : index
    %158 = vector.load %arg6[%c0_210, %c0_211, %c2_212, %c0_213] : memref<1x1x110x8xbf16, #tpu.memory_space<vmem>>, vector<1x1x80x8xbf16>
    %159 = vector.shape_cast %158 : vector<1x1x80x8xbf16> to vector<80x8xbf16>
    %c0_214 = arith.constant 0 : index
    %c0_215 = arith.constant 0 : index
    %160 = vector.load %arg13[%c0_214, %c0_215] : memref<80x16xf32, #tpu.memory_space<vmem>>, vector<80x16xf32>
    %c11_216 = arith.constant 11 : index
    %c0_217 = arith.constant 0 : index
    %c0_218 = arith.constant 0 : index
    %161 = vector.load %arg8[%c11_216, %c0_217, %c0_218] : memref<27x8x16xbf16, #tpu.memory_space<vmem>>, vector<1x8x16xbf16>
    %162 = vector.shape_cast %161 : vector<1x8x16xbf16> to vector<8x16xbf16>
    %cst_219 = arith.constant dense<0.000000e+00> : vector<80x16xf32>
    %163 = tpu.matmul %157, %162, %cst_219 {dimension_numbers = #tpu.dot_dimension_numbers<[1], [0], [0], [1], [0, 0, 1, 1], [], []>} : vector<80x8xbf16>, vector<8x16xbf16>, vector<80x16xf32> -> vector<80x16xf32>
    %c11_220 = arith.constant 11 : index
    %c0_221 = arith.constant 0 : index
    %c0_222 = arith.constant 0 : index
    %164 = vector.load %arg9[%c11_220, %c0_221, %c0_222] : memref<27x8x16xbf16, #tpu.memory_space<vmem>>, vector<1x8x16xbf16>
    %165 = vector.shape_cast %164 : vector<1x8x16xbf16> to vector<8x16xbf16>
    %cst_223 = arith.constant dense<0.000000e+00> : vector<80x16xf32>
    %166 = tpu.matmul %159, %165, %cst_223 {dimension_numbers = #tpu.dot_dimension_numbers<[1], [0], [0], [1], [0, 0, 1, 1], [], []>} : vector<80x8xbf16>, vector<8x16xbf16>, vector<80x16xf32> -> vector<80x16xf32>
    %167 = arith.addf %163, %166 : vector<80x16xf32>
    %168 = arith.addf %160, %167 : vector<80x16xf32>
    %c0_224 = arith.constant 0 : index
    %c0_225 = arith.constant 0 : index
    %169 = vector.load %arg13[%c0_224, %c0_225] : memref<80x16xf32, #tpu.memory_space<vmem>>, vector<80x16xf32>
    tpu.vector_store %arg13[%c0_224, %c0_225], %168 {strides = array<i32>} : memref<80x16xf32, #tpu.memory_space<vmem>>, vector<80x16xf32>,
    %c0_226 = arith.constant 0 : index
    %c0_227 = arith.constant 0 : index
    %c10_228 = arith.constant 10 : index
    %c0_229 = arith.constant 0 : index
    %170 = vector.load %arg3[%c0_226, %c0_227, %c10_228, %c0_229] : memref<1x1x110x8xbf16, #tpu.memory_space<vmem>>, vector<1x1x80x8xbf16>
    %171 = vector.shape_cast %170 : vector<1x1x80x8xbf16> to vector<80x8xbf16>
    %c0_230 = arith.constant 0 : index
    %c0_231 = arith.constant 0 : index
    %c10_232 = arith.constant 10 : index
    %c0_233 = arith.constant 0 : index
    %172 = vector.load %arg6[%c0_230, %c0_231, %c10_232, %c0_233] : memref<1x1x110x8xbf16, #tpu.memory_space<vmem>>, vector<1x1x80x8xbf16>
    %173 = vector.shape_cast %172 : vector<1x1x80x8xbf16> to vector<80x8xbf16>
    %c0_234 = arith.constant 0 : index
    %c0_235 = arith.constant 0 : index
    %174 = vector.load %arg13[%c0_234, %c0_235] : memref<80x16xf32, #tpu.memory_space<vmem>>, vector<80x16xf32>
    %c12_236 = arith.constant 12 : index
    %c0_237 = arith.constant 0 : index
    %c0_238 = arith.constant 0 : index
    %175 = vector.load %arg8[%c12_236, %c0_237, %c0_238] : memref<27x8x16xbf16, #tpu.memory_space<vmem>>, vector<1x8x16xbf16>
    %176 = vector.shape_cast %175 : vector<1x8x16xbf16> to vector<8x16xbf16>
    %cst_239 = arith.constant dense<0.000000e+00> : vector<80x16xf32>
    %177 = tpu.matmul %171, %176, %cst_239 {dimension_numbers = #tpu.dot_dimension_numbers<[1], [0], [0], [1], [0, 0, 1, 1], [], []>} : vector<80x8xbf16>, vector<8x16xbf16>, vector<80x16xf32> -> vector<80x16xf32>
    %c12_240 = arith.constant 12 : index
    %c0_241 = arith.constant 0 : index
    %c0_242 = arith.constant 0 : index
    %178 = vector.load %arg9[%c12_240, %c0_241, %c0_242] : memref<27x8x16xbf16, #tpu.memory_space<vmem>>, vector<1x8x16xbf16>
    %179 = vector.shape_cast %178 : vector<1x8x16xbf16> to vector<8x16xbf16>
    %cst_243 = arith.constant dense<0.000000e+00> : vector<80x16xf32>
    %180 = tpu.matmul %173, %179, %cst_243 {dimension_numbers = #tpu.dot_dimension_numbers<[1], [0], [0], [1], [0, 0, 1, 1], [], []>} : vector<80x8xbf16>, vector<8x16xbf16>, vector<80x16xf32> -> vector<80x16xf32>
    %181 = arith.addf %177, %180 : vector<80x16xf32>
    %182 = arith.addf %174, %181 : vector<80x16xf32>
    %c0_244 = arith.constant 0 : index
    %c0_245 = arith.constant 0 : index
    %183 = vector.load %arg13[%c0_244, %c0_245] : memref<80x16xf32, #tpu.memory_space<vmem>>, vector<80x16xf32>
    tpu.vector_store %arg13[%c0_244, %c0_245], %182 {strides = array<i32>} : memref<80x16xf32, #tpu.memory_space<vmem>>, vector<80x16xf32>,
    %c0_246 = arith.constant 0 : index
    %c0_247 = arith.constant 0 : index
    %c11_248 = arith.constant 11 : index
    %c0_249 = arith.constant 0 : index
    %184 = vector.load %arg3[%c0_246, %c0_247, %c11_248, %c0_249] : memref<1x1x110x8xbf16, #tpu.memory_space<vmem>>, vector<1x1x80x8xbf16>
    %185 = vector.shape_cast %184 : vector<1x1x80x8xbf16> to vector<80x8xbf16>
    %c0_250 = arith.constant 0 : index
    %c0_251 = arith.constant 0 : index
    %c11_252 = arith.constant 11 : index
    %c0_253 = arith.constant 0 : index
    %186 = vector.load %arg6[%c0_250, %c0_251, %c11_252, %c0_253] : memref<1x1x110x8xbf16, #tpu.memory_space<vmem>>, vector<1x1x80x8xbf16>
    %187 = vector.shape_cast %186 : vector<1x1x80x8xbf16> to vector<80x8xbf16>
    %c0_254 = arith.constant 0 : index
    %c0_255 = arith.constant 0 : index
    %188 = vector.load %arg13[%c0_254, %c0_255] : memref<80x16xf32, #tpu.memory_space<vmem>>, vector<80x16xf32>
    %c13 = arith.constant 13 : index
    %c0_256 = arith.constant 0 : index
    %c0_257 = arith.constant 0 : index
    %189 = vector.load %arg8[%c13, %c0_256, %c0_257] : memref<27x8x16xbf16, #tpu.memory_space<vmem>>, vector<1x8x16xbf16>
    %190 = vector.shape_cast %189 : vector<1x8x16xbf16> to vector<8x16xbf16>
    %cst_258 = arith.constant dense<0.000000e+00> : vector<80x16xf32>
    %191 = tpu.matmul %185, %190, %cst_258 {dimension_numbers = #tpu.dot_dimension_numbers<[1], [0], [0], [1], [0, 0, 1, 1], [], []>} : vector<80x8xbf16>, vector<8x16xbf16>, vector<80x16xf32> -> vector<80x16xf32>
    %c13_259 = arith.constant 13 : index
    %c0_260 = arith.constant 0 : index
    %c0_261 = arith.constant 0 : index
    %192 = vector.load %arg9[%c13_259, %c0_260, %c0_261] : memref<27x8x16xbf16, #tpu.memory_space<vmem>>, vector<1x8x16xbf16>
    %193 = vector.shape_cast %192 : vector<1x8x16xbf16> to vector<8x16xbf16>
    %cst_262 = arith.constant dense<0.000000e+00> : vector<80x16xf32>
    %194 = tpu.matmul %187, %193, %cst_262 {dimension_numbers = #tpu.dot_dimension_numbers<[1], [0], [0], [1], [0, 0, 1, 1], [], []>} : vector<80x8xbf16>, vector<8x16xbf16>, vector<80x16xf32> -> vector<80x16xf32>
    %195 = arith.addf %191, %194 : vector<80x16xf32>
    %196 = arith.addf %188, %195 : vector<80x16xf32>
    %c0_263 = arith.constant 0 : index
    %c0_264 = arith.constant 0 : index
    %197 = vector.load %arg13[%c0_263, %c0_264] : memref<80x16xf32, #tpu.memory_space<vmem>>, vector<80x16xf32>
    tpu.vector_store %arg13[%c0_263, %c0_264], %196 {strides = array<i32>} : memref<80x16xf32, #tpu.memory_space<vmem>>, vector<80x16xf32>,
    %c0_265 = arith.constant 0 : index
    %c0_266 = arith.constant 0 : index
    %c12_267 = arith.constant 12 : index
    %c0_268 = arith.constant 0 : index
    %198 = vector.load %arg3[%c0_265, %c0_266, %c12_267, %c0_268] : memref<1x1x110x8xbf16, #tpu.memory_space<vmem>>, vector<1x1x80x8xbf16>
    %199 = vector.shape_cast %198 : vector<1x1x80x8xbf16> to vector<80x8xbf16>
    %c0_269 = arith.constant 0 : index
    %c0_270 = arith.constant 0 : index
    %c12_271 = arith.constant 12 : index
    %c0_272 = arith.constant 0 : index
    %200 = vector.load %arg6[%c0_269, %c0_270, %c12_271, %c0_272] : memref<1x1x110x8xbf16, #tpu.memory_space<vmem>>, vector<1x1x80x8xbf16>
    %201 = vector.shape_cast %200 : vector<1x1x80x8xbf16> to vector<80x8xbf16>
    %c0_273 = arith.constant 0 : index
    %c0_274 = arith.constant 0 : index
    %202 = vector.load %arg13[%c0_273, %c0_274] : memref<80x16xf32, #tpu.memory_space<vmem>>, vector<80x16xf32>
    %c14 = arith.constant 14 : index
    %c0_275 = arith.constant 0 : index
    %c0_276 = arith.constant 0 : index
    %203 = vector.load %arg8[%c14, %c0_275, %c0_276] : memref<27x8x16xbf16, #tpu.memory_space<vmem>>, vector<1x8x16xbf16>
    %204 = vector.shape_cast %203 : vector<1x8x16xbf16> to vector<8x16xbf16>
    %cst_277 = arith.constant dense<0.000000e+00> : vector<80x16xf32>
    %205 = tpu.matmul %199, %204, %cst_277 {dimension_numbers = #tpu.dot_dimension_numbers<[1], [0], [0], [1], [0, 0, 1, 1], [], []>} : vector<80x8xbf16>, vector<8x16xbf16>, vector<80x16xf32> -> vector<80x16xf32>
    %c14_278 = arith.constant 14 : index
    %c0_279 = arith.constant 0 : index
    %c0_280 = arith.constant 0 : index
    %206 = vector.load %arg9[%c14_278, %c0_279, %c0_280] : memref<27x8x16xbf16, #tpu.memory_space<vmem>>, vector<1x8x16xbf16>
    %207 = vector.shape_cast %206 : vector<1x8x16xbf16> to vector<8x16xbf16>
    %cst_281 = arith.constant dense<0.000000e+00> : vector<80x16xf32>
    %208 = tpu.matmul %201, %207, %cst_281 {dimension_numbers = #tpu.dot_dimension_numbers<[1], [0], [0], [1], [0, 0, 1, 1], [], []>} : vector<80x8xbf16>, vector<8x16xbf16>, vector<80x16xf32> -> vector<80x16xf32>
    %209 = arith.addf %205, %208 : vector<80x16xf32>
    %210 = arith.addf %202, %209 : vector<80x16xf32>
    %c0_282 = arith.constant 0 : index
    %c0_283 = arith.constant 0 : index
    %211 = vector.load %arg13[%c0_282, %c0_283] : memref<80x16xf32, #tpu.memory_space<vmem>>, vector<80x16xf32>
    tpu.vector_store %arg13[%c0_282, %c0_283], %210 {strides = array<i32>} : memref<80x16xf32, #tpu.memory_space<vmem>>, vector<80x16xf32>,
    %c0_284 = arith.constant 0 : index
    %c0_285 = arith.constant 0 : index
    %c20_286 = arith.constant 20 : index
    %c0_287 = arith.constant 0 : index
    %212 = vector.load %arg3[%c0_284, %c0_285, %c20_286, %c0_287] : memref<1x1x110x8xbf16, #tpu.memory_space<vmem>>, vector<1x1x80x8xbf16>
    %213 = vector.shape_cast %212 : vector<1x1x80x8xbf16> to vector<80x8xbf16>
    %c0_288 = arith.constant 0 : index
    %c0_289 = arith.constant 0 : index
    %c20_290 = arith.constant 20 : index
    %c0_291 = arith.constant 0 : index
    %214 = vector.load %arg6[%c0_288, %c0_289, %c20_290, %c0_291] : memref<1x1x110x8xbf16, #tpu.memory_space<vmem>>, vector<1x1x80x8xbf16>
    %215 = vector.shape_cast %214 : vector<1x1x80x8xbf16> to vector<80x8xbf16>
    %c0_292 = arith.constant 0 : index
    %c0_293 = arith.constant 0 : index
    %216 = vector.load %arg13[%c0_292, %c0_293] : memref<80x16xf32, #tpu.memory_space<vmem>>, vector<80x16xf32>
    %c15 = arith.constant 15 : index
    %c0_294 = arith.constant 0 : index
    %c0_295 = arith.constant 0 : index
    %217 = vector.load %arg8[%c15, %c0_294, %c0_295] : memref<27x8x16xbf16, #tpu.memory_space<vmem>>, vector<1x8x16xbf16>
    %218 = vector.shape_cast %217 : vector<1x8x16xbf16> to vector<8x16xbf16>
    %cst_296 = arith.constant dense<0.000000e+00> : vector<80x16xf32>
    %219 = tpu.matmul %213, %218, %cst_296 {dimension_numbers = #tpu.dot_dimension_numbers<[1], [0], [0], [1], [0, 0, 1, 1], [], []>} : vector<80x8xbf16>, vector<8x16xbf16>, vector<80x16xf32> -> vector<80x16xf32>
    %c15_297 = arith.constant 15 : index
    %c0_298 = arith.constant 0 : index
    %c0_299 = arith.constant 0 : index
    %220 = vector.load %arg9[%c15_297, %c0_298, %c0_299] : memref<27x8x16xbf16, #tpu.memory_space<vmem>>, vector<1x8x16xbf16>
    %221 = vector.shape_cast %220 : vector<1x8x16xbf16> to vector<8x16xbf16>
    %cst_300 = arith.constant dense<0.000000e+00> : vector<80x16xf32>
    %222 = tpu.matmul %215, %221, %cst_300 {dimension_numbers = #tpu.dot_dimension_numbers<[1], [0], [0], [1], [0, 0, 1, 1], [], []>} : vector<80x8xbf16>, vector<8x16xbf16>, vector<80x16xf32> -> vector<80x16xf32>
    %223 = arith.addf %219, %222 : vector<80x16xf32>
    %224 = arith.addf %216, %223 : vector<80x16xf32>
    %c0_301 = arith.constant 0 : index
    %c0_302 = arith.constant 0 : index
    %225 = vector.load %arg13[%c0_301, %c0_302] : memref<80x16xf32, #tpu.memory_space<vmem>>, vector<80x16xf32>
    tpu.vector_store %arg13[%c0_301, %c0_302], %224 {strides = array<i32>} : memref<80x16xf32, #tpu.memory_space<vmem>>, vector<80x16xf32>,
    %c0_303 = arith.constant 0 : index
    %c0_304 = arith.constant 0 : index
    %c21_305 = arith.constant 21 : index
    %c0_306 = arith.constant 0 : index
    %226 = vector.load %arg3[%c0_303, %c0_304, %c21_305, %c0_306] : memref<1x1x110x8xbf16, #tpu.memory_space<vmem>>, vector<1x1x80x8xbf16>
    %227 = vector.shape_cast %226 : vector<1x1x80x8xbf16> to vector<80x8xbf16>
    %c0_307 = arith.constant 0 : index
    %c0_308 = arith.constant 0 : index
    %c21_309 = arith.constant 21 : index
    %c0_310 = arith.constant 0 : index
    %228 = vector.load %arg6[%c0_307, %c0_308, %c21_309, %c0_310] : memref<1x1x110x8xbf16, #tpu.memory_space<vmem>>, vector<1x1x80x8xbf16>
    %229 = vector.shape_cast %228 : vector<1x1x80x8xbf16> to vector<80x8xbf16>
    %c0_311 = arith.constant 0 : index
    %c0_312 = arith.constant 0 : index
    %230 = vector.load %arg13[%c0_311, %c0_312] : memref<80x16xf32, #tpu.memory_space<vmem>>, vector<80x16xf32>
    %c16 = arith.constant 16 : index
    %c0_313 = arith.constant 0 : index
    %c0_314 = arith.constant 0 : index
    %231 = vector.load %arg8[%c16, %c0_313, %c0_314] : memref<27x8x16xbf16, #tpu.memory_space<vmem>>, vector<1x8x16xbf16>
    %232 = vector.shape_cast %231 : vector<1x8x16xbf16> to vector<8x16xbf16>
    %cst_315 = arith.constant dense<0.000000e+00> : vector<80x16xf32>
    %233 = tpu.matmul %227, %232, %cst_315 {dimension_numbers = #tpu.dot_dimension_numbers<[1], [0], [0], [1], [0, 0, 1, 1], [], []>} : vector<80x8xbf16>, vector<8x16xbf16>, vector<80x16xf32> -> vector<80x16xf32>
    %c16_316 = arith.constant 16 : index
    %c0_317 = arith.constant 0 : index
    %c0_318 = arith.constant 0 : index
    %234 = vector.load %arg9[%c16_316, %c0_317, %c0_318] : memref<27x8x16xbf16, #tpu.memory_space<vmem>>, vector<1x8x16xbf16>
    %235 = vector.shape_cast %234 : vector<1x8x16xbf16> to vector<8x16xbf16>
    %cst_319 = arith.constant dense<0.000000e+00> : vector<80x16xf32>
    %236 = tpu.matmul %229, %235, %cst_319 {dimension_numbers = #tpu.dot_dimension_numbers<[1], [0], [0], [1], [0, 0, 1, 1], [], []>} : vector<80x8xbf16>, vector<8x16xbf16>, vector<80x16xf32> -> vector<80x16xf32>
    %237 = arith.addf %233, %236 : vector<80x16xf32>
    %238 = arith.addf %230, %237 : vector<80x16xf32>
    %c0_320 = arith.constant 0 : index
    %c0_321 = arith.constant 0 : index
    %239 = vector.load %arg13[%c0_320, %c0_321] : memref<80x16xf32, #tpu.memory_space<vmem>>, vector<80x16xf32>
    tpu.vector_store %arg13[%c0_320, %c0_321], %238 {strides = array<i32>} : memref<80x16xf32, #tpu.memory_space<vmem>>, vector<80x16xf32>,
    %c0_322 = arith.constant 0 : index
    %c0_323 = arith.constant 0 : index
    %c22_324 = arith.constant 22 : index
    %c0_325 = arith.constant 0 : index
    %240 = vector.load %arg3[%c0_322, %c0_323, %c22_324, %c0_325] : memref<1x1x110x8xbf16, #tpu.memory_space<vmem>>, vector<1x1x80x8xbf16>
    %241 = vector.shape_cast %240 : vector<1x1x80x8xbf16> to vector<80x8xbf16>
    %c0_326 = arith.constant 0 : index
    %c0_327 = arith.constant 0 : index
    %c22_328 = arith.constant 22 : index
    %c0_329 = arith.constant 0 : index
    %242 = vector.load %arg6[%c0_326, %c0_327, %c22_328, %c0_329] : memref<1x1x110x8xbf16, #tpu.memory_space<vmem>>, vector<1x1x80x8xbf16>
    %243 = vector.shape_cast %242 : vector<1x1x80x8xbf16> to vector<80x8xbf16>
    %c0_330 = arith.constant 0 : index
    %c0_331 = arith.constant 0 : index
    %244 = vector.load %arg13[%c0_330, %c0_331] : memref<80x16xf32, #tpu.memory_space<vmem>>, vector<80x16xf32>
    %c17 = arith.constant 17 : index
    %c0_332 = arith.constant 0 : index
    %c0_333 = arith.constant 0 : index
    %245 = vector.load %arg8[%c17, %c0_332, %c0_333] : memref<27x8x16xbf16, #tpu.memory_space<vmem>>, vector<1x8x16xbf16>
    %246 = vector.shape_cast %245 : vector<1x8x16xbf16> to vector<8x16xbf16>
    %cst_334 = arith.constant dense<0.000000e+00> : vector<80x16xf32>
    %247 = tpu.matmul %241, %246, %cst_334 {dimension_numbers = #tpu.dot_dimension_numbers<[1], [0], [0], [1], [0, 0, 1, 1], [], []>} : vector<80x8xbf16>, vector<8x16xbf16>, vector<80x16xf32> -> vector<80x16xf32>
    %c17_335 = arith.constant 17 : index
    %c0_336 = arith.constant 0 : index
    %c0_337 = arith.constant 0 : index
    %248 = vector.load %arg9[%c17_335, %c0_336, %c0_337] : memref<27x8x16xbf16, #tpu.memory_space<vmem>>, vector<1x8x16xbf16>
    %249 = vector.shape_cast %248 : vector<1x8x16xbf16> to vector<8x16xbf16>
    %cst_338 = arith.constant dense<0.000000e+00> : vector<80x16xf32>
    %250 = tpu.matmul %243, %249, %cst_338 {dimension_numbers = #tpu.dot_dimension_numbers<[1], [0], [0], [1], [0, 0, 1, 1], [], []>} : vector<80x8xbf16>, vector<8x16xbf16>, vector<80x16xf32> -> vector<80x16xf32>
    %251 = arith.addf %247, %250 : vector<80x16xf32>
    %252 = arith.addf %244, %251 : vector<80x16xf32>
    %c0_339 = arith.constant 0 : index
    %c0_340 = arith.constant 0 : index
    %253 = vector.load %arg13[%c0_339, %c0_340] : memref<80x16xf32, #tpu.memory_space<vmem>>, vector<80x16xf32>
    tpu.vector_store %arg13[%c0_339, %c0_340], %252 {strides = array<i32>} : memref<80x16xf32, #tpu.memory_space<vmem>>, vector<80x16xf32>,
    %c0_341 = arith.constant 0 : index
    %c0_342 = arith.constant 0 : index
    %c0_343 = arith.constant 0 : index
    %c0_344 = arith.constant 0 : index
    %254 = vector.load %arg4[%c0_341, %c0_342, %c0_343, %c0_344] : memref<1x1x110x8xbf16, #tpu.memory_space<vmem>>, vector<1x1x80x8xbf16>
    %255 = vector.shape_cast %254 : vector<1x1x80x8xbf16> to vector<80x8xbf16>
    %c0_345 = arith.constant 0 : index
    %c0_346 = arith.constant 0 : index
    %c0_347 = arith.constant 0 : index
    %c0_348 = arith.constant 0 : index
    %256 = vector.load %arg7[%c0_345, %c0_346, %c0_347, %c0_348] : memref<1x1x110x8xbf16, #tpu.memory_space<vmem>>, vector<1x1x80x8xbf16>
    %257 = vector.shape_cast %256 : vector<1x1x80x8xbf16> to vector<80x8xbf16>
    %c0_349 = arith.constant 0 : index
    %c0_350 = arith.constant 0 : index
    %258 = vector.load %arg13[%c0_349, %c0_350] : memref<80x16xf32, #tpu.memory_space<vmem>>, vector<80x16xf32>
    %c18 = arith.constant 18 : index
    %c0_351 = arith.constant 0 : index
    %c0_352 = arith.constant 0 : index
    %259 = vector.load %arg8[%c18, %c0_351, %c0_352] : memref<27x8x16xbf16, #tpu.memory_space<vmem>>, vector<1x8x16xbf16>
    %260 = vector.shape_cast %259 : vector<1x8x16xbf16> to vector<8x16xbf16>
    %cst_353 = arith.constant dense<0.000000e+00> : vector<80x16xf32>
    %261 = tpu.matmul %255, %260, %cst_353 {dimension_numbers = #tpu.dot_dimension_numbers<[1], [0], [0], [1], [0, 0, 1, 1], [], []>} : vector<80x8xbf16>, vector<8x16xbf16>, vector<80x16xf32> -> vector<80x16xf32>
    %c18_354 = arith.constant 18 : index
    %c0_355 = arith.constant 0 : index
    %c0_356 = arith.constant 0 : index
    %262 = vector.load %arg9[%c18_354, %c0_355, %c0_356] : memref<27x8x16xbf16, #tpu.memory_space<vmem>>, vector<1x8x16xbf16>
    %263 = vector.shape_cast %262 : vector<1x8x16xbf16> to vector<8x16xbf16>
    %cst_357 = arith.constant dense<0.000000e+00> : vector<80x16xf32>
    %264 = tpu.matmul %257, %263, %cst_357 {dimension_numbers = #tpu.dot_dimension_numbers<[1], [0], [0], [1], [0, 0, 1, 1], [], []>} : vector<80x8xbf16>, vector<8x16xbf16>, vector<80x16xf32> -> vector<80x16xf32>
    %265 = arith.addf %261, %264 : vector<80x16xf32>
    %266 = arith.addf %258, %265 : vector<80x16xf32>
    %c0_358 = arith.constant 0 : index
    %c0_359 = arith.constant 0 : index
    %267 = vector.load %arg13[%c0_358, %c0_359] : memref<80x16xf32, #tpu.memory_space<vmem>>, vector<80x16xf32>
    tpu.vector_store %arg13[%c0_358, %c0_359], %266 {strides = array<i32>} : memref<80x16xf32, #tpu.memory_space<vmem>>, vector<80x16xf32>,
    %c0_360 = arith.constant 0 : index
    %c0_361 = arith.constant 0 : index
    %c1_362 = arith.constant 1 : index
    %c0_363 = arith.constant 0 : index
    %268 = vector.load %arg4[%c0_360, %c0_361, %c1_362, %c0_363] : memref<1x1x110x8xbf16, #tpu.memory_space<vmem>>, vector<1x1x80x8xbf16>
    %269 = vector.shape_cast %268 : vector<1x1x80x8xbf16> to vector<80x8xbf16>
    %c0_364 = arith.constant 0 : index
    %c0_365 = arith.constant 0 : index
    %c1_366 = arith.constant 1 : index
    %c0_367 = arith.constant 0 : index
    %270 = vector.load %arg7[%c0_364, %c0_365, %c1_366, %c0_367] : memref<1x1x110x8xbf16, #tpu.memory_space<vmem>>, vector<1x1x80x8xbf16>
    %271 = vector.shape_cast %270 : vector<1x1x80x8xbf16> to vector<80x8xbf16>
    %c0_368 = arith.constant 0 : index
    %c0_369 = arith.constant 0 : index
    %272 = vector.load %arg13[%c0_368, %c0_369] : memref<80x16xf32, #tpu.memory_space<vmem>>, vector<80x16xf32>
    %c19 = arith.constant 19 : index
    %c0_370 = arith.constant 0 : index
    %c0_371 = arith.constant 0 : index
    %273 = vector.load %arg8[%c19, %c0_370, %c0_371] : memref<27x8x16xbf16, #tpu.memory_space<vmem>>, vector<1x8x16xbf16>
    %274 = vector.shape_cast %273 : vector<1x8x16xbf16> to vector<8x16xbf16>
    %cst_372 = arith.constant dense<0.000000e+00> : vector<80x16xf32>
    %275 = tpu.matmul %269, %274, %cst_372 {dimension_numbers = #tpu.dot_dimension_numbers<[1], [0], [0], [1], [0, 0, 1, 1], [], []>} : vector<80x8xbf16>, vector<8x16xbf16>, vector<80x16xf32> -> vector<80x16xf32>
    %c19_373 = arith.constant 19 : index
    %c0_374 = arith.constant 0 : index
    %c0_375 = arith.constant 0 : index
    %276 = vector.load %arg9[%c19_373, %c0_374, %c0_375] : memref<27x8x16xbf16, #tpu.memory_space<vmem>>, vector<1x8x16xbf16>
    %277 = vector.shape_cast %276 : vector<1x8x16xbf16> to vector<8x16xbf16>
    %cst_376 = arith.constant dense<0.000000e+00> : vector<80x16xf32>
    %278 = tpu.matmul %271, %277, %cst_376 {dimension_numbers = #tpu.dot_dimension_numbers<[1], [0], [0], [1], [0, 0, 1, 1], [], []>} : vector<80x8xbf16>, vector<8x16xbf16>, vector<80x16xf32> -> vector<80x16xf32>
    %279 = arith.addf %275, %278 : vector<80x16xf32>
    %280 = arith.addf %272, %279 : vector<80x16xf32>
    %c0_377 = arith.constant 0 : index
    %c0_378 = arith.constant 0 : index
    %281 = vector.load %arg13[%c0_377, %c0_378] : memref<80x16xf32, #tpu.memory_space<vmem>>, vector<80x16xf32>
    tpu.vector_store %arg13[%c0_377, %c0_378], %280 {strides = array<i32>} : memref<80x16xf32, #tpu.memory_space<vmem>>, vector<80x16xf32>,
    %c0_379 = arith.constant 0 : index
    %c0_380 = arith.constant 0 : index
    %c2_381 = arith.constant 2 : index
    %c0_382 = arith.constant 0 : index
    %282 = vector.load %arg4[%c0_379, %c0_380, %c2_381, %c0_382] : memref<1x1x110x8xbf16, #tpu.memory_space<vmem>>, vector<1x1x80x8xbf16>
    %283 = vector.shape_cast %282 : vector<1x1x80x8xbf16> to vector<80x8xbf16>
    %c0_383 = arith.constant 0 : index
    %c0_384 = arith.constant 0 : index
    %c2_385 = arith.constant 2 : index
    %c0_386 = arith.constant 0 : index
    %284 = vector.load %arg7[%c0_383, %c0_384, %c2_385, %c0_386] : memref<1x1x110x8xbf16, #tpu.memory_space<vmem>>, vector<1x1x80x8xbf16>
    %285 = vector.shape_cast %284 : vector<1x1x80x8xbf16> to vector<80x8xbf16>
    %c0_387 = arith.constant 0 : index
    %c0_388 = arith.constant 0 : index
    %286 = vector.load %arg13[%c0_387, %c0_388] : memref<80x16xf32, #tpu.memory_space<vmem>>, vector<80x16xf32>
    %c20_389 = arith.constant 20 : index
    %c0_390 = arith.constant 0 : index
    %c0_391 = arith.constant 0 : index
    %287 = vector.load %arg8[%c20_389, %c0_390, %c0_391] : memref<27x8x16xbf16, #tpu.memory_space<vmem>>, vector<1x8x16xbf16>
    %288 = vector.shape_cast %287 : vector<1x8x16xbf16> to vector<8x16xbf16>
    %cst_392 = arith.constant dense<0.000000e+00> : vector<80x16xf32>
    %289 = tpu.matmul %283, %288, %cst_392 {dimension_numbers = #tpu.dot_dimension_numbers<[1], [0], [0], [1], [0, 0, 1, 1], [], []>} : vector<80x8xbf16>, vector<8x16xbf16>, vector<80x16xf32> -> vector<80x16xf32>
    %c20_393 = arith.constant 20 : index
    %c0_394 = arith.constant 0 : index
    %c0_395 = arith.constant 0 : index
    %290 = vector.load %arg9[%c20_393, %c0_394, %c0_395] : memref<27x8x16xbf16, #tpu.memory_space<vmem>>, vector<1x8x16xbf16>
    %291 = vector.shape_cast %290 : vector<1x8x16xbf16> to vector<8x16xbf16>
    %cst_396 = arith.constant dense<0.000000e+00> : vector<80x16xf32>
    %292 = tpu.matmul %285, %291, %cst_396 {dimension_numbers = #tpu.dot_dimension_numbers<[1], [0], [0], [1], [0, 0, 1, 1], [], []>} : vector<80x8xbf16>, vector<8x16xbf16>, vector<80x16xf32> -> vector<80x16xf32>
    %293 = arith.addf %289, %292 : vector<80x16xf32>
    %294 = arith.addf %286, %293 : vector<80x16xf32>
    %c0_397 = arith.constant 0 : index
    %c0_398 = arith.constant 0 : index
    %295 = vector.load %arg13[%c0_397, %c0_398] : memref<80x16xf32, #tpu.memory_space<vmem>>, vector<80x16xf32>
    tpu.vector_store %arg13[%c0_397, %c0_398], %294 {strides = array<i32>} : memref<80x16xf32, #tpu.memory_space<vmem>>, vector<80x16xf32>,
    %c0_399 = arith.constant 0 : index
    %c0_400 = arith.constant 0 : index
    %c10_401 = arith.constant 10 : index
    %c0_402 = arith.constant 0 : index
    %296 = vector.load %arg4[%c0_399, %c0_400, %c10_401, %c0_402] : memref<1x1x110x8xbf16, #tpu.memory_space<vmem>>, vector<1x1x80x8xbf16>
    %297 = vector.shape_cast %296 : vector<1x1x80x8xbf16> to vector<80x8xbf16>
    %c0_403 = arith.constant 0 : index
    %c0_404 = arith.constant 0 : index
    %c10_405 = arith.constant 10 : index
    %c0_406 = arith.constant 0 : index
    %298 = vector.load %arg7[%c0_403, %c0_404, %c10_405, %c0_406] : memref<1x1x110x8xbf16, #tpu.memory_space<vmem>>, vector<1x1x80x8xbf16>
    %299 = vector.shape_cast %298 : vector<1x1x80x8xbf16> to vector<80x8xbf16>
    %c0_407 = arith.constant 0 : index
    %c0_408 = arith.constant 0 : index
    %300 = vector.load %arg13[%c0_407, %c0_408] : memref<80x16xf32, #tpu.memory_space<vmem>>, vector<80x16xf32>
    %c21_409 = arith.constant 21 : index
    %c0_410 = arith.constant 0 : index
    %c0_411 = arith.constant 0 : index
    %301 = vector.load %arg8[%c21_409, %c0_410, %c0_411] : memref<27x8x16xbf16, #tpu.memory_space<vmem>>, vector<1x8x16xbf16>
    %302 = vector.shape_cast %301 : vector<1x8x16xbf16> to vector<8x16xbf16>
    %cst_412 = arith.constant dense<0.000000e+00> : vector<80x16xf32>
    %303 = tpu.matmul %297, %302, %cst_412 {dimension_numbers = #tpu.dot_dimension_numbers<[1], [0], [0], [1], [0, 0, 1, 1], [], []>} : vector<80x8xbf16>, vector<8x16xbf16>, vector<80x16xf32> -> vector<80x16xf32>
    %c21_413 = arith.constant 21 : index
    %c0_414 = arith.constant 0 : index
    %c0_415 = arith.constant 0 : index
    %304 = vector.load %arg9[%c21_413, %c0_414, %c0_415] : memref<27x8x16xbf16, #tpu.memory_space<vmem>>, vector<1x8x16xbf16>
    %305 = vector.shape_cast %304 : vector<1x8x16xbf16> to vector<8x16xbf16>
    %cst_416 = arith.constant dense<0.000000e+00> : vector<80x16xf32>
    %306 = tpu.matmul %299, %305, %cst_416 {dimension_numbers = #tpu.dot_dimension_numbers<[1], [0], [0], [1], [0, 0, 1, 1], [], []>} : vector<80x8xbf16>, vector<8x16xbf16>, vector<80x16xf32> -> vector<80x16xf32>
    %307 = arith.addf %303, %306 : vector<80x16xf32>
    %308 = arith.addf %300, %307 : vector<80x16xf32>
    %c0_417 = arith.constant 0 : index
    %c0_418 = arith.constant 0 : index
    %309 = vector.load %arg13[%c0_417, %c0_418] : memref<80x16xf32, #tpu.memory_space<vmem>>, vector<80x16xf32>
    tpu.vector_store %arg13[%c0_417, %c0_418], %308 {strides = array<i32>} : memref<80x16xf32, #tpu.memory_space<vmem>>, vector<80x16xf32>,
    %c0_419 = arith.constant 0 : index
    %c0_420 = arith.constant 0 : index
    %c11_421 = arith.constant 11 : index
    %c0_422 = arith.constant 0 : index
    %310 = vector.load %arg4[%c0_419, %c0_420, %c11_421, %c0_422] : memref<1x1x110x8xbf16, #tpu.memory_space<vmem>>, vector<1x1x80x8xbf16>
    %311 = vector.shape_cast %310 : vector<1x1x80x8xbf16> to vector<80x8xbf16>
    %c0_423 = arith.constant 0 : index
    %c0_424 = arith.constant 0 : index
    %c11_425 = arith.constant 11 : index
    %c0_426 = arith.constant 0 : index
    %312 = vector.load %arg7[%c0_423, %c0_424, %c11_425, %c0_426] : memref<1x1x110x8xbf16, #tpu.memory_space<vmem>>, vector<1x1x80x8xbf16>
    %313 = vector.shape_cast %312 : vector<1x1x80x8xbf16> to vector<80x8xbf16>
    %c0_427 = arith.constant 0 : index
    %c0_428 = arith.constant 0 : index
    %314 = vector.load %arg13[%c0_427, %c0_428] : memref<80x16xf32, #tpu.memory_space<vmem>>, vector<80x16xf32>
    %c22_429 = arith.constant 22 : index
    %c0_430 = arith.constant 0 : index
    %c0_431 = arith.constant 0 : index
    %315 = vector.load %arg8[%c22_429, %c0_430, %c0_431] : memref<27x8x16xbf16, #tpu.memory_space<vmem>>, vector<1x8x16xbf16>
    %316 = vector.shape_cast %315 : vector<1x8x16xbf16> to vector<8x16xbf16>
    %cst_432 = arith.constant dense<0.000000e+00> : vector<80x16xf32>
    %317 = tpu.matmul %311, %316, %cst_432 {dimension_numbers = #tpu.dot_dimension_numbers<[1], [0], [0], [1], [0, 0, 1, 1], [], []>} : vector<80x8xbf16>, vector<8x16xbf16>, vector<80x16xf32> -> vector<80x16xf32>
    %c22_433 = arith.constant 22 : index
    %c0_434 = arith.constant 0 : index
    %c0_435 = arith.constant 0 : index
    %318 = vector.load %arg9[%c22_433, %c0_434, %c0_435] : memref<27x8x16xbf16, #tpu.memory_space<vmem>>, vector<1x8x16xbf16>
    %319 = vector.shape_cast %318 : vector<1x8x16xbf16> to vector<8x16xbf16>
    %cst_436 = arith.constant dense<0.000000e+00> : vector<80x16xf32>
    %320 = tpu.matmul %313, %319, %cst_436 {dimension_numbers = #tpu.dot_dimension_numbers<[1], [0], [0], [1], [0, 0, 1, 1], [], []>} : vector<80x8xbf16>, vector<8x16xbf16>, vector<80x16xf32> -> vector<80x16xf32>
    %321 = arith.addf %317, %320 : vector<80x16xf32>
    %322 = arith.addf %314, %321 : vector<80x16xf32>
    %c0_437 = arith.constant 0 : index
    %c0_438 = arith.constant 0 : index
    %323 = vector.load %arg13[%c0_437, %c0_438] : memref<80x16xf32, #tpu.memory_space<vmem>>, vector<80x16xf32>
    tpu.vector_store %arg13[%c0_437, %c0_438], %322 {strides = array<i32>} : memref<80x16xf32, #tpu.memory_space<vmem>>, vector<80x16xf32>,
    %c0_439 = arith.constant 0 : index
    %c0_440 = arith.constant 0 : index
    %c12_441 = arith.constant 12 : index
    %c0_442 = arith.constant 0 : index
    %324 = vector.load %arg4[%c0_439, %c0_440, %c12_441, %c0_442] : memref<1x1x110x8xbf16, #tpu.memory_space<vmem>>, vector<1x1x80x8xbf16>
    %325 = vector.shape_cast %324 : vector<1x1x80x8xbf16> to vector<80x8xbf16>
    %c0_443 = arith.constant 0 : index
    %c0_444 = arith.constant 0 : index
    %c12_445 = arith.constant 12 : index
    %c0_446 = arith.constant 0 : index
    %326 = vector.load %arg7[%c0_443, %c0_444, %c12_445, %c0_446] : memref<1x1x110x8xbf16, #tpu.memory_space<vmem>>, vector<1x1x80x8xbf16>
    %327 = vector.shape_cast %326 : vector<1x1x80x8xbf16> to vector<80x8xbf16>
    %c0_447 = arith.constant 0 : index
    %c0_448 = arith.constant 0 : index
    %328 = vector.load %arg13[%c0_447, %c0_448] : memref<80x16xf32, #tpu.memory_space<vmem>>, vector<80x16xf32>
    %c23 = arith.constant 23 : index
    %c0_449 = arith.constant 0 : index
    %c0_450 = arith.constant 0 : index
    %329 = vector.load %arg8[%c23, %c0_449, %c0_450] : memref<27x8x16xbf16, #tpu.memory_space<vmem>>, vector<1x8x16xbf16>
    %330 = vector.shape_cast %329 : vector<1x8x16xbf16> to vector<8x16xbf16>
    %cst_451 = arith.constant dense<0.000000e+00> : vector<80x16xf32>
    %331 = tpu.matmul %325, %330, %cst_451 {dimension_numbers = #tpu.dot_dimension_numbers<[1], [0], [0], [1], [0, 0, 1, 1], [], []>} : vector<80x8xbf16>, vector<8x16xbf16>, vector<80x16xf32> -> vector<80x16xf32>
    %c23_452 = arith.constant 23 : index
    %c0_453 = arith.constant 0 : index
    %c0_454 = arith.constant 0 : index
    %332 = vector.load %arg9[%c23_452, %c0_453, %c0_454] : memref<27x8x16xbf16, #tpu.memory_space<vmem>>, vector<1x8x16xbf16>
    %333 = vector.shape_cast %332 : vector<1x8x16xbf16> to vector<8x16xbf16>
    %cst_455 = arith.constant dense<0.000000e+00> : vector<80x16xf32>
    %334 = tpu.matmul %327, %333, %cst_455 {dimension_numbers = #tpu.dot_dimension_numbers<[1], [0], [0], [1], [0, 0, 1, 1], [], []>} : vector<80x8xbf16>, vector<8x16xbf16>, vector<80x16xf32> -> vector<80x16xf32>
    %335 = arith.addf %331, %334 : vector<80x16xf32>
    %336 = arith.addf %328, %335 : vector<80x16xf32>
    %c0_456 = arith.constant 0 : index
    %c0_457 = arith.constant 0 : index
    %337 = vector.load %arg13[%c0_456, %c0_457] : memref<80x16xf32, #tpu.memory_space<vmem>>, vector<80x16xf32>
    tpu.vector_store %arg13[%c0_456, %c0_457], %336 {strides = array<i32>} : memref<80x16xf32, #tpu.memory_space<vmem>>, vector<80x16xf32>,
    %c0_458 = arith.constant 0 : index
    %c0_459 = arith.constant 0 : index
    %c20_460 = arith.constant 20 : index
    %c0_461 = arith.constant 0 : index
    %338 = vector.load %arg4[%c0_458, %c0_459, %c20_460, %c0_461] : memref<1x1x110x8xbf16, #tpu.memory_space<vmem>>, vector<1x1x80x8xbf16>
    %339 = vector.shape_cast %338 : vector<1x1x80x8xbf16> to vector<80x8xbf16>
    %c0_462 = arith.constant 0 : index
    %c0_463 = arith.constant 0 : index
    %c20_464 = arith.constant 20 : index
    %c0_465 = arith.constant 0 : index
    %340 = vector.load %arg7[%c0_462, %c0_463, %c20_464, %c0_465] : memref<1x1x110x8xbf16, #tpu.memory_space<vmem>>, vector<1x1x80x8xbf16>
    %341 = vector.shape_cast %340 : vector<1x1x80x8xbf16> to vector<80x8xbf16>
    %c0_466 = arith.constant 0 : index
    %c0_467 = arith.constant 0 : index
    %342 = vector.load %arg13[%c0_466, %c0_467] : memref<80x16xf32, #tpu.memory_space<vmem>>, vector<80x16xf32>
    %c24 = arith.constant 24 : index
    %c0_468 = arith.constant 0 : index
    %c0_469 = arith.constant 0 : index
    %343 = vector.load %arg8[%c24, %c0_468, %c0_469] : memref<27x8x16xbf16, #tpu.memory_space<vmem>>, vector<1x8x16xbf16>
    %344 = vector.shape_cast %343 : vector<1x8x16xbf16> to vector<8x16xbf16>
    %cst_470 = arith.constant dense<0.000000e+00> : vector<80x16xf32>
    %345 = tpu.matmul %339, %344, %cst_470 {dimension_numbers = #tpu.dot_dimension_numbers<[1], [0], [0], [1], [0, 0, 1, 1], [], []>} : vector<80x8xbf16>, vector<8x16xbf16>, vector<80x16xf32> -> vector<80x16xf32>
    %c24_471 = arith.constant 24 : index
    %c0_472 = arith.constant 0 : index
    %c0_473 = arith.constant 0 : index
    %346 = vector.load %arg9[%c24_471, %c0_472, %c0_473] : memref<27x8x16xbf16, #tpu.memory_space<vmem>>, vector<1x8x16xbf16>
    %347 = vector.shape_cast %346 : vector<1x8x16xbf16> to vector<8x16xbf16>
    %cst_474 = arith.constant dense<0.000000e+00> : vector<80x16xf32>
    %348 = tpu.matmul %341, %347, %cst_474 {dimension_numbers = #tpu.dot_dimension_numbers<[1], [0], [0], [1], [0, 0, 1, 1], [], []>} : vector<80x8xbf16>, vector<8x16xbf16>, vector<80x16xf32> -> vector<80x16xf32>
    %349 = arith.addf %345, %348 : vector<80x16xf32>
    %350 = arith.addf %342, %349 : vector<80x16xf32>
    %c0_475 = arith.constant 0 : index
    %c0_476 = arith.constant 0 : index
    %351 = vector.load %arg13[%c0_475, %c0_476] : memref<80x16xf32, #tpu.memory_space<vmem>>, vector<80x16xf32>
    tpu.vector_store %arg13[%c0_475, %c0_476], %350 {strides = array<i32>} : memref<80x16xf32, #tpu.memory_space<vmem>>, vector<80x16xf32>,
    %c0_477 = arith.constant 0 : index
    %c0_478 = arith.constant 0 : index
    %c21_479 = arith.constant 21 : index
    %c0_480 = arith.constant 0 : index
    %352 = vector.load %arg4[%c0_477, %c0_478, %c21_479, %c0_480] : memref<1x1x110x8xbf16, #tpu.memory_space<vmem>>, vector<1x1x80x8xbf16>
    %353 = vector.shape_cast %352 : vector<1x1x80x8xbf16> to vector<80x8xbf16>
    %c0_481 = arith.constant 0 : index
    %c0_482 = arith.constant 0 : index
    %c21_483 = arith.constant 21 : index
    %c0_484 = arith.constant 0 : index
    %354 = vector.load %arg7[%c0_481, %c0_482, %c21_483, %c0_484] : memref<1x1x110x8xbf16, #tpu.memory_space<vmem>>, vector<1x1x80x8xbf16>
    %355 = vector.shape_cast %354 : vector<1x1x80x8xbf16> to vector<80x8xbf16>
    %c0_485 = arith.constant 0 : index
    %c0_486 = arith.constant 0 : index
    %356 = vector.load %arg13[%c0_485, %c0_486] : memref<80x16xf32, #tpu.memory_space<vmem>>, vector<80x16xf32>
    %c25 = arith.constant 25 : index
    %c0_487 = arith.constant 0 : index
    %c0_488 = arith.constant 0 : index
    %357 = vector.load %arg8[%c25, %c0_487, %c0_488] : memref<27x8x16xbf16, #tpu.memory_space<vmem>>, vector<1x8x16xbf16>
    %358 = vector.shape_cast %357 : vector<1x8x16xbf16> to vector<8x16xbf16>
    %cst_489 = arith.constant dense<0.000000e+00> : vector<80x16xf32>
    %359 = tpu.matmul %353, %358, %cst_489 {dimension_numbers = #tpu.dot_dimension_numbers<[1], [0], [0], [1], [0, 0, 1, 1], [], []>} : vector<80x8xbf16>, vector<8x16xbf16>, vector<80x16xf32> -> vector<80x16xf32>
    %c25_490 = arith.constant 25 : index
    %c0_491 = arith.constant 0 : index
    %c0_492 = arith.constant 0 : index
    %360 = vector.load %arg9[%c25_490, %c0_491, %c0_492] : memref<27x8x16xbf16, #tpu.memory_space<vmem>>, vector<1x8x16xbf16>
    %361 = vector.shape_cast %360 : vector<1x8x16xbf16> to vector<8x16xbf16>
    %cst_493 = arith.constant dense<0.000000e+00> : vector<80x16xf32>
    %362 = tpu.matmul %355, %361, %cst_493 {dimension_numbers = #tpu.dot_dimension_numbers<[1], [0], [0], [1], [0, 0, 1, 1], [], []>} : vector<80x8xbf16>, vector<8x16xbf16>, vector<80x16xf32> -> vector<80x16xf32>
    %363 = arith.addf %359, %362 : vector<80x16xf32>
    %364 = arith.addf %356, %363 : vector<80x16xf32>
    %c0_494 = arith.constant 0 : index
    %c0_495 = arith.constant 0 : index
    %365 = vector.load %arg13[%c0_494, %c0_495] : memref<80x16xf32, #tpu.memory_space<vmem>>, vector<80x16xf32>
    tpu.vector_store %arg13[%c0_494, %c0_495], %364 {strides = array<i32>} : memref<80x16xf32, #tpu.memory_space<vmem>>, vector<80x16xf32>,
    %c0_496 = arith.constant 0 : index
    %c0_497 = arith.constant 0 : index
    %c22_498 = arith.constant 22 : index
    %c0_499 = arith.constant 0 : index
    %366 = vector.load %arg4[%c0_496, %c0_497, %c22_498, %c0_499] : memref<1x1x110x8xbf16, #tpu.memory_space<vmem>>, vector<1x1x80x8xbf16>
    %367 = vector.shape_cast %366 : vector<1x1x80x8xbf16> to vector<80x8xbf16>
    %c0_500 = arith.constant 0 : index
    %c0_501 = arith.constant 0 : index
    %c22_502 = arith.constant 22 : index
    %c0_503 = arith.constant 0 : index
    %368 = vector.load %arg7[%c0_500, %c0_501, %c22_502, %c0_503] : memref<1x1x110x8xbf16, #tpu.memory_space<vmem>>, vector<1x1x80x8xbf16>
    %369 = vector.shape_cast %368 : vector<1x1x80x8xbf16> to vector<80x8xbf16>
    %c0_504 = arith.constant 0 : index
    %c0_505 = arith.constant 0 : index
    %370 = vector.load %arg13[%c0_504, %c0_505] : memref<80x16xf32, #tpu.memory_space<vmem>>, vector<80x16xf32>
    %c26 = arith.constant 26 : index
    %c0_506 = arith.constant 0 : index
    %c0_507 = arith.constant 0 : index
    %371 = vector.load %arg8[%c26, %c0_506, %c0_507] : memref<27x8x16xbf16, #tpu.memory_space<vmem>>, vector<1x8x16xbf16>
    %372 = vector.shape_cast %371 : vector<1x8x16xbf16> to vector<8x16xbf16>
    %cst_508 = arith.constant dense<0.000000e+00> : vector<80x16xf32>
    %373 = tpu.matmul %367, %372, %cst_508 {dimension_numbers = #tpu.dot_dimension_numbers<[1], [0], [0], [1], [0, 0, 1, 1], [], []>} : vector<80x8xbf16>, vector<8x16xbf16>, vector<80x16xf32> -> vector<80x16xf32>
    %c26_509 = arith.constant 26 : index
    %c0_510 = arith.constant 0 : index
    %c0_511 = arith.constant 0 : index
    %374 = vector.load %arg9[%c26_509, %c0_510, %c0_511] : memref<27x8x16xbf16, #tpu.memory_space<vmem>>, vector<1x8x16xbf16>
    %375 = vector.shape_cast %374 : vector<1x8x16xbf16> to vector<8x16xbf16>
    %cst_512 = arith.constant dense<0.000000e+00> : vector<80x16xf32>
    %376 = tpu.matmul %369, %375, %cst_512 {dimension_numbers = #tpu.dot_dimension_numbers<[1], [0], [0], [1], [0, 0, 1, 1], [], []>} : vector<80x8xbf16>, vector<8x16xbf16>, vector<80x16xf32> -> vector<80x16xf32>
    %377 = arith.addf %373, %376 : vector<80x16xf32>
    %378 = arith.addf %370, %377 : vector<80x16xf32>
    %c0_513 = arith.constant 0 : index
    %c0_514 = arith.constant 0 : index
    %379 = vector.load %arg13[%c0_513, %c0_514] : memref<80x16xf32, #tpu.memory_space<vmem>>, vector<80x16xf32>
    tpu.vector_store %arg13[%c0_513, %c0_514], %378 {strides = array<i32>} : memref<80x16xf32, #tpu.memory_space<vmem>>, vector<80x16xf32>,
    %c0_515 = arith.constant 0 : index
    %c0_516 = arith.constant 0 : index
    %380 = vector.load %arg13[%c0_515, %c0_516] : memref<80x16xf32, #tpu.memory_space<vmem>>, vector<80x16xf32>
    %c0_517 = arith.constant 0 : index
    %c0_518 = arith.constant 0 : index
    %c0_519 = arith.constant 0 : index
    %c0_520 = arith.constant 0 : index
    %381 = vector.load %arg10[%c0_517, %c0_518, %c0_519, %c0_520] : memref<1x1x80x16xf32, #tpu.memory_space<vmem>>, vector<1x1x80x16xf32>
    %382 = vector.shape_cast %381 : vector<1x1x80x16xf32> to vector<80x16xf32>
    %383 = vector.shape_cast %380 : vector<80x16xf32> to vector<1x1x80x16xf32>
    tpu.vector_store %arg10[%c0_517, %c0_518, %c0_519, %c0_520], %383 {strides = array<i32>} : memref<1x1x80x16xf32, #tpu.memory_space<vmem>>, vector<1x1x80x16xf32>,
    %384 = tpu.iota {dimensions = array<i32: 0>} : vector<80x1xi32>
    %c10_i32 = arith.constant 10 : i32
    %c0_i32 = arith.constant 0 : i32
    %385 = arith.cmpi eq, %c10_i32, %c0_i32 : i32
    %c1_i32 = arith.constant 1 : i32
    %386 = arith.select %385, %c1_i32, %c10_i32 : i32
    %387 = vector.broadcast %386 : i32 to vector<80x1xi32>
    %388 = arith.remsi %384, %387 : vector<80x1xi32>
    %c0_i32_521 = arith.constant 0 : i32
    %389 = vector.broadcast %c0_i32_521 : i32 to vector<80x1xi32>
    %390 = arith.cmpi ne, %388, %389 : vector<80x1xi32>
    %c0_i32_522 = arith.constant 0 : i32
    %391 = vector.broadcast %c0_i32_522 : i32 to vector<80x1xi32>
    %392 = arith.cmpi slt, %388, %391 : vector<80x1xi32>
    %c0_i32_523 = arith.constant 0 : i32
    %393 = arith.cmpi slt, %386, %c0_i32_523 : i32
    %394 = vector.broadcast %393 : i1 to vector<80x1xi1>
    %395 = vector.broadcast %394 : vector<80x1xi1> to vector<80x1xi1>
    %396 = arith.xori %392, %395 : vector<80x1xi1>
    %397 = arith.andi %396, %390 : vector<80x1xi1>
    %398 = vector.broadcast %386 : i32 to vector<80x1xi32>
    %399 = arith.addi %388, %398 : vector<80x1xi32>
    %400 = arith.select %397, %399, %388 : vector<80x1xi1>, vector<80x1xi32>
    %c8_i32 = arith.constant 8 : i32
    %401 = vector.broadcast %c8_i32 : i32 to vector<80x1xi32>
    %402 = arith.cmpi slt, %400, %401 : vector<80x1xi32>
    %cst_524 = arith.constant 0.000000e+00 : f32
    %403 = vector.shape_cast %402 : vector<80x1xi1> to vector<80x1xi1>
    %404 = vector.broadcast %403 : vector<80x1xi1> to vector<80x16xi1>
    %405 = vector.broadcast %cst_524 : f32 to vector<80x16xf32>
    %406 = arith.select %404, %380, %405 : vector<80x16xi1>, vector<80x16xf32>
    %cst_525 = arith.constant dense<0.000000e+00> : vector<16xf32>
    %407 = vector.multi_reduction <add>, %406, %cst_525 [0] : vector<80x16xf32> to vector<16xf32>
    %408 = vector.shape_cast %407 : vector<16xf32> to vector<1x16xf32>
    %c0_526 = arith.constant 0 : index
    %c0_527 = arith.constant 0 : index
    %c0_528 = arith.constant 0 : index
    %c0_529 = arith.constant 0 : index
    %409 = vector.load %arg11[%c0_526, %c0_527, %c0_528, %c0_529] : memref<1x1x1x16xf32, #tpu.memory_space<vmem>>, vector<1x1x1x16xf32>
    %410 = vector.shape_cast %409 : vector<1x1x1x16xf32> to vector<1x16xf32>
    %411 = vector.shape_cast %408 : vector<1x16xf32> to vector<1x1x1x16xf32>
    tpu.vector_store %arg11[%c0_526, %c0_527, %c0_528, %c0_529], %411 {strides = array<i32>} : memref<1x1x1x16xf32, #tpu.memory_space<vmem>>, vector<1x1x1x16xf32>,
    %412 = arith.mulf %406, %406 : vector<80x16xf32>
    %cst_530 = arith.constant dense<0.000000e+00> : vector<16xf32>
    %413 = vector.multi_reduction <add>, %412, %cst_530 [0] : vector<80x16xf32> to vector<16xf32>
    %414 = vector.shape_cast %413 : vector<16xf32> to vector<1x16xf32>
    %c0_531 = arith.constant 0 : index
    %c0_532 = arith.constant 0 : index
    %c0_533 = arith.constant 0 : index
    %c0_534 = arith.constant 0 : index
    %415 = vector.load %arg12[%c0_531, %c0_532, %c0_533, %c0_534] : memref<1x1x1x16xf32, #tpu.memory_space<vmem>>, vector<1x1x1x16xf32>
    %416 = vector.shape_cast %415 : vector<1x1x1x16xf32> to vector<1x16xf32>
    %417 = vector.shape_cast %414 : vector<1x16xf32> to vector<1x1x1x16xf32>
    tpu.vector_store %arg12[%c0_531, %c0_532, %c0_533, %c0_534], %417 {strides = array<i32>} : memref<1x1x1x16xf32, #tpu.memory_space<vmem>>, vector<1x1x1x16xf32>,
    return
  }
  func.func @transform_0(%arg0: i32, %arg1: i32) -> (i32, i32, i32, i32) {
    %c0_i32 = arith.constant 0 : i32
    %0 = arith.addi %arg1, %c0_i32 : i32
    %c0_i32_0 = arith.constant 0 : i32
    %c0_i32_1 = arith.constant 0 : i32
    %c0_i32_2 = arith.constant 0 : i32
    return %arg0, %0, %c0_i32_0, %c0_i32_1 : i32, i32, i32, i32
  }
  func.func @transform_1(%arg0: i32, %arg1: i32) -> (i32, i32, i32, i32) {
    %c1_i32 = arith.constant 1 : i32
    %0 = arith.addi %arg1, %c1_i32 : i32
    %c0_i32 = arith.constant 0 : i32
    %c0_i32_0 = arith.constant 0 : i32
    %c0_i32_1 = arith.constant 0 : i32
    return %arg0, %0, %c0_i32, %c0_i32_0 : i32, i32, i32, i32
  }
  func.func @transform_2(%arg0: i32, %arg1: i32) -> (i32, i32, i32, i32) {
    %c2_i32 = arith.constant 2 : i32
    %0 = arith.addi %arg1, %c2_i32 : i32
    %c0_i32 = arith.constant 0 : i32
    %c0_i32_0 = arith.constant 0 : i32
    %c0_i32_1 = arith.constant 0 : i32
    return %arg0, %0, %c0_i32, %c0_i32_0 : i32, i32, i32, i32
  }
  func.func @transform_3(%arg0: i32, %arg1: i32) -> (i32, i32, i32, i32) {
    %c0_i32 = arith.constant 0 : i32
    %0 = arith.addi %arg1, %c0_i32 : i32
    %c0_i32_0 = arith.constant 0 : i32
    %c0_i32_1 = arith.constant 0 : i32
    %c0_i32_2 = arith.constant 0 : i32
    return %arg0, %0, %c0_i32_0, %c0_i32_1 : i32, i32, i32, i32
  }
  func.func @transform_4(%arg0: i32, %arg1: i32) -> (i32, i32, i32, i32) {
    %c1_i32 = arith.constant 1 : i32
    %0 = arith.addi %arg1, %c1_i32 : i32
    %c0_i32 = arith.constant 0 : i32
    %c0_i32_0 = arith.constant 0 : i32
    %c0_i32_1 = arith.constant 0 : i32
    return %arg0, %0, %c0_i32, %c0_i32_0 : i32, i32, i32, i32
  }
  func.func @transform_5(%arg0: i32, %arg1: i32) -> (i32, i32, i32, i32) {
    %c2_i32 = arith.constant 2 : i32
    %0 = arith.addi %arg1, %c2_i32 : i32
    %c0_i32 = arith.constant 0 : i32
    %c0_i32_0 = arith.constant 0 : i32
    %c0_i32_1 = arith.constant 0 : i32
    return %arg0, %0, %c0_i32, %c0_i32_0 : i32, i32, i32, i32
  }
  func.func @transform_6(%arg0: i32, %arg1: i32) -> (i32, i32, i32) {
    %c0_i32 = arith.constant 0 : i32
    %c0_i32_0 = arith.constant 0 : i32
    %c0_i32_1 = arith.constant 0 : i32
    %c0_i32_2 = arith.constant 0 : i32
    return %c0_i32, %c0_i32_0, %c0_i32_1 : i32, i32, i32
  }
  func.func @transform_7(%arg0: i32, %arg1: i32) -> (i32, i32, i32) {
    %c0_i32 = arith.constant 0 : i32
    %c0_i32_0 = arith.constant 0 : i32
    %c0_i32_1 = arith.constant 0 : i32
    %c0_i32_2 = arith.constant 0 : i32
    return %c0_i32, %c0_i32_0, %c0_i32_1 : i32, i32, i32
  }
  func.func @transform_8(%arg0: i32, %arg1: i32) -> (i32, i32, i32, i32) {
    %c0_i32 = arith.constant 0 : i32
    %c0_i32_0 = arith.constant 0 : i32
    %c0_i32_1 = arith.constant 0 : i32
    return %arg0, %arg1, %c0_i32, %c0_i32_0 : i32, i32, i32, i32
  }
  func.func @transform_9(%arg0: i32, %arg1: i32) -> (i32, i32, i32, i32) {
    %c0_i32 = arith.constant 0 : i32
    %c0_i32_0 = arith.constant 0 : i32
    %c0_i32_1 = arith.constant 0 : i32
    return %arg0, %arg1, %c0_i32, %c0_i32_0 : i32, i32, i32, i32
  }
  func.func @transform_10(%arg0: i32, %arg1: i32) -> (i32, i32, i32, i32) {
    %c0_i32 = arith.constant 0 : i32
    %c0_i32_0 = arith.constant 0 : i32
    %c0_i32_1 = arith.constant 0 : i32
    return %arg0, %arg1, %c0_i32, %c0_i32_0 : i32, i32, i32, i32
  }
}

module attributes {stable_mosaic.version = 11 : i64} {
  func.func @_bn_relu_kernel(%arg0: i32, %arg1: memref<64x128xf32, #tpu.memory_space<vmem>>, %arg2: memref<1x128xf32, #tpu.memory_space<vmem>>, %arg3: memref<1x128xf32, #tpu.memory_space<vmem>>, %arg4: memref<64x128xf32, #tpu.memory_space<vmem>>) attributes {dimension_semantics = [#tpu.dimension_semantics<parallel>], iteration_bounds = array<i64: 2>, scalar_prefetch = 0 : i64, scratch_operands = 0 : i64, tpu.core_type = #tpu.core_type<tc>, window_params = [{transform_indices = @transform_0, window_bounds = array<i64: 64, 128>}, {pipeline_mode = #tpu.pipeline_mode<synchronous>, transform_indices = @transform_1, window_bounds = array<i64: 1, 128>}, {pipeline_mode = #tpu.pipeline_mode<synchronous>, transform_indices = @transform_2, window_bounds = array<i64: 1, 128>}, {transform_indices = @transform_3, window_bounds = array<i64: 64, 128>}]} {
    %c0 = arith.constant 0 : index
    %c0_0 = arith.constant 0 : index
    %0 = vector.load %arg1[%c0, %c0_0] : memref<64x128xf32, #tpu.memory_space<vmem>>, vector<64x128xf32>
    %c0_1 = arith.constant 0 : index
    %c0_2 = arith.constant 0 : index
    %1 = vector.load %arg2[%c0_1, %c0_2] : memref<1x128xf32, #tpu.memory_space<vmem>>, vector<1x128xf32>
    %2 = vector.broadcast %1 : vector<1x128xf32> to vector<64x128xf32>
    %3 = arith.mulf %0, %2 : vector<64x128xf32>
    %c0_3 = arith.constant 0 : index
    %c0_4 = arith.constant 0 : index
    %4 = vector.load %arg3[%c0_3, %c0_4] : memref<1x128xf32, #tpu.memory_space<vmem>>, vector<1x128xf32>
    %5 = vector.broadcast %4 : vector<1x128xf32> to vector<64x128xf32>
    %6 = arith.addf %3, %5 : vector<64x128xf32>
    %cst = arith.constant 0.000000e+00 : f32
    %7 = vector.broadcast %cst : f32 to vector<64x128xf32>
    %8 = arith.maximumf %6, %7 : vector<64x128xf32>
    %c0_5 = arith.constant 0 : index
    %c0_6 = arith.constant 0 : index
    %9 = vector.load %arg4[%c0_5, %c0_6] : memref<64x128xf32, #tpu.memory_space<vmem>>, vector<64x128xf32>
    tpu.vector_store %arg4[%c0_5, %c0_6], %8 {strides = array<i32>} : memref<64x128xf32, #tpu.memory_space<vmem>>, vector<64x128xf32>,
    return
  }
  func.func @transform_0(%arg0: i32) -> (i32, i32) {
    %c0_i32 = arith.constant 0 : i32
    %c0_i32_0 = arith.constant 0 : i32
    return %arg0, %c0_i32 : i32, i32
  }
  func.func @transform_1(%arg0: i32) -> (i32, i32) {
    %c0_i32 = arith.constant 0 : i32
    %c0_i32_0 = arith.constant 0 : i32
    %c0_i32_1 = arith.constant 0 : i32
    return %c0_i32, %c0_i32_0 : i32, i32
  }
  func.func @transform_2(%arg0: i32) -> (i32, i32) {
    %c0_i32 = arith.constant 0 : i32
    %c0_i32_0 = arith.constant 0 : i32
    %c0_i32_1 = arith.constant 0 : i32
    return %c0_i32, %c0_i32_0 : i32, i32
  }
  func.func @transform_3(%arg0: i32) -> (i32, i32) {
    %c0_i32 = arith.constant 0 : i32
    %c0_i32_0 = arith.constant 0 : i32
    return %arg0, %c0_i32 : i32, i32
  }
}

</mosaic_0001>

<bundles_post_ra>
// kernel: resnet_like_tu_forward.3
= control target key start
LH: loop header
LB: loop body
LE: loop exit
PB: predicated region body
PF: predicated region fallthrough
CT: control target
= control target key end

     0   :  { %s550_s15 = smov 0   ;;  %s615_s0 = inlined_call_operand.vmem [shape: bf16[128,8], index: 0, kind: input, shape index: {}]   ;;  %s616_s1 = inlined_call_operand.vmem [shape: bf16[8,64], index: 1, kind: input, shape index: {}]   ;;  %s617_s2 = inlined_call_operand.vmem [shape: bf16[128,64], index: 2, kind: output, shape index: {0}]   ;;  %s618_s3 = inlined_call_operand.vmem [shape: f32[2,1,64], index: 3, kind: output, shape index: {1}]   ;;  %s619_s4 = inlined_call_operand.vmem [shape: f32[2,1,64], index: 4, kind: output, shape index: {2}]  }
   0x1 LB: > { %s556_s16 = sadd.s32 4294967295, %s523_s15   ;;  %p475_p0 = scmp.ge.s32.totalorder %s523_s15, 1  ;;  %s523_s15 = sphi %s550_s15, %s15_s15  }
   0x2   : > { %p168_p1 = scmp.lt.s32.totalorder %s523_s15, 3 }
   0x4   : > { %p169_p2 = pnand %p475_p0, %p168_p1 }
   0x5   : > { %s476_s19 = sshll.u32 (!%p169_p2), %s556_s16, 3  ;;  %p212_p4 = scmp.lt.s32.totalorder (!%p169_p2), %s556_s16, 1 }
   0x6   : > { %172 = sbr.rel (%p169_p2) target bundleno = 180 (0xb4), region = 28  ;;  %p201_p3 = scmp.lt.s32.totalorder (!%p169_p2), %s476_s19, 15 }
   0xb   : > { %v227_v0 = vld [vmem:[%s616_s1] sm:$0xf]  ;;  %vm261_vm0 = vcmask 1043456   ;;  %s621_s19 = smov (!%p201_p3, %s476_s19), 15  ;;  %vm248_vm1 = vcmask 64512   ;;  %vm302_vm2 = vcmask 519168  }
   0xc   : > { %v263_v1 = vsel %vm261_vm0, %v227_v0, 0  ;;  %s477_s20 = sshll.u32 %s621_s19, 2  ;;  %vm311_vm3 = vcmask 523264   ;;  %s623_s16 = smov (!%p212_p4, %s556_s16), 1  ;;  %vm333_vm4 = vcmask 516096  }
   0xd   : > { %272 = vmatpush.bf16.msra.mxu0 %v263_v1  ;;  %506 = vmatpush.bf16.msra.mxu1 %v263_v1  ;;  %s204_s23 = scalar_lea.vmem %s615_s0, %s477_s20  ;;  %s570_s26 = scalar_lea.vmem %s617_s2, %s477_s20 }
   0xe   : > { %507 = vmatpush.bf16.msra.mxu2 %v263_v1  ;;  %508 = vmatpush.bf16.msra.mxu3 %v263_v1  ;;  %v502_v2 = vld [vmem:[%s204_s23] sm:$0xff]  ;;  %v503_v3 = vld [vmem:[%s204_s23 + $0x8] sm:$0xff]  ;;  %v504_v4 = vld [vmem:[%s204_s23 + $0x10] sm:$0xff]  ;;  %s214_s29 = scalar_lea.vmem %s618_s3, %s623_s16  ;;  %s217_s6 = scalar_lea.vmem %s619_s4, %s623_s16 }
   0xf   : > { %v505_v5 = vld [vmem:[%s204_s23 + $0x18] sm:$0xff] }
  0x10   : > { %496 = vmatmul.msk.bf16.vlgmr.msra.gmra.mxu0 %vm248_vm1, %v502_v2  ;;  %497 = vmatmul.msk.bf16.vlgmr.msra.gmra.mxu1 %vm248_vm1, %v503_v3 }
  0x11   : > { %498 = vmatmul.msk.bf16.vlgmr.msra.gmra.mxu2 %vm248_vm1, %v504_v4  ;;  %499 = vmatmul.msk.bf16.vlgmr.msra.gmra.mxu3 %vm248_vm1, %v505_v5 }
  0x8d   : > { %v274_v6 = vpop.f32.mrf.mxu0  ;;  %v279_v7 = vpop.f32.mrf.mxu1 }
  0x8e   : > { %v294_v8 = vpack.c.bf16 %v274_v6, %v274_v6  ;;  %v296_v9 = vpack.c.bf16 %v279_v7, %v279_v7  ;;  %v335_v12 = vmul.f32 %v274_v6, %v274_v6  ;;  %v312_v17 = vsel %vm311_vm3, %v274_v6, 0.0 }
  0x8f   : > { %v337_v20 = vmul.f32 %v279_v7, %v279_v7  ;;  %v315_v24 = vsel %vm311_vm3, %v279_v7, 0.0 }
  0x90   : > { %303 = vst.msk [vmem:[%s570_s26] sm:$0xf] %vm302_vm2, %v294_v8  ;;  %v343_v25 = vsel %vm311_vm3, %v335_v12, 0.0 }
  0x91   : > { %305 = vst.msk [vmem:[%s570_s26 + $0x8] sm:$0xf] %vm302_vm2, %v296_v9  ;;  %v346_v31 = vsel %vm311_vm3, %v337_v20, 0.0 }
  0x94   : > { %v284_v10 = vpop.f32.mrf.mxu2  ;;  %v289_v11 = vpop.f32.mrf.mxu3 }
  0x95   : > { %v298_v13 = vpack.c.bf16 %v284_v10, %v284_v10  ;;  %v300_v14 = vpack.c.bf16 %v289_v11, %v289_v11  ;;  %v276_v15 = vpop.f32.mrf.mxu0  ;;  %v281_v16 = vpop.f32.mrf.mxu1  ;;  %v339_v32 = vmul.f32 %v284_v10, %v284_v10  ;;  %v319_v34 = vsel %vm311_vm3, %v284_v10, 0.0 }
  0x96   : > { %v295_v18 = vpack.c.bf16 %v276_v15, %v276_v15  ;;  %v313_v19 = vsel %vm311_vm3, %v276_v15, 0.0  ;;  %v336_v22 = vmul.f32 %v276_v15, %v276_v15  ;;  %v297_v23 = vpack.c.bf16 %v281_v16, %v281_v16 }
  0x97   : > { %307 = vst.msk [vmem:[%s570_s26 + $0x10] sm:$0xf] %vm302_vm2, %v298_v13  ;;  %v314_v21 = vadd.f32 %v313_v19, %v312_v17  ;;  %v338_v28 = vmul.f32 %v281_v16, %v281_v16  ;;  %v317_v30 = vsel %vm311_vm3, %v281_v16, 0.0  ;;  %v350_v45 = vsel %vm311_vm3, %v339_v32, 0.0 }
  0x98   : > { %309 = vst.msk [vmem:[%s570_s26 + $0x18] sm:$0xf] %vm302_vm2, %v300_v14  ;;  %v344_v26 = vsel %vm311_vm3, %v336_v22, 0.0  ;;  %v341_v46 = vmul.f32 %v289_v11, %v289_v11  ;;  %v323_v48 = vsel %vm311_vm3, %v289_v11, 0.0 }
  0x99   : > { %304 = vst.msk [vmem:[%s570_s26 + $0x4] sm:$0xf] %vm302_vm2, %v295_v18  ;;  %v316_v27 = vadd.f32 %v315_v24, %v314_v21  ;;  %v345_v29 = vadd.f32 %v344_v26, %v343_v25  ;;  %v348_v38 = vsel %vm311_vm3, %v338_v28, 0.0 }
  0x9a   : > { %306 = vst.msk [vmem:[%s570_s26 + $0xc] sm:$0xf] %vm302_vm2, %v297_v23  ;;  %v354_v55 = vsel %vm311_vm3, %v341_v46, 0.0 }
  0x9b   : > { %v318_v33 = vadd.f32 %v317_v30, %v316_v27  ;;  %v347_v35 = vadd.f32 %v346_v31, %v345_v29 }
  0x9c   : > { %v286_v36 = vpop.f32.mrf.mxu2  ;;  %v291_v37 = vpop.f32.mrf.mxu3 }
  0x9d   : > { %v299_v39 = vpack.c.bf16 %v286_v36, %v286_v36  ;;  %v320_v40 = vadd.f32 %v319_v34, %v318_v33  ;;  %v340_v41 = vmul.f32 %v286_v36, %v286_v36  ;;  %v349_v42 = vadd.f32 %v348_v38, %v347_v35 }
  0x9e   : > { %v321_v43 = vsel %vm311_vm3, %v286_v36, 0.0  ;;  %v301_v44 = vpack.c.bf16 %v291_v37, %v291_v37  ;;  %v342_v52 = vmul.f32 %v291_v37, %v291_v37  ;;  %v325_v54 = vsel %vm311_vm3, %v291_v37, 0.0 }
  0x9f   : > { %308 = vst.msk [vmem:[%s570_s26 + $0x14] sm:$0xf] %vm302_vm2, %v299_v39  ;;  %v322_v47 = vadd.f32 %v321_v43, %v320_v40  ;;  %v351_v49 = vadd.f32 %v350_v45, %v349_v42  ;;  %v352_v50 = vsel %vm311_vm3, %v340_v41, 0.0 }
  0xa0   : > { %310 = vst.msk [vmem:[%s570_s26 + $0x1c] sm:$0xf] %vm302_vm2, %v301_v44  ;;  %v356_v59 = vsel %vm311_vm3, %v342_v52, 0.0 }
  0xa1   : > { %v324_v51 = vadd.f32 %v323_v48, %v322_v47  ;;  %v353_v53 = vadd.f32 %v352_v50, %v351_v49 }
  0xa3   : > { %v326_v56 = vadd.f32 %v325_v54, %v324_v51  ;;  %v355_v57 = vadd.f32 %v354_v55, %v353_v53 }
  0xa5   : > { %v327_v58 = vrot.slane %v326_v56, 4  ;;  %v357_v60 = vadd.f32 %v356_v59, %v355_v57 }
  0xa7   : > { %v328_v61 = vadd.f32 %v327_v58, %v326_v56  ;;  %v358_v62 = vrot.slane %v357_v60, 4 }
  0xa9   : > { %v329_v63 = vrot.slane %v328_v61, 2  ;;  %v359_v0 = vadd.f32 %v358_v62, %v357_v60 }
  0xab   : > { %v330_v1 = vadd.f32 %v329_v63, %v328_v61  ;;  %v360_v2 = vrot.slane %v359_v0, 2 }
  0xad   : > { %v331_v3 = vrot.slane %v330_v1, 1  ;;  %v361_v4 = vadd.f32 %v360_v2, %v359_v0 }
  0xaf   : > { %v332_v5 = vadd.f32 %v331_v3, %v330_v1  ;;  %v362_v6 = vrot.slane %v361_v4, 1 }
  0xb1   : > { %334 = vst.msk [vmem:[%s214_s29] sm:$0x1] %vm333_vm4, %v332_v5  ;;  %v363_v7 = vadd.f32 %v362_v6, %v361_v4 }
  0xb3   : > { %364 = vst.msk [vmem:[%s217_s6] sm:$0x1] %vm333_vm4, %v363_v7 }
  0xb4 PF: > { %s15_s15 = sadd.s32 1, %s523_s15  }
  0xb5   : > { %p12_p5 = scmp.ge.s32.totalorder %s15_s15, 4  }
  0xb7   :  { %14 = sbr.rel (!%p12_p5) target bundleno = 1 (0x1), region = 82 }

// kernel: tile.13
= control target key start
LH: loop header
LB: loop body
LE: loop exit
PB: predicated region body
PF: predicated region fallthrough
CT: control target
= control target key end

     0   :  { %s22_s0 = inlined_call_operand.vmem [shape: f32[16], index: 0, kind: input, shape index: {}]   ;;  %s23_s1 = inlined_call_operand.vmem [shape: f32[8,16], index: 1, kind: output, shape index: {}]  }
   0x1   :  { %v4_v0 = vld [vmem:[%s22_s0] ss:$0 sm:$0xff] }
   0x2   :  { %5 = vst [vmem:[%s23_s1] sm:$0xff] %v4_v0 }

// kernel: tile.14
= control target key start
LH: loop header
LB: loop body
LE: loop exit
PB: predicated region body
PF: predicated region fallthrough
CT: control target
= control target key end

     0   :  { %s67_s10 = smov 112   ;;  %s68_s11 = smov 80   ;;  %vm3_vm0 = vcmask 130048   ;;  %vm9_vm1 = vcmask 1048448   ;;  %vm15_vm2 = vcmask 917248   ;;  %vm21_vm3 = vcmask 786048   ;;  %s111_s0 = inlined_call_operand.vmem [shape: f32[8,16], index: 0, kind: input, shape index: {}]   ;;  %s112_s1 = inlined_call_operand.vmem [shape: f32[1,128], index: 1, kind: output, shape index: {}]  }
   0x1   :  { %v53_v0 = vld [vmem:[%s111_s0 + $0x7] sm:$0x1]   ;;  %v55_v1 = vld [vmem:[%s111_s0 + $0x5] sm:$0x1]   ;;  %v57_v2 = vld [vmem:[%s111_s0 + $0x3] sm:$0x1]  }
   0x2   :  { %7 = vrot.lane.b32.xlu0 %v53_v0, %s67_s10  ;;  %19 = vrot.lane.b32.xlu1 %v55_v1, %s68_s11  ;;  %s69_s14 = smov 48   ;;  %v54_v3 = vld [vmem:[%s111_s0 + $0x6] sm:$0x1]   ;;  %v56_v4 = vld [vmem:[%s111_s0 + $0x4] sm:$0x1]   ;;  %s70_s21 = smov 96  }
   0x3   :  { %31 = vrot.lane.b32.xlu2 %v57_v2, %s69_s14  ;;  %v58_v5 = vld [vmem:[%s111_s0 + $0x2] sm:$0x1]   ;;  %s71_s22 = smov 64   ;;  %s72_s23 = smov 32   ;;  %v59_v6 = vld [vmem:[%s111_s0 + $0x1] sm:$0x1]  }
   0x4   :  { %s73_s26 = smov 16   ;;  %v2_v7 = vld [vmem:[%s111_s0] sm:$0x1]   ;;  %vm27_vm4 = vcmask 654848   ;;  %vm33_vm5 = vcmask 523648   ;;  %vm39_vm6 = vcmask 392448  }
   0x5   :  { %4 = vst.msk [vmem:[#allocation0] sm:$0x1] %vm3_vm0, %v2_v7   ;;  %vm45_vm7 = vcmask 261248  }
   0xa   :  { %13 = vrot.lane.b32.xlu0 %v54_v3, %s70_s21  ;;  %25 = vrot.lane.b32.xlu1 %v56_v4, %s71_s22 }
   0xb   :  { %37 = vrot.lane.b32.xlu2 %v58_v5, %s72_s23 }
  0x12   :  { %43 = vrot.lane.b32.xlu0 %v59_v6, %s73_s26 }
  0x5d   :  { %v32_v8 = vpop.permute.xlu2 %31  }
  0x65   :  { %v38_v9 = vpop.permute.xlu2 %37  }
  0x74   :  { %v8_v10 = vpop.permute.xlu0 %7   ;;  %v20_v11 = vpop.permute.xlu1 %19  }
  0x75   :  { %10 = vst.msk [vmem:[#allocation0] sm:$0x1] %vm9_vm1, %v8_v10  }
  0x7c   :  { %v14_v12 = vpop.permute.xlu0 %13   ;;  %v26_v13 = vpop.permute.xlu1 %25  }
  0x7d   :  { %16 = vst.msk [vmem:[#allocation0] sm:$0x1] %vm15_vm2, %v14_v12  }
  0x7e   :  { %22 = vst.msk [vmem:[#allocation0] sm:$0x1] %vm21_vm3, %v20_v11  }
  0x7f   :  { %28 = vst.msk [vmem:[#allocation0] sm:$0x1] %vm27_vm4, %v26_v13  }
  0x80   :  { %34 = vst.msk [vmem:[#allocation0] sm:$0x1] %vm33_vm5, %v32_v8  }
  0x81   :  { %40 = vst.msk [vmem:[#allocation0] sm:$0x1] %vm39_vm6, %v38_v9  }
  0x84   :  { %v44_v14 = vpop.permute.xlu0 %43  }
  0x85   :  { %46 = vst.msk [vmem:[#allocation0] sm:$0x1] %vm45_vm7, %v44_v14  }
  0x8c   :  { %v49_v15 = vld [vmem:[#allocation0] sm:$0x1] }
  0x8d   :  { %52 = vst [vmem:[%s112_s1] sm:$0x1] %v49_v15 }

// kernel: resnet_like_tu_forward.5
= control target key start
LH: loop header
LB: loop body
LE: loop exit
PB: predicated region body
PF: predicated region fallthrough
CT: control target
= control target key end

     0   :  { %s327_s12 = smov 0   ;;  %s350_s0 = inlined_call_operand.vmem [shape: f32[128,128], index: 0, kind: input, shape index: {}]   ;;  %s351_s1 = inlined_call_operand.vmem [shape: f32[1,128], index: 1, kind: input, shape index: {}]   ;;  %s352_s2 = inlined_call_operand.vmem [shape: f32[1,128], index: 2, kind: input, shape index: {}]   ;;  %s353_s3 = inlined_call_operand.vmem [shape: f32[128,128], index: 3, kind: output, shape index: {}]  }
   0x1 LB: > { %s278_s13 = sadd.s32 4294967295, %s305_s12   ;;  %p282_p0 = scmp.ge.s32.totalorder %s305_s12, 1  ;;  %s305_s12 = sphi %s327_s12, %s13_s12  }
   0x2   : > { %p138_p1 = scmp.lt.s32.totalorder %s305_s12, 3 }
   0x4   : > { %p139_p2 = pnand %p282_p0, %p138_p1 }
   0x5   : > { %s283_s14 = sshll.u32 (!%p139_p2), %s278_s13, 3 }
   0x6   : > { %142 = sbr.rel (%p139_p2) target bundleno = 29 (0x1d), region = 32  ;;  %p163_p3 = scmp.lt.s32.totalorder (!%p139_p2), %s283_s14, 15 }
   0xb   : > { %s355_s14 = smov (!%p163_p3, %s283_s14), 15  ;;  %v297_v0 = vld [vmem:[%s351_s1] ss:$0 sm:$0xff] }
   0xc   : > { %s284_s17 = sshll.u32 %s355_s14, 3  ;;  %v298_v1 = vld [vmem:[%s352_s2] ss:$0 sm:$0xff] }
   0xd   : > { %s166_s20 = scalar_lea.vmem %s350_s0, %s284_s17  ;;  %s172_s25 = scalar_lea.vmem %s353_s3, %s284_s17 }
   0xe   : > { %v174_v2 = vld [vmem:[%s166_s20] sm:$0xff]  ;;  %v175_v3 = vld [vmem:[%s166_s20 + $0x8] sm:$0xff]  ;;  %v176_v4 = vld [vmem:[%s166_s20 + $0x10] sm:$0xff] }
   0xf   : > { %v186_v5 = vmul.f32 %v297_v0, %v174_v2  ;;  %v187_v6 = vmul.f32 %v297_v0, %v175_v3  ;;  %v188_v7 = vmul.f32 %v297_v0, %v176_v4  ;;  %v177_v8 = vld [vmem:[%s166_s20 + $0x18] sm:$0xff]  ;;  %v178_v9 = vld [vmem:[%s166_s20 + $0x20] sm:$0xff]  ;;  %v179_v10 = vld [vmem:[%s166_s20 + $0x28] sm:$0xff] }
  0x10   : > { %v189_v11 = vmul.f32 %v297_v0, %v177_v8  ;;  %v190_v12 = vmul.f32 %v297_v0, %v178_v9  ;;  %v191_v13 = vmul.f32 %v297_v0, %v179_v10  ;;  %v180_v14 = vld [vmem:[%s166_s20 + $0x30] sm:$0xff]  ;;  %v181_v15 = vld [vmem:[%s166_s20 + $0x38] sm:$0xff] }
  0x11   : > { %v198_v16 = vadd.f32 %v298_v1, %v186_v5  ;;  %v199_v17 = vadd.f32 %v298_v1, %v187_v6  ;;  %v200_v18 = vadd.f32 %v298_v1, %v188_v7  ;;  %v192_v19 = vmul.f32 %v297_v0, %v180_v14 }
  0x12   : > { %v201_v20 = vadd.f32 %v298_v1, %v189_v11  ;;  %v202_v21 = vadd.f32 %v298_v1, %v190_v12  ;;  %v203_v22 = vadd.f32 %v298_v1, %v191_v13  ;;  %v193_v23 = vmul.f32 %v297_v0, %v181_v15 }
  0x13   : > { %v206_v24 = vmax.f32 %v198_v16, 0.0  ;;  %v207_v25 = vmax.f32 %v199_v17, 0.0  ;;  %v208_v26 = vmax.f32 %v200_v18, 0.0  ;;  %v204_v27 = vadd.f32 %v298_v1, %v192_v19 }
  0x14   : > { %v209_v28 = vmax.f32 %v201_v20, 0.0  ;;  %v205_v29 = vadd.f32 %v298_v1, %v193_v23  ;;  %v210_v30 = vmax.f32 %v202_v21, 0.0  ;;  %v211_v31 = vmax.f32 %v203_v22, 0.0 }
  0x15   : > { %214 = vst [vmem:[%s172_s25] sm:$0xff] %v206_v24  ;;  %v212_v32 = vmax.f32 %v204_v27, 0.0 }
  0x16   : > { %215 = vst [vmem:[%s172_s25 + $0x8] sm:$0xff] %v207_v25  ;;  %v213_v33 = vmax.f32 %v205_v29, 0.0 }
  0x17   : > { %216 = vst [vmem:[%s172_s25 + $0x10] sm:$0xff] %v208_v26 }
  0x18   : > { %217 = vst [vmem:[%s172_s25 + $0x18] sm:$0xff] %v209_v28 }
  0x19   : > { %218 = vst [vmem:[%s172_s25 + $0x20] sm:$0xff] %v210_v30 }
  0x1a   : > { %219 = vst [vmem:[%s172_s25 + $0x28] sm:$0xff] %v211_v31 }
  0x1b   : > { %220 = vst [vmem:[%s172_s25 + $0x30] sm:$0xff] %v212_v32 }
  0x1c   : > { %221 = vst [vmem:[%s172_s25 + $0x38] sm:$0xff] %v213_v33 }
  0x1d PF: > { %s13_s12 = sadd.s32 1, %s305_s12  }
  0x1e   : > { %p10_p4 = scmp.ge.s32.totalorder %s13_s12, 4  }
  0x20   :  { %12 = sbr.rel (!%p10_p4) target bundleno = 1 (0x1), region = 62 }

// kernel: resnet_like_tu_forward.4
= control target key start
LH: loop header
LB: loop body
LE: loop exit
PB: predicated region body
PF: predicated region fallthrough
CT: control target
= control target key end

     0   :  { %s10278_s13 = smov 0   ;;  %s10280_s14 = smov 0   ;;  %s12921_s0 = inlined_call_operand.vmem [shape: bf16[2,10,110,8], index: 0, kind: input, shape index: {}, may-alias: {0,1,2}]   ;;  %s12922_s1 = inlined_call_operand.vmem [shape: bf16[2,10,110,8], index: 1, kind: input, shape index: {}, may-alias: {0,1,2}]   ;;  %s12923_s2 = inlined_call_operand.vmem [shape: bf16[2,10,110,8], index: 2, kind: input, shape index: {}, may-alias: {0,1,2}]   ;;  %s12924_s3 = inlined_call_operand.vmem [shape: bf16[2,10,110,8], index: 3, kind: input, shape index: {}, may-alias: {3,4,5}]   ;;  %s12925_s4 = inlined_call_operand.vmem [shape: bf16[2,10,110,8], index: 4, kind: input, shape index: {}, may-alias: {3,4,5}]   ;;  %s12926_s5 = inlined_call_operand.vmem [shape: bf16[2,10,110,8], index: 5, kind: input, shape index: {}, may-alias: {3,4,5}]   ;;  %s12927_s6 = inlined_call_operand.vmem [shape: bf16[27,8,16], index: 6, kind: input, shape index: {}]   ;;  %s12928_s7 = inlined_call_operand.vmem [shape: bf16[27,8,16], index: 7, kind: input, shape index: {}]   ;;  %s12929_s8 = inlined_call_operand.vmem [shape: f32[2,8,80,16], index: 8, kind: output, shape index: {0}]   ;;  %s12930_s9 = inlined_call_operand.vmem [shape: f32[2,8,1,16], index: 9, kind: output, shape index: {1}]   ;;  %s12931_s10 = inlined_call_operand.vmem [shape: f32[2,8,1,16], index: 10, kind: output, shape index: {2}]  }
   0x1   :  { %s10282_s15 = smov 0   ;;  %s10284_s16 = smov 0  }
   0x2   :  { %s10286_s17 = smov 0  }
   0x3 LB: > { %s30_s18 = sadd.s32 1, %s10211_s15  ;;  %s33_s19 = sadd.s32 1, %s10215_s16  ;;  %s10219_s17 = sphi %s10286_s17, %s21_s17   ;;  %s10215_s16 = sphi %s10284_s16, %s12979_s16   ;;  %s10211_s15 = sphi %s10282_s15, %s12978_s15   ;;  %s10207_s14 = sphi %s10280_s14, %s12977_s14   ;;  %s10203_s13 = sphi %s10278_s13, %s12976_s13  }
   0x4   : > { %p31_p0 = scmp.ge.s32.totalorder %s30_s18, 8  ;;  %p8447_p1 = scmp.ge.s32.totalorder %s10219_s17, 1 }
   0x5   : > { %p437_p2 = scmp.lt.s32.totalorder %s10219_s17, 17 }
   0x6   : > { %s12981_s18 = smov (%p31_p0, %s30_s18), 0  ;;  %s12983_s19 = smov (!%p31_p0, %s33_s19), %s10215_s16 }
   0x7   : > { %p438_p3 = pnand %p8447_p1, %p437_p2  ;;  %p35_p4 = scmp.ge.s32.totalorder %s12983_s19, 2 }
   0x8   : > { %p546_p5 = scmp.lt.s32.totalorder (!%p438_p3), %s10207_s14, 1  ;;  %p548_p6 = scmp.lt.s32.totalorder (!%p438_p3), %s10203_s13, 9 }
   0x9   : > { %s12985_s19 = smov (%p35_p4, %s12983_s19), 0  ;;  %441 = sbr.rel (%p438_p3) target bundleno = 1262 (0x4ee), region = 52 }
   0xa   : > { %s555_s20 = sadd.s32 (!%p438_p3), 1, %s10203_s13  ;;  %s566_s24 = sadd.s32 (!%p438_p3), 2, %s10203_s13 }
   0xb   : > { %p10943_p7 = scmp.lt.s32.totalorder (!%p438_p3), %s555_s20, 9  ;;  %p11654_p8 = scmp.lt.s32.totalorder (!%p438_p3), %s566_s24, 9 }
   0xc   : > { %p610_p9 = scmp.lt.s32.totalorder (!%p438_p3), %s10203_s13, 7 }
   0xe   : > { %v674_v0 = vld [vmem:[%s12928_s7] sm:$0xf]  ;;  %vm716_vm0 = vcmask 1043456   ;;  %s12987_s14 = smov (!%p546_p5, %s10207_s14), 1  ;;  %v8508_v4 = vld [vmem:[%s12928_s7 + $0x4] sm:$0xf] }
   0xf   : > { %v673_v1 = vld [vmem:[%s12927_s6] sm:$0xf]  ;;  %v718_v2 = vsel %vm716_vm0, %v674_v0, 0  ;;  %v8507_v5 = vld [vmem:[%s12927_s6 + $0x4] sm:$0xf]  ;;  %s549_s28 = scalar_select %p548_p6, %s10203_s13, 9 }
  0x10   : > { %v795_v3 = vsel %vm716_vm0, %v673_v1, 0  ;;  %727 = vmatpush.bf16.msra.mxu0 %v718_v2  ;;  %10131 = vmatpush.bf16.msra.mxu2 %v718_v2  ;;  %v976_v6 = vsel %vm716_vm0, %v8508_v4, 0  ;;  %v1100_v7 = vsel %vm716_vm0, %v8507_v5, 0  ;;  %v8560_v8 = vld [vmem:[%s12928_s7 + $0x8] sm:$0xf]  ;;  %s10334_s11 = smul.u32 140, %s12987_s14 }
  0x11   : > { %804 = vmatpush.bf16.msra.mxu1 %v795_v3  ;;  %10132 = vmatpush.bf16.msra.mxu3 %v795_v3  ;;  %v1248_v9 = vsel %vm716_vm0, %v8560_v8, 0  ;;  %v8559_v10 = vld [vmem:[%s12927_s6 + $0x8] sm:$0xf]  ;;  %s10133_s21 = smul.u32 14, %s549_s28  ;;  %vm700_vm1 = vcmask 64512   ;;  %vm1220_vm3 = vcmask 1046528  }
  0x12   : > { %v1339_v11 = vsel %vm716_vm0, %v8559_v10, 0  ;;  %v8612_v16 = vld [vmem:[%s12928_s7 + $0xc] sm:$0xf]  ;;  %v8664_v28 = vld [vmem:[%s12928_s7 + $0x10] sm:$0xf]  ;;  %vm632_vm4 = vcmask 130048  }
  0x13   : > { %s552_s22 = sadd.s32 %s10334_s11, %s10133_s21  ;;  %v8611_v17 = vld [vmem:[%s12927_s6 + $0xc] sm:$0xf]  ;;  %v1486_v18 = vsel %vm716_vm0, %v8612_v16, 0  ;;  %v8663_v29 = vld [vmem:[%s12927_s6 + $0x10] sm:$0xf]  ;;  %v1767_v32 = vsel %vm716_vm0, %v8664_v28, 0 }
  0x14   : > { %985 = vmatpush.bf16.msrb.mxu2 %v976_v6  ;;  %1257 = vmatpush.bf16.msrb.mxu0 %v1248_v9  ;;  %s8448_s23 = sshll.u32 %s552_s22, 2  ;;  %v1577_v19 = vsel %vm716_vm0, %v8611_v17, 0  ;;  %v1900_v33 = vsel %vm716_vm0, %v8663_v29, 0  ;;  %vm915_vm2 = vsmask.f32 7424  ;;  %vm2020_vm6 = vcmask 1045504  }
  0x15   : > { %1109 = vmatpush.bf16.msrb.mxu3 %v1100_v7  ;;  %1348 = vmatpush.bf16.msrb.mxu1 %v1339_v11  ;;  %s10345_s26 = scalar_lea.vmem %s12924_s3, %s8448_s23  ;;  %s10354_s29 = scalar_lea.vmem %s12921_s0, %s8448_s23  ;;  %vm1697_vm5 = vsmask.f32 6400  ;;  %vm2497_vm7 = vsmask.f32 5376  ;;  %vm2820_vm8 = vcmask 1044480  }
  0x16   : > { %v9866_v12 = vld [vmem:[%s10345_s26] sm:$0xff]  ;;  %v9869_v13 = vld [vmem:[%s10345_s26 + $0x18] sm:$0xff]  ;;  %v9867_v20 = vld [vmem:[%s10345_s26 + $0x8] sm:$0xff]  ;;  %s12989_s20 = smov (!%p10943_p7, %s555_s20), 9  ;;  %s12991_s24 = smov (!%p11654_p8, %s566_s24), 9 }
  0x17   : > { %8477 = vmatmul.msk.bf16.vlgmr.msra.gmra.mxu0 %vm700_vm1, %v9866_v12  ;;  %8480 = vmatmul.msk.bf16.vlgmr.msra.gmra.mxu2 %vm700_vm1, %v9869_v13  ;;  %v9861_v14 = vld [vmem:[%s10354_s29] sm:$0xff]  ;;  %v9864_v15 = vld [vmem:[%s10354_s29 + $0x18] sm:$0xff]  ;;  %v9862_v23 = vld [vmem:[%s10354_s29 + $0x8] sm:$0xff]  ;;  %s10135_s27 = smul.u32 14, %s12989_s20  ;;  %s12993_s13 = smov (!%p610_p9, %s10203_s13), 7 }
  0x18   : > { %8502 = vmatmul.msk.bf16.vlgmr.msra.gmra.mxu1 %vm700_vm1, %v9861_v14  ;;  %8505 = vmatmul.msk.bf16.vlgmr.msra.gmra.mxu3 %vm700_vm1, %v9864_v15  ;;  %v9870_v21 = vld [vmem:[%s10345_s26 + $0x20] sm:$0xff]  ;;  %v9877_v26 = vld [vmem:[%s10345_s26 + $0x8] sm:$0xff]  ;;  %v9868_v42 = vld [vmem:[%s10345_s26 + $0x10] sm:$0xff]  ;;  %s10136_s12 = smul.u32 14, %s12991_s24  ;;  %s8455_s22 = sshll.u32 %s12987_s14, 3 }
  0x19   : > { %1495 = vmatpush.bf16.msra.mxu2 %v1486_v18  ;;  %1586 = vmatpush.bf16.msra.mxu3 %v1577_v19  ;;  %v9876_v22 = vld [vmem:[%s10345_s26] sm:$0xff]  ;;  %v9872_v30 = vld [vmem:[%s10354_s29 + $0x8] sm:$0xff]  ;;  %v924_v36 = vshll.u32 %v9877_v26, 16  ;;  %v9863_v46 = vld [vmem:[%s10354_s29 + $0x10] sm:$0xff]  ;;  %v928_v51 = vshrl.u32 %v9877_v26, 16 }
  0x1a   : > { %v9865_v24 = vld [vmem:[%s10354_s29 + $0x20] sm:$0xff]  ;;  %v919_v27 = vshll.u32 %v9876_v22, 16  ;;  %v917_v34 = vshrl.u32 %v9876_v22, 16  ;;  %1776 = vmatpush.bf16.msra.mxu0 %v1767_v32  ;;  %1909 = vmatpush.bf16.msra.mxu1 %v1900_v33  ;;  %v1048_v39 = vshll.u32 %v9872_v30, 16  ;;  %v9878_v48 = vld [vmem:[%s10345_s26 + $0x10] sm:$0xff]  ;;  %v9887_v54 = vld [vmem:[%s10345_s26 + $0x8] sm:$0xff] }
  0x1b   : > { %v9871_v25 = vld [vmem:[%s10354_s29] sm:$0xff]  ;;  %v926_v41 = vrot.slane %v924_v36, 1  ;;  %v9873_v52 = vld [vmem:[%s10354_s29 + $0x10] sm:$0xff]  ;;  %v932_v53 = vshll.u32 %v9878_v48, 16  ;;  %v1052_v58 = vshrl.u32 %v9872_v30, 16  ;;  %v9882_v60 = vld [vmem:[%s10354_s29 + $0x8] sm:$0xff] }
  0x1c   : > { %v1043_v31 = vshll.u32 %v9871_v25, 16  ;;  %v921_v35 = vrot.slane %v919_v27, 1  ;;  %v1041_v37 = vshrl.u32 %v9871_v25, 16  ;;  %v1050_v44 = vrot.slane %v1048_v39, 1  ;;  %v8563_v49 = vld [vmem:[%s10345_s26] sm:$0xe] }
  0x1d   : > { %v9886_v50 = vld [vmem:[%s10345_s26] sm:$0xf0]  ;;  %v8588_v56 = vld [vmem:[%s10354_s29] sm:$0xe]  ;;  %v1056_v59 = vshll.u32 %v9873_v52, 16  ;;  %v930_v62 = vor.u32 %v928_v51, %v926_v41  ;;  %v934_v63 = vrot.slane %v932_v53, 1 }
  0x1e   : > { %v1045_v38 = vrot.slane %v1043_v31, 1  ;;  %v922_v40 = vor.u32 %v921_v35, %v917_v34  ;;  %v8564_v55 = vor.u32 %v9886_v50, %v8563_v49  ;;  %v9881_v57 = vld [vmem:[%s10354_s29] sm:$0xf0]  ;;  %v1222_v1 = vrot.slane %v9887_v54, 1  ;;  %v9879_v10 = vld [vmem:[%s10345_s26 + $0x18] sm:$0xff]  ;;  %v9888_v14 = vld [vmem:[%s10345_s26 + $0x10] sm:$0xff] }
  0x1f   : > { %v8589_v61 = vor.u32 %v9881_v57, %v8588_v56  ;;  %v1054_v2 = vor.u32 %v1052_v58, %v1050_v44  ;;  %v1058_v3 = vrot.slane %v1056_v59, 1  ;;  %v1313_v5 = vrot.slane %v9882_v60, 1  ;;  %v9874_v11 = vld [vmem:[%s10354_s29 + $0x18] sm:$0xff]  ;;  %v9883_v17 = vld [vmem:[%s10354_s29 + $0x10] sm:$0xff]  ;;  %v9880_v28 = vld [vmem:[%s10345_s26 + $0x20] sm:$0xff] }
  0x20   : > { %v1046_v43 = vor.u32 %v1045_v38, %v1041_v37  ;;  %v927_v45 = vsel %vm915_vm2, %v922_v40, %v926_v41  ;;  %v1221_v0 = vrot.slane %v8564_v55, 1  ;;  %v935_v6 = vsel %vm915_vm2, %v930_v62, %v934_v63  ;;  %v9875_v29 = vld [vmem:[%s10354_s29 + $0x20] sm:$0xff]  ;;  %v9889_v32 = vld [vmem:[%s10345_s26 + $0x18] sm:$0xff]  ;;  %v872_v39 = vld [vmem:[%s10345_s26 + $0x28] sm:$0x1] }
  0x21   : > { %v1312_v4 = vrot.slane %v8589_v61, 1  ;;  %v1059_v8 = vsel %vm915_vm2, %v1054_v2, %v1058_v3  ;;  %v936_v12 = vshrl.u32 %v9878_v48, 16  ;;  %v940_v13 = vshll.u32 %v9879_v10, 16  ;;  %v9884_v35 = vld [vmem:[%s10354_s29 + $0x18] sm:$0xff]  ;;  %v8716_v51 = vld [vmem:[%s12928_s7 + $0x14] sm:$0xf] }
  0x22   : > { %v1051_v47 = vsel %vm915_vm2, %v1046_v43, %v1050_v44  ;;  %v1223_v7 = vsel %vm1220_vm3, %v1221_v0, %v1222_v1  ;;  %v1060_v15 = vshrl.u32 %v9873_v52, 16  ;;  %v1064_v16 = vshll.u32 %v9874_v11, 16  ;;  %v8715_v52 = vld [vmem:[%s12927_s6 + $0x14] sm:$0xf]  ;;  %v9890_v58 = vld [vmem:[%s10345_s26 + $0x20] sm:$0xff] }
  0x23   : > { %v1314_v9 = vsel %vm1220_vm3, %v1312_v4, %v1313_v5  ;;  %v938_v18 = vor.u32 %v936_v12, %v934_v63  ;;  %v942_v19 = vrot.slane %v940_v13, 1  ;;  %v944_v30 = vshrl.u32 %v9879_v10, 16  ;;  %v10448_v61 = vld [vmem:[%s10354_s29 + $0x20] sm:$0xff]  ;;  %v9896_v13 = vld [vmem:[%s10345_s26 + $0x4] sm:$0xf0] }
  0x24   : > { %v1066_v22 = vrot.slane %v1064_v16, 1  ;;  %v948_v31 = vshll.u32 %v9880_v28, 16  ;;  %v1068_v33 = vshrl.u32 %v9874_v11, 16  ;;  %v1072_v34 = vshll.u32 %v9875_v29, 16  ;;  %v1166_v11 = vld [vmem:[%s10354_s29 + $0x28] sm:$0x1] }
  0x25   : > { %v946_v36 = vor.u32 %v944_v30, %v942_v19  ;;  %v1226_v38 = vrot.slane %v9889_v32, 1  ;;  %v2048_v54 = vsel %vm716_vm0, %v8716_v51, 0  ;;  %v2139_v55 = vsel %vm716_vm0, %v8715_v52, 0  ;;  %v8615_v12 = vld [vmem:[%s10345_s26 + $0x4] sm:$0xe] }
  0x26   : > { %v950_v37 = vrot.slane %v948_v31, 1  ;;  %v1070_v40 = vor.u32 %v1068_v33, %v1066_v22  ;;  %v1074_v41 = vrot.slane %v1072_v34, 1  ;;  %v952_v56 = vshrl.u32 %v9880_v28, 16  ;;  %v8640_v16 = vld [vmem:[%s10354_s29 + $0x4] sm:$0xe] }
  0x27   : > { %8478 = vmatmul.msk.bf16.gmra.mxu0 %vm700_vm1, %v9867_v20  ;;  %8481 = vmatmul.msk.bf16.gmra.mxu2 %vm700_vm1, %v9870_v21  ;;  %v1224_v20 = vrot.slane %v9888_v14, 1  ;;  %v1062_v21 = vor.u32 %v1060_v15, %v1058_v3  ;;  %v1076_v59 = vshrl.u32 %v9875_v29, 16  ;;  %v1228_v0 = vrot.slane %v9890_v58, 1  ;;  %v10473_v15 = vld [vmem:[%s10345_s26 + $0xc] sm:$0xff]  ;;  %v8667_v30 = vld [vmem:[%s10345_s26 + $0x4] sm:$0xe] }
  0x28   : > { %8503 = vmatmul.msk.bf16.gmra.mxu1 %vm700_vm1, %v9862_v23  ;;  %8506 = vmatmul.msk.bf16.gmra.mxu3 %vm700_vm1, %v9865_v24  ;;  %v1315_v23 = vrot.slane %v9883_v17, 1  ;;  %v943_v24 = vsel %vm915_vm2, %v938_v18, %v942_v19  ;;  %v951_v43 = vsel %vm915_vm2, %v946_v36, %v950_v37  ;;  %v954_v62 = vor.u32 %v952_v56, %v950_v37  ;;  %v9891_v19 = vld [vmem:[%s10354_s29 + $0x4] sm:$0xf0]  ;;  %v9907_v37 = vld [vmem:[%s10345_s26 + $0xc] sm:$0xff]  ;;  %v10506_v58 = vld [vmem:[%s10354_s29 + $0x14] sm:$0xff] }
  0x29   : > { %v1225_v25 = vsel %vm1220_vm3, %v1222_v1, %v1224_v20  ;;  %v1067_v26 = vsel %vm915_vm2, %v1062_v21, %v1066_v22  ;;  %v1227_v44 = vsel %vm1220_vm3, %v1224_v20, %v1226_v38  ;;  %v10221_v1 = vmov 0.0   ;;  %v8768_v20 = vld [vmem:[%s12928_s7 + $0x18] sm:$0xf]  ;;  %v9906_v31 = vld [vmem:[%s10345_s26 + $0x4] sm:$0xf0] }
  0x2a   : > { %v1316_v27 = vsel %vm1220_vm3, %v1313_v5, %v1315_v23  ;;  %633 = vst.msk [vmem:[#allocation2] sm:$0xff] %vm632_vm4, %v10221_v1  ;;  %v1078_v2 = vor.u32 %v1076_v59, %v1074_v41  ;;  %v1319_v4 = vrot.slane %v10448_v61, 1  ;;  %v1305_v14 = vunpack.c.l.b16 %v1166_v11  ;;  %v8767_v21 = vld [vmem:[%s12927_s6 + $0x18] sm:$0xf] }
  0x2b   : > { %634 = vst.msk [vmem:[#allocation2 + $0x8] sm:$0xff] %vm632_vm4, %v10221_v1  ;;  %v8616_v18 = vor.u32 %v9896_v13, %v8615_v12  ;;  %v2286_v22 = vsel %vm716_vm0, %v8768_v20, 0  ;;  %v1460_v29 = vrot.slane %v10473_v15, 1  ;;  %v9903_v13 = vld [vmem:[%s10354_s29 + $0x14] sm:$0xff] }
  0x2c   : > { %635 = vst.msk [vmem:[#allocation2 + $0x10] sm:$0xff] %vm632_vm4, %v10221_v1  ;;  %v1852_v20 = vshll.u32 %v9903_v13, 16 }
  0x2d   : > { %636 = vst.msk [vmem:[#allocation2 + $0x18] sm:$0xff] %vm632_vm4, %v10221_v1  ;;  %v1459_v28 = vrot.slane %v8616_v18, 1 }
  0x2e   : > { %637 = vst.msk [vmem:[#allocation2 + $0x20] sm:$0xff] %vm632_vm4, %v10221_v1 }
  0x2f   : > { %638 = vst.msk [vmem:[#allocation2 + $0x28] sm:$0xff] %vm632_vm4, %v10221_v1  ;;  %v1461_v36 = vsel %vm1220_vm3, %v1459_v28, %v1460_v29 }
  0x30   : > { %639 = vst.msk [vmem:[#allocation2 + $0x30] sm:$0xff] %vm632_vm4, %v10221_v1 }
  0x31   : > { %640 = vst.msk [vmem:[#allocation2 + $0x38] sm:$0xff] %vm632_vm4, %v10221_v1 }
  0x32   : > { %641 = vst.msk [vmem:[#allocation2 + $0x40] sm:$0xff] %vm632_vm4, %v10221_v1  ;;  %v664_v28 = vld [vmem:[#allocation2 + $0x8] sm:$0xff] }
  0x33   : > { %642 = vst.msk [vmem:[#allocation2 + $0x48] sm:$0xff] %vm632_vm4, %v10221_v1 }
  0x37   : > { %8479 = vmatmul.msk.bf16.gmra.mxu0 %vm700_vm1, %v9868_v42  ;;  %8529 = vmatmul.msk.bf16.vlgmr.msrb.gmra.mxu2 %vm700_vm1, %v927_v45  ;;  %v1317_v42 = vrot.slane %v9884_v35, 1  ;;  %v908_v45 = vunpack.c.l.b16 %v872_v39  ;;  %v8692_v39 = vld [vmem:[%s10354_s29 + $0x4] sm:$0xe] }
  0x38   : > { %8504 = vmatmul.msk.bf16.gmra.mxu1 %vm700_vm1, %v9863_v46  ;;  %8554 = vmatmul.msk.bf16.vlgmr.msrb.gmra.mxu3 %vm700_vm1, %v1051_v47  ;;  %v861_v46 = vld [vmem:[%s10354_s29 + $0x28] sm:$0x1]  ;;  %v1075_v47 = vsel %vm915_vm2, %v1070_v40, %v1074_v41 }
  0x39   : > { %v1318_v48 = vsel %vm1220_vm3, %v1315_v23, %v1317_v42  ;;  %v1033_v49 = vunpack.c.l.b16 %v861_v46  ;;  %v914_v50 = vpack.c.b16 %v908_v45, %v908_v45  ;;  %2057 = vmatpush.bf16.msrb.mxu2 %v2048_v54  ;;  %2148 = vmatpush.bf16.msrb.mxu3 %v2139_v55  ;;  %v2377_v23 = vsel %vm716_vm0, %v8767_v21, 0  ;;  %v9901_v40 = vld [vmem:[%s10354_s29 + $0x4] sm:$0xf0] }
  0x3b   : > { %v1039_v53 = vpack.c.b16 %v1033_v49, %v1033_v49  ;;  %v956_v57 = vshll.u32 %v914_v50, 16 }
  0x3d   : > { %v1080_v60 = vshll.u32 %v1039_v53, 16  ;;  %v958_v63 = vrot.slane %v956_v57, 1  ;;  %v10503_v53 = vld [vmem:[%s10345_s26 + $0x14] sm:$0xff] }
  0x3f   : > { %v1082_v3 = vrot.slane %v1080_v60, 1  ;;  %v959_v5 = vsel %vm915_vm2, %v954_v62, %v958_v63  ;;  %v1462_v63 = vrot.slane %v10503_v53, 1 }
  0x47   : > { %8530 = vmatmul.msk.bf16.gmra.mxu2 %vm700_vm1, %v935_v6  ;;  %8581 = vmatmul.msk.bf16.vlgmr.msrb.gmra.mxu0 %vm700_vm1, %v1223_v7  ;;  %v1229_v6 = vsel %vm1220_vm3, %v1226_v38, %v1228_v0  ;;  %v1177_v7 = vld [vmem:[%s10345_s26 + $0x28] sm:$0x1]  ;;  %v8668_v38 = vor.u32 %v9906_v31, %v8667_v30  ;;  %v10525_v30 = vld [vmem:[%s10354_s29 + $0x1c] sm:$0xff] }
  0x48   : > { %8555 = vmatmul.msk.bf16.gmra.mxu3 %vm700_vm1, %v1059_v8  ;;  %8606 = vmatmul.msk.bf16.vlgmr.msrb.gmra.mxu1 %vm700_vm1, %v1314_v9  ;;  %v1083_v8 = vsel %vm915_vm2, %v1078_v2, %v1082_v3  ;;  %v1320_v9 = vsel %vm1220_vm3, %v1317_v42, %v1319_v4  ;;  %v1213_v10 = vunpack.c.l.b16 %v1177_v7  ;;  %v1553_v2 = vrot.slane %v10506_v58, 1 }
  0x49   : > { %2295 = vmatpush.bf16.msrb.mxu0 %v2286_v22  ;;  %2386 = vmatpush.bf16.msrb.mxu1 %v2377_v23  ;;  %v1699_v45 = vshrl.u32 %v8668_v38, 16  ;;  %v1702_v46 = vshll.u32 %v8668_v38, 16  ;;  %v10522_v22 = vld [vmem:[%s10345_s26 + $0x1c] sm:$0xff] }
  0x4a   : > { %v1219_v17 = vpack.c.b16 %v1213_v10, %v1213_v10 }
  0x4b   : > { %v1701_v54 = vrot.slane %v1699_v45, 1  ;;  %v1704_v55 = vrot.slane %v1702_v46, 2  ;;  %v670_v45 = vld [vmem:[#allocation2 + $0x38] sm:$0xff] }
  0x57   : > { %8531 = vmatmul.msk.bf16.gmra.mxu2 %vm700_vm1, %v943_v24  ;;  %8582 = vmatmul.msk.bf16.gmra.mxu0 %vm700_vm1, %v1225_v25  ;;  %v1311_v24 = vpack.c.b16 %v1305_v14, %v1305_v14  ;;  %v9892_v25 = vld [vmem:[%s10354_s29 + $0xc] sm:$0xff] }
  0x58   : > { %8556 = vmatmul.msk.bf16.gmra.mxu3 %vm700_vm1, %v1067_v26  ;;  %8607 = vmatmul.msk.bf16.gmra.mxu1 %vm700_vm1, %v1316_v27  ;;  %v8641_v26 = vor.u32 %v9891_v19, %v8640_v16  ;;  %v1230_v27 = vrot.slane %v1219_v17, 1  ;;  %v1551_v34 = vrot.slane %v9892_v25, 1  ;;  %v1849_v19 = vshrl.u32 %v9903_v13, 16  ;;  %v669_v25 = vld [vmem:[#allocation2 + $0x30] sm:$0xff] }
  0x59   : > { %v1321_v32 = vrot.slane %v1311_v24, 1 }
  0x5a   : > { %v1550_v33 = vrot.slane %v8641_v26, 1  ;;  %v1231_v35 = vsel %vm1220_vm3, %v1228_v0, %v1230_v27  ;;  %v1705_v0 = vor.u32 %v1704_v55, %v1701_v54  ;;  %v1554_v11 = vsel %vm1220_vm3, %v1551_v34, %v1553_v2 }
  0x5b   : > { %v1322_v41 = vsel %vm1220_vm3, %v1319_v4, %v1321_v32  ;;  %v1851_v31 = vrot.slane %v1849_v19, 1  ;;  %v1854_v32 = vrot.slane %v1852_v20, 2 }
  0x5c   : > { %v1552_v42 = vsel %vm1220_vm3, %v1550_v33, %v1551_v34 }
  0x67   : > { %8532 = vmatmul.msk.bf16.gmra.mxu2 %vm700_vm1, %v951_v43  ;;  %8583 = vmatmul.msk.bf16.gmra.mxu0 %vm700_vm1, %v1227_v44  ;;  %v9902_v43 = vld [vmem:[%s10354_s29 + $0xc] sm:$0xff]  ;;  %v8693_v44 = vor.u32 %v9901_v40, %v8692_v39  ;;  %v1555_v39 = vrot.slane %v10525_v30, 1  ;;  %v10530_v40 = vor.u32 %v1854_v32, %v1851_v31  ;;  %v9905_v31 = vld [vmem:[%s10354_s29 + $0x24] sm:$0xff] }
  0x68   : > { %8557 = vmatmul.msk.bf16.gmra.mxu3 %vm700_vm1, %v1075_v47  ;;  %8608 = vmatmul.msk.bf16.gmra.mxu1 %vm700_vm1, %v1318_v48  ;;  %v1707_v47 = vshrl.u32 %v9907_v37, 16  ;;  %v1710_v48 = vshll.u32 %v9907_v37, 16  ;;  %v1840_v51 = vshrl.u32 %v9902_v43, 16  ;;  %v1843_v52 = vshll.u32 %v9902_v43, 16 }
  0x69   : > { %v1832_v49 = vshrl.u32 %v8693_v44, 16  ;;  %v1835_v50 = vshll.u32 %v8693_v44, 16  ;;  %v9909_v44 = vld [vmem:[%s10345_s26 + $0x1c] sm:$0xff] }
  0x6a   : > { %v1709_v56 = vrot.slane %v1707_v47, 1  ;;  %v1712_v57 = vrot.slane %v1710_v48, 2  ;;  %v1842_v61 = vrot.slane %v1840_v51, 1  ;;  %v1845_v62 = vrot.slane %v1843_v52, 2  ;;  %v665_v48 = vld [vmem:[#allocation2 + $0x10] sm:$0xff]  ;;  %v9904_v52 = vld [vmem:[%s10354_s29 + $0x1c] sm:$0xff] }
  0x6b   : > { %v1834_v59 = vrot.slane %v1832_v49, 1  ;;  %v1837_v60 = vrot.slane %v1835_v50, 2  ;;  %v1556_v50 = vsel %vm1220_vm3, %v1553_v2, %v1555_v39  ;;  %v1725_v55 = vshrl.u32 %v9909_v44, 16 }
  0x6c   : > { %v1713_v1 = vor.u32 %v1712_v57, %v1709_v56  ;;  %v1846_v4 = vor.u32 %v1845_v62, %v1842_v61  ;;  %v1728_v56 = vshll.u32 %v9909_v44, 16  ;;  %v10549_v62 = vld [vmem:[%s10345_s26 + $0x24] sm:$0xff] }
  0x6d   : > { %v1838_v3 = vor.u32 %v1837_v60, %v1834_v59  ;;  %v1858_v59 = vshrl.u32 %v9904_v52, 16  ;;  %v1861_v60 = vshll.u32 %v9904_v52, 16 }
  0x6e   : > { %v1714_v7 = vsel %vm1697_vm5, %v1705_v0, %v1713_v1  ;;  %v1856_v51 = vsel %vm1697_vm5, %v1846_v4, %v10530_v40  ;;  %v1730_v0 = vrot.slane %v1728_v56, 2 }
  0x6f   : > { %v1847_v12 = vsel %vm1697_vm5, %v1838_v3, %v1846_v4  ;;  %v666_v4 = vld [vmem:[#allocation2 + $0x18] sm:$0xff] }
  0x77   : > { %8533 = vmatmul.msk.bf16.gmra.mxu2 %vm700_vm1, %v959_v5  ;;  %8584 = vmatmul.msk.bf16.gmra.mxu0 %vm700_vm1, %v1229_v6  ;;  %v1463_v6 = vsel %vm1220_vm3, %v1460_v29, %v1462_v63 }
  0x78   : > { %8558 = vmatmul.msk.bf16.gmra.mxu3 %vm700_vm1, %v1083_v8  ;;  %8609 = vmatmul.msk.bf16.gmra.mxu1 %vm700_vm1, %v1320_v9  ;;  %v9908_v8 = vld [vmem:[%s10345_s26 + $0x14] sm:$0xff]  ;;  %v663_v9 = vld [vmem:[#allocation2] sm:$0xff] }
  0x79   : > { %v1716_v15 = vshrl.u32 %v9908_v8, 16  ;;  %v1719_v16 = vshll.u32 %v9908_v8, 16  ;;  %v1863_v8 = vrot.slane %v1861_v60, 2 }
  0x7b   : > { %v1718_v23 = vrot.slane %v1716_v15, 1  ;;  %v1721_v24 = vrot.slane %v1719_v16, 2 }
  0x87   : > { %8585 = vmatmul.msk.bf16.gmra.mxu0 %vm700_vm1, %v1231_v35  ;;  %8633 = vmatmul.msk.bf16.vlgmr.msra.gmra.mxu2 %vm700_vm1, %v1461_v36  ;;  %v1464_v35 = vrot.slane %v10522_v22, 1  ;;  %v1722_v36 = vor.u32 %v1721_v24, %v1718_v23  ;;  %v1416_v23 = vld [vmem:[%s10345_s26 + $0x2c] sm:$0x1] }
  0x88   : > { %8610 = vmatmul.msk.bf16.gmra.mxu1 %vm700_vm1, %v1322_v41  ;;  %8658 = vmatmul.msk.bf16.vlgmr.msra.gmra.mxu3 %vm700_vm1, %v1552_v42 }
  0x89   : > { %v1465_v42 = vsel %vm1220_vm3, %v1462_v63, %v1464_v35  ;;  %v1723_v43 = vsel %vm1697_vm5, %v1713_v1, %v1722_v36  ;;  %v1727_v63 = vrot.slane %v1725_v55, 1  ;;  %v671_v1 = vld [vmem:[#allocation2 + $0x40] sm:$0xff] }
  0x94   : > { %v729_v5 = vpop.f32.mrf.mxu0 }
  0x95   : > { %v806_v10 = vpop.f32.mrf.mxu1 }
  0x96   : > { %v807_v14 = vadd.f32 %v806_v10, %v729_v5 }
  0x97   : > { %8634 = vmatmul.msk.bf16.gmra.mxu2 %vm700_vm1, %v1463_v6  ;;  %8685 = vmatmul.msk.bf16.vlgmr.msra.gmra.mxu0 %vm700_vm1, %v1714_v7  ;;  %v10552_v6 = vld [vmem:[%s10354_s29 + $0x24] sm:$0xff]  ;;  %v1860_v7 = vrot.slane %v1858_v59, 1  ;;  %v1643_v59 = vld [vmem:[%s10354_s29 + $0x2c] sm:$0x3] }
  0x98   : > { %v831_v17 = vadd.f32 %v807_v14, %v663_v9  ;;  %8659 = vmatmul.msk.bf16.gmra.mxu3 %vm700_vm1, %v1554_v11  ;;  %8710 = vmatmul.msk.bf16.vlgmr.msra.gmra.mxu1 %vm700_vm1, %v1847_v12  ;;  %v1466_v11 = vrot.slane %v10549_v62, 1  ;;  %v10555_v12 = vor.u32 %v1730_v0, %v1727_v63  ;;  %v1557_v15 = vrot.slane %v10552_v6, 1 }
  0x99   : > { %v10559_v16 = vor.u32 %v1863_v8, %v1860_v7 }
  0x9a   : > { %v744_v18 = vpop.f32.mrf.mxu2  ;;  %841 = vst.msk [vmem:[#allocation2] sm:$0xff] %vm632_vm4, %v831_v17  ;;  %v9910_v17 = vld [vmem:[%s10345_s26 + $0x24] sm:$0xff]  ;;  %v1467_v19 = vsel %vm1220_vm3, %v1464_v35, %v1466_v11  ;;  %v1732_v20 = vsel %vm1697_vm5, %v1722_v36, %v10555_v12  ;;  %v1405_v35 = vld [vmem:[%s10354_s29 + $0x2c] sm:$0x1] }
  0x9b   : > { %v821_v26 = vpop.f32.mrf.mxu3  ;;  %v1737_v36 = vshll.u32 %v9910_v17, 16 }
  0x9c   : > { %v731_v21 = vpop.f32.mrf.mxu0  ;;  %v822_v27 = vadd.f32 %v821_v26, %v744_v18 }
  0x9d   : > { %v808_v29 = vpop.f32.mrf.mxu1 }
  0x9e   : > { %v837_v33 = vadd.f32 %v822_v27, %v669_v25  ;;  %v809_v34 = vadd.f32 %v808_v29, %v731_v21  ;;  %v672_v21 = vld [vmem:[#allocation2 + $0x48] sm:$0xff]  ;;  %v667_v25 = vld [vmem:[#allocation2 + $0x20] sm:$0xff]  ;;  %v1558_v27 = vsel %vm1220_vm3, %v1555_v39, %v1557_v15  ;;  %v1734_v29 = vshrl.u32 %v9910_v17, 16 }
  0xa0   : > { %847 = vst.msk [vmem:[#allocation2 + $0x30] sm:$0xff] %vm632_vm4, %v837_v33  ;;  %v832_v37 = vadd.f32 %v809_v34, %v664_v28  ;;  %v1865_v28 = vsel %vm1697_vm5, %v10530_v40, %v10559_v16  ;;  %v1452_v34 = vunpack.c.l.b16 %v1416_v23  ;;  %v1736_v39 = vrot.slane %v1734_v29, 1  ;;  %v8744_v29 = vld [vmem:[%s10354_s29 + $0x4] sm:$0xc] }
  0xa1   : > { %v1870_v40 = vshll.u32 %v9905_v31, 16  ;;  %v873_v52 = vld [vmem:[#allocation2] sm:$0xff] }
  0xa2   : > { %v746_v38 = vpop.f32.mrf.mxu2  ;;  %842 = vst.msk [vmem:[#allocation2 + $0x8] sm:$0xff] %vm632_vm4, %v832_v37  ;;  %v1458_v44 = vpack.c.b16 %v1452_v34, %v1452_v34 }
  0xa3   : > { %v823_v46 = vpop.f32.mrf.mxu3 }
  0xa4   : > { %v734_v41 = vpop.f32.mrf.mxu0  ;;  %v824_v47 = vadd.f32 %v823_v46, %v746_v38  ;;  %v1543_v38 = vunpack.c.l.b16 %v1405_v35  ;;  %v8820_v46 = vld [vmem:[%s12928_s7 + $0x1c] sm:$0xf]  ;;  %v1468_v63 = vrot.slane %v1458_v44, 1  ;;  %v8872_v35 = vld [vmem:[%s12928_s7 + $0x20] sm:$0xf] }
  0xa5   : > { %v811_v49 = vpop.f32.mrf.mxu1 }
  0xa6   : > { %v838_v53 = vadd.f32 %v824_v47, %v670_v45  ;;  %v812_v54 = vadd.f32 %v811_v49, %v734_v41  ;;  %v1867_v41 = vshrl.u32 %v9905_v31, 16  ;;  %v1739_v45 = vrot.slane %v1737_v36, 2  ;;  %v8819_v47 = vld [vmem:[%s12927_s6 + $0x1c] sm:$0xf]  ;;  %v9911_v31 = vld [vmem:[%s10354_s29 + $0x4] sm:$0xf0] }
  0xa7   : > { %8635 = vmatmul.msk.bf16.gmra.mxu2 %vm700_vm1, %v1465_v42  ;;  %8686 = vmatmul.msk.bf16.gmra.mxu0 %vm700_vm1, %v1723_v43  ;;  %v1654_v42 = vld [vmem:[%s10345_s26 + $0x2c] sm:$0x3]  ;;  %v2567_v49 = vsel %vm716_vm0, %v8820_v46, 0  ;;  %v1549_v55 = vpack.c.b16 %v1543_v38, %v1543_v38  ;;  %v8871_v36 = vld [vmem:[%s12927_s6 + $0x20] sm:$0xf]  ;;  %v8745_v46 = vor.u32 %v9911_v31, %v8744_v29 }
  0xa8   : > { %848 = vst.msk [vmem:[#allocation2 + $0x38] sm:$0xff] %vm632_vm4, %v838_v53  ;;  %v833_v57 = vadd.f32 %v812_v54, %v665_v48  ;;  %8660 = vmatmul.msk.bf16.gmra.mxu3 %vm700_vm1, %v1556_v50  ;;  %8711 = vmatmul.msk.bf16.gmra.mxu1 %vm700_vm1, %v1856_v51  ;;  %v2700_v50 = vsel %vm716_vm0, %v8819_v47, 0  ;;  %v668_v53 = vld [vmem:[#allocation2 + $0x28] sm:$0xff]  ;;  %v1869_v56 = vrot.slane %v1867_v41, 1  ;;  %v10595_v0 = vor.u32 %v1739_v45, %v1736_v39 }
  0xa9   : > { %2576 = vmatpush.bf16.msra.mxu2 %v2567_v49  ;;  %2709 = vmatpush.bf16.msra.mxu3 %v2700_v50  ;;  %v2939_v38 = vsel %vm716_vm0, %v8871_v36, 0  ;;  %v10635_v45 = vld [vmem:[%s10354_s29 + $0xc] sm:$0xff] }
  0xaa   : > { %v749_v58 = vpop.f32.mrf.mxu2  ;;  %843 = vst.msk [vmem:[#allocation2 + $0x10] sm:$0xff] %vm632_vm4, %v833_v57  ;;  %v1872_v57 = vrot.slane %v1870_v40, 2  ;;  %2948 = vmatpush.bf16.msra.mxu1 %v2939_v38 }
  0xab   : > { %v826_v2 = vpop.f32.mrf.mxu3 }
  0xac   : > { %v736_v61 = vpop.f32.mrf.mxu0  ;;  %v827_v3 = vadd.f32 %v826_v2, %v749_v58  ;;  %v1690_v58 = vunpack.c.l.b16 %v1654_v42 }
  0xad   : > { %v813_v5 = vpop.f32.mrf.mxu1 }
  0xae   : > { %v839_v9 = vadd.f32 %v827_v3, %v671_v1  ;;  %v814_v10 = vadd.f32 %v813_v5, %v736_v61  ;;  %v1824_v3 = vunpack.c.l.b16 %v1643_v59  ;;  %v10598_v5 = vor.u32 %v1872_v57, %v1869_v56 }
  0xaf   : > { %v1696_v7 = vpack.c.b16 %v1690_v58, %v1690_v58  ;;  %v2113_v56 = vrot.slane %v10635_v45, 2 }
  0xb0   : > { %849 = vst.msk [vmem:[#allocation2 + $0x40] sm:$0xff] %vm632_vm4, %v839_v9  ;;  %v834_v13 = vadd.f32 %v814_v10, %v666_v4  ;;  %v1559_v4 = vrot.slane %v1549_v55, 1  ;;  %v1469_v9 = vsel %vm1220_vm3, %v1466_v11, %v1468_v63  ;;  %v1741_v10 = vsel %vm1697_vm5, %v10555_v12, %v10595_v0 }
  0xb1   : > { %v1830_v17 = vpack.c.b16 %v1824_v3, %v1824_v3  ;;  %v1874_v62 = vsel %vm1697_vm5, %v10559_v16, %v10598_v5  ;;  %v1743_v11 = vshrl.u32 %v1696_v7, 16  ;;  %v1746_v12 = vshll.u32 %v1696_v7, 16  ;;  %v875_v41 = vld [vmem:[#allocation2 + $0x10] sm:$0xff] }
  0xb2   : > { %v751_v14 = vpop.f32.mrf.mxu2  ;;  %844 = vst.msk [vmem:[#allocation2 + $0x18] sm:$0xff] %vm632_vm4, %v834_v13  ;;  %v2112_v55 = vrot.slane %v8745_v46, 2 }
  0xb3   : > { %v828_v22 = vpop.f32.mrf.mxu3  ;;  %v1879_v16 = vshll.u32 %v1830_v17, 16 }
  0xb4   : > { %v739_v18 = vpop.f32.mrf.mxu0  ;;  %v829_v24 = vadd.f32 %v828_v22, %v751_v14  ;;  %v2114_v3 = vsel %vm2020_vm6, %v2112_v55, %v2113_v56  ;;  %v10691_v55 = vld [vmem:[%s10354_s29 + $0x18] sm:$0xff] }
  0xb5   : > { %v816_v26 = vpop.f32.mrf.mxu1  ;;  %v1881_v44 = vrot.slane %v1879_v16, 2 }
  0xb6   : > { %v840_v32 = vadd.f32 %v829_v24, %v672_v21  ;;  %v817_v33 = vadd.f32 %v816_v26, %v739_v18  ;;  %v874_v18 = vld [vmem:[#allocation2 + $0x8] sm:$0xff]  ;;  %v8719_v24 = vld [vmem:[%s10345_s26 + $0x4] sm:$0xc]  ;;  %v1876_v26 = vshrl.u32 %v1830_v17, 16  ;;  %v10659_v17 = vld [vmem:[%s10345_s26 + $0x10] sm:$0xff] }
  0xb7   : > { %8636 = vmatmul.msk.bf16.gmra.mxu2 %vm700_vm1, %v1467_v19  ;;  %8687 = vmatmul.msk.bf16.gmra.mxu0 %vm700_vm1, %v1732_v20  ;;  %v1560_v20 = vsel %vm1220_vm3, %v1557_v15, %v1559_v4  ;;  %v2260_v16 = vrot.slane %v10659_v17, 2 }
  0xb8   : > { %850 = vst.msk [vmem:[#allocation2 + $0x48] sm:$0xff] %vm632_vm4, %v840_v32  ;;  %v835_v37 = vadd.f32 %v817_v33, %v667_v25  ;;  %8661 = vmatmul.msk.bf16.gmra.mxu3 %vm700_vm1, %v1558_v27  ;;  %8712 = vmatmul.msk.bf16.gmra.mxu1 %vm700_vm1, %v1865_v28  ;;  %v9916_v25 = vld [vmem:[%s10345_s26 + $0x4] sm:$0xf0]  ;;  %v1745_v27 = vrot.slane %v1743_v11, 1  ;;  %v1748_v28 = vrot.slane %v1746_v12, 2  ;;  %v10624_v33 = vld [vmem:[%s10345_s26 + $0xc] sm:$0xff] }
  0xb9   : > { %v8720_v34 = vor.u32 %v9916_v25, %v8719_v24  ;;  %v2022_v50 = vrot.slane %v10624_v33, 2  ;;  %v876_v63 = vld [vmem:[#allocation2 + $0x18] sm:$0xff]  ;;  %v10668_v24 = vld [vmem:[%s10354_s29 + $0x10] sm:$0xff] }
  0xba   : > { %v987_v30 = vpop.f32.mrf.mxu2  ;;  %845 = vst.msk [vmem:[#allocation2 + $0x20] sm:$0xff] %vm632_vm4, %v835_v37  ;;  %v1749_v42 = vor.u32 %v1748_v28, %v1745_v27  ;;  %v2351_v33 = vrot.slane %v10668_v24, 2 }
  0xbb   : > { %v1111_v48 = vpop.f32.mrf.mxu3  ;;  %v2021_v49 = vrot.slane %v8720_v34, 2 }
  0xbc   : > { %v741_v43 = vpop.f32.mrf.mxu0  ;;  %v1112_v51 = vadd.f32 %v1111_v48, %v987_v30  ;;  %v2848_v30 = vsel %vm716_vm0, %v8872_v35, 0  ;;  %v1750_v58 = vsel %vm1697_vm5, %v10595_v0, %v1749_v42 }
  0xbd   : > { %v818_v54 = vpop.f32.mrf.mxu1  ;;  %2857 = vmatpush.bf16.msra.mxu0 %v2848_v30  ;;  %v2023_v59 = vsel %vm2020_vm6, %v2021_v49, %v2022_v50  ;;  %v9928_v49 = vld [vmem:[%s10345_s26 + $0x18] sm:$0xff] }
  0xbe   : > { %v1136_v60 = vadd.f32 %v1112_v51, %v873_v52  ;;  %v819_v61 = vadd.f32 %v818_v54, %v741_v43  ;;  %v1878_v43 = vrot.slane %v1876_v26, 1 }
  0xc0   : > { %1146 = vst.msk [vmem:[#allocation2] sm:$0xff] %vm632_vm4, %v1136_v60  ;;  %v836_v1 = vadd.f32 %v819_v61, %v668_v53  ;;  %v1882_v54 = vor.u32 %v1881_v44, %v1878_v43 }
  0xc1   : > { %v877_v12 = vld [vmem:[#allocation2 + $0x20] sm:$0xff] }
  0xc2   : > { %v989_v2 = vpop.f32.mrf.mxu2  ;;  %846 = vst.msk [vmem:[#allocation2 + $0x28] sm:$0xff] %vm632_vm4, %v836_v1 }
  0xc3   : > { %v1113_v13 = vpop.f32.mrf.mxu3 }
  0xc4   : > { %v1259_v8 = vpop.f32.mrf.mxu0  ;;  %v1114_v14 = vadd.f32 %v1113_v13, %v989_v2  ;;  %v1883_v2 = vsel %vm1697_vm5, %v10598_v5, %v1882_v54  ;;  %v10655_v13 = vld [vmem:[%s10345_s26 + $0x14] sm:$0xff]  ;;  %v10688_v54 = vld [vmem:[%s10354_s29 + $0x1c] sm:$0xff] }
  0xc5   : > { %v1350_v19 = vpop.f32.mrf.mxu1 }
  0xc6   : > { %v1137_v21 = vadd.f32 %v1114_v14, %v874_v18  ;;  %v1351_v22 = vadd.f32 %v1350_v19, %v1259_v8  ;;  %v8771_v8 = vld [vmem:[%s10345_s26 + $0x8] sm:$0xc] }
  0xc7   : > { %8637 = vmatmul.msk.bf16.gmra.mxu2 %vm700_vm1, %v1469_v9  ;;  %8688 = vmatmul.msk.bf16.gmra.mxu0 %vm700_vm1, %v1741_v10  ;;  %v1178_v23 = vld [vmem:[#allocation2] sm:$0xff]  ;;  %v9926_v9 = vld [vmem:[%s10345_s26 + $0x8] sm:$0xf0]  ;;  %v8796_v19 = vld [vmem:[%s10354_s29 + $0x8] sm:$0xc] }
  0xc8   : > { %1147 = vst.msk [vmem:[#allocation2 + $0x8] sm:$0xff] %vm632_vm4, %v1137_v21  ;;  %v1375_v6 = vadd.f32 %v1351_v22, %v1178_v23  ;;  %8662 = vmatmul.msk.bf16.gmra.mxu3 %vm700_vm1, %v1560_v20  ;;  %8713 = vmatmul.msk.bf16.gmra.mxu1 %vm700_vm1, %v1874_v62  ;;  %v8772_v18 = vor.u32 %v9926_v9, %v8771_v8  ;;  %v9921_v20 = vld [vmem:[%s10354_s29 + $0x8] sm:$0xf0]  ;;  %v2024_v22 = vrot.slane %v10655_v13, 2  ;;  %v10665_v23 = vld [vmem:[%s10354_s29 + $0x14] sm:$0xff] }
  0xc9   : > { %v8797_v25 = vor.u32 %v9921_v20, %v8796_v19  ;;  %v2115_v31 = vrot.slane %v10665_v23, 2  ;;  %v878_v38 = vld [vmem:[#allocation2 + $0x28] sm:$0xff]  ;;  %v880_v9 = vld [vmem:[#allocation2 + $0x38] sm:$0xff]  ;;  %v881_v23 = vld [vmem:[#allocation2 + $0x40] sm:$0xff] }
  0xca   : > { %v992_v15 = vpop.f32.mrf.mxu2  ;;  %1385 = vst.msk [vmem:[#allocation2] sm:$0xff] %vm632_vm4, %v1375_v6  ;;  %v2259_v26 = vrot.slane %v8772_v18, 2  ;;  %v2025_v35 = vsel %vm2020_vm6, %v2022_v50, %v2024_v22 }
  0xcb   : > { %v1116_v37 = vpop.f32.mrf.mxu3 }
  0xcc   : > { %v1261_v32 = vpop.f32.mrf.mxu0  ;;  %v1117_v39 = vadd.f32 %v1116_v37, %v992_v15  ;;  %v2261_v36 = vsel %vm2020_vm6, %v2259_v26, %v2260_v16 }
  0xcd   : > { %v1352_v40 = vpop.f32.mrf.mxu1 }
  0xce   : > { %v1138_v47 = vadd.f32 %v1117_v39, %v875_v41  ;;  %v1353_v48 = vadd.f32 %v1352_v40, %v1261_v32  ;;  %v2350_v32 = vrot.slane %v8797_v25, 2  ;;  %v2116_v41 = vsel %vm2020_vm6, %v2113_v56, %v2115_v31  ;;  %v10714_v25 = vld [vmem:[%s10354_s29 + $0x24] sm:$0xff] }
  0xcf   : > { %v1179_v51 = vld [vmem:[#allocation2 + $0x8] sm:$0xff] }
  0xd0   : > { %1148 = vst.msk [vmem:[#allocation2 + $0x10] sm:$0xff] %vm632_vm4, %v1138_v47  ;;  %v1376_v52 = vadd.f32 %v1353_v48, %v1179_v51  ;;  %v2352_v40 = vsel %vm2020_vm6, %v2350_v32, %v2351_v33  ;;  %v9919_v48 = vld [vmem:[%s10345_s26 + $0x1c] sm:$0xff]  ;;  %v2119_v32 = vrot.slane %v10714_v25, 2 }
  0xd2   : > { %v994_v53 = vpop.f32.mrf.mxu2  ;;  %1386 = vst.msk [vmem:[#allocation2 + $0x8] sm:$0xff] %vm632_vm4, %v1376_v52  ;;  %v879_v52 = vld [vmem:[#allocation2 + $0x30] sm:$0xff] }
  0xd3   : > { %v1118_v60 = vpop.f32.mrf.mxu3 }
  0xd4   : > { %v1264_v57 = vpop.f32.mrf.mxu0  ;;  %v1119_v61 = vadd.f32 %v1118_v60, %v994_v53 }
  0xd5   : > { %v1355_v1 = vpop.f32.mrf.mxu1 }
  0xd6   : > { %v1139_v4 = vadd.f32 %v1119_v61, %v876_v63  ;;  %v1356_v0 = vadd.f32 %v1355_v1, %v1264_v57  ;;  %v2117_v1 = vrot.slane %v10688_v54, 2  ;;  %v8924_v54 = vld [vmem:[%s12928_s7 + $0x24] sm:$0xf] }
  0xd7   : > { %8689 = vmatmul.msk.bf16.gmra.mxu0 %vm700_vm1, %v1750_v58  ;;  %8737 = vmatmul.msk.bf16.vlgmr.msrb.gmra.mxu2 %vm700_vm1, %v2023_v59  ;;  %v1180_v7 = vld [vmem:[#allocation2 + $0x10] sm:$0xff]  ;;  %v2026_v58 = vrot.slane %v9919_v48, 2  ;;  %v2262_v59 = vrot.slane %v9928_v49, 2 }
  0xd8   : > { %1149 = vst.msk [vmem:[#allocation2 + $0x18] sm:$0xff] %vm632_vm4, %v1139_v4  ;;  %v1377_v10 = vadd.f32 %v1356_v0, %v1180_v7  ;;  %8714 = vmatmul.msk.bf16.gmra.mxu1 %vm700_vm1, %v1883_v2  ;;  %8762 = vmatmul.msk.bf16.vlgmr.msrb.gmra.mxu3 %vm700_vm1, %v2114_v3  ;;  %v2353_v2 = vrot.slane %v10691_v55, 2  ;;  %v8923_v55 = vld [vmem:[%s12927_s6 + $0x24] sm:$0xf] }
  0xd9   : > { %v2027_v4 = vsel %vm2020_vm6, %v2024_v22, %v2026_v58  ;;  %v2263_v0 = vsel %vm2020_vm6, %v2260_v16, %v2262_v59 }
  0xda   : > { %v997_v5 = vpop.f32.mrf.mxu2  ;;  %1387 = vst.msk [vmem:[#allocation2 + $0x10] sm:$0xff] %vm632_vm4, %v1377_v10  ;;  %v2354_v13 = vsel %vm2020_vm6, %v2351_v33, %v2353_v2 }
  0xdb   : > { %v1121_v62 = vpop.f32.mrf.mxu3 }
  0xdc   : > { %v1266_v14 = vpop.f32.mrf.mxu0  ;;  %v1122_v11 = vadd.f32 %v1121_v62, %v997_v5  ;;  %v2118_v5 = vsel %vm2020_vm6, %v2115_v31, %v2117_v1 }
  0xdd   : > { %v1357_v21 = vpop.f32.mrf.mxu1 }
  0xde   : > { %v1140_v6 = vadd.f32 %v1122_v11, %v877_v12  ;;  %v1358_v15 = vadd.f32 %v1357_v21, %v1266_v14  ;;  %v10708_v11 = vld [vmem:[%s10345_s26 + $0x24] sm:$0xff] }
  0xdf   : > { %v1181_v27 = vld [vmem:[#allocation2 + $0x18] sm:$0xff]  ;;  %v10711_v12 = vld [vmem:[%s10345_s26 + $0x20] sm:$0xff]  ;;  %v2028_v16 = vrot.slane %v10708_v11, 2 }
  0xe0   : > { %1150 = vst.msk [vmem:[#allocation2 + $0x20] sm:$0xff] %vm632_vm4, %v1140_v6  ;;  %v1378_v28 = vadd.f32 %v1358_v15, %v1181_v27  ;;  %v10717_v6 = vld [vmem:[%s10354_s29 + $0x20] sm:$0xff]  ;;  %v2264_v27 = vrot.slane %v10711_v12, 2 }
  0xe1   : > { %v2355_v33 = vrot.slane %v10717_v6, 2 }
  0xe2   : > { %v999_v29 = vpop.f32.mrf.mxu2  ;;  %1388 = vst.msk [vmem:[#allocation2 + $0x18] sm:$0xff] %vm632_vm4, %v1378_v28 }
  0xe3   : > { %v1123_v37 = vpop.f32.mrf.mxu3 }
  0xe4   : > { %v1269_v34 = vpop.f32.mrf.mxu0  ;;  %v1124_v30 = vadd.f32 %v1123_v37, %v999_v29 }
  0xe5   : > { %v1360_v39 = vpop.f32.mrf.mxu1 }
  0xe6   : > { %v1141_v42 = vadd.f32 %v1124_v30, %v878_v38  ;;  %v1361_v43 = vadd.f32 %v1360_v39, %v1269_v34  ;;  %v1977_v30 = vld [vmem:[%s10345_s26 + $0x2c] sm:$0x3] }
  0xe7   : > { %8738 = vmatmul.msk.bf16.gmra.mxu2 %vm700_vm1, %v2025_v35  ;;  %8789 = vmatmul.msk.bf16.vlgmr.msrb.gmra.mxu0 %vm700_vm1, %v2261_v36  ;;  %v1182_v44 = vld [vmem:[#allocation2 + $0x20] sm:$0xff]  ;;  %v2029_v35 = vsel %vm2020_vm6, %v2026_v58, %v2028_v16  ;;  %v2265_v36 = vsel %vm2020_vm6, %v2262_v59, %v2264_v27  ;;  %v882_v39 = vld [vmem:[#allocation2 + $0x48] sm:$0xff]  ;;  %v3147_v58 = vsel %vm716_vm0, %v8923_v55, 0 }
  0xe8   : > { %1151 = vst.msk [vmem:[#allocation2 + $0x28] sm:$0xff] %vm632_vm4, %v1141_v42  ;;  %v1379_v45 = vadd.f32 %v1361_v43, %v1182_v44  ;;  %8763 = vmatmul.msk.bf16.gmra.mxu3 %vm700_vm1, %v2116_v41  ;;  %8814 = vmatmul.msk.bf16.vlgmr.msrb.gmra.mxu1 %vm700_vm1, %v2352_v40  ;;  %v2120_v40 = vsel %vm2020_vm6, %v2117_v1, %v2119_v32  ;;  %v1417_v59 = vld [vmem:[#allocation2] sm:$0xff]  ;;  %v10757_v1 = vld [vmem:[%s10354_s29 + $0x28] sm:$0xff] }
  0xe9   : > { %v2356_v42 = vsel %vm2020_vm6, %v2353_v2, %v2355_v33  ;;  %3156 = vmatpush.bf16.msrb.mxu3 %v3147_v58  ;;  %v8823_v2 = vld [vmem:[%s10345_s26 + $0x8] sm:$0xc]  ;;  %v1419_v58 = vld [vmem:[#allocation2 + $0x10] sm:$0xff] }
  0xea   : > { %v1002_v46 = vpop.f32.mrf.mxu2  ;;  %1389 = vst.msk [vmem:[#allocation2 + $0x20] sm:$0xff] %vm632_vm4, %v1379_v45  ;;  %v2013_v45 = vunpack.c.l.b16 %v1977_v30 }
  0xeb   : > { %v1126_v50 = vpop.f32.mrf.mxu3 }
  0xec   : > { %v1271_v47 = vpop.f32.mrf.mxu0  ;;  %v1127_v51 = vadd.f32 %v1126_v50, %v1002_v46  ;;  %v1966_v46 = vld [vmem:[%s10354_s29 + $0x2c] sm:$0x3] }
  0xed   : > { %v1362_v53 = vpop.f32.mrf.mxu1  ;;  %v2105_v50 = vunpack.c.l.b16 %v1966_v46 }
  0xee   : > { %v1142_v56 = vadd.f32 %v1127_v51, %v879_v52  ;;  %v1363_v57 = vadd.f32 %v1362_v53, %v1271_v47  ;;  %v2019_v52 = vpack.c.b16 %v2013_v45, %v2013_v45  ;;  %v10746_v53 = vld [vmem:[%s10345_s26 + $0x28] sm:$0xff] }
  0xef   : > { %v1183_v60 = vld [vmem:[#allocation2 + $0x28] sm:$0xff] }
  0xf0   : > { %1152 = vst.msk [vmem:[#allocation2 + $0x30] sm:$0xff] %vm632_vm4, %v1142_v56  ;;  %v1380_v61 = vadd.f32 %v1363_v57, %v1183_v60  ;;  %v3070_v57 = vsel %vm716_vm0, %v8924_v54, 0 }
  0xf1   : > { %3079 = vmatpush.bf16.msrb.mxu2 %v3070_v57 }
  0xf2   : > { %v1004_v63 = vpop.f32.mrf.mxu2  ;;  %1390 = vst.msk [vmem:[#allocation2 + $0x28] sm:$0xff] %vm632_vm4, %v1380_v61 }
  0xf3   : > { %v1128_v7 = vpop.f32.mrf.mxu3 }
  0xf4   : > { %v1274_v3 = vpop.f32.mrf.mxu0  ;;  %v1129_v8 = vadd.f32 %v1128_v7, %v1004_v63  ;;  %v2111_v63 = vpack.c.b16 %v2105_v50, %v2105_v50  ;;  %v2030_v7 = vrot.slane %v2019_v52, 2  ;;  %v8975_v50 = vld [vmem:[%s12927_s6 + $0x28] sm:$0xf] }
  0xf5   : > { %v1365_v10 = vpop.f32.mrf.mxu1  ;;  %v3451_v54 = vsel %vm716_vm0, %v8975_v50, 0 }
  0xf6   : > { %v1143_v14 = vadd.f32 %v1129_v8, %v880_v9  ;;  %v1366_v17 = vadd.f32 %v1365_v10, %v1274_v3  ;;  %v9936_v3 = vld [vmem:[%s10345_s26 + $0x8] sm:$0xf0]  ;;  %v2266_v8 = vrot.slane %v10746_v53, 2  ;;  %3460 = vmatpush.bf16.msrb.mxu1 %v3451_v54 }
  0xf7   : > { %8739 = vmatmul.msk.bf16.gmra.mxu2 %vm700_vm1, %v2027_v4  ;;  %8790 = vmatmul.msk.bf16.gmra.mxu0 %vm700_vm1, %v2263_v0  ;;  %v1184_v18 = vld [vmem:[#allocation2 + $0x30] sm:$0xff] }
  0xf8   : > { %1153 = vst.msk [vmem:[#allocation2 + $0x38] sm:$0xff] %vm632_vm4, %v1143_v14  ;;  %v1381_v19 = vadd.f32 %v1366_v17, %v1184_v18  ;;  %8764 = vmatmul.msk.bf16.gmra.mxu3 %vm700_vm1, %v2118_v5  ;;  %8815 = vmatmul.msk.bf16.gmra.mxu1 %vm700_vm1, %v2354_v13  ;;  %v8824_v13 = vor.u32 %v9936_v3, %v8823_v2  ;;  %v8848_v14 = vld [vmem:[%s10354_s29 + $0x8] sm:$0xc]  ;;  %v9931_v17 = vld [vmem:[%s10354_s29 + $0x8] sm:$0xf0]  ;;  %v2121_v18 = vrot.slane %v2111_v63, 2 }
  0xfa   : > { %v1007_v20 = vpop.f32.mrf.mxu2  ;;  %1391 = vst.msk [vmem:[#allocation2 + $0x30] sm:$0xff] %vm632_vm4, %v1381_v19  ;;  %v2357_v19 = vrot.slane %v10757_v1, 2  ;;  %v2122_v11 = vsel %vm2020_vm6, %v2119_v32, %v2121_v18  ;;  %v9938_v18 = vld [vmem:[%s10345_s26 + $0x18] sm:$0xff] }
  0xfb   : > { %v1131_v21 = vpop.f32.mrf.mxu3 }
  0xfc   : > { %v1276_v62 = vpop.f32.mrf.mxu0  ;;  %v1132_v22 = vadd.f32 %v1131_v21, %v1007_v20  ;;  %v2216_v20 = vld [vmem:[%s10345_s26 + $0x30] sm:$0x3]  ;;  %v2358_v12 = vsel %vm2020_vm6, %v2355_v33, %v2357_v19 }
  0xfd   : > { %v1367_v24 = vpop.f32.mrf.mxu1 }
  0xfe   : > { %v1144_v15 = vadd.f32 %v1132_v22, %v881_v23  ;;  %v1368_v26 = vadd.f32 %v1367_v24, %v1276_v62  ;;  %v9937_v62 = vld [vmem:[%s10345_s26 + $0x10] sm:$0xff]  ;;  %v2031_v22 = vsel %vm2020_vm6, %v2028_v16, %v2030_v7  ;;  %v2267_v23 = vsel %vm2020_vm6, %v2264_v27, %v2266_v8 }
  0xff   : > { %v1185_v28 = vld [vmem:[#allocation2 + $0x38] sm:$0xff]  ;;  %v2502_v16 = vshll.u32 %v8824_v13, 16  ;;  %v2507_v27 = vshrl.u32 %v9937_v62, 16 }
 0x100   : > { %1154 = vst.msk [vmem:[#allocation2 + $0x40] sm:$0xff] %vm632_vm4, %v1144_v15  ;;  %v1382_v29 = vadd.f32 %v1368_v26, %v1185_v28  ;;  %v8849_v15 = vor.u32 %v9931_v17, %v8848_v14  ;;  %v2252_v28 = vunpack.c.l.b16 %v2216_v20 }
 0x102   : > { %v1009_v31 = vpop.f32.mrf.mxu2  ;;  %1392 = vst.msk [vmem:[#allocation2 + $0x38] sm:$0xff] %vm632_vm4, %v1382_v29  ;;  %v2205_v29 = vld [vmem:[%s10354_s29 + $0x30] sm:$0x3]  ;;  %v2258_v6 = vpack.c.b16 %v2252_v28, %v2252_v28  ;;  %v2635_v33 = vshll.u32 %v8849_v15, 16  ;;  %v2519_v28 = vshll.u32 %v9938_v18, 16 }
 0x103   : > { %v1133_v37 = vpop.f32.mrf.mxu3 }
 0x104   : > { %v1279_v34 = vpop.f32.mrf.mxu0  ;;  %v1134_v38 = vadd.f32 %v1133_v37, %v1009_v31  ;;  %v2499_v31 = vshrl.u32 %v8824_v13, 16 }
 0x105   : > { %v1370_v41 = vpop.f32.mrf.mxu1 }
 0x106   : > { %v1145_v43 = vadd.f32 %v1134_v38, %v882_v39  ;;  %v1371_v44 = vadd.f32 %v1370_v41, %v1279_v34  ;;  %v1418_v34 = vld [vmem:[#allocation2 + $0x8] sm:$0xff]  ;;  %v2510_v38 = vshll.u32 %v9937_v62, 16  ;;  %v2343_v41 = vunpack.c.l.b16 %v2205_v29  ;;  %v9933_v29 = vld [vmem:[%s10354_s29 + $0x18] sm:$0xff] }
 0x107   : > { %8740 = vmatmul.msk.bf16.gmra.mxu2 %vm700_vm1, %v2029_v35  ;;  %8791 = vmatmul.msk.bf16.gmra.mxu0 %vm700_vm1, %v2265_v36  ;;  %v1186_v47 = vld [vmem:[#allocation2 + $0x40] sm:$0xff]  ;;  %v9932_v36 = vld [vmem:[%s10354_s29 + $0x10] sm:$0xff] }
 0x108   : > { %1155 = vst.msk [vmem:[#allocation2 + $0x48] sm:$0xff] %vm632_vm4, %v1145_v43  ;;  %v1383_v48 = vadd.f32 %v1371_v44, %v1186_v47  ;;  %8765 = vmatmul.msk.bf16.gmra.mxu3 %vm700_vm1, %v2120_v40  ;;  %8816 = vmatmul.msk.bf16.gmra.mxu1 %vm700_vm1, %v2356_v42  ;;  %v2632_v40 = vshrl.u32 %v8849_v15, 16  ;;  %v2501_v42 = vrot.slane %v2499_v31, 2  ;;  %v2504_v43 = vrot.slane %v2502_v16, 3 }
 0x109   : > { %v2509_v44 = vrot.slane %v2507_v27, 2  ;;  %v2640_v45 = vshrl.u32 %v9932_v36, 16  ;;  %v2643_v46 = vshll.u32 %v9932_v36, 16  ;;  %v2521_v27 = vrot.slane %v2519_v28, 3 }
 0x10a   : > { %v1497_v49 = vpop.f32.mrf.mxu2  ;;  %1393 = vst.msk [vmem:[#allocation2 + $0x40] sm:$0xff] %vm632_vm4, %v1383_v48  ;;  %v2512_v48 = vrot.slane %v2510_v38, 3  ;;  %v2634_v57 = vrot.slane %v2632_v40, 2  ;;  %v2649_v36 = vshrl.u32 %v9933_v29, 16  ;;  %v10828_v38 = vld [vmem:[%s10345_s26 + $0x10] sm:$0xff] }
 0x10b   : > { %v1588_v56 = vpop.f32.mrf.mxu3  ;;  %v2642_v63 = vrot.slane %v2640_v45, 2  ;;  %v2645_v2 = vrot.slane %v2643_v46, 3  ;;  %v9941_v40 = vld [vmem:[%s10354_s29 + $0x8] sm:$0xf0]  ;;  %v10835_v45 = vld [vmem:[%s10354_s29 + $0x10] sm:$0xff]  ;;  %v2822_v50 = vrot.slane %v10828_v38, 3 }
 0x10c   : > { %v1281_v51 = vpop.f32.mrf.mxu0  ;;  %v1589_v60 = vadd.f32 %v1588_v56, %v1497_v49  ;;  %v8976_v49 = vld [vmem:[%s12928_s7 + $0x28] sm:$0xf]  ;;  %v2349_v56 = vpack.c.b16 %v2343_v41, %v2343_v41  ;;  %v10801_v7 = vor.u32 %v2512_v48, %v2509_v44 }
 0x10d   : > { %v1372_v61 = vpop.f32.mrf.mxu1  ;;  %v3327_v52 = vsel %vm716_vm0, %v8976_v49, 0  ;;  %v10804_v17 = vor.u32 %v2645_v2, %v2642_v63  ;;  %v8900_v41 = vld [vmem:[%s10354_s29 + $0x8] sm:$0x8] }
 0x10e   : > { %v1613_v4 = vadd.f32 %v1589_v60, %v1417_v59  ;;  %v1373_v0 = vadd.f32 %v1372_v61, %v1281_v51  ;;  %3336 = vmatpush.bf16.msrb.mxu0 %v3327_v52  ;;  %v2268_v60 = vrot.slane %v2258_v6, 2  ;;  %v2637_v61 = vrot.slane %v2635_v33, 3  ;;  %v1421_v6 = vld [vmem:[#allocation2 + $0x20] sm:$0xff] }
 0x10f   : > { %v1187_v9 = vld [vmem:[#allocation2 + $0x48] sm:$0xff]  ;;  %v2359_v13 = vrot.slane %v2349_v56, 2  ;;  %v8901_v46 = vor.u32 %v9941_v40, %v8900_v41 }
 0x110   : > { %1623 = vst.msk [vmem:[#allocation2] sm:$0xff] %vm632_vm4, %v1613_v4  ;;  %v1384_v10 = vadd.f32 %v1373_v0, %v1187_v9  ;;  %v2505_v0 = vor.u32 %v2504_v43, %v2501_v42  ;;  %v2638_v14 = vor.u32 %v2637_v61, %v2634_v57  ;;  %v2269_v62 = vsel %vm2020_vm6, %v2266_v8, %v2268_v60  ;;  %v9939_v61 = vld [vmem:[%s10345_s26 + $0x20] sm:$0xff]  ;;  %v9940_v41 = vld [vmem:[%s10345_s26 + $0x28] sm:$0xff] }
 0x111   : > { %v2516_v8 = vshrl.u32 %v9938_v18, 16  ;;  %v2651_v43 = vrot.slane %v2649_v36, 2  ;;  %v2912_v56 = vrot.slane %v8901_v46, 3  ;;  %v2913_v57 = vrot.slane %v10835_v45, 3 }
 0x112   : > { %v1499_v5 = vpop.f32.mrf.mxu2  ;;  %1394 = vst.msk [vmem:[#allocation2 + $0x48] sm:$0xff] %vm632_vm4, %v1384_v10  ;;  %v2647_v53 = vsel %vm2497_vm7, %v2638_v14, %v10804_v17  ;;  %v2528_v14 = vshll.u32 %v9939_v61, 16 }
 0x113   : > { %v1590_v24 = vpop.f32.mrf.mxu3  ;;  %v2518_v16 = vrot.slane %v2516_v8, 2  ;;  %v1423_v8 = vld [vmem:[#allocation2 + $0x30] sm:$0xff] }
 0x114   : > { %v1778_v21 = vpop.f32.mrf.mxu0  ;;  %v1591_v26 = vadd.f32 %v1590_v24, %v1499_v5  ;;  %v1420_v24 = vld [vmem:[#allocation2 + $0x18] sm:$0xff] }
 0x115   : > { %v1911_v35 = vpop.f32.mrf.mxu1  ;;  %v10832_v33 = vor.u32 %v2521_v27, %v2518_v16 }
 0x116   : > { %v1614_v37 = vadd.f32 %v1591_v26, %v1418_v34  ;;  %v1912_v30 = vadd.f32 %v1911_v35, %v1778_v21  ;;  %v2514_v21 = vsel %vm2497_vm7, %v2505_v0, %v10801_v7  ;;  %v2360_v26 = vsel %vm2020_vm6, %v2357_v19, %v2359_v13 }
 0x117   : > { %8741 = vmatmul.msk.bf16.gmra.mxu2 %vm700_vm1, %v2031_v22  ;;  %8792 = vmatmul.msk.bf16.gmra.mxu0 %vm700_vm1, %v2267_v23  ;;  %v1655_v39 = vld [vmem:[#allocation2] sm:$0xff]  ;;  %v2525_v13 = vshrl.u32 %v9939_v61, 16 }
 0x118   : > { %1624 = vst.msk [vmem:[#allocation2 + $0x8] sm:$0xff] %vm632_vm4, %v1614_v37  ;;  %v1936_v25 = vadd.f32 %v1912_v30, %v1655_v39  ;;  %8766 = vmatmul.msk.bf16.gmra.mxu3 %vm700_vm1, %v2122_v11  ;;  %8817 = vmatmul.msk.bf16.gmra.mxu1 %vm700_vm1, %v2358_v12  ;;  %v8875_v11 = vld [vmem:[%s10345_s26 + $0x8] sm:$0x8]  ;;  %v9946_v12 = vld [vmem:[%s10345_s26 + $0x8] sm:$0xf0]  ;;  %v2652_v37 = vshll.u32 %v9933_v29, 16 }
 0x119   : > { %v8876_v39 = vor.u32 %v9946_v12, %v8875_v11 }
 0x11a   : > { %v1502_v32 = vpop.f32.mrf.mxu2  ;;  %1946 = vst.msk [vmem:[#allocation2] sm:$0xff] %vm632_vm4, %v1936_v25  ;;  %v2654_v44 = vrot.slane %v2652_v37, 3 }
 0x11b   : > { %v1593_v51 = vpop.f32.mrf.mxu3  ;;  %v2821_v49 = vrot.slane %v8876_v39, 3 }
 0x11c   : > { %v1780_v47 = vpop.f32.mrf.mxu0  ;;  %v1594_v55 = vadd.f32 %v1593_v51, %v1502_v32 }
 0x11d   : > { %v1913_v59 = vpop.f32.mrf.mxu1  ;;  %v2823_v60 = vsel %vm2820_vm8, %v2821_v49, %v2822_v50 }
 0x11e   : > { %v1615_v3 = vadd.f32 %v1594_v55, %v1419_v58  ;;  %v1914_v4 = vadd.f32 %v1913_v59, %v1780_v47  ;;  %v10839_v55 = vor.u32 %v2654_v44, %v2651_v43  ;;  %v2523_v59 = vsel %vm2497_vm7, %v10801_v7, %v10832_v33  ;;  %v9934_v7 = vld [vmem:[%s10354_s29 + $0x20] sm:$0xff] }
 0x11f   : > { %v1656_v9 = vld [vmem:[#allocation2 + $0x8] sm:$0xff] }
 0x120   : > { %1625 = vst.msk [vmem:[#allocation2 + $0x10] sm:$0xff] %vm632_vm4, %v1615_v3  ;;  %v1937_v10 = vadd.f32 %v1914_v4, %v1656_v9  ;;  %v1422_v3 = vld [vmem:[#allocation2 + $0x28] sm:$0xff]  ;;  %v2656_v0 = vsel %vm2497_vm7, %v10804_v17, %v10839_v55  ;;  %v2914_v9 = vsel %vm2820_vm8, %v2912_v56, %v2913_v57 }
 0x122   : > { %v1504_v5 = vpop.f32.mrf.mxu2  ;;  %1947 = vst.msk [vmem:[#allocation2 + $0x8] sm:$0xff] %vm632_vm4, %v1937_v10 }
 0x123   : > { %v1595_v22 = vpop.f32.mrf.mxu3 }
 0x124   : > { %v1783_v20 = vpop.f32.mrf.mxu0  ;;  %v1596_v23 = vadd.f32 %v1595_v22, %v1504_v5 }
 0x125   : > { %v1916_v15 = vpop.f32.mrf.mxu1 }
 0x126   : > { %v1616_v31 = vadd.f32 %v1596_v23, %v1420_v24  ;;  %v1917_v34 = vadd.f32 %v1916_v15, %v1783_v20  ;;  %v2527_v23 = vrot.slane %v2525_v13, 2  ;;  %v2530_v24 = vrot.slane %v2528_v14, 3  ;;  %v10862_v15 = vld [vmem:[%s10345_s26 + $0x18] sm:$0xff]  ;;  %v2443_v13 = vld [vmem:[%s10354_s29 + $0x30] sm:$0x7] }
 0x127   : > { %8793 = vmatmul.msk.bf16.gmra.mxu0 %vm700_vm1, %v2269_v62  ;;  %8841 = vmatmul.msk.bf16.vlgmr.msra.gmra.mxu2 %vm700_vm1, %v2514_v21  ;;  %v1657_v35 = vld [vmem:[#allocation2 + $0x10] sm:$0xff]  ;;  %v2658_v62 = vshrl.u32 %v9934_v7, 16  ;;  %v2661_v21 = vshll.u32 %v9934_v7, 16 }
 0x128   : > { %1626 = vst.msk [vmem:[#allocation2 + $0x18] sm:$0xff] %vm632_vm4, %v1616_v31  ;;  %v1938_v1 = vadd.f32 %v1917_v34, %v1657_v35  ;;  %8818 = vmatmul.msk.bf16.gmra.mxu1 %vm700_vm1, %v2360_v26  ;;  %8866 = vmatmul.msk.bf16.vlgmr.msra.gmra.mxu3 %vm700_vm1, %v2647_v53  ;;  %v10865_v34 = vld [vmem:[%s10354_s29 + $0x18] sm:$0xff]  ;;  %v10867_v12 = vor.u32 %v2530_v24, %v2527_v23 }
 0x129   : > { %v2660_v29 = vrot.slane %v2658_v62, 2  ;;  %v2663_v31 = vrot.slane %v2661_v21, 3  ;;  %v2915_v37 = vrot.slane %v10865_v34, 3 }
 0x12a   : > { %v1507_v19 = vpop.f32.mrf.mxu2  ;;  %1948 = vst.msk [vmem:[#allocation2 + $0x10] sm:$0xff] %vm632_vm4, %v1938_v1  ;;  %v2824_v1 = vrot.slane %v10862_v15, 3  ;;  %v2532_v38 = vsel %vm2497_vm7, %v10832_v33, %v10867_v12 }
 0x12b   : > { %v1598_v25 = vpop.f32.mrf.mxu3  ;;  %v2664_v36 = vor.u32 %v2663_v31, %v2660_v29  ;;  %v2916_v33 = vsel %vm2820_vm8, %v2913_v57, %v2915_v37  ;;  %v10895_v57 = vld [vmem:[%s10345_s26 + $0x20] sm:$0xff]  ;;  %v1426_v29 = vld [vmem:[#allocation2 + $0x48] sm:$0xff] }
 0x12c   : > { %v1785_v30 = vpop.f32.mrf.mxu0  ;;  %v1599_v32 = vadd.f32 %v1598_v25, %v1507_v19  ;;  %v2825_v39 = vsel %vm2820_vm8, %v2822_v50, %v2824_v1 }
 0x12d   : > { %v1918_v42 = vpop.f32.mrf.mxu1  ;;  %v2665_v43 = vsel %vm2497_vm7, %v10839_v55, %v2664_v36 }
 0x12e   : > { %v1617_v47 = vadd.f32 %v1599_v32, %v1421_v6  ;;  %v1919_v48 = vadd.f32 %v1918_v42, %v1785_v30  ;;  %v9935_v32 = vld [vmem:[%s10354_s29 + $0x28] sm:$0xff]  ;;  %v1424_v6 = vld [vmem:[#allocation2 + $0x38] sm:$0xff] }
 0x12f   : > { %v1658_v51 = vld [vmem:[#allocation2 + $0x18] sm:$0xff]  ;;  %v2670_v45 = vshll.u32 %v9935_v32, 16 }
 0x130   : > { %1627 = vst.msk [vmem:[#allocation2 + $0x20] sm:$0xff] %vm632_vm4, %v1617_v47  ;;  %v1939_v52 = vadd.f32 %v1919_v48, %v1658_v51  ;;  %v2534_v47 = vshrl.u32 %v9940_v41, 16  ;;  %v2537_v48 = vshll.u32 %v9940_v41, 16  ;;  %v10933_v41 = vld [vmem:[%s10345_s26 + $0x28] sm:$0xff] }
 0x132   : > { %v1509_v54 = vpop.f32.mrf.mxu2  ;;  %1949 = vst.msk [vmem:[#allocation2 + $0x18] sm:$0xff] %vm632_vm4, %v1939_v52  ;;  %v2667_v52 = vshrl.u32 %v9935_v32, 16  ;;  %v2536_v55 = vrot.slane %v2534_v47, 2  ;;  %v2539_v56 = vrot.slane %v2537_v48, 3  ;;  %v10948_v48 = vld [vmem:[%s10354_s29 + $0x28] sm:$0xff] }
 0x133   : > { %v1600_v63 = vpop.f32.mrf.mxu3 }
 0x134   : > { %v1788_v58 = vpop.f32.mrf.mxu0  ;;  %v1601_v2 = vadd.f32 %v1600_v63, %v1509_v54  ;;  %v2669_v61 = vrot.slane %v2667_v52, 2  ;;  %v2672_v63 = vrot.slane %v2670_v45, 3  ;;  %v2828_v52 = vrot.slane %v10933_v41, 3 }
 0x135   : > { %v1921_v4 = vpop.f32.mrf.mxu1 }
 0x136   : > { %v1618_v10 = vadd.f32 %v1601_v2, %v1422_v3  ;;  %v1922_v5 = vadd.f32 %v1921_v4, %v1788_v58  ;;  %v2454_v58 = vld [vmem:[%s10345_s26 + $0x30] sm:$0x7]  ;;  %v1425_v2 = vld [vmem:[#allocation2 + $0x40] sm:$0xff] }
 0x137   : > { %8842 = vmatmul.msk.bf16.gmra.mxu2 %vm700_vm1, %v2523_v59  ;;  %8893 = vmatmul.msk.bf16.vlgmr.msra.gmra.mxu0 %vm700_vm1, %v2823_v60  ;;  %v1659_v18 = vld [vmem:[#allocation2 + $0x20] sm:$0xff] }
 0x138   : > { %1628 = vst.msk [vmem:[#allocation2 + $0x28] sm:$0xff] %vm632_vm4, %v1618_v10  ;;  %v1940_v20 = vadd.f32 %v1922_v5, %v1659_v18  ;;  %8867 = vmatmul.msk.bf16.gmra.mxu3 %vm700_vm1, %v2656_v0  ;;  %8918 = vmatmul.msk.bf16.vlgmr.msra.gmra.mxu1 %vm700_vm1, %v2914_v9  ;;  %v10899_v4 = vld [vmem:[%s10354_s29 + $0x20] sm:$0xff]  ;;  %v2490_v0 = vunpack.c.l.b16 %v2454_v58  ;;  %v10901_v10 = vor.u32 %v2539_v56, %v2536_v55  ;;  %v2826_v5 = vrot.slane %v10895_v57, 3 }
 0x139   : > { %v2917_v62 = vrot.slane %v10899_v4, 3  ;;  %v2919_v58 = vrot.slane %v10948_v48, 3 }
 0x13a   : > { %v1512_v17 = vpop.f32.mrf.mxu2  ;;  %1950 = vst.msk [vmem:[#allocation2 + $0x20] sm:$0xff] %vm632_vm4, %v1940_v20  ;;  %v2496_v21 = vpack.c.b16 %v2490_v0, %v2490_v0  ;;  %v2541_v24 = vsel %vm2497_vm7, %v10867_v12, %v10901_v10  ;;  %v1979_v0 = vld [vmem:[#allocation2 + $0x8] sm:$0xff] }
 0x13b   : > { %v1603_v26 = vpop.f32.mrf.mxu3  ;;  %v2918_v15 = vsel %vm2820_vm8, %v2915_v37, %v2917_v62  ;;  %v2920_v57 = vsel %vm2820_vm8, %v2917_v62, %v2919_v58 }
 0x13c   : > { %v1790_v22 = vpop.f32.mrf.mxu0  ;;  %v1604_v53 = vadd.f32 %v1603_v26, %v1512_v17  ;;  %v10906_v17 = vor.u32 %v2672_v63, %v2669_v61  ;;  %v2827_v26 = vsel %vm2820_vm8, %v2824_v1, %v2826_v5  ;;  %v2829_v61 = vsel %vm2820_vm8, %v2826_v5, %v2828_v52 }
 0x13d   : > { %v1923_v28 = vpop.f32.mrf.mxu1 }
 0x13e   : > { %v1619_v35 = vadd.f32 %v1604_v53, %v1423_v8  ;;  %v1924_v11 = vadd.f32 %v1923_v28, %v1790_v22  ;;  %v2624_v22 = vunpack.c.l.b16 %v2443_v13  ;;  %v2674_v28 = vsel %vm2497_vm7, %v2664_v36, %v10906_v17 }
 0x13f   : > { %v1660_v19 = vld [vmem:[#allocation2 + $0x28] sm:$0xff] }
 0x140   : > { %1629 = vst.msk [vmem:[#allocation2 + $0x30] sm:$0xff] %vm632_vm4, %v1619_v35  ;;  %v1941_v16 = vadd.f32 %v1924_v11, %v1660_v19  ;;  %v2543_v35 = vshrl.u32 %v2496_v21, 16  ;;  %v2546_v11 = vshll.u32 %v2496_v21, 16  ;;  %v2630_v12 = vpack.c.b16 %v2624_v22, %v2624_v22  ;;  %v9080_v22 = vld [vmem:[%s12928_s7 + $0x30] sm:$0xf] }
 0x142   : > { %v1514_v27 = vpop.f32.mrf.mxu2  ;;  %1951 = vst.msk [vmem:[#allocation2 + $0x28] sm:$0xff] %vm632_vm4, %v1941_v16  ;;  %v2548_v34 = vrot.slane %v2546_v11, 3  ;;  %v2679_v37 = vshll.u32 %v2630_v12, 16 }
 0x143   : > { %v1605_v40 = vpop.f32.mrf.mxu3 }
 0x144   : > { %v1793_v30 = vpop.f32.mrf.mxu0  ;;  %v1606_v25 = vadd.f32 %v1605_v40, %v1514_v27  ;;  %v9028_v40 = vld [vmem:[%s12928_s7 + $0x2c] sm:$0xf]  ;;  %v2681_v47 = vrot.slane %v2679_v37, 3 }
 0x145   : > { %v1926_v42 = vpop.f32.mrf.mxu1 }
 0x146   : > { %v1620_v44 = vadd.f32 %v1606_v25, %v1424_v6  ;;  %v1927_v46 = vadd.f32 %v1926_v42, %v1793_v30  ;;  %v2545_v30 = vrot.slane %v2543_v35, 2  ;;  %v9027_v25 = vld [vmem:[%s12927_s6 + $0x2c] sm:$0xf]  ;;  %v3598_v6 = vsel %vm716_vm0, %v9028_v40, 0  ;;  %v1981_v40 = vld [vmem:[#allocation2 + $0x18] sm:$0xff] }
 0x147   : > { %8843 = vmatmul.msk.bf16.gmra.mxu2 %vm700_vm1, %v2532_v38  ;;  %8894 = vmatmul.msk.bf16.gmra.mxu0 %vm700_vm1, %v2825_v39  ;;  %v1661_v49 = vld [vmem:[#allocation2 + $0x30] sm:$0xff]  ;;  %v2676_v38 = vshrl.u32 %v2630_v12, 16  ;;  %v3689_v42 = vsel %vm716_vm0, %v9027_v25, 0 }
 0x148   : > { %1630 = vst.msk [vmem:[#allocation2 + $0x38] sm:$0xff] %vm632_vm4, %v1620_v44  ;;  %v1942_v50 = vadd.f32 %v1927_v46, %v1661_v49  ;;  %8868 = vmatmul.msk.bf16.gmra.mxu3 %vm700_vm1, %v2665_v43  ;;  %8919 = vmatmul.msk.bf16.gmra.mxu1 %vm700_vm1, %v2916_v33  ;;  %v1978_v33 = vld [vmem:[#allocation2] sm:$0xff] }
 0x149   : > { %3607 = vmatpush.bf16.msra.mxu2 %v3598_v6  ;;  %3698 = vmatpush.bf16.msra.mxu3 %v3689_v42  ;;  %v2678_v46 = vrot.slane %v2676_v38, 2 }
 0x14a   : > { %v1517_v51 = vpop.f32.mrf.mxu2  ;;  %1952 = vst.msk [vmem:[#allocation2 + $0x30] sm:$0xff] %vm632_vm4, %v1942_v50 }
 0x14b   : > { %v1608_v59 = vpop.f32.mrf.mxu3  ;;  %v2682_v56 = vor.u32 %v2681_v47, %v2678_v46 }
 0x14c   : > { %v1795_v54 = vpop.f32.mrf.mxu0  ;;  %v1609_v60 = vadd.f32 %v1608_v59, %v1517_v51  ;;  %v2549_v51 = vor.u32 %v2548_v34, %v2545_v30 }
 0x14d   : > { %v1928_v3 = vpop.f32.mrf.mxu1 }
 0x14e   : > { %v1621_v9 = vadd.f32 %v1609_v60, %v1425_v2  ;;  %v1929_v7 = vadd.f32 %v1928_v3, %v1795_v54  ;;  %v2550_v60 = vsel %vm2497_vm7, %v10901_v10, %v2549_v51  ;;  %v2777_v2 = vld [vmem:[%s10345_s26 + $0x30] sm:$0x7]  ;;  %s10975_s26 = sadd.s32 %s10135_s27, %s10334_s11 }
 0x14f   : > { %v1662_v14 = vld [vmem:[#allocation2 + $0x38] sm:$0xff]  ;;  %v2813_v13 = vunpack.c.l.b16 %v2777_v2  ;;  %s8449_s20 = sshll.u32 %s10975_s26, 2 }
 0x150   : > { %1631 = vst.msk [vmem:[#allocation2 + $0x40] sm:$0xff] %vm632_vm4, %v1621_v9  ;;  %v1943_v18 = vadd.f32 %v1929_v7, %v1662_v14  ;;  %v2683_v7 = vsel %vm2497_vm7, %v10906_v17, %v2682_v56  ;;  %v2766_v14 = vld [vmem:[%s10354_s29 + $0x30] sm:$0x7]  ;;  %s10993_s23 = scalar_lea.vmem %s12925_s4, %s8449_s20  ;;  %s10999_s27 = scalar_lea.vmem %s12922_s1, %s8449_s20  ;;  %v1982_v56 = vld [vmem:[#allocation2 + $0x20] sm:$0xff] }
 0x151   : > { %v2905_v21 = vunpack.c.l.b16 %v2766_v14  ;;  %v2819_v62 = vpack.c.b16 %v2813_v13, %v2813_v13  ;;  %v9966_v34 = vld [vmem:[%s10993_s23] sm:$0xff]  ;;  %v11021_v48 = vld [vmem:[%s10999_s27 + $0x8] sm:$0xff]  ;;  %s573_s20 = sadd.s32 %s10136_s12, %s10334_s11  ;;  %s622_s11 = sadd.s32 %s8455_s22, %s12993_s13 }
 0x152   : > { %v1519_v20 = vpop.f32.mrf.mxu2  ;;  %1953 = vst.msk [vmem:[#allocation2 + $0x38] sm:$0xff] %vm632_vm4, %v1943_v18  ;;  %v9961_v6 = vld [vmem:[%s10999_s27] sm:$0xff]  ;;  %v3268_v51 = vshrl.u32 %v9966_v34, 16  ;;  %s8450_s21 = sshll.u32 %s573_s20, 2 }
 0x153   : > { %v1610_v53 = vpop.f32.mrf.mxu3  ;;  %v2830_v11 = vrot.slane %v2819_v62, 3  ;;  %s11687_s24 = scalar_lea.vmem %s12926_s5, %s8450_s21  ;;  %s11693_s28 = scalar_lea.vmem %s12923_s2, %s8450_s21 }
 0x154   : > { %v1798_v23 = vpop.f32.mrf.mxu0  ;;  %v1611_v8 = vadd.f32 %v1610_v53, %v1519_v20 }
 0x155   : > { %v1931_v31 = vpop.f32.mrf.mxu1  ;;  %v2831_v30 = vsel %vm2820_vm8, %v2828_v52, %v2830_v11 }
 0x156   : > { %v1622_v1 = vadd.f32 %v1611_v8, %v1426_v29  ;;  %v1932_v19 = vadd.f32 %v1931_v31, %v1798_v23  ;;  %v9079_v23 = vld [vmem:[%s12927_s6 + $0x30] sm:$0xf]  ;;  %v2911_v31 = vpack.c.b16 %v2905_v21, %v2905_v21  ;;  %v9952_v21 = vld [vmem:[%s10999_s27 + $0x8] sm:$0xff] }
 0x157   : > { %8844 = vmatmul.msk.bf16.gmra.mxu2 %vm700_vm1, %v2541_v24  ;;  %8895 = vmatmul.msk.bf16.gmra.mxu0 %vm700_vm1, %v2827_v26  ;;  %v1663_v16 = vld [vmem:[#allocation2 + $0x40] sm:$0xff]  ;;  %v3836_v26 = vsel %vm716_vm0, %v9080_v22, 0  ;;  %v3927_v53 = vsel %vm716_vm0, %v9079_v23, 0 }
 0x158   : > { %1632 = vst.msk [vmem:[#allocation2 + $0x48] sm:$0xff] %vm632_vm4, %v1622_v1  ;;  %v1944_v27 = vadd.f32 %v1932_v19, %v1663_v16  ;;  %8869 = vmatmul.msk.bf16.gmra.mxu3 %vm700_vm1, %v2674_v28  ;;  %8920 = vmatmul.msk.bf16.gmra.mxu1 %vm700_vm1, %v2918_v15  ;;  %v1980_v28 = vld [vmem:[#allocation2 + $0x10] sm:$0xff]  ;;  %v2921_v16 = vrot.slane %v2911_v31, 3 }
 0x159   : > { %3845 = vmatpush.bf16.msra.mxu0 %v3836_v26  ;;  %3936 = vmatpush.bf16.msra.mxu1 %v3927_v53  ;;  %v11035_v26 = vld [vmem:[%s10993_s23 + $0x10] sm:$0xff] }
 0x15a   : > { %v2059_v36 = vpop.f32.mrf.mxu2  ;;  %1954 = vst.msk [vmem:[#allocation2 + $0x40] sm:$0xff] %vm632_vm4, %v1944_v27  ;;  %v9956_v27 = vld [vmem:[%s10993_s23] sm:$0xff] }
 0x15b   : > { %v2150_v32 = vpop.f32.mrf.mxu3 }
 0x15c   : > { %v1800_v39 = vpop.f32.mrf.mxu0  ;;  %v2151_v43 = vadd.f32 %v2150_v32, %v2059_v36  ;;  %v2922_v32 = vsel %vm2820_vm8, %v2919_v58, %v2921_v16  ;;  %v3403_v16 = vshrl.u32 %v11021_v48, 16 }
 0x15d   : > { %v1933_v44 = vpop.f32.mrf.mxu1 }
 0x15e   : > { %v2175_v49 = vadd.f32 %v2151_v43, %v1978_v33  ;;  %v1934_v50 = vadd.f32 %v1933_v44, %v1800_v39  ;;  %v9951_v39 = vld [vmem:[%s10999_s27] sm:$0xff]  ;;  %v11015_v43 = vld [vmem:[%s10993_s23 + $0x8] sm:$0xff]  ;;  %v3270_v33 = vshll.u32 %v9966_v34, 16 }
 0x15f   : > { %v1664_v45 = vld [vmem:[#allocation2 + $0x48] sm:$0xff] }
 0x160   : > { %2185 = vst.msk [vmem:[#allocation2] sm:$0xff] %vm632_vm4, %v2175_v49  ;;  %v1945_v54 = vadd.f32 %v1934_v50, %v1664_v45  ;;  %v3394_v49 = vshll.u32 %v9961_v6, 16  ;;  %v3272_v52 = vrot.slane %v3270_v33, 1  ;;  %v3275_v45 = vshll.u32 %v11015_v43, 16 }
 0x162   : > { %v2061_v55 = vpop.f32.mrf.mxu2  ;;  %1955 = vst.msk [vmem:[#allocation2 + $0x48] sm:$0xff] %vm632_vm4, %v1945_v54 }
 0x163   : > { %v2152_v63 = vpop.f32.mrf.mxu3 }
 0x164   : > { %v2297_v59 = vpop.f32.mrf.mxu0  ;;  %v2153_v3 = vadd.f32 %v2152_v63, %v2061_v55 }
 0x165   : > { %v2388_v9 = vpop.f32.mrf.mxu1 }
 0x166   : > { %v2176_v10 = vadd.f32 %v2153_v3, %v1979_v0  ;;  %v2389_v5 = vadd.f32 %v2388_v9, %v2297_v59  ;;  %v3392_v59 = vshrl.u32 %v9961_v6, 16  ;;  %v3273_v3 = vor.u32 %v3272_v52, %v3268_v51  ;;  %v11057_v51 = vld [vmem:[%s10993_s23 + $0x18] sm:$0xff] }
 0x167   : > { %8845 = vmatmul.msk.bf16.gmra.mxu2 %vm700_vm1, %v2550_v60  ;;  %8896 = vmatmul.msk.bf16.gmra.mxu0 %vm700_vm1, %v2829_v61  ;;  %v2217_v18 = vld [vmem:[#allocation2] sm:$0xff]  ;;  %v3396_v60 = vrot.slane %v3394_v49, 1  ;;  %v3399_v61 = vshll.u32 %v11021_v48, 16  ;;  %v3277_v0 = vrot.slane %v3275_v45, 1 }
 0x168   : > { %2186 = vst.msk [vmem:[#allocation2 + $0x8] sm:$0xff] %vm632_vm4, %v2176_v10  ;;  %v2413_v20 = vadd.f32 %v2389_v5, %v2217_v18  ;;  %8870 = vmatmul.msk.bf16.gmra.mxu3 %vm700_vm1, %v2683_v7  ;;  %8921 = vmatmul.msk.bf16.gmra.mxu1 %vm700_vm1, %v2920_v57  ;;  %v9957_v10 = vld [vmem:[%s10993_s23 + $0x8] sm:$0xff] }
 0x169   : > { %v3397_v5 = vor.u32 %v3396_v60, %v3392_v59  ;;  %v3401_v13 = vrot.slane %v3399_v61, 1  ;;  %v3278_v18 = vsel %vm915_vm2, %v3273_v3, %v3277_v0  ;;  %v3291_v59 = vshll.u32 %v11057_v51, 16 }
 0x16a   : > { %v2064_v17 = vpop.f32.mrf.mxu2  ;;  %2423 = vst.msk [vmem:[#allocation2] sm:$0xff] %vm632_vm4, %v2413_v20 }
 0x16b   : > { %v2155_v24 = vpop.f32.mrf.mxu3  ;;  %v3402_v22 = vsel %vm915_vm2, %v3397_v5, %v3401_v13 }
 0x16c   : > { %v2299_v4 = vpop.f32.mrf.mxu0  ;;  %v2156_v8 = vadd.f32 %v2155_v24, %v2064_v17 }
 0x16d   : > { %v2390_v29 = vpop.f32.mrf.mxu1 }
 0x16e   : > { %v2177_v15 = vadd.f32 %v2156_v8, %v1980_v28  ;;  %v2391_v35 = vadd.f32 %v2390_v29, %v2299_v4  ;;  %v1983_v4 = vld [vmem:[#allocation2 + $0x28] sm:$0xff]  ;;  %v11041_v29 = vld [vmem:[%s10999_s27 + $0x10] sm:$0xff] }
 0x16f   : > { %v2218_v12 = vld [vmem:[#allocation2 + $0x8] sm:$0xff]  ;;  %v3411_v3 = vshrl.u32 %v11041_v29, 16 }
 0x170   : > { %2187 = vst.msk [vmem:[#allocation2 + $0x10] sm:$0xff] %vm632_vm4, %v2177_v15  ;;  %v2414_v1 = vadd.f32 %v2391_v35, %v2218_v12  ;;  %v3279_v15 = vshrl.u32 %v11015_v43, 16  ;;  %v3283_v35 = vshll.u32 %v11035_v26, 16 }
 0x172   : > { %v2066_v19 = vpop.f32.mrf.mxu2  ;;  %2424 = vst.msk [vmem:[#allocation2 + $0x8] sm:$0xff] %vm632_vm4, %v2414_v1  ;;  %v1984_v1 = vld [vmem:[#allocation2 + $0x30] sm:$0xff]  ;;  %v3281_v34 = vor.u32 %v3279_v15, %v3277_v0 }
 0x173   : > { %v2157_v38 = vpop.f32.mrf.mxu3 }
 0x174   : > { %v2302_v36 = vpop.f32.mrf.mxu0  ;;  %v2158_v37 = vadd.f32 %v2157_v38, %v2066_v19  ;;  %v3285_v38 = vrot.slane %v3283_v35, 1 }
 0x175   : > { %v2393_v25 = vpop.f32.mrf.mxu1 }
 0x176   : > { %v2178_v42 = vadd.f32 %v2158_v37, %v1981_v40  ;;  %v2394_v41 = vadd.f32 %v2393_v25, %v2302_v36  ;;  %v9958_v25 = vld [vmem:[%s10993_s23 + $0x10] sm:$0xff] }
 0x177   : > { %8897 = vmatmul.msk.bf16.gmra.mxu0 %vm700_vm1, %v2831_v30  ;;  %8945 = vmatmul.msk.bf16.vlgmr.msrb.gmra.mxu2 %vm700_vm1, %v9956_v27  ;;  %v2219_v44 = vld [vmem:[#allocation2 + $0x10] sm:$0xff]  ;;  %v3407_v27 = vshll.u32 %v11041_v29, 16  ;;  %v11079_v29 = vld [vmem:[%s10993_s23 + $0x20] sm:$0xff] }
 0x178   : > { %2188 = vst.msk [vmem:[#allocation2 + $0x18] sm:$0xff] %vm632_vm4, %v2178_v42  ;;  %v2415_v46 = vadd.f32 %v2394_v41, %v2219_v44  ;;  %8922 = vmatmul.msk.bf16.gmra.mxu1 %vm700_vm1, %v2922_v32  ;;  %8970 = vmatmul.msk.bf16.vlgmr.msrb.gmra.mxu3 %vm700_vm1, %v9951_v39  ;;  %v3405_v32 = vor.u32 %v3403_v16, %v3401_v13  ;;  %v9953_v44 = vld [vmem:[%s10999_s27 + $0x10] sm:$0xff] }
 0x179   : > { %v3409_v6 = vrot.slane %v3407_v27, 1  ;;  %v3286_v41 = vsel %vm915_vm2, %v3281_v34, %v3285_v38  ;;  %v9132_v16 = vld [vmem:[%s12928_s7 + $0x34] sm:$0xf] }
 0x17a   : > { %v2069_v47 = vpop.f32.mrf.mxu2  ;;  %2425 = vst.msk [vmem:[#allocation2 + $0x10] sm:$0xff] %vm632_vm4, %v2415_v46  ;;  %v1985_v46 = vld [vmem:[#allocation2 + $0x38] sm:$0xff]  ;;  %v9131_v27 = vld [vmem:[%s12927_s6 + $0x34] sm:$0xf] }
 0x17b   : > { %v2160_v54 = vpop.f32.mrf.mxu3  ;;  %v3410_v48 = vsel %vm915_vm2, %v3405_v32, %v3409_v6  ;;  %v4249_v34 = vsel %vm716_vm0, %v9131_v27, 0 }
 0x17c   : > { %v2304_v50 = vpop.f32.mrf.mxu0  ;;  %v2161_v55 = vadd.f32 %v2160_v54, %v2069_v47  ;;  %4258 = vmatpush.bf16.msrb.mxu3 %v4249_v34 }
 0x17d   : > { %v2395_v58 = vpop.f32.mrf.mxu1 }
 0x17e   : > { %v2179_v63 = vadd.f32 %v2161_v55, %v1982_v56  ;;  %v2396_v2 = vadd.f32 %v2395_v58, %v2304_v50  ;;  %v11063_v55 = vld [vmem:[%s10999_s27 + $0x18] sm:$0xff]  ;;  %v3287_v58 = vshrl.u32 %v11035_v26, 16 }
 0x17f   : > { %v2220_v9 = vld [vmem:[#allocation2 + $0x18] sm:$0xff]  ;;  %v3415_v0 = vshll.u32 %v11063_v55, 16 }
 0x180   : > { %2189 = vst.msk [vmem:[#allocation2 + $0x20] sm:$0xff] %vm632_vm4, %v2179_v63  ;;  %v2416_v7 = vadd.f32 %v2396_v2, %v2220_v9  ;;  %v1986_v63 = vld [vmem:[#allocation2 + $0x40] sm:$0xff] }
 0x182   : > { %v2071_v57 = vpop.f32.mrf.mxu2  ;;  %2426 = vst.msk [vmem:[#allocation2 + $0x18] sm:$0xff] %vm632_vm4, %v2416_v7 }
 0x183   : > { %v2162_v20 = vpop.f32.mrf.mxu3 }
 0x184   : > { %v2307_v14 = vpop.f32.mrf.mxu0  ;;  %v2163_v17 = vadd.f32 %v2162_v20, %v2071_v57  ;;  %v3289_v57 = vor.u32 %v3287_v58, %v3285_v38  ;;  %v3413_v20 = vor.u32 %v3411_v3, %v3409_v6  ;;  %v2456_v58 = vld [vmem:[#allocation2 + $0x8] sm:$0xff] }
 0x185   : > { %v2398_v62 = vpop.f32.mrf.mxu1 }
 0x186   : > { %v2180_v23 = vadd.f32 %v2163_v17, %v1983_v4  ;;  %v2399_v24 = vadd.f32 %v2398_v62, %v2307_v14  ;;  %v3417_v17 = vrot.slane %v3415_v0, 1 }
 0x187   : > { %8946 = vmatmul.msk.bf16.gmra.mxu2 %vm700_vm1, %v9957_v10  ;;  %8997 = vmatmul.msk.bf16.vlgmr.msrb.gmra.mxu0 %vm700_vm1, %v3278_v18  ;;  %v2221_v53 = vld [vmem:[#allocation2 + $0x20] sm:$0xff]  ;;  %v3293_v10 = vrot.slane %v3291_v59, 1  ;;  %v9959_v18 = vld [vmem:[%s10993_s23 + $0x18] sm:$0xff] }
 0x188   : > { %2190 = vst.msk [vmem:[#allocation2 + $0x28] sm:$0xff] %vm632_vm4, %v2180_v23  ;;  %v2417_v8 = vadd.f32 %v2399_v24, %v2221_v53  ;;  %8971 = vmatmul.msk.bf16.gmra.mxu3 %vm700_vm1, %v9952_v21  ;;  %9022 = vmatmul.msk.bf16.vlgmr.msrb.gmra.mxu1 %vm700_vm1, %v3402_v22  ;;  %v9954_v23 = vld [vmem:[%s10999_s27 + $0x18] sm:$0xff]  ;;  %v1987_v24 = vld [vmem:[#allocation2 + $0x48] sm:$0xff]  ;;  %v3418_v53 = vsel %vm915_vm2, %v3413_v20, %v3417_v17  ;;  %v9971_v20 = vld [vmem:[%s10999_s27] sm:$0xf0] }
 0x189   : > { %v3294_v4 = vsel %vm915_vm2, %v3289_v57, %v3293_v10 }
 0x18a   : > { %v2074_v28 = vpop.f32.mrf.mxu2  ;;  %2427 = vst.msk [vmem:[#allocation2 + $0x20] sm:$0xff] %vm632_vm4, %v2417_v8 }
 0x18b   : > { %v2165_v11 = vpop.f32.mrf.mxu3 }
 0x18c   : > { %v2309_v31 = vpop.f32.mrf.mxu0  ;;  %v2166_v12 = vadd.f32 %v2165_v11, %v2074_v28  ;;  %v3295_v11 = vshrl.u32 %v11057_v51, 16 }
 0x18d   : > { %v2400_v19 = vpop.f32.mrf.mxu1 }
 0x18e   : > { %v2181_v36 = vadd.f32 %v2166_v12, %v1984_v1  ;;  %v2401_v30 = vadd.f32 %v2400_v19, %v2309_v31  ;;  %v11086_v12 = vld [vmem:[%s10999_s27 + $0x20] sm:$0xff]  ;;  %v3299_v19 = vshll.u32 %v11079_v29, 16 }
 0x18f   : > { %v2222_v37 = vld [vmem:[#allocation2 + $0x28] sm:$0xff] }
 0x190   : > { %2191 = vst.msk [vmem:[#allocation2 + $0x30] sm:$0xff] %vm632_vm4, %v2181_v36  ;;  %v2418_v39 = vadd.f32 %v2401_v30, %v2222_v37  ;;  %v4116_v30 = vsel %vm716_vm0, %v9132_v16, 0  ;;  %v2455_v37 = vld [vmem:[#allocation2] sm:$0xff] }
 0x191   : > { %4125 = vmatpush.bf16.msrb.mxu2 %v4116_v30 }
 0x192   : > { %v2076_v40 = vpop.f32.mrf.mxu2  ;;  %2428 = vst.msk [vmem:[#allocation2 + $0x28] sm:$0xff] %vm632_vm4, %v2418_v39 }
 0x193   : > { %v2167_v43 = vpop.f32.mrf.mxu3 }
 0x194   : > { %v2312_v42 = vpop.f32.mrf.mxu0  ;;  %v2168_v33 = vadd.f32 %v2167_v43, %v2076_v40  ;;  %v3419_v40 = vshrl.u32 %v11063_v55, 16  ;;  %v3224_v43 = vld [vmem:[%s10993_s23 + $0x28] sm:$0x1] }
 0x195   : > { %v2403_v47 = vpop.f32.mrf.mxu1 }
 0x196   : > { %v2182_v49 = vadd.f32 %v2168_v33, %v1985_v46  ;;  %v2404_v50 = vadd.f32 %v2403_v47, %v2312_v42  ;;  %v3297_v42 = vor.u32 %v3295_v11, %v3293_v10  ;;  %v9960_v47 = vld [vmem:[%s10993_s23 + $0x20] sm:$0xff]  ;;  %v11132_v11 = vld [vmem:[%s10999_s27 + $0x8] sm:$0xff] }
 0x197   : > { %8947 = vmatmul.msk.bf16.gmra.mxu2 %vm700_vm1, %v9958_v25  ;;  %8998 = vmatmul.msk.bf16.gmra.mxu0 %vm700_vm1, %v3286_v41  ;;  %v2223_v52 = vld [vmem:[#allocation2 + $0x30] sm:$0xff]  ;;  %v3423_v25 = vshll.u32 %v11086_v12, 16  ;;  %v3301_v41 = vrot.slane %v3299_v19, 1 }
 0x198   : > { %2192 = vst.msk [vmem:[#allocation2 + $0x38] sm:$0xff] %vm632_vm4, %v2182_v49  ;;  %v2419_v45 = vadd.f32 %v2404_v50, %v2223_v52  ;;  %8972 = vmatmul.msk.bf16.gmra.mxu3 %vm700_vm1, %v9953_v44  ;;  %9023 = vmatmul.msk.bf16.gmra.mxu1 %vm700_vm1, %v3410_v48  ;;  %v3421_v48 = vor.u32 %v3419_v40, %v3417_v17  ;;  %v3260_v50 = vunpack.c.l.b16 %v3224_v43  ;;  %v3663_v40 = vrot.slane %v11132_v11, 1  ;;  %v2458_v43 = vld [vmem:[#allocation2 + $0x18] sm:$0xff] }
 0x199   : > { %v3425_v49 = vrot.slane %v3423_v25, 1  ;;  %v3302_v52 = vsel %vm915_vm2, %v3297_v42, %v3301_v41 }
 0x19a   : > { %v2079_v54 = vpop.f32.mrf.mxu2  ;;  %2429 = vst.msk [vmem:[#allocation2 + $0x30] sm:$0xff] %vm632_vm4, %v2419_v45  ;;  %v3213_v45 = vld [vmem:[%s10999_s27 + $0x28] sm:$0x1] }
 0x19b   : > { %v2170_v60 = vpop.f32.mrf.mxu3 }
 0x19c   : > { %v2314_v56 = vpop.f32.mrf.mxu0  ;;  %v2171_v61 = vadd.f32 %v2170_v60, %v2079_v54  ;;  %v3426_v60 = vsel %vm915_vm2, %v3421_v48, %v3425_v49 }
 0x19d   : > { %v2405_v2 = vpop.f32.mrf.mxu1 }
 0x19e   : > { %v2183_v9 = vadd.f32 %v2171_v61, %v1986_v63  ;;  %v2406_v7 = vadd.f32 %v2405_v2, %v2314_v56  ;;  %v9955_v56 = vld [vmem:[%s10999_s27 + $0x20] sm:$0xff]  ;;  %v3266_v61 = vpack.c.b16 %v3260_v50, %v3260_v50  ;;  %v3384_v63 = vunpack.c.l.b16 %v3213_v45 }
 0x19f   : > { %v2224_v5 = vld [vmem:[#allocation2 + $0x38] sm:$0xff]  ;;  %v9083_v50 = vld [vmem:[%s10993_s23 + $0x4] sm:$0xe] }
 0x1a0   : > { %2193 = vst.msk [vmem:[#allocation2 + $0x40] sm:$0xff] %vm632_vm4, %v2183_v9  ;;  %v2420_v13 = vadd.f32 %v2406_v7, %v2224_v5  ;;  %v9031_v9 = vld [vmem:[%s10993_s23] sm:$0xe]  ;;  %v9976_v7 = vld [vmem:[%s10993_s23] sm:$0xf0]  ;;  %v3303_v5 = vshrl.u32 %v11079_v29, 16 }
 0x1a2   : > { %v2081_v14 = vpop.f32.mrf.mxu2  ;;  %2430 = vst.msk [vmem:[#allocation2 + $0x38] sm:$0xff] %vm632_vm4, %v2420_v13  ;;  %v3307_v13 = vshll.u32 %v3266_v61, 16 }
 0x1a3   : > { %v2172_v62 = vpop.f32.mrf.mxu3 }
 0x1a4   : > { %v2317_v21 = vpop.f32.mrf.mxu0  ;;  %v2173_v22 = vadd.f32 %v2172_v62, %v2081_v14  ;;  %v3390_v14 = vpack.c.b16 %v3384_v63, %v3384_v63  ;;  %v9184_v62 = vld [vmem:[%s12928_s7 + $0x38] sm:$0xf] }
 0x1a5   : > { %v2408_v26 = vpop.f32.mrf.mxu1 }
 0x1a6   : > { %v2184_v8 = vadd.f32 %v2173_v22, %v1987_v24  ;;  %v2409_v28 = vadd.f32 %v2408_v26, %v2317_v21  ;;  %v11120_v21 = vld [vmem:[%s10993_s23 + $0x8] sm:$0xff]  ;;  %v9183_v22 = vld [vmem:[%s12927_s6 + $0x38] sm:$0xf]  ;;  %v4396_v24 = vsel %vm716_vm0, %v9184_v62, 0 }
 0x1a7   : > { %8948 = vmatmul.msk.bf16.gmra.mxu2 %vm700_vm1, %v9959_v18  ;;  %8999 = vmatmul.msk.bf16.gmra.mxu0 %vm700_vm1, %v3294_v4  ;;  %v2225_v31 = vld [vmem:[#allocation2 + $0x40] sm:$0xff]  ;;  %v9032_v4 = vor.u32 %v9976_v7, %v9031_v9  ;;  %v4487_v26 = vsel %vm716_vm0, %v9183_v22, 0  ;;  %v11160_v9 = vld [vmem:[%s10999_s27 + $0x10] sm:$0xff] }
 0x1a8   : > { %2194 = vst.msk [vmem:[#allocation2 + $0x48] sm:$0xff] %vm632_vm4, %v2184_v8  ;;  %v2421_v15 = vadd.f32 %v2409_v28, %v2225_v31  ;;  %8973 = vmatmul.msk.bf16.gmra.mxu3 %vm700_vm1, %v9954_v23  ;;  %9024 = vmatmul.msk.bf16.gmra.mxu1 %vm700_vm1, %v3418_v53  ;;  %v9056_v18 = vld [vmem:[%s10999_s27] sm:$0xe]  ;;  %v3427_v8 = vshrl.u32 %v11086_v12, 16  ;;  %v2457_v28 = vld [vmem:[#allocation2 + $0x10] sm:$0xff]  ;;  %v3305_v31 = vor.u32 %v3303_v5, %v3301_v41 }
 0x1a9   : > { %4405 = vmatpush.bf16.msrb.mxu0 %v4396_v24  ;;  %4496 = vmatpush.bf16.msrb.mxu1 %v4487_v26  ;;  %v3571_v27 = vrot.slane %v9032_v4, 1  ;;  %v11163_v7 = vld [vmem:[%s10999_s27 + $0xc] sm:$0xff] }
 0x1aa   : > { %v2578_v35 = vpop.f32.mrf.mxu2  ;;  %2431 = vst.msk [vmem:[#allocation2 + $0x40] sm:$0xff] %vm632_vm4, %v2421_v15  ;;  %v3309_v15 = vrot.slane %v3307_v13, 1  ;;  %v3901_v62 = vrot.slane %v11163_v7, 1 }
 0x1ab   : > { %v2711_v36 = vpop.f32.mrf.mxu3 }
 0x1ac   : > { %v2319_v1 = vpop.f32.mrf.mxu0  ;;  %v2712_v38 = vadd.f32 %v2711_v36, %v2578_v35  ;;  %v3431_v35 = vshll.u32 %v3390_v14, 16  ;;  %v3572_v36 = vrot.slane %v11120_v21, 1  ;;  %v3665_v21 = vrot.slane %v11160_v9, 1 }
 0x1ad   : > { %v2410_v39 = vpop.f32.mrf.mxu1 }
 0x1ae   : > { %v2736_v32 = vadd.f32 %v2712_v38, %v2455_v37  ;;  %v2411_v6 = vadd.f32 %v2410_v39, %v2319_v1  ;;  %v9057_v1 = vor.u32 %v9971_v20, %v9056_v18  ;;  %v3429_v38 = vor.u32 %v3427_v8, %v3425_v49  ;;  %v2460_v8 = vld [vmem:[#allocation2 + $0x28] sm:$0xff] }
 0x1af   : > { %v2226_v33 = vld [vmem:[#allocation2 + $0x48] sm:$0xff]  ;;  %v3433_v37 = vrot.slane %v3431_v35, 1 }
 0x1b0   : > { %2746 = vst.msk [vmem:[#allocation2] sm:$0xff] %vm632_vm4, %v2736_v32  ;;  %v2422_v44 = vadd.f32 %v2411_v6, %v2226_v33  ;;  %v3662_v39 = vrot.slane %v9057_v1, 1  ;;  %v3310_v32 = vsel %vm915_vm2, %v3305_v31, %v3309_v15  ;;  %v3573_v6 = vsel %vm1220_vm3, %v3571_v27, %v3572_v36  ;;  %v9979_v27 = vld [vmem:[%s10993_s23 + $0x18] sm:$0xff] }
 0x1b1   : > { %v2463_v9 = vld [vmem:[#allocation2 + $0x40] sm:$0xff] }
 0x1b2   : > { %v2580_v46 = vpop.f32.mrf.mxu2  ;;  %2432 = vst.msk [vmem:[#allocation2 + $0x48] sm:$0xff] %vm632_vm4, %v2422_v44  ;;  %v3434_v44 = vsel %vm915_vm2, %v3429_v38, %v3433_v37  ;;  %v11183_v37 = vld [vmem:[%s10999_s27 + $0x18] sm:$0xff] }
 0x1b3   : > { %v2713_v54 = vpop.f32.mrf.mxu3 }
 0x1b4   : > { %v2859_v51 = vpop.f32.mrf.mxu0  ;;  %v2714_v55 = vadd.f32 %v2713_v54, %v2580_v46  ;;  %v3664_v46 = vsel %vm1220_vm3, %v3662_v39, %v3663_v40  ;;  %v11150_v54 = vld [vmem:[%s10993_s23 + $0x10] sm:$0xff] }
 0x1b5   : > { %v2950_v59 = vpop.f32.mrf.mxu1  ;;  %v11186_v39 = vld [vmem:[%s10999_s27 + $0x14] sm:$0xff] }
 0x1b6   : > { %v2737_v2 = vadd.f32 %v2714_v55, %v2456_v58  ;;  %v2951_v3 = vadd.f32 %v2950_v59, %v2859_v51  ;;  %v9986_v51 = vld [vmem:[%s10993_s23 + $0x4] sm:$0xf0]  ;;  %v9108_v59 = vld [vmem:[%s10999_s27 + $0x4] sm:$0xe] }
 0x1b7   : > { %8949 = vmatmul.msk.bf16.gmra.mxu2 %vm700_vm1, %v9960_v47  ;;  %9000 = vmatmul.msk.bf16.gmra.mxu0 %vm700_vm1, %v3302_v52  ;;  %v2778_v0 = vld [vmem:[#allocation2] sm:$0xff]  ;;  %v9084_v58 = vor.u32 %v9986_v51, %v9083_v50  ;;  %v2462_v51 = vld [vmem:[#allocation2 + $0x38] sm:$0xff] }
 0x1b8   : > { %2747 = vst.msk [vmem:[#allocation2 + $0x8] sm:$0xff] %vm632_vm4, %v2737_v2  ;;  %v2975_v57 = vadd.f32 %v2951_v3, %v2778_v0  ;;  %8974 = vmatmul.msk.bf16.gmra.mxu3 %vm700_vm1, %v9955_v56  ;;  %9025 = vmatmul.msk.bf16.gmra.mxu1 %vm700_vm1, %v3426_v60  ;;  %v11154_v56 = vld [vmem:[%s10993_s23 + $0xc] sm:$0xff]  ;;  %v9981_v60 = vld [vmem:[%s10999_s27 + $0x4] sm:$0xf0]  ;;  %v2459_v2 = vld [vmem:[#allocation2 + $0x20] sm:$0xff]  ;;  %v3574_v0 = vrot.slane %v11150_v54, 1 }
 0x1b9   : > { %v3809_v13 = vrot.slane %v9084_v58, 1  ;;  %v3810_v14 = vrot.slane %v11154_v56, 1 }
 0x1ba   : > { %v2583_v10 = vpop.f32.mrf.mxu2  ;;  %2985 = vst.msk [vmem:[#allocation2] sm:$0xff] %vm632_vm4, %v2975_v57  ;;  %v9109_v57 = vor.u32 %v9981_v60, %v9108_v59 }
 0x1bb   : > { %v2716_v23 = vpop.f32.mrf.mxu3  ;;  %v3811_v24 = vsel %vm1220_vm3, %v3809_v13, %v3810_v14 }
 0x1bc   : > { %v2861_v17 = vpop.f32.mrf.mxu0  ;;  %v2717_v53 = vadd.f32 %v2716_v23, %v2583_v10  ;;  %v3900_v4 = vrot.slane %v9109_v57, 1  ;;  %v3575_v23 = vsel %vm1220_vm3, %v3572_v36, %v3574_v0  ;;  %v9988_v36 = vld [vmem:[%s10993_s23 + $0x14] sm:$0xff]  ;;  %v11209_v57 = vld [vmem:[%s10999_s27 + $0x20] sm:$0xff] }
 0x1bd   : > { %v2952_v29 = vpop.f32.mrf.mxu1 }
 0x1be   : > { %v2738_v19 = vadd.f32 %v2717_v53, %v2457_v28  ;;  %v2953_v16 = vadd.f32 %v2952_v29, %v2861_v17  ;;  %v3666_v29 = vsel %vm1220_vm3, %v3663_v40, %v3665_v21  ;;  %v3902_v31 = vsel %vm1220_vm3, %v3900_v4, %v3901_v62 }
 0x1bf   : > { %v2779_v30 = vld [vmem:[#allocation2 + $0x8] sm:$0xff]  ;;  %v3669_v4 = vrot.slane %v11209_v57, 1 }
 0x1c0   : > { %2748 = vst.msk [vmem:[#allocation2 + $0x10] sm:$0xff] %vm632_vm4, %v2738_v19  ;;  %v2976_v34 = vadd.f32 %v2953_v16, %v2779_v30 }
 0x1c2   : > { %v2585_v12 = vpop.f32.mrf.mxu2  ;;  %2986 = vst.msk [vmem:[#allocation2 + $0x8] sm:$0xff] %vm632_vm4, %v2976_v34 }
 0x1c3   : > { %v2718_v42 = vpop.f32.mrf.mxu3 }
 0x1c4   : > { %v2864_v25 = vpop.f32.mrf.mxu0  ;;  %v2719_v41 = vadd.f32 %v2718_v42, %v2585_v12  ;;  %v2461_v12 = vld [vmem:[#allocation2 + $0x30] sm:$0xff] }
 0x1c5   : > { %v2955_v33 = vpop.f32.mrf.mxu1 }
 0x1c6   : > { %v2739_v47 = vadd.f32 %v2719_v41, %v2458_v43  ;;  %v2956_v48 = vadd.f32 %v2955_v33, %v2864_v25  ;;  %v3667_v33 = vrot.slane %v11183_v37, 1  ;;  %v9236_v37 = vld [vmem:[%s12928_s7 + $0x3c] sm:$0xf] }
 0x1c7   : > { %9001 = vmatmul.msk.bf16.gmra.mxu0 %vm700_vm1, %v3310_v32  ;;  %9049 = vmatmul.msk.bf16.vlgmr.msra.gmra.mxu2 %vm700_vm1, %v3573_v6  ;;  %v2780_v49 = vld [vmem:[#allocation2 + $0x10] sm:$0xff]  ;;  %v3576_v32 = vrot.slane %v9979_v27, 1  ;;  %v3812_v6 = vrot.slane %v9988_v36, 1 }
 0x1c8   : > { %2749 = vst.msk [vmem:[#allocation2 + $0x18] sm:$0xff] %vm632_vm4, %v2739_v47  ;;  %v2977_v52 = vadd.f32 %v2956_v48, %v2780_v49  ;;  %9026 = vmatmul.msk.bf16.gmra.mxu1 %vm700_vm1, %v3434_v44  ;;  %9074 = vmatmul.msk.bf16.vlgmr.msra.gmra.mxu3 %vm700_vm1, %v3664_v46  ;;  %v3903_v44 = vrot.slane %v11186_v39, 1  ;;  %v9235_v39 = vld [vmem:[%s12927_s6 + $0x3c] sm:$0xf] }
 0x1c9   : > { %v3577_v47 = vsel %vm1220_vm3, %v3574_v0, %v3576_v32  ;;  %v3813_v48 = vsel %vm1220_vm3, %v3810_v14, %v3812_v6 }
 0x1ca   : > { %v2588_v45 = vpop.f32.mrf.mxu2  ;;  %2987 = vst.msk [vmem:[#allocation2 + $0x10] sm:$0xff] %vm632_vm4, %v2977_v52  ;;  %v3904_v54 = vsel %vm1220_vm3, %v3901_v62, %v3903_v44 }
 0x1cb   : > { %v2721_v61 = vpop.f32.mrf.mxu3 }
 0x1cc   : > { %v2866_v55 = vpop.f32.mrf.mxu0  ;;  %v2722_v63 = vadd.f32 %v2721_v61, %v2588_v45  ;;  %v3668_v45 = vsel %vm1220_vm3, %v3665_v21, %v3667_v33 }
 0x1cd   : > { %v2957_v3 = vpop.f32.mrf.mxu1 }
 0x1ce   : > { %v2740_v10 = vadd.f32 %v2722_v63, %v2459_v2  ;;  %v2958_v5 = vadd.f32 %v2957_v3, %v2866_v55  ;;  %v11203_v63 = vld [vmem:[%s10993_s23 + $0x20] sm:$0xff] }
 0x1cf   : > { %v2781_v18 = vld [vmem:[#allocation2 + $0x18] sm:$0xff]  ;;  %v3578_v14 = vrot.slane %v11203_v63, 1 }
 0x1d0   : > { %2750 = vst.msk [vmem:[#allocation2 + $0x20] sm:$0xff] %vm632_vm4, %v2740_v10  ;;  %v2978_v20 = vadd.f32 %v2958_v5, %v2781_v18  ;;  %v11206_v2 = vld [vmem:[%s10993_s23 + $0x1c] sm:$0xff] }
 0x1d1   : > { %v11212_v10 = vld [vmem:[%s10999_s27 + $0x1c] sm:$0xff]  ;;  %v3814_v18 = vrot.slane %v11206_v2, 1 }
 0x1d2   : > { %v2590_v17 = vpop.f32.mrf.mxu2  ;;  %2988 = vst.msk [vmem:[#allocation2 + $0x18] sm:$0xff] %vm632_vm4, %v2978_v20  ;;  %v3905_v62 = vrot.slane %v11212_v10, 1 }
 0x1d3   : > { %v2723_v26 = vpop.f32.mrf.mxu3 }
 0x1d4   : > { %v2869_v22 = vpop.f32.mrf.mxu0  ;;  %v2724_v53 = vadd.f32 %v2723_v26, %v2590_v17 }
 0x1d5   : > { %v2960_v28 = vpop.f32.mrf.mxu1 }
 0x1d6   : > { %v2741_v15 = vadd.f32 %v2724_v53, %v2460_v8  ;;  %v2961_v35 = vadd.f32 %v2960_v28, %v2869_v22  ;;  %v3528_v53 = vld [vmem:[%s10993_s23 + $0x28] sm:$0x1] }
 0x1d7   : > { %9050 = vmatmul.msk.bf16.gmra.mxu2 %vm700_vm1, %v3575_v23  ;;  %9101 = vmatmul.msk.bf16.vlgmr.msra.gmra.mxu0 %vm700_vm1, %v3811_v24  ;;  %v2782_v11 = vld [vmem:[#allocation2 + $0x20] sm:$0xff]  ;;  %v3579_v23 = vsel %vm1220_vm3, %v3576_v32, %v3578_v14  ;;  %v3815_v24 = vsel %vm1220_vm3, %v3812_v6, %v3814_v18  ;;  %v2464_v28 = vld [vmem:[#allocation2 + $0x48] sm:$0xff]  ;;  %v4725_v32 = vsel %vm716_vm0, %v9235_v39, 0 }
 0x1d8   : > { %2751 = vst.msk [vmem:[#allocation2 + $0x28] sm:$0xff] %vm632_vm4, %v2741_v15  ;;  %v2979_v1 = vadd.f32 %v2961_v35, %v2782_v11  ;;  %9075 = vmatmul.msk.bf16.gmra.mxu3 %vm700_vm1, %v3666_v29  ;;  %9126 = vmatmul.msk.bf16.vlgmr.msra.gmra.mxu1 %vm700_vm1, %v3902_v31  ;;  %v3670_v31 = vsel %vm1220_vm3, %v3667_v33, %v3669_v4  ;;  %v3015_v6 = vld [vmem:[#allocation2] sm:$0xff] }
 0x1d9   : > { %v3906_v15 = vsel %vm1220_vm3, %v3903_v44, %v3905_v62  ;;  %4734 = vmatpush.bf16.msra.mxu3 %v4725_v32  ;;  %v11252_v33 = vld [vmem:[%s10999_s27 + $0x24] sm:$0xff]  ;;  %v3017_v32 = vld [vmem:[#allocation2 + $0x10] sm:$0xff] }
 0x1da   : > { %v2593_v19 = vpop.f32.mrf.mxu2  ;;  %2989 = vst.msk [vmem:[#allocation2 + $0x20] sm:$0xff] %vm632_vm4, %v2979_v1  ;;  %v3564_v1 = vunpack.c.l.b16 %v3528_v53  ;;  %v9135_v44 = vld [vmem:[%s10993_s23 + $0x4] sm:$0xe] }
 0x1db   : > { %v2726_v30 = vpop.f32.mrf.mxu3 }
 0x1dc   : > { %v2871_v16 = vpop.f32.mrf.mxu0  ;;  %v2727_v34 = vadd.f32 %v2726_v30, %v2593_v19  ;;  %v3517_v19 = vld [vmem:[%s10999_s27 + $0x28] sm:$0x1] }
 0x1dd   : > { %v2962_v38 = vpop.f32.mrf.mxu1  ;;  %v3655_v30 = vunpack.c.l.b16 %v3517_v19 }
 0x1de   : > { %v2742_v40 = vadd.f32 %v2727_v34, %v2461_v12  ;;  %v2963_v25 = vadd.f32 %v2962_v38, %v2871_v16  ;;  %v3570_v12 = vpack.c.b16 %v3564_v1, %v3564_v1  ;;  %v11241_v38 = vld [vmem:[%s10993_s23 + $0x24] sm:$0xff] }
 0x1df   : > { %v2783_v42 = vld [vmem:[#allocation2 + $0x28] sm:$0xff] }
 0x1e0   : > { %2752 = vst.msk [vmem:[#allocation2 + $0x30] sm:$0xff] %vm632_vm4, %v2742_v40  ;;  %v2980_v41 = vadd.f32 %v2963_v25, %v2783_v42  ;;  %v4634_v25 = vsel %vm716_vm0, %v9236_v37, 0 }
 0x1e1   : > { %4643 = vmatpush.bf16.msra.mxu2 %v4634_v25 }
 0x1e2   : > { %v2595_v43 = vpop.f32.mrf.mxu2  ;;  %2990 = vst.msk [vmem:[#allocation2 + $0x28] sm:$0xff] %vm632_vm4, %v2980_v41 }
 0x1e3   : > { %v2728_v49 = vpop.f32.mrf.mxu3 }
 0x1e4   : > { %v2874_v46 = vpop.f32.mrf.mxu0  ;;  %v2729_v50 = vadd.f32 %v2728_v49, %v2595_v43  ;;  %v3661_v43 = vpack.c.b16 %v3655_v30, %v3655_v30  ;;  %v3580_v49 = vrot.slane %v3570_v12, 1  ;;  %v9287_v30 = vld [vmem:[%s12927_s6 + $0x40] sm:$0xf] }
 0x1e5   : > { %v2965_v52 = vpop.f32.mrf.mxu1  ;;  %v5047_v37 = vsel %vm716_vm0, %v9287_v30, 0 }
 0x1e6   : > { %v2743_v55 = vadd.f32 %v2729_v50, %v2462_v51  ;;  %v2966_v56 = vadd.f32 %v2965_v52, %v2874_v46  ;;  %v9996_v46 = vld [vmem:[%s10993_s23 + $0x4] sm:$0xf0]  ;;  %v3816_v50 = vrot.slane %v11241_v38, 1  ;;  %5056 = vmatpush.bf16.msra.mxu1 %v5047_v37 }
 0x1e7   : > { %9051 = vmatmul.msk.bf16.gmra.mxu2 %vm700_vm1, %v3577_v47  ;;  %9102 = vmatmul.msk.bf16.gmra.mxu0 %vm700_vm1, %v3813_v48  ;;  %v2784_v58 = vld [vmem:[#allocation2 + $0x30] sm:$0xff] }
 0x1e8   : > { %2753 = vst.msk [vmem:[#allocation2 + $0x38] sm:$0xff] %vm632_vm4, %v2743_v55  ;;  %v2981_v59 = vadd.f32 %v2966_v56, %v2784_v58  ;;  %9076 = vmatmul.msk.bf16.gmra.mxu3 %vm700_vm1, %v3668_v45  ;;  %9127 = vmatmul.msk.bf16.gmra.mxu1 %vm700_vm1, %v3904_v54  ;;  %v9136_v54 = vor.u32 %v9996_v46, %v9135_v44  ;;  %v9160_v55 = vld [vmem:[%s10999_s27 + $0x4] sm:$0xe]  ;;  %v9991_v56 = vld [vmem:[%s10999_s27 + $0x4] sm:$0xf0]  ;;  %v3671_v58 = vrot.slane %v3661_v43, 1 }
 0x1ea   : > { %v2598_v60 = vpop.f32.mrf.mxu2  ;;  %2991 = vst.msk [vmem:[#allocation2 + $0x30] sm:$0xff] %vm632_vm4, %v2981_v59  ;;  %v3907_v59 = vrot.slane %v11252_v33, 1  ;;  %v3672_v63 = vsel %vm1220_vm3, %v3669_v4, %v3671_v58  ;;  %v9998_v58 = vld [vmem:[%s10993_s23 + $0x14] sm:$0xff] }
 0x1eb   : > { %v2731_v3 = vpop.f32.mrf.mxu3 }
 0x1ec   : > { %v2876_v61 = vpop.f32.mrf.mxu0  ;;  %v2732_v0 = vadd.f32 %v2731_v3, %v2598_v60  ;;  %v3766_v60 = vld [vmem:[%s10993_s23 + $0x2c] sm:$0x1]  ;;  %v3908_v2 = vsel %vm1220_vm3, %v3905_v62, %v3907_v59 }
 0x1ed   : > { %v2967_v7 = vpop.f32.mrf.mxu1 }
 0x1ee   : > { %v2744_v5 = vadd.f32 %v2732_v0, %v2463_v9  ;;  %v2968_v13 = vadd.f32 %v2967_v7, %v2876_v61  ;;  %v9997_v61 = vld [vmem:[%s10993_s23 + $0xc] sm:$0xff]  ;;  %v3581_v0 = vsel %vm1220_vm3, %v3578_v14, %v3580_v49  ;;  %v3817_v9 = vsel %vm1220_vm3, %v3814_v18, %v3816_v50 }
 0x1ef   : > { %v2785_v20 = vld [vmem:[#allocation2 + $0x38] sm:$0xff]  ;;  %v4051_v14 = vshll.u32 %v9136_v54, 16  ;;  %v4056_v18 = vshrl.u32 %v9997_v61, 16 }
 0x1f0   : > { %2754 = vst.msk [vmem:[#allocation2 + $0x40] sm:$0xff] %vm632_vm4, %v2744_v5  ;;  %v2982_v17 = vadd.f32 %v2968_v13, %v2785_v20  ;;  %v9161_v5 = vor.u32 %v9991_v56, %v9160_v55  ;;  %v3802_v20 = vunpack.c.l.b16 %v3766_v60 }
 0x1f2   : > { %v2600_v21 = vpop.f32.mrf.mxu2  ;;  %2992 = vst.msk [vmem:[#allocation2 + $0x38] sm:$0xff] %vm632_vm4, %v2982_v17  ;;  %v3755_v17 = vld [vmem:[%s10999_s27 + $0x2c] sm:$0x1]  ;;  %v3808_v10 = vpack.c.b16 %v3802_v20, %v3802_v20  ;;  %v4184_v62 = vshll.u32 %v9161_v5, 16  ;;  %v4068_v20 = vshll.u32 %v9998_v58, 16 }
 0x1f3   : > { %v2733_v26 = vpop.f32.mrf.mxu3 }
 0x1f4   : > { %v2879_v22 = vpop.f32.mrf.mxu0  ;;  %v2734_v8 = vadd.f32 %v2733_v26, %v2600_v21  ;;  %v4048_v21 = vshrl.u32 %v9136_v54, 16 }
 0x1f5   : > { %v2970_v29 = vpop.f32.mrf.mxu1 }
 0x1f6   : > { %v2745_v35 = vadd.f32 %v2734_v8, %v2464_v28  ;;  %v2971_v11 = vadd.f32 %v2970_v29, %v2879_v22  ;;  %v3016_v22 = vld [vmem:[#allocation2 + $0x8] sm:$0xff]  ;;  %v4059_v8 = vshll.u32 %v9997_v61, 16  ;;  %v3893_v29 = vunpack.c.l.b16 %v3755_v17  ;;  %v9993_v17 = vld [vmem:[%s10999_s27 + $0x14] sm:$0xff] }
 0x1f7   : > { %9052 = vmatmul.msk.bf16.gmra.mxu2 %vm700_vm1, %v3579_v23  ;;  %9103 = vmatmul.msk.bf16.gmra.mxu0 %vm700_vm1, %v3815_v24  ;;  %v2786_v16 = vld [vmem:[#allocation2 + $0x40] sm:$0xff]  ;;  %v9992_v24 = vld [vmem:[%s10999_s27 + $0xc] sm:$0xff] }
 0x1f8   : > { %2755 = vst.msk [vmem:[#allocation2 + $0x48] sm:$0xff] %vm632_vm4, %v2745_v35  ;;  %v2983_v27 = vadd.f32 %v2971_v11, %v2786_v16  ;;  %9077 = vmatmul.msk.bf16.gmra.mxu3 %vm700_vm1, %v3670_v31  ;;  %9128 = vmatmul.msk.bf16.gmra.mxu1 %vm700_vm1, %v3906_v15  ;;  %v4181_v31 = vshrl.u32 %v9161_v5, 16  ;;  %v4050_v15 = vrot.slane %v4048_v21, 1  ;;  %v4053_v35 = vrot.slane %v4051_v14, 2 }
 0x1f9   : > { %v4058_v11 = vrot.slane %v4056_v18, 1  ;;  %v4189_v1 = vshrl.u32 %v9992_v24, 16  ;;  %v4192_v19 = vshll.u32 %v9992_v24, 16  ;;  %v4070_v18 = vrot.slane %v4068_v20, 2 }
 0x1fa   : > { %v3081_v36 = vpop.f32.mrf.mxu2  ;;  %2993 = vst.msk [vmem:[#allocation2 + $0x40] sm:$0xff] %vm632_vm4, %v2983_v27  ;;  %v4061_v27 = vrot.slane %v4059_v8, 2  ;;  %v4183_v25 = vrot.slane %v4181_v31, 1  ;;  %v4198_v24 = vshrl.u32 %v9993_v17, 16  ;;  %v11323_v8 = vld [vmem:[%s10993_s23 + $0xc] sm:$0xff] }
 0x1fb   : > { %v3158_v40 = vpop.f32.mrf.mxu3  ;;  %v4191_v43 = vrot.slane %v4189_v1, 1  ;;  %v4194_v44 = vrot.slane %v4192_v19, 2  ;;  %v10001_v31 = vld [vmem:[%s10999_s27 + $0x4] sm:$0xf0]  ;;  %v11330_v1 = vld [vmem:[%s10999_s27 + $0xc] sm:$0xff]  ;;  %v4370_v30 = vrot.slane %v11323_v8, 2 }
 0x1fc   : > { %v2881_v34 = vpop.f32.mrf.mxu0  ;;  %v3159_v42 = vadd.f32 %v3158_v40, %v3081_v36  ;;  %v9288_v36 = vld [vmem:[%s12928_s7 + $0x40] sm:$0xf]  ;;  %v3899_v40 = vpack.c.b16 %v3893_v29, %v3893_v29  ;;  %v11296_v49 = vor.u32 %v4061_v27, %v4058_v11  ;;  %v9212_v29 = vld [vmem:[%s10999_s27 + $0x4] sm:$0xc] }
 0x1fd   : > { %v2972_v41 = vpop.f32.mrf.mxu1  ;;  %v4914_v12 = vsel %vm716_vm0, %v9288_v36, 0  ;;  %v11299_v56 = vor.u32 %v4194_v44, %v4191_v43  ;;  %v9213_v19 = vor.u32 %v10001_v31, %v9212_v29  ;;  %v10000_v29 = vld [vmem:[%s10993_s23 + $0x24] sm:$0xff] }
 0x1fe   : > { %v3183_v47 = vadd.f32 %v3159_v42, %v3015_v6  ;;  %v2973_v48 = vadd.f32 %v2972_v41, %v2881_v34  ;;  %4923 = vmatpush.bf16.msra.mxu0 %v4914_v12  ;;  %v3818_v42 = vrot.slane %v3808_v10, 1  ;;  %v4186_v41 = vrot.slane %v4184_v62, 2  ;;  %v3019_v10 = vld [vmem:[#allocation2 + $0x20] sm:$0xff] }
 0x1ff   : > { %v2787_v51 = vld [vmem:[#allocation2 + $0x48] sm:$0xff]  ;;  %v3909_v54 = vrot.slane %v3899_v40, 1  ;;  %v4460_v40 = vrot.slane %v9213_v19, 2 }
 0x200   : > { %3193 = vst.msk [vmem:[#allocation2] sm:$0xff] %vm632_vm4, %v3183_v47  ;;  %v2984_v52 = vadd.f32 %v2973_v48, %v2787_v51  ;;  %v4054_v48 = vor.u32 %v4053_v35, %v4050_v15  ;;  %v4187_v55 = vor.u32 %v4186_v41, %v4183_v25  ;;  %v3819_v61 = vsel %vm1220_vm3, %v3816_v50, %v3818_v42  ;;  %v9999_v41 = vld [vmem:[%s10993_s23 + $0x1c] sm:$0xff] }
 0x201   : > { %v4065_v50 = vshrl.u32 %v9998_v58, 16  ;;  %v4200_v35 = vrot.slane %v4198_v24, 1  ;;  %v4461_v25 = vrot.slane %v11330_v1, 2 }
 0x202   : > { %v3083_v45 = vpop.f32.mrf.mxu2  ;;  %2994 = vst.msk [vmem:[#allocation2 + $0x48] sm:$0xff] %vm632_vm4, %v2984_v52  ;;  %v4196_v38 = vsel %vm1697_vm5, %v4187_v55, %v11299_v56  ;;  %v4077_v55 = vshll.u32 %v9999_v41, 16 }
 0x203   : > { %v3160_v7 = vpop.f32.mrf.mxu3  ;;  %v4067_v14 = vrot.slane %v4065_v50, 1  ;;  %v3021_v50 = vld [vmem:[#allocation2 + $0x30] sm:$0xff] }
 0x204   : > { %v3338_v3 = vpop.f32.mrf.mxu0  ;;  %v3161_v13 = vadd.f32 %v3160_v7, %v3083_v45  ;;  %v3018_v7 = vld [vmem:[#allocation2 + $0x18] sm:$0xff] }
 0x205   : > { %v3462_v23 = vpop.f32.mrf.mxu1  ;;  %v11327_v62 = vor.u32 %v4070_v18, %v4067_v14 }
 0x206   : > { %v3184_v26 = vadd.f32 %v3161_v13, %v3016_v22  ;;  %v3463_v53 = vadd.f32 %v3462_v23, %v3338_v3  ;;  %v4063_v3 = vsel %vm1697_vm5, %v4054_v48, %v11296_v49  ;;  %v3910_v13 = vsel %vm1220_vm3, %v3907_v59, %v3909_v54 }
 0x207   : > { %9053 = vmatmul.msk.bf16.gmra.mxu2 %vm700_vm1, %v3581_v0  ;;  %9104 = vmatmul.msk.bf16.gmra.mxu0 %vm700_vm1, %v3817_v9  ;;  %v3225_v28 = vld [vmem:[#allocation2] sm:$0xff]  ;;  %v4074_v54 = vshrl.u32 %v9999_v41, 16 }
 0x208   : > { %3194 = vst.msk [vmem:[#allocation2 + $0x8] sm:$0xff] %vm632_vm4, %v3184_v26  ;;  %v3487_v57 = vadd.f32 %v3463_v53, %v3225_v28  ;;  %9078 = vmatmul.msk.bf16.gmra.mxu3 %vm700_vm1, %v3672_v63  ;;  %9129 = vmatmul.msk.bf16.gmra.mxu1 %vm700_vm1, %v3908_v2  ;;  %v9187_v63 = vld [vmem:[%s10993_s23 + $0x4] sm:$0xc]  ;;  %v10006_v2 = vld [vmem:[%s10993_s23 + $0x4] sm:$0xf0]  ;;  %v4201_v26 = vshll.u32 %v9993_v17, 16 }
 0x209   : > { %v9188_v28 = vor.u32 %v10006_v2, %v9187_v63 }
 0x20a   : > { %v3086_v4 = vpop.f32.mrf.mxu2  ;;  %3497 = vst.msk [vmem:[#allocation2] sm:$0xff] %vm632_vm4, %v3487_v57  ;;  %v4203_v11 = vrot.slane %v4201_v26, 2 }
 0x20b   : > { %v3163_v34 = vpop.f32.mrf.mxu3  ;;  %v4369_v36 = vrot.slane %v9188_v28, 2 }
 0x20c   : > { %v3340_v16 = vpop.f32.mrf.mxu0  ;;  %v3164_v39 = vadd.f32 %v3163_v34, %v3086_v4 }
 0x20d   : > { %v3464_v6 = vpop.f32.mrf.mxu1  ;;  %v4371_v42 = vsel %vm2020_vm6, %v4369_v36, %v4370_v30 }
 0x20e   : > { %v3185_v46 = vadd.f32 %v3164_v39, %v3017_v32  ;;  %v3465_v47 = vadd.f32 %v3464_v6, %v3340_v16  ;;  %v11334_v39 = vor.u32 %v4203_v11, %v4200_v35  ;;  %v4072_v6 = vsel %vm1697_vm5, %v11296_v49, %v11327_v62  ;;  %v9994_v49 = vld [vmem:[%s10999_s27 + $0x1c] sm:$0xff] }
 0x20f   : > { %v3226_v51 = vld [vmem:[#allocation2 + $0x8] sm:$0xff] }
 0x210   : > { %3195 = vst.msk [vmem:[#allocation2 + $0x10] sm:$0xff] %vm632_vm4, %v3185_v46  ;;  %v3488_v52 = vadd.f32 %v3465_v47, %v3226_v51  ;;  %v3020_v46 = vld [vmem:[#allocation2 + $0x28] sm:$0xff]  ;;  %v4205_v48 = vsel %vm1697_vm5, %v11299_v56, %v11334_v39  ;;  %v4462_v51 = vsel %vm2020_vm6, %v4460_v40, %v4461_v25 }
 0x212   : > { %v3088_v45 = vpop.f32.mrf.mxu2  ;;  %3498 = vst.msk [vmem:[#allocation2 + $0x8] sm:$0xff] %vm632_vm4, %v3488_v52 }
 0x213   : > { %v3165_v0 = vpop.f32.mrf.mxu3 }
 0x214   : > { %v3343_v60 = vpop.f32.mrf.mxu0  ;;  %v3166_v9 = vadd.f32 %v3165_v0, %v3088_v45 }
 0x215   : > { %v3467_v5 = vpop.f32.mrf.mxu1 }
 0x216   : > { %v3186_v21 = vadd.f32 %v3166_v9, %v3018_v7  ;;  %v3468_v22 = vadd.f32 %v3467_v5, %v3343_v60  ;;  %v4076_v9 = vrot.slane %v4074_v54, 1  ;;  %v4079_v7 = vrot.slane %v4077_v55, 2  ;;  %v11357_v5 = vld [vmem:[%s10993_s23 + $0x14] sm:$0xff]  ;;  %v3993_v54 = vld [vmem:[%s10999_s27 + $0x2c] sm:$0x3] }
 0x217   : > { %9105 = vmatmul.msk.bf16.gmra.mxu0 %vm700_vm1, %v3819_v61  ;;  %9153 = vmatmul.msk.bf16.vlgmr.msrb.gmra.mxu2 %vm700_vm1, %v4063_v3  ;;  %v3227_v23 = vld [vmem:[#allocation2 + $0x10] sm:$0xff]  ;;  %v4207_v61 = vshrl.u32 %v9994_v49, 16  ;;  %v4210_v3 = vshll.u32 %v9994_v49, 16 }
 0x218   : > { %3196 = vst.msk [vmem:[#allocation2 + $0x18] sm:$0xff] %vm632_vm4, %v3186_v21  ;;  %v3489_v33 = vadd.f32 %v3468_v22, %v3227_v23  ;;  %9130 = vmatmul.msk.bf16.gmra.mxu1 %vm700_vm1, %v3910_v13  ;;  %9178 = vmatmul.msk.bf16.vlgmr.msrb.gmra.mxu3 %vm700_vm1, %v4196_v38  ;;  %v11360_v22 = vld [vmem:[%s10999_s27 + $0x14] sm:$0xff]  ;;  %v11362_v2 = vor.u32 %v4079_v7, %v4076_v9 }
 0x219   : > { %v4209_v17 = vrot.slane %v4207_v61, 1  ;;  %v4212_v21 = vrot.slane %v4210_v3, 2  ;;  %v4463_v26 = vrot.slane %v11360_v22, 2 }
 0x21a   : > { %v3091_v59 = vpop.f32.mrf.mxu2  ;;  %3499 = vst.msk [vmem:[#allocation2 + $0x10] sm:$0xff] %vm632_vm4, %v3489_v33  ;;  %v4372_v33 = vrot.slane %v11357_v5, 2  ;;  %v4081_v8 = vsel %vm1697_vm5, %v11327_v62, %v11362_v2 }
 0x21b   : > { %v3168_v57 = vpop.f32.mrf.mxu3  ;;  %v4213_v24 = vor.u32 %v4212_v21, %v4209_v17  ;;  %v4464_v62 = vsel %vm2020_vm6, %v4461_v25, %v4463_v26  ;;  %v11390_v25 = vld [vmem:[%s10993_s23 + $0x1c] sm:$0xff]  ;;  %v3024_v17 = vld [vmem:[#allocation2 + $0x48] sm:$0xff] }
 0x21c   : > { %v3345_v53 = vpop.f32.mrf.mxu0  ;;  %v3169_v4 = vadd.f32 %v3168_v57, %v3091_v59  ;;  %v4373_v28 = vsel %vm2020_vm6, %v4370_v30, %v4372_v33 }
 0x21d   : > { %v3469_v15 = vpop.f32.mrf.mxu1  ;;  %v4214_v35 = vsel %vm1697_vm5, %v11334_v39, %v4213_v24 }
 0x21e   : > { %v3187_v16 = vadd.f32 %v3169_v4, %v3019_v10  ;;  %v3470_v27 = vadd.f32 %v3469_v15, %v3345_v53  ;;  %v9995_v4 = vld [vmem:[%s10999_s27 + $0x24] sm:$0xff]  ;;  %v3022_v10 = vld [vmem:[#allocation2 + $0x38] sm:$0xff] }
 0x21f   : > { %v3228_v34 = vld [vmem:[#allocation2 + $0x18] sm:$0xff]  ;;  %v4219_v1 = vshll.u32 %v9995_v4, 16 }
 0x220   : > { %3197 = vst.msk [vmem:[#allocation2 + $0x20] sm:$0xff] %vm632_vm4, %v3187_v16  ;;  %v3490_v12 = vadd.f32 %v3470_v27, %v3228_v34  ;;  %v4083_v16 = vshrl.u32 %v10000_v29, 16  ;;  %v4086_v27 = vshll.u32 %v10000_v29, 16  ;;  %v11427_v29 = vld [vmem:[%s10993_s23 + $0x24] sm:$0xff] }
 0x222   : > { %v3093_v37 = vpop.f32.mrf.mxu2  ;;  %3500 = vst.msk [vmem:[#allocation2 + $0x18] sm:$0xff] %vm632_vm4, %v3490_v12  ;;  %v4216_v12 = vshrl.u32 %v9995_v4, 16  ;;  %v4085_v39 = vrot.slane %v4083_v16, 1  ;;  %v4088_v40 = vrot.slane %v4086_v27, 2  ;;  %v11438_v27 = vld [vmem:[%s10999_s27 + $0x24] sm:$0xff] }
 0x223   : > { %v3170_v43 = vpop.f32.mrf.mxu3 }
 0x224   : > { %v3348_v32 = vpop.f32.mrf.mxu0  ;;  %v3171_v44 = vadd.f32 %v3170_v43, %v3093_v37  ;;  %v4218_v41 = vrot.slane %v4216_v12, 1  ;;  %v4221_v43 = vrot.slane %v4219_v1, 2  ;;  %v4376_v12 = vrot.slane %v11427_v29, 2 }
 0x225   : > { %v3472_v47 = vpop.f32.mrf.mxu1 }
 0x226   : > { %v3188_v52 = vadd.f32 %v3171_v44, %v3020_v46  ;;  %v3473_v45 = vadd.f32 %v3472_v47, %v3348_v32  ;;  %v4004_v32 = vld [vmem:[%s10993_s23 + $0x2c] sm:$0x3]  ;;  %v3023_v44 = vld [vmem:[#allocation2 + $0x40] sm:$0xff] }
 0x227   : > { %9154 = vmatmul.msk.bf16.gmra.mxu2 %vm700_vm1, %v4072_v6  ;;  %9205 = vmatmul.msk.bf16.vlgmr.msrb.gmra.mxu0 %vm700_vm1, %v4371_v42  ;;  %v3229_v58 = vld [vmem:[#allocation2 + $0x20] sm:$0xff] }
 0x228   : > { %3198 = vst.msk [vmem:[#allocation2 + $0x28] sm:$0xff] %vm632_vm4, %v3188_v52  ;;  %v3491_v60 = vadd.f32 %v3473_v45, %v3229_v58  ;;  %9179 = vmatmul.msk.bf16.gmra.mxu3 %vm700_vm1, %v4205_v48  ;;  %9230 = vmatmul.msk.bf16.vlgmr.msrb.gmra.mxu1 %vm700_vm1, %v4462_v51  ;;  %v11394_v47 = vld [vmem:[%s10999_s27 + $0x1c] sm:$0xff]  ;;  %v4040_v48 = vunpack.c.l.b16 %v4004_v32  ;;  %v11396_v52 = vor.u32 %v4088_v40, %v4085_v39  ;;  %v4374_v45 = vrot.slane %v11390_v25, 2 }
 0x229   : > { %v4465_v61 = vrot.slane %v11394_v47, 2  ;;  %v4467_v32 = vrot.slane %v11438_v27, 2 }
 0x22a   : > { %v3096_v56 = vpop.f32.mrf.mxu2  ;;  %3501 = vst.msk [vmem:[#allocation2 + $0x20] sm:$0xff] %vm632_vm4, %v3491_v60  ;;  %v4046_v3 = vpack.c.b16 %v4040_v48, %v4040_v48  ;;  %v4090_v7 = vsel %vm1697_vm5, %v11362_v2, %v11396_v52  ;;  %v3530_v48 = vld [vmem:[#allocation2 + $0x8] sm:$0xff] }
 0x22b   : > { %v3173_v13 = vpop.f32.mrf.mxu3  ;;  %v4468_v25 = vsel %vm2020_vm6, %v4465_v61, %v4467_v32 }
 0x22c   : > { %v3350_v0 = vpop.f32.mrf.mxu0  ;;  %v3174_v38 = vadd.f32 %v3173_v13, %v3096_v56  ;;  %v11401_v56 = vor.u32 %v4221_v43, %v4218_v41  ;;  %v4375_v13 = vsel %vm2020_vm6, %v4372_v33, %v4374_v45  ;;  %v4092_v5 = vshrl.u32 %v4046_v3, 16  ;;  %v4326_v43 = vld [vmem:[%s10993_s23 + $0x2c] sm:$0x3] }
 0x22d   : > { %v3474_v20 = vpop.f32.mrf.mxu1  ;;  %v4377_v41 = vsel %vm2020_vm6, %v4374_v45, %v4376_v12  ;;  %v4315_v45 = vld [vmem:[%s10999_s27 + $0x2c] sm:$0x3] }
 0x22e   : > { %v3189_v23 = vadd.f32 %v3174_v38, %v3021_v50  ;;  %v3475_v63 = vadd.f32 %v3474_v20, %v3350_v0  ;;  %v4173_v0 = vunpack.c.l.b16 %v3993_v54  ;;  %v4223_v20 = vsel %vm1697_vm5, %v4213_v24, %v11401_v56 }
 0x22f   : > { %v3230_v59 = vld [vmem:[#allocation2 + $0x28] sm:$0xff] }
 0x230   : > { %3199 = vst.msk [vmem:[#allocation2 + $0x30] sm:$0xff] %vm632_vm4, %v3189_v23  ;;  %v3492_v14 = vadd.f32 %v3475_v63, %v3230_v59  ;;  %v4466_v23 = vsel %vm2020_vm6, %v4463_v26, %v4465_v61  ;;  %v4095_v63 = vshll.u32 %v4046_v3, 16  ;;  %v4179_v2 = vpack.c.b16 %v4173_v0, %v4173_v0  ;;  %v10016_v3 = vld [vmem:[%s10993_s23 + $0x8] sm:$0xf0]  ;;  %v9264_v61 = vld [vmem:[%s10999_s27 + $0x8] sm:$0xc] }
 0x231   : > { %v4453_v0 = vunpack.c.l.b16 %v4315_v45  ;;  %v11512_v45 = vld [vmem:[%s10993_s23 + $0x18] sm:$0xff] }
 0x232   : > { %v3098_v18 = vpop.f32.mrf.mxu2  ;;  %3502 = vst.msk [vmem:[#allocation2 + $0x28] sm:$0xff] %vm632_vm4, %v3492_v14  ;;  %v4225_v22 = vshrl.u32 %v4179_v2, 16 }
 0x233   : > { %v3175_v31 = vpop.f32.mrf.mxu3 }
 0x234   : > { %v3353_v53 = vpop.f32.mrf.mxu0  ;;  %v3176_v57 = vadd.f32 %v3175_v31, %v3098_v18  ;;  %v9340_v31 = vld [vmem:[%s12928_s7 + $0x44] sm:$0xf] }
 0x235   : > { %v3477_v15 = vpop.f32.mrf.mxu1 }
 0x236   : > { %v3190_v11 = vadd.f32 %v3176_v57, %v3022_v10  ;;  %v3478_v19 = vadd.f32 %v3477_v15, %v3353_v53  ;;  %v4094_v53 = vrot.slane %v4092_v5, 1  ;;  %v9339_v57 = vld [vmem:[%s12927_s6 + $0x44] sm:$0xf]  ;;  %v5194_v10 = vsel %vm716_vm0, %v9340_v31, 0  ;;  %v10026_v31 = vld [vmem:[%s10993_s23 + $0x8] sm:$0xf0] }
 0x237   : > { %9155 = vmatmul.msk.bf16.gmra.mxu2 %vm700_vm1, %v4081_v8  ;;  %9206 = vmatmul.msk.bf16.gmra.mxu0 %vm700_vm1, %v4373_v28  ;;  %v3231_v36 = vld [vmem:[#allocation2 + $0x30] sm:$0xff]  ;;  %v4097_v8 = vrot.slane %v4095_v63, 2  ;;  %v4228_v28 = vshll.u32 %v4179_v2, 16  ;;  %v5285_v15 = vsel %vm716_vm0, %v9339_v57, 0  ;;  %v4459_v2 = vpack.c.b16 %v4453_v0, %v4453_v0 }
 0x238   : > { %3200 = vst.msk [vmem:[#allocation2 + $0x38] sm:$0xff] %vm632_vm4, %v3190_v11  ;;  %v3493_v30 = vadd.f32 %v3478_v19, %v3231_v36  ;;  %9180 = vmatmul.msk.bf16.gmra.mxu3 %vm700_vm1, %v4214_v35  ;;  %9231 = vmatmul.msk.bf16.gmra.mxu1 %vm700_vm1, %v4464_v62  ;;  %v3529_v62 = vld [vmem:[#allocation2] sm:$0xff]  ;;  %v4227_v19 = vrot.slane %v4225_v22, 1 }
 0x239   : > { %5203 = vmatpush.bf16.msrb.mxu2 %v5194_v10  ;;  %5294 = vmatpush.bf16.msrb.mxu3 %v5285_v15  ;;  %v4230_v16 = vrot.slane %v4228_v28, 2  ;;  %v4469_v15 = vrot.slane %v4459_v2, 2 }
 0x23a   : > { %v3101_v34 = vpop.f32.mrf.mxu2  ;;  %3503 = vst.msk [vmem:[#allocation2 + $0x30] sm:$0xff] %vm632_vm4, %v3493_v30 }
 0x23b   : > { %v3178_v6 = vpop.f32.mrf.mxu3  ;;  %v4231_v40 = vor.u32 %v4230_v16, %v4227_v19  ;;  %v9316_v19 = vld [vmem:[%s10999_s27 + $0x8] sm:$0xc]  ;;  %v10021_v16 = vld [vmem:[%s10999_s27 + $0x8] sm:$0xf0] }
 0x23c   : > { %v3355_v37 = vpop.f32.mrf.mxu0  ;;  %v3179_v42 = vadd.f32 %v3178_v6, %v3101_v34  ;;  %v4098_v34 = vor.u32 %v4097_v8, %v4094_v53 }
 0x23d   : > { %v3479_v46 = vpop.f32.mrf.mxu1 }
 0x23e   : > { %v3191_v51 = vadd.f32 %v3179_v42, %v3023_v44  ;;  %v3480_v49 = vadd.f32 %v3479_v46, %v3355_v37  ;;  %v4099_v42 = vsel %vm1697_vm5, %v11396_v52, %v4098_v34  ;;  %v4362_v52 = vunpack.c.l.b16 %v4326_v43 }
 0x23f   : > { %v3232_v55 = vld [vmem:[#allocation2 + $0x38] sm:$0xff] }
 0x240   : > { %3201 = vst.msk [vmem:[#allocation2 + $0x40] sm:$0xff] %vm632_vm4, %v3191_v51  ;;  %v3494_v58 = vadd.f32 %v3480_v49, %v3232_v55  ;;  %v4232_v49 = vsel %vm1697_vm5, %v11401_v56, %v4231_v40  ;;  %v9317_v40 = vor.u32 %v10021_v16, %v9316_v19 }
 0x242   : > { %v3103_v60 = vpop.f32.mrf.mxu2  ;;  %3504 = vst.msk [vmem:[#allocation2 + $0x38] sm:$0xff] %vm632_vm4, %v3494_v58 }
 0x243   : > { %v3180_v38 = vpop.f32.mrf.mxu3 }
 0x244   : > { %v3358_v9 = vpop.f32.mrf.mxu0  ;;  %v3181_v50 = vadd.f32 %v3180_v38, %v3103_v60  ;;  %v9239_v60 = vld [vmem:[%s10993_s23 + $0x8] sm:$0xc]  ;;  %v11471_v38 = vld [vmem:[%s10993_s23 + $0x10] sm:$0xff] }
 0x245   : > { %v3482_v21 = vpop.f32.mrf.mxu1  ;;  %v4608_v28 = vrot.slane %v11471_v38, 2  ;;  %v10023_v38 = vld [vmem:[%s10999_s27 + $0x18] sm:$0xff] }
 0x246   : > { %v3192_v33 = vadd.f32 %v3181_v50, %v3024_v17  ;;  %v3483_v59 = vadd.f32 %v3482_v21, %v3358_v9  ;;  %v4368_v9 = vpack.c.b16 %v4362_v52, %v4362_v52  ;;  %v9240_v50 = vor.u32 %v10016_v3, %v9239_v60  ;;  %v9391_v17 = vld [vmem:[%s12927_s6 + $0x48] sm:$0xf] }
 0x247   : > { %9156 = vmatmul.msk.bf16.gmra.mxu2 %vm700_vm1, %v4090_v7  ;;  %9207 = vmatmul.msk.bf16.gmra.mxu0 %vm700_vm1, %v4375_v13  ;;  %v3233_v14 = vld [vmem:[#allocation2 + $0x40] sm:$0xff]  ;;  %v10011_v7 = vld [vmem:[%s10999_s27 + $0x8] sm:$0xf0]  ;;  %v5493_v5 = vsel %vm716_vm0, %v9391_v17, 0  ;;  %v4979_v52 = vshrl.u32 %v9317_v40, 16  ;;  %v11517_v17 = vld [vmem:[%s10999_s27 + $0x18] sm:$0xff] }
 0x248   : > { %3202 = vst.msk [vmem:[#allocation2 + $0x48] sm:$0xff] %vm632_vm4, %v3192_v33  ;;  %v3495_v18 = vadd.f32 %v3483_v59, %v3233_v14  ;;  %9181 = vmatmul.msk.bf16.gmra.mxu3 %vm700_vm1, %v4223_v20  ;;  %9232 = vmatmul.msk.bf16.gmra.mxu1 %vm700_vm1, %v4466_v23  ;;  %v9392_v20 = vld [vmem:[%s12928_s7 + $0x48] sm:$0xf]  ;;  %v3531_v33 = vld [vmem:[#allocation2 + $0x10] sm:$0xff]  ;;  %v4378_v14 = vrot.slane %v4368_v9, 2  ;;  %v4607_v22 = vrot.slane %v9240_v50, 2 }
 0x249   : > { %v5416_v23 = vsel %vm716_vm0, %v9392_v20, 0  ;;  %5502 = vmatpush.bf16.msrb.mxu1 %v5493_v5  ;;  %v4610_v20 = vrot.slane %v11512_v45, 2  ;;  %v10024_v45 = vld [vmem:[%s10999_s27 + $0x20] sm:$0xff] }
 0x24a   : > { %v3609_v24 = vpop.f32.mrf.mxu2  ;;  %3505 = vst.msk [vmem:[#allocation2 + $0x40] sm:$0xff] %vm632_vm4, %v3495_v18  ;;  %5425 = vmatpush.bf16.msrb.mxu0 %v5416_v23  ;;  %v11482_v18 = vld [vmem:[%s10999_s27 + $0x10] sm:$0xff]  ;;  %v4609_v34 = vsel %vm2020_vm6, %v4607_v22, %v4608_v28 }
 0x24b   : > { %v3700_v4 = vpop.f32.mrf.mxu3 }
 0x24c   : > { %v3360_v26 = vpop.f32.mrf.mxu0  ;;  %v3701_v35 = vadd.f32 %v3700_v4, %v3609_v24  ;;  %v9265_v24 = vor.u32 %v10011_v7, %v9264_v61  ;;  %v4981_v7 = vrot.slane %v4979_v52, 2 }
 0x24d   : > { %v3484_v11 = vpop.f32.mrf.mxu1 }
 0x24e   : > { %v3725_v36 = vadd.f32 %v3701_v35, %v3529_v62  ;;  %v3485_v30 = vadd.f32 %v3484_v11, %v3360_v26  ;;  %v9291_v26 = vld [vmem:[%s10993_s23 + $0x8] sm:$0xc]  ;;  %v4698_v35 = vrot.slane %v9265_v24, 2  ;;  %v4699_v62 = vrot.slane %v11482_v18, 2 }
 0x24f   : > { %v3234_v1 = vld [vmem:[#allocation2 + $0x48] sm:$0xff]  ;;  %v9292_v11 = vor.u32 %v10026_v31, %v9291_v26 }
 0x250   : > { %3735 = vst.msk [vmem:[#allocation2] sm:$0xff] %vm632_vm4, %v3725_v36  ;;  %v3496_v37 = vadd.f32 %v3485_v30, %v3234_v1  ;;  %v4379_v30 = vsel %vm2020_vm6, %v4376_v12, %v4378_v14  ;;  %v10027_v1 = vld [vmem:[%s10993_s23 + $0x10] sm:$0xff]  ;;  %v4700_v29 = vsel %vm2020_vm6, %v4698_v35, %v4699_v62 }
 0x251   : > { %v4846_v12 = vshrl.u32 %v9292_v11, 16  ;;  %v4849_v43 = vshll.u32 %v9292_v11, 16  ;;  %v3534_v11 = vld [vmem:[#allocation2 + $0x28] sm:$0xff] }
 0x252   : > { %v3611_v39 = vpop.f32.mrf.mxu2  ;;  %3506 = vst.msk [vmem:[#allocation2 + $0x48] sm:$0xff] %vm632_vm4, %v3496_v37 }
 0x253   : > { %v3702_v44 = vpop.f32.mrf.mxu3  ;;  %v4848_v3 = vrot.slane %v4846_v12, 2 }
 0x254   : > { %v3847_v6 = vpop.f32.mrf.mxu0  ;;  %v3703_v46 = vadd.f32 %v3702_v44, %v3611_v39  ;;  %v10022_v44 = vld [vmem:[%s10999_s27 + $0x10] sm:$0xff] }
 0x255   : > { %v3938_v51 = vpop.f32.mrf.mxu1 }
 0x256   : > { %v3726_v54 = vadd.f32 %v3703_v46, %v3530_v48  ;;  %v3939_v55 = vadd.f32 %v3938_v51, %v3847_v6  ;;  %v3532_v6 = vld [vmem:[#allocation2 + $0x18] sm:$0xff]  ;;  %v4854_v51 = vshrl.u32 %v10027_v1, 16 }
 0x257   : > { %9157 = vmatmul.msk.bf16.gmra.mxu2 %vm700_vm1, %v4099_v42  ;;  %9208 = vmatmul.msk.bf16.gmra.mxu0 %vm700_vm1, %v4377_v41  ;;  %v3767_v58 = vld [vmem:[#allocation2] sm:$0xff]  ;;  %v4470_v41 = vsel %vm2020_vm6, %v4467_v32, %v4469_v15 }
 0x258   : > { %3736 = vst.msk [vmem:[#allocation2 + $0x8] sm:$0xff] %vm632_vm4, %v3726_v54  ;;  %v3963_v56 = vadd.f32 %v3939_v55, %v3767_v58  ;;  %9182 = vmatmul.msk.bf16.gmra.mxu3 %vm700_vm1, %v4232_v49  ;;  %9233 = vmatmul.msk.bf16.gmra.mxu1 %vm700_vm1, %v4468_v25  ;;  %v4857_v49 = vshll.u32 %v10027_v1, 16  ;;  %v4982_v54 = vshll.u32 %v9317_v40, 16  ;;  %v4987_v55 = vshrl.u32 %v10022_v44, 16 }
 0x259   : > { %v4990_v58 = vshll.u32 %v10022_v44, 16  ;;  %v4999_v40 = vshll.u32 %v10023_v38, 16  ;;  %v3535_v44 = vld [vmem:[#allocation2 + $0x30] sm:$0xff] }
 0x25a   : > { %v3614_v47 = vpop.f32.mrf.mxu2  ;;  %3973 = vst.msk [vmem:[#allocation2] sm:$0xff] %vm632_vm4, %v3963_v56  ;;  %v4851_v56 = vrot.slane %v4849_v43, 3  ;;  %v4859_v0 = vrot.slane %v4857_v49, 3  ;;  %v4989_v23 = vrot.slane %v4987_v55, 2 }
 0x25b   : > { %v3705_v21 = vpop.f32.mrf.mxu3  ;;  %v4992_v5 = vrot.slane %v4990_v58, 3  ;;  %v5001_v49 = vrot.slane %v4999_v40, 3 }
 0x25c   : > { %v3849_v13 = vpop.f32.mrf.mxu0  ;;  %v3706_v63 = vadd.f32 %v3705_v21, %v3614_v47  ;;  %v4856_v47 = vrot.slane %v4854_v51, 2  ;;  %v4984_v21 = vrot.slane %v4982_v54, 3 }
 0x25d   : > { %v3940_v59 = vpop.f32.mrf.mxu1  ;;  %v4993_v26 = vor.u32 %v4992_v5, %v4989_v23 }
 0x25e   : > { %v3727_v53 = vadd.f32 %v3706_v63, %v3531_v33  ;;  %v3941_v8 = vadd.f32 %v3940_v59, %v3849_v13  ;;  %v3533_v13 = vld [vmem:[#allocation2 + $0x20] sm:$0xff]  ;;  %v4852_v33 = vor.u32 %v4851_v56, %v4848_v3  ;;  %v4860_v59 = vor.u32 %v4859_v0, %v4856_v47 }
 0x25f   : > { %v3768_v57 = vld [vmem:[#allocation2 + $0x8] sm:$0xff]  ;;  %v4985_v22 = vor.u32 %v4984_v21, %v4981_v7 }
 0x260   : > { %3737 = vst.msk [vmem:[#allocation2 + $0x10] sm:$0xff] %vm632_vm4, %v3727_v53  ;;  %v3964_v4 = vadd.f32 %v3941_v8, %v3768_v57  ;;  %v4701_v8 = vrot.slane %v11517_v17, 2  ;;  %v4611_v57 = vsel %vm2020_vm6, %v4608_v28, %v4610_v20 }
 0x262   : > { %v3616_v10 = vpop.f32.mrf.mxu2  ;;  %3974 = vst.msk [vmem:[#allocation2 + $0x8] sm:$0xff] %vm632_vm4, %v3964_v4  ;;  %v4861_v4 = vsel %vm2497_vm7, %v4852_v33, %v4860_v59  ;;  %v4702_v16 = vsel %vm2020_vm6, %v4699_v62, %v4701_v8  ;;  %v4996_v62 = vshrl.u32 %v10023_v38, 16 }
 0x263   : > { %v3707_v37 = vpop.f32.mrf.mxu3 }
 0x264   : > { %v3852_v36 = vpop.f32.mrf.mxu0  ;;  %v3708_v39 = vadd.f32 %v3707_v37, %v3616_v10  ;;  %v10028_v10 = vld [vmem:[%s10993_s23 + $0x18] sm:$0xff]  ;;  %v4998_v51 = vrot.slane %v4996_v62, 2 }
 0x265   : > { %v3943_v42 = vpop.f32.mrf.mxu1  ;;  %v4866_v1 = vshll.u32 %v10028_v10, 16 }
 0x266   : > { %v3728_v46 = vadd.f32 %v3708_v39, %v3532_v6  ;;  %v3944_v48 = vadd.f32 %v3943_v42, %v3852_v36  ;;  %v4994_v36 = vsel %vm2497_vm7, %v4985_v22, %v4993_v26  ;;  %v11541_v42 = vld [vmem:[%s10993_s23 + $0x20] sm:$0xff]  ;;  %v11549_v3 = vor.u32 %v5001_v49, %v4998_v51 }
 0x267   : > { %9209 = vmatmul.msk.bf16.gmra.mxu0 %vm700_vm1, %v4379_v30  ;;  %9257 = vmatmul.msk.bf16.vlgmr.msra.gmra.mxu2 %vm700_vm1, %v4609_v34  ;;  %v3769_v25 = vld [vmem:[#allocation2 + $0x10] sm:$0xff]  ;;  %v4863_v34 = vshrl.u32 %v10028_v10, 16 }
 0x268   : > { %3738 = vst.msk [vmem:[#allocation2 + $0x18] sm:$0xff] %vm632_vm4, %v3728_v46  ;;  %v3965_v27 = vadd.f32 %v3944_v48, %v3769_v25  ;;  %9234 = vmatmul.msk.bf16.gmra.mxu1 %vm700_vm1, %v4470_v41  ;;  %9282 = vmatmul.msk.bf16.vlgmr.msra.gmra.mxu3 %vm700_vm1, %v4700_v29  ;;  %v4868_v29 = vrot.slane %v4866_v1, 3  ;;  %v11544_v48 = vld [vmem:[%s10999_s27 + $0x20] sm:$0xff]  ;;  %v5003_v21 = vsel %vm2497_vm7, %v4993_v26, %v11549_v3 }
 0x269   : > { %v4865_v41 = vrot.slane %v4863_v34, 2 }
 0x26a   : > { %v3619_v32 = vpop.f32.mrf.mxu2  ;;  %3975 = vst.msk [vmem:[#allocation2 + $0x10] sm:$0xff] %vm632_vm4, %v3965_v27 }
 0x26b   : > { %v3710_v9 = vpop.f32.mrf.mxu3  ;;  %v4869_v52 = vor.u32 %v4868_v29, %v4865_v41  ;;  %v3538_v29 = vld [vmem:[#allocation2 + $0x48] sm:$0xff] }
 0x26c   : > { %v3854_v60 = vpop.f32.mrf.mxu0  ;;  %v3711_v61 = vadd.f32 %v3710_v9, %v3619_v32  ;;  %v4612_v32 = vrot.slane %v11541_v42, 2  ;;  %v10029_v9 = vld [vmem:[%s10993_s23 + $0x20] sm:$0xff]  ;;  %v4564_v42 = vld [vmem:[%s10993_s23 + $0x30] sm:$0x3] }
 0x26d   : > { %v3945_v50 = vpop.f32.mrf.mxu1  ;;  %v4870_v0 = vsel %vm2497_vm7, %v4860_v59, %v4869_v52  ;;  %v4872_v5 = vshrl.u32 %v10029_v9, 16 }
 0x26e   : > { %v3729_v63 = vadd.f32 %v3711_v61, %v3533_v13  ;;  %v3946_v2 = vadd.f32 %v3945_v50, %v3854_v60  ;;  %v4703_v60 = vrot.slane %v11544_v48, 2  ;;  %v4613_v47 = vsel %vm2020_vm6, %v4610_v20, %v4612_v32  ;;  %v3536_v13 = vld [vmem:[#allocation2 + $0x38] sm:$0xff]  ;;  %v10025_v48 = vld [vmem:[%s10999_s27 + $0x28] sm:$0xff] }
 0x26f   : > { %v3770_v14 = vld [vmem:[#allocation2 + $0x18] sm:$0xff]  ;;  %v4874_v22 = vrot.slane %v4872_v5, 2 }
 0x270   : > { %3739 = vst.msk [vmem:[#allocation2 + $0x20] sm:$0xff] %vm632_vm4, %v3729_v63  ;;  %v3966_v24 = vadd.f32 %v3946_v2, %v3770_v14  ;;  %v4704_v17 = vsel %vm2020_vm6, %v4701_v8, %v4703_v60  ;;  %v4875_v63 = vshll.u32 %v10029_v9, 16  ;;  %v5005_v14 = vshrl.u32 %v10024_v45, 16  ;;  %v11568_v8 = vld [vmem:[%s10993_s23 + $0x28] sm:$0xff] }
 0x272   : > { %v3621_v53 = vpop.f32.mrf.mxu2  ;;  %3976 = vst.msk [vmem:[#allocation2 + $0x18] sm:$0xff] %vm632_vm4, %v3966_v24  ;;  %v5008_v24 = vshll.u32 %v10024_v45, 16  ;;  %v4877_v26 = vrot.slane %v4875_v63, 3 }
 0x273   : > { %v3712_v15 = vpop.f32.mrf.mxu3 }
 0x274   : > { %v3857_v31 = vpop.f32.mrf.mxu0  ;;  %v3713_v35 = vadd.f32 %v3712_v15, %v3621_v53  ;;  %v11571_v15 = vld [vmem:[%s10999_s27 + $0x28] sm:$0xff]  ;;  %v11574_v38 = vor.u32 %v4877_v26, %v4874_v22 }
 0x275   : > { %v3948_v19 = vpop.f32.mrf.mxu1  ;;  %v4705_v1 = vrot.slane %v11571_v15, 2 }
 0x276   : > { %v3730_v28 = vadd.f32 %v3713_v35, %v3534_v11  ;;  %v3949_v30 = vadd.f32 %v3948_v19, %v3857_v31  ;;  %v5007_v35 = vrot.slane %v5005_v14, 2  ;;  %v5010_v11 = vrot.slane %v5008_v24, 3 }
 0x277   : > { %9258 = vmatmul.msk.bf16.gmra.mxu2 %vm700_vm1, %v4611_v57  ;;  %9309 = vmatmul.msk.bf16.vlgmr.msra.gmra.mxu0 %vm700_vm1, %v4861_v4  ;;  %v3771_v37 = vld [vmem:[#allocation2 + $0x20] sm:$0xff]  ;;  %v4879_v40 = vsel %vm2497_vm7, %v4869_v52, %v11574_v38 }
 0x278   : > { %3740 = vst.msk [vmem:[#allocation2 + $0x28] sm:$0xff] %vm632_vm4, %v3730_v28  ;;  %v3967_v39 = vadd.f32 %v3949_v30, %v3771_v37  ;;  %9283 = vmatmul.msk.bf16.gmra.mxu3 %vm700_vm1, %v4702_v16  ;;  %9334 = vmatmul.msk.bf16.vlgmr.msra.gmra.mxu1 %vm700_vm1, %v4994_v36  ;;  %v3537_v4 = vld [vmem:[#allocation2 + $0x40] sm:$0xff]  ;;  %v4614_v36 = vrot.slane %v11568_v8, 2  ;;  %v11578_v37 = vor.u32 %v5010_v11, %v5007_v35 }
 0x27a   : > { %v3624_v18 = vpop.f32.mrf.mxu2  ;;  %3977 = vst.msk [vmem:[#allocation2 + $0x20] sm:$0xff] %vm632_vm4, %v3967_v39  ;;  %v10030_v39 = vld [vmem:[%s10993_s23 + $0x28] sm:$0xff]  ;;  %v4615_v62 = vsel %vm2020_vm6, %v4612_v32, %v4614_v36 }
 0x27b   : > { %v3715_v12 = vpop.f32.mrf.mxu3  ;;  %v4884_v32 = vshll.u32 %v10030_v39, 16 }
 0x27c   : > { %v3859_v6 = vpop.f32.mrf.mxu0  ;;  %v3716_v43 = vadd.f32 %v3715_v12, %v3624_v18 }
 0x27d   : > { %v3950_v46 = vpop.f32.mrf.mxu1 }
 0x27e   : > { %v3731_v25 = vadd.f32 %v3716_v43, %v3535_v44  ;;  %v3951_v27 = vadd.f32 %v3950_v46, %v3859_v6  ;;  %v4706_v43 = vsel %vm2020_vm6, %v4703_v60, %v4705_v1  ;;  %v5012_v44 = vsel %vm2497_vm7, %v11549_v3, %v11578_v37 }
 0x27f   : > { %v3772_v54 = vld [vmem:[#allocation2 + $0x28] sm:$0xff]  ;;  %v4881_v46 = vshrl.u32 %v10030_v39, 16  ;;  %v5014_v3 = vshrl.u32 %v10025_v48, 16 }
 0x280   : > { %3741 = vst.msk [vmem:[#allocation2 + $0x30] sm:$0xff] %vm632_vm4, %v3731_v25  ;;  %v3968_v55 = vadd.f32 %v3951_v27, %v3772_v54  ;;  %v4600_v25 = vunpack.c.l.b16 %v4564_v42  ;;  %v4553_v27 = vld [vmem:[%s10999_s27 + $0x30] sm:$0x3] }
 0x281   : > { %v4883_v60 = vrot.slane %v4881_v46, 2  ;;  %v5016_v63 = vrot.slane %v5014_v3, 2  ;;  %v4007_v3 = vld [vmem:[#allocation2 + $0x10] sm:$0xff] }
 0x282   : > { %v3626_v58 = vpop.f32.mrf.mxu2  ;;  %3978 = vst.msk [vmem:[#allocation2 + $0x28] sm:$0xff] %vm632_vm4, %v3968_v55  ;;  %v4606_v9 = vpack.c.b16 %v4600_v25, %v4600_v25  ;;  %v11642_v25 = vld [vmem:[%s10993_s23 + $0x10] sm:$0xff] }
 0x283   : > { %v3717_v61 = vpop.f32.mrf.mxu3 }
 0x284   : > { %v3862_v56 = vpop.f32.mrf.mxu0  ;;  %v3718_v7 = vadd.f32 %v3717_v61, %v3626_v58  ;;  %v4691_v58 = vunpack.c.l.b16 %v4553_v27  ;;  %v4886_v61 = vrot.slane %v4884_v32, 3  ;;  %v9496_v32 = vld [vmem:[%s12928_s7 + $0x50] sm:$0xf] }
 0x285   : > { %v3953_v50 = vpop.f32.mrf.mxu1 }
 0x286   : > { %v3732_v23 = vadd.f32 %v3718_v7, %v3536_v13  ;;  %v3954_v20 = vadd.f32 %v3953_v50, %v3862_v56  ;;  %v5017_v56 = vshll.u32 %v10025_v48, 16  ;;  %v9444_v7 = vld [vmem:[%s12928_s7 + $0x4c] sm:$0xf]  ;;  %v4697_v5 = vpack.c.b16 %v4691_v58, %v4691_v58  ;;  %v9368_v48 = vld [vmem:[%s10999_s27 + $0x8] sm:$0x8] }
 0x287   : > { %9259 = vmatmul.msk.bf16.gmra.mxu2 %vm700_vm1, %v4613_v47  ;;  %9310 = vmatmul.msk.bf16.gmra.mxu0 %vm700_vm1, %v4870_v0  ;;  %v3773_v2 = vld [vmem:[#allocation2 + $0x30] sm:$0xff]  ;;  %v9443_v13 = vld [vmem:[%s12927_s6 + $0x4c] sm:$0xf]  ;;  %v11612_v22 = vor.u32 %v4886_v61, %v4883_v60 }
 0x288   : > { %3742 = vst.msk [vmem:[#allocation2 + $0x38] sm:$0xff] %vm632_vm4, %v3732_v23  ;;  %v3969_v33 = vadd.f32 %v3954_v20, %v3773_v2  ;;  %9284 = vmatmul.msk.bf16.gmra.mxu3 %vm700_vm1, %v4704_v17  ;;  %9335 = vmatmul.msk.bf16.gmra.mxu1 %vm700_vm1, %v5003_v21  ;;  %v4802_v47 = vld [vmem:[%s10993_s23 + $0x30] sm:$0x7]  ;;  %v5673_v17 = vsel %vm716_vm0, %v9444_v7, 0  ;;  %v5797_v21 = vsel %vm716_vm0, %v9443_v13, 0  ;;  %v4005_v23 = vld [vmem:[#allocation2] sm:$0xff] }
 0x289   : > { %5682 = vmatpush.bf16.msra.mxu2 %v5673_v17  ;;  %5806 = vmatpush.bf16.msra.mxu3 %v5797_v21  ;;  %v5019_v2 = vrot.slane %v5017_v56, 3  ;;  %v11659_v61 = vld [vmem:[%s10999_s27 + $0x10] sm:$0xff]  ;;  %v5168_v21 = vrot.slane %v11642_v25, 3 }
 0x28a   : > { %v3629_v59 = vpop.f32.mrf.mxu2  ;;  %3979 = vst.msk [vmem:[#allocation2 + $0x30] sm:$0xff] %vm632_vm4, %v3969_v33  ;;  %v4838_v33 = vunpack.c.l.b16 %v4802_v47 }
 0x28b   : > { %v3720_v31 = vpop.f32.mrf.mxu3  ;;  %v11615_v35 = vor.u32 %v5019_v2, %v5016_v63  ;;  %v5259_v2 = vrot.slane %v11659_v61, 3 }
 0x28c   : > { %v3864_v53 = vpop.f32.mrf.mxu0  ;;  %v3721_v57 = vadd.f32 %v3720_v31, %v3629_v59  ;;  %v4791_v59 = vld [vmem:[%s10999_s27 + $0x30] sm:$0x7]  ;;  %v4844_v11 = vpack.c.b16 %v4838_v33, %v4838_v33 }
 0x28d   : > { %v3955_v10 = vpop.f32.mrf.mxu1 }
 0x28e   : > { %v3733_v19 = vadd.f32 %v3721_v57, %v3537_v4  ;;  %v3956_v16 = vadd.f32 %v3955_v10, %v3864_v53  ;;  %v4616_v53 = vrot.slane %v4606_v9, 2  ;;  %v4971_v4 = vunpack.c.l.b16 %v4791_v59 }
 0x28f   : > { %v3774_v28 = vld [vmem:[#allocation2 + $0x38] sm:$0xff]  ;;  %v4707_v10 = vrot.slane %v4697_v5, 2 }
 0x290   : > { %3743 = vst.msk [vmem:[#allocation2 + $0x40] sm:$0xff] %vm632_vm4, %v3733_v19  ;;  %v3970_v30 = vadd.f32 %v3956_v16, %v3774_v28  ;;  %v4617_v16 = vsel %vm2020_vm6, %v4614_v36, %v4616_v53  ;;  %v4888_v28 = vsel %vm2497_vm7, %v11574_v38, %v11612_v22  ;;  %v4977_v39 = vpack.c.b16 %v4971_v4, %v4971_v4 }
 0x291   : > { %v4708_v8 = vsel %vm2020_vm6, %v4705_v1, %v4707_v10  ;;  %v5021_v36 = vsel %vm2497_vm7, %v11578_v37, %v11615_v35  ;;  %v4890_v38 = vshrl.u32 %v4844_v11, 16 }
 0x292   : > { %v3631_v34 = vpop.f32.mrf.mxu2  ;;  %3980 = vst.msk [vmem:[#allocation2 + $0x38] sm:$0xff] %vm632_vm4, %v3970_v30  ;;  %v5023_v37 = vshrl.u32 %v4977_v39, 16 }
 0x293   : > { %v3722_v6 = vpop.f32.mrf.mxu3 }
 0x294   : > { %v3867_v18 = vpop.f32.mrf.mxu0  ;;  %v3723_v41 = vadd.f32 %v3722_v6, %v3631_v34 }
 0x295   : > { %v3958_v12 = vpop.f32.mrf.mxu1 }
 0x296   : > { %v3734_v51 = vadd.f32 %v3723_v41, %v3538_v29  ;;  %v3959_v49 = vadd.f32 %v3958_v12, %v3867_v18  ;;  %v4006_v18 = vld [vmem:[#allocation2 + $0x8] sm:$0xff] }
 0x297   : > { %9260 = vmatmul.msk.bf16.gmra.mxu2 %vm700_vm1, %v4615_v62  ;;  %9311 = vmatmul.msk.bf16.gmra.mxu0 %vm700_vm1, %v4879_v40  ;;  %v3775_v52 = vld [vmem:[#allocation2 + $0x40] sm:$0xff]  ;;  %v4893_v40 = vshll.u32 %v4844_v11, 16  ;;  %v9343_v29 = vld [vmem:[%s10993_s23 + $0x8] sm:$0x8]  ;;  %v10036_v12 = vld [vmem:[%s10993_s23 + $0x8] sm:$0xf0] }
 0x298   : > { %3744 = vst.msk [vmem:[#allocation2 + $0x48] sm:$0xff] %vm632_vm4, %v3734_v51  ;;  %v3971_v54 = vadd.f32 %v3959_v49, %v3775_v52  ;;  %9285 = vmatmul.msk.bf16.gmra.mxu3 %vm700_vm1, %v4706_v43  ;;  %9336 = vmatmul.msk.bf16.gmra.mxu1 %vm700_vm1, %v5012_v44  ;;  %v5026_v43 = vshll.u32 %v4977_v39, 16  ;;  %v4892_v44 = vrot.slane %v4890_v38, 2  ;;  %v10031_v51 = vld [vmem:[%s10999_s27 + $0x8] sm:$0xf0]  ;;  %v9344_v27 = vor.u32 %v10036_v12, %v9343_v29  ;;  %v4009_v39 = vld [vmem:[#allocation2 + $0x20] sm:$0xff] }
 0x299   : > { %v4895_v46 = vrot.slane %v4893_v40, 3  ;;  %v9495_v52 = vld [vmem:[%s12927_s6 + $0x50] sm:$0xf]  ;;  %v9369_v7 = vor.u32 %v10031_v51, %v9368_v48  ;;  %v10046_v29 = vld [vmem:[%s11687_s24] sm:$0xff] }
 0x29a   : > { %v4127_v55 = vpop.f32.mrf.mxu2  ;;  %3981 = vst.msk [vmem:[#allocation2 + $0x40] sm:$0xff] %vm632_vm4, %v3971_v54  ;;  %v6035_v58 = vsel %vm716_vm0, %v9495_v52, 0  ;;  %v5028_v9 = vrot.slane %v5026_v43, 3  ;;  %v5167_v17 = vrot.slane %v9344_v27, 3  ;;  %v10041_v43 = vld [vmem:[%s11693_s28] sm:$0xff] }
 0x29b   : > { %v4260_v50 = vpop.f32.mrf.mxu3  ;;  %6044 = vmatpush.bf16.msra.mxu1 %v6035_v58  ;;  %v4896_v47 = vor.u32 %v4895_v46, %v4892_v44  ;;  %v5258_v63 = vrot.slane %v9369_v7, 3  ;;  %v4010_v44 = vld [vmem:[#allocation2 + $0x28] sm:$0xff] }
 0x29c   : > { %v3869_v0 = vpop.f32.mrf.mxu0  ;;  %v4261_v45 = vadd.f32 %v4260_v50, %v4127_v55  ;;  %v5944_v55 = vsel %vm716_vm0, %v9496_v32, 0 }
 0x29d   : > { %v3960_v20 = vpop.f32.mrf.mxu1  ;;  %5953 = vmatpush.bf16.msra.mxu0 %v5944_v55  ;;  %v4897_v59 = vsel %vm2497_vm7, %v11612_v22, %v4896_v47  ;;  %v5260_v4 = vsel %vm2820_vm8, %v5258_v63, %v5259_v2  ;;  %v4012_v63 = vld [vmem:[#allocation2 + $0x38] sm:$0xff] }
 0x29e   : > { %v4285_v14 = vadd.f32 %v4261_v45, %v4005_v23  ;;  %v3961_v24 = vadd.f32 %v3960_v20, %v3869_v0  ;;  %v5025_v0 = vrot.slane %v5023_v37, 2 }
 0x29f   : > { %v3776_v26 = vld [vmem:[#allocation2 + $0x48] sm:$0xff] }
 0x2a0   : > { %4295 = vst.msk [vmem:[#allocation2] sm:$0xff] %vm632_vm4, %v4285_v14  ;;  %v3972_v31 = vadd.f32 %v3961_v24, %v3776_v26  ;;  %v5029_v5 = vor.u32 %v5028_v9, %v5025_v0  ;;  %v5169_v14 = vsel %vm2820_vm8, %v5167_v17, %v5168_v21  ;;  %v4008_v26 = vld [vmem:[#allocation2 + $0x18] sm:$0xff]  ;;  %v10047_v17 = vld [vmem:[%s11687_s24 + $0x8] sm:$0xff] }
 0x2a2   : > { %v4129_v57 = vpop.f32.mrf.mxu2  ;;  %3982 = vst.msk [vmem:[#allocation2 + $0x48] sm:$0xff] %vm632_vm4, %v3972_v31 }
 0x2a3   : > { %v4262_v30 = vpop.f32.mrf.mxu3 }
 0x2a4   : > { %v4407_v19 = vpop.f32.mrf.mxu0  ;;  %v4263_v34 = vadd.f32 %v4262_v30, %v4129_v57  ;;  %v5030_v57 = vsel %vm2497_vm7, %v11615_v35, %v5029_v5  ;;  %v10042_v5 = vld [vmem:[%s11693_s28 + $0x8] sm:$0xff] }
 0x2a5   : > { %v4498_v62 = vpop.f32.mrf.mxu1 }
 0x2a6   : > { %v4286_v6 = vadd.f32 %v4263_v34, %v4006_v18  ;;  %v4499_v42 = vadd.f32 %v4498_v62, %v4407_v19  ;;  %v10033_v62 = vld [vmem:[%s10999_s27 + $0x18] sm:$0xff] }
 0x2a7   : > { %9261 = vmatmul.msk.bf16.gmra.mxu2 %vm700_vm1, %v4617_v16  ;;  %9312 = vmatmul.msk.bf16.gmra.mxu0 %vm700_vm1, %v4888_v28  ;;  %v4327_v41 = vld [vmem:[#allocation2] sm:$0xff]  ;;  %v10038_v28 = vld [vmem:[%s10993_s23 + $0x18] sm:$0xff] }
 0x2a8   : > { %4296 = vst.msk [vmem:[#allocation2 + $0x8] sm:$0xff] %vm632_vm4, %v4286_v6  ;;  %v4523_v15 = vadd.f32 %v4499_v42, %v4327_v41  ;;  %9286 = vmatmul.msk.bf16.gmra.mxu3 %vm700_vm1, %v4708_v8  ;;  %9337 = vmatmul.msk.bf16.gmra.mxu1 %vm700_vm1, %v5021_v36  ;;  %v5170_v38 = vrot.slane %v10038_v28, 3  ;;  %v5261_v41 = vrot.slane %v10033_v62, 3  ;;  %v10048_v62 = vld [vmem:[%s11687_s24 + $0x10] sm:$0xff] }
 0x2aa   : > { %v4132_v1 = vpop.f32.mrf.mxu2  ;;  %4533 = vst.msk [vmem:[#allocation2] sm:$0xff] %vm632_vm4, %v4523_v15  ;;  %v5171_v15 = vsel %vm2820_vm8, %v5168_v21, %v5170_v38  ;;  %v5262_v48 = vsel %vm2820_vm8, %v5259_v2, %v5261_v41 }
 0x2ab   : > { %v4265_v54 = vpop.f32.mrf.mxu3 }
 0x2ac   : > { %v4409_v49 = vpop.f32.mrf.mxu0  ;;  %v4266_v60 = vadd.f32 %v4265_v54, %v4132_v1  ;;  %v10039_v54 = vld [vmem:[%s10993_s23 + $0x20] sm:$0xff] }
 0x2ad   : > { %v4500_v56 = vpop.f32.mrf.mxu1  ;;  %v5172_v9 = vrot.slane %v10039_v54, 3 }
 0x2ae   : > { %v4287_v13 = vadd.f32 %v4266_v60, %v4007_v3  ;;  %v4501_v50 = vadd.f32 %v4500_v56, %v4409_v49  ;;  %v4011_v60 = vld [vmem:[#allocation2 + $0x30] sm:$0xff]  ;;  %v10034_v56 = vld [vmem:[%s10999_s27 + $0x20] sm:$0xff] }
 0x2af   : > { %v4328_v45 = vld [vmem:[#allocation2 + $0x8] sm:$0xff] }
 0x2b0   : > { %4297 = vst.msk [vmem:[#allocation2 + $0x10] sm:$0xff] %vm632_vm4, %v4287_v13  ;;  %v4524_v23 = vadd.f32 %v4501_v50, %v4328_v45  ;;  %v5263_v50 = vrot.slane %v10034_v56, 3  ;;  %v5173_v45 = vsel %vm2820_vm8, %v5170_v38, %v5172_v9 }
 0x2b2   : > { %v4134_v20 = vpop.f32.mrf.mxu2  ;;  %4534 = vst.msk [vmem:[#allocation2 + $0x8] sm:$0xff] %vm632_vm4, %v4524_v23 }
 0x2b3   : > { %v4267_v24 = vpop.f32.mrf.mxu3 }
 0x2b4   : > { %v4412_v33 = vpop.f32.mrf.mxu0  ;;  %v4268_v53 = vadd.f32 %v4267_v24, %v4134_v20 }
 0x2b5   : > { %v4503_v31 = vpop.f32.mrf.mxu1 }
 0x2b6   : > { %v4288_v10 = vadd.f32 %v4268_v53, %v4008_v26  ;;  %v4504_v11 = vadd.f32 %v4503_v31, %v4412_v33  ;;  %v5264_v33 = vsel %vm2820_vm8, %v5261_v41, %v5263_v50  ;;  %v4014_v41 = vld [vmem:[#allocation2 + $0x48] sm:$0xff] }
 0x2b7   : > { %9313 = vmatmul.msk.bf16.gmra.mxu0 %vm700_vm1, %v4897_v59  ;;  %9361 = vmatmul.msk.bf16.vlgmr.msrb.gmra.mxu2 %vm700_vm1, %v5169_v14  ;;  %v4329_v22 = vld [vmem:[#allocation2 + $0x10] sm:$0xff] }
 0x2b8   : > { %4298 = vst.msk [vmem:[#allocation2 + $0x18] sm:$0xff] %vm632_vm4, %v4288_v10  ;;  %v4525_v19 = vadd.f32 %v4504_v11, %v4329_v22  ;;  %9338 = vmatmul.msk.bf16.gmra.mxu1 %vm700_vm1, %v5030_v57  ;;  %9386 = vmatmul.msk.bf16.vlgmr.msrb.gmra.mxu3 %vm700_vm1, %v5260_v4  ;;  %v11721_v57 = vld [vmem:[%s10993_s23 + $0x28] sm:$0xff]  ;;  %v4013_v11 = vld [vmem:[#allocation2 + $0x40] sm:$0xff] }
 0x2b9   : > { %v5174_v28 = vrot.slane %v11721_v57, 3 }
 0x2ba   : > { %v4137_v16 = vpop.f32.mrf.mxu2  ;;  %4535 = vst.msk [vmem:[#allocation2 + $0x10] sm:$0xff] %vm632_vm4, %v4525_v19  ;;  %v11724_v19 = vld [vmem:[%s10999_s27 + $0x28] sm:$0xff] }
 0x2bb   : > { %v4270_v30 = vpop.f32.mrf.mxu3 }
 0x2bc   : > { %v4414_v35 = vpop.f32.mrf.mxu0  ;;  %v4271_v34 = vadd.f32 %v4270_v30, %v4137_v16 }
 0x2bd   : > { %v4505_v18 = vpop.f32.mrf.mxu1 }
 0x2be   : > { %v4289_v8 = vadd.f32 %v4271_v34, %v4009_v39  ;;  %v4506_v36 = vadd.f32 %v4505_v18, %v4414_v35  ;;  %v5265_v18 = vrot.slane %v11724_v19, 3  ;;  %v11767_v19 = vld [vmem:[%s11693_s28 + $0x8] sm:$0xff] }
 0x2bf   : > { %v4330_v40 = vld [vmem:[#allocation2 + $0x18] sm:$0xff] }
 0x2c0   : > { %4299 = vst.msk [vmem:[#allocation2 + $0x20] sm:$0xff] %vm632_vm4, %v4289_v8  ;;  %v4526_v6 = vadd.f32 %v4506_v36, %v4330_v40  ;;  %v5175_v36 = vsel %vm2820_vm8, %v5172_v9, %v5174_v28  ;;  %v5124_v40 = vld [vmem:[%s10993_s23 + $0x30] sm:$0x7]  ;;  %s623_s23 = scalar_lea.vmem %s12930_s9, %s622_s11 }
 0x2c2   : > { %v4139_v42 = vpop.f32.mrf.mxu2  ;;  %4536 = vst.msk [vmem:[#allocation2 + $0x18] sm:$0xff] %vm632_vm4, %v4526_v6 }
 0x2c3   : > { %v4272_v1 = vpop.f32.mrf.mxu3 }
 0x2c4   : > { %v4417_v12 = vpop.f32.mrf.mxu0  ;;  %v4273_v37 = vadd.f32 %v4272_v1, %v4139_v42  ;;  %v10043_v42 = vld [vmem:[%s11693_s28 + $0x10] sm:$0xff] }
 0x2c5   : > { %v4508_v46 = vpop.f32.mrf.mxu1 }
 0x2c6   : > { %v4290_v51 = vadd.f32 %v4273_v37, %v4010_v44  ;;  %v4509_v49 = vadd.f32 %v4508_v46, %v4417_v12  ;;  %v5266_v12 = vsel %vm2820_vm8, %v5263_v50, %v5265_v18  ;;  %v5160_v37 = vunpack.c.l.b16 %v5124_v40 }
 0x2c7   : > { %9362 = vmatmul.msk.bf16.gmra.mxu2 %vm700_vm1, %v5171_v15  ;;  %9413 = vmatmul.msk.bf16.vlgmr.msrb.gmra.mxu0 %vm700_vm1, %v10046_v29  ;;  %v4331_v25 = vld [vmem:[#allocation2 + $0x20] sm:$0xff] }
 0x2c8   : > { %4300 = vst.msk [vmem:[#allocation2 + $0x28] sm:$0xff] %vm632_vm4, %v4290_v51  ;;  %v4527_v27 = vadd.f32 %v4509_v49, %v4331_v25  ;;  %9387 = vmatmul.msk.bf16.gmra.mxu3 %vm700_vm1, %v5262_v48  ;;  %9438 = vmatmul.msk.bf16.vlgmr.msrb.gmra.mxu1 %vm700_vm1, %v10041_v43  ;;  %v5113_v43 = vld [vmem:[%s10999_s27 + $0x30] sm:$0x7]  ;;  %v5166_v25 = vpack.c.b16 %v5160_v37, %v5160_v37 }
 0x2c9   : > { %v5251_v51 = vunpack.c.l.b16 %v5113_v43 }
 0x2ca   : > { %v4142_v32 = vpop.f32.mrf.mxu2  ;;  %4537 = vst.msk [vmem:[#allocation2 + $0x20] sm:$0xff] %vm632_vm4, %v4527_v27  ;;  %v9548_v27 = vld [vmem:[%s12928_s7 + $0x54] sm:$0xf]  ;;  %v5176_v9 = vrot.slane %v5166_v25, 3 }
 0x2cb   : > { %v4275_v55 = vpop.f32.mrf.mxu3  ;;  %v6182_v54 = vsel %vm716_vm0, %v9548_v27, 0  ;;  %v5257_v56 = vpack.c.b16 %v5251_v51, %v5251_v51 }
 0x2cc   : > { %v4419_v52 = vpop.f32.mrf.mxu0  ;;  %v4276_v58 = vadd.f32 %v4275_v55, %v4142_v32  ;;  %v9547_v32 = vld [vmem:[%s12927_s6 + $0x54] sm:$0xf]  ;;  %6191 = vmatpush.bf16.msrb.mxu2 %v6182_v54 }
 0x2cd   : > { %v4510_v3 = vpop.f32.mrf.mxu1  ;;  %v6273_v55 = vsel %vm716_vm0, %v9547_v32, 0  ;;  %v5267_v50 = vrot.slane %v5257_v56, 3  ;;  %v10045_v32 = vld [vmem:[%s11693_s28 + $0x20] sm:$0xff] }
 0x2ce   : > { %v4291_v47 = vadd.f32 %v4276_v58, %v4011_v60  ;;  %v4511_v0 = vadd.f32 %v4510_v3, %v4419_v52  ;;  %6282 = vmatpush.bf16.msrb.mxu3 %v6273_v55  ;;  %v4565_v60 = vld [vmem:[#allocation2] sm:$0xff] }
 0x2cf   : > { %v4332_v61 = vld [vmem:[#allocation2 + $0x28] sm:$0xff] }
 0x2d0   : > { %4301 = vst.msk [vmem:[#allocation2 + $0x30] sm:$0xff] %vm632_vm4, %v4291_v47  ;;  %v4528_v7 = vadd.f32 %v4511_v0, %v4332_v61 }
 0x2d2   : > { %v4144_v13 = vpop.f32.mrf.mxu2  ;;  %4538 = vst.msk [vmem:[#allocation2 + $0x28] sm:$0xff] %vm632_vm4, %v4528_v7 }
 0x2d3   : > { %v4277_v23 = vpop.f32.mrf.mxu3 }
 0x2d4   : > { %v4422_v21 = vpop.f32.mrf.mxu0  ;;  %v4278_v20 = vadd.f32 %v4277_v23, %v4144_v13  ;;  %v5177_v23 = vsel %vm2820_vm8, %v5174_v28, %v5176_v9 }
 0x2d5   : > { %v4513_v2 = vpop.f32.mrf.mxu1 }
 0x2d6   : > { %v4292_v59 = vadd.f32 %v4278_v20, %v4012_v63  ;;  %v4514_v14 = vadd.f32 %v4513_v2, %v4422_v21  ;;  %v10056_v21 = vld [vmem:[%s11687_s24] sm:$0xff]  ;;  %v10044_v63 = vld [vmem:[%s11693_s28 + $0x18] sm:$0xff]  ;;  %v4566_v2 = vld [vmem:[#allocation2 + $0x8] sm:$0xff] }
 0x2d7   : > { %9363 = vmatmul.msk.bf16.gmra.mxu2 %vm700_vm1, %v5173_v45  ;;  %9414 = vmatmul.msk.bf16.gmra.mxu0 %vm700_vm1, %v10047_v17  ;;  %v4333_v24 = vld [vmem:[#allocation2 + $0x30] sm:$0xff]  ;;  %v10049_v17 = vld [vmem:[%s11687_s24 + $0x18] sm:$0xff] }
 0x2d8   : > { %4302 = vst.msk [vmem:[#allocation2 + $0x38] sm:$0xff] %vm632_vm4, %v4292_v59  ;;  %v4529_v53 = vadd.f32 %v4514_v14, %v4333_v24  ;;  %9388 = vmatmul.msk.bf16.gmra.mxu3 %vm700_vm1, %v5264_v33  ;;  %9439 = vmatmul.msk.bf16.gmra.mxu1 %vm700_vm1, %v10042_v5  ;;  %v5268_v59 = vsel %vm2820_vm8, %v5265_v18, %v5267_v50  ;;  %v5616_v14 = vshll.u32 %v10056_v21, 16  ;;  %v10051_v24 = vld [vmem:[%s11693_s28] sm:$0xff]  ;;  %v11799_v50 = vld [vmem:[%s11693_s28 + $0x10] sm:$0xff] }
 0x2d9   : > { %v5738_v40 = vshrl.u32 %v10051_v24, 16 }
 0x2da   : > { %v4147_v26 = vpop.f32.mrf.mxu2  ;;  %4539 = vst.msk [vmem:[#allocation2 + $0x30] sm:$0xff] %vm632_vm4, %v4529_v53 }
 0x2db   : > { %v4280_v4 = vpop.f32.mrf.mxu3 }
 0x2dc   : > { %v4424_v31 = vpop.f32.mrf.mxu0  ;;  %v4281_v10 = vadd.f32 %v4280_v4, %v4147_v26 }
 0x2dd   : > { %v4515_v22 = vpop.f32.mrf.mxu1 }
 0x2de   : > { %v4293_v16 = vadd.f32 %v4281_v10, %v4013_v11  ;;  %v4516_v35 = vadd.f32 %v4515_v22, %v4424_v31  ;;  %v11761_v31 = vld [vmem:[%s11687_s24 + $0x8] sm:$0xff]  ;;  %v5614_v11 = vshrl.u32 %v10056_v21, 16  ;;  %v5618_v22 = vrot.slane %v5616_v14, 1 }
 0x2df   : > { %v4334_v30 = vld [vmem:[#allocation2 + $0x38] sm:$0xff]  ;;  %v5621_v28 = vshll.u32 %v11761_v31, 16  ;;  %v11803_v21 = vld [vmem:[%s11687_s24 + $0x8] sm:$0xff] }
 0x2e0   : > { %4303 = vst.msk [vmem:[#allocation2 + $0x40] sm:$0xff] %vm632_vm4, %v4293_v16  ;;  %v4530_v34 = vadd.f32 %v4516_v35, %v4334_v30  ;;  %v5740_v16 = vshll.u32 %v10051_v24, 16  ;;  %v9600_v30 = vld [vmem:[%s12928_s7 + $0x58] sm:$0xf] }
 0x2e1   : > { %v6462_v18 = vsel %vm716_vm0, %v9600_v30, 0 }
 0x2e2   : > { %v4149_v39 = vpop.f32.mrf.mxu2  ;;  %4540 = vst.msk [vmem:[#allocation2 + $0x38] sm:$0xff] %vm632_vm4, %v4530_v34  ;;  %v9599_v34 = vld [vmem:[%s12927_s6 + $0x58] sm:$0xf]  ;;  %6471 = vmatpush.bf16.msrb.mxu0 %v6462_v18 }
 0x2e3   : > { %v4282_v38 = vpop.f32.mrf.mxu3 }
 0x2e4   : > { %v4427_v8 = vpop.f32.mrf.mxu0  ;;  %v4283_v6 = vadd.f32 %v4282_v38, %v4149_v39 }
 0x2e5   : > { %v4518_v29 = vpop.f32.mrf.mxu1 }
 0x2e6   : > { %v4294_v15 = vadd.f32 %v4283_v6, %v4014_v41  ;;  %v4519_v1 = vadd.f32 %v4518_v29, %v4427_v8  ;;  %v5742_v6 = vrot.slane %v5740_v16, 1 }
 0x2e7   : > { %9364 = vmatmul.msk.bf16.gmra.mxu2 %vm700_vm1, %v5175_v36  ;;  %9415 = vmatmul.msk.bf16.gmra.mxu0 %vm700_vm1, %v10048_v62  ;;  %v4335_v44 = vld [vmem:[#allocation2 + $0x40] sm:$0xff]  ;;  %v6595_v62 = vsel %vm716_vm0, %v9599_v34, 0  ;;  %v4567_v36 = vld [vmem:[#allocation2 + $0x10] sm:$0xff] }
 0x2e8   : > { %4304 = vst.msk [vmem:[#allocation2 + $0x48] sm:$0xff] %vm632_vm4, %v4294_v15  ;;  %v4531_v46 = vadd.f32 %v4519_v1, %v4335_v44  ;;  %9389 = vmatmul.msk.bf16.gmra.mxu3 %vm700_vm1, %v5266_v12  ;;  %9440 = vmatmul.msk.bf16.gmra.mxu1 %vm700_vm1, %v10043_v42  ;;  %v5745_v42 = vshll.u32 %v11767_v19, 16  ;;  %v5619_v12 = vor.u32 %v5618_v22, %v5614_v11  ;;  %v5623_v15 = vrot.slane %v5621_v28, 1  ;;  %v10050_v44 = vld [vmem:[%s11687_s24 + $0x20] sm:$0xff] }
 0x2e9   : > { %6604 = vmatpush.bf16.msrb.mxu1 %v6595_v62  ;;  %v5918_v11 = vrot.slane %v11803_v21, 1 }
 0x2ea   : > { %v4645_v48 = vpop.f32.mrf.mxu2  ;;  %4541 = vst.msk [vmem:[#allocation2 + $0x40] sm:$0xff] %vm632_vm4, %v4531_v46  ;;  %v5743_v46 = vor.u32 %v5742_v6, %v5738_v40 }
 0x2eb   : > { %v4736_v52 = vpop.f32.mrf.mxu3 }
 0x2ec   : > { %v4429_v49 = vpop.f32.mrf.mxu0  ;;  %v4737_v58 = vadd.f32 %v4736_v52, %v4645_v48  ;;  %v5747_v48 = vrot.slane %v5745_v42, 1  ;;  %v4568_v52 = vld [vmem:[#allocation2 + $0x18] sm:$0xff] }
 0x2ed   : > { %v4520_v3 = vpop.f32.mrf.mxu1 }
 0x2ee   : > { %v4761_v47 = vadd.f32 %v4737_v58, %v4565_v60  ;;  %v4521_v0 = vadd.f32 %v4520_v3, %v4429_v49  ;;  %v5624_v49 = vsel %vm915_vm2, %v5619_v12, %v5623_v15  ;;  %v5748_v55 = vsel %vm915_vm2, %v5743_v46, %v5747_v48  ;;  %v11789_v58 = vld [vmem:[%s11687_s24 + $0x10] sm:$0xff]  ;;  %v11823_v12 = vld [vmem:[%s11687_s24 + $0x18] sm:$0xff] }
 0x2ef   : > { %v4336_v61 = vld [vmem:[#allocation2 + $0x48] sm:$0xff] }
 0x2f0   : > { %4771 = vst.msk [vmem:[#allocation2] sm:$0xff] %vm632_vm4, %v4761_v47  ;;  %v4532_v7 = vadd.f32 %v4521_v0, %v4336_v61  ;;  %v9499_v47 = vld [vmem:[%s11687_s24] sm:$0xe]  ;;  %v10066_v0 = vld [vmem:[%s11687_s24] sm:$0xf0] }
 0x2f2   : > { %v4647_v13 = vpop.f32.mrf.mxu2  ;;  %4542 = vst.msk [vmem:[#allocation2 + $0x48] sm:$0xff] %vm632_vm4, %v4532_v7  ;;  %v5625_v7 = vshrl.u32 %v11761_v31, 16 }
 0x2f3   : > { %v4738_v20 = vpop.f32.mrf.mxu3 }
 0x2f4   : > { %v4925_v45 = vpop.f32.mrf.mxu0  ;;  %v4739_v5 = vadd.f32 %v4738_v20, %v4647_v13  ;;  %v5629_v13 = vshll.u32 %v11789_v58, 16  ;;  %v10061_v20 = vld [vmem:[%s11693_s28] sm:$0xf0]  ;;  %v5627_v14 = vor.u32 %v5625_v7, %v5623_v15 }
 0x2f5   : > { %v5058_v33 = vpop.f32.mrf.mxu1 }
 0x2f6   : > { %v4762_v53 = vadd.f32 %v4739_v5, %v4566_v2  ;;  %v5059_v26 = vadd.f32 %v5058_v33, %v4925_v45  ;;  %v9500_v45 = vor.u32 %v10066_v0, %v9499_v47  ;;  %v5749_v2 = vshrl.u32 %v11767_v19, 16  ;;  %v4569_v33 = vld [vmem:[#allocation2 + $0x20] sm:$0xff] }
 0x2f7   : > { %9365 = vmatmul.msk.bf16.gmra.mxu2 %vm700_vm1, %v5177_v23  ;;  %9416 = vmatmul.msk.bf16.gmra.mxu0 %vm700_vm1, %v10049_v17  ;;  %v4803_v57 = vld [vmem:[#allocation2] sm:$0xff]  ;;  %v5631_v24 = vrot.slane %v5629_v13, 1 }
 0x2f8   : > { %4772 = vst.msk [vmem:[#allocation2 + $0x8] sm:$0xff] %vm632_vm4, %v4762_v53  ;;  %v5083_v4 = vadd.f32 %v5059_v26, %v4803_v57  ;;  %9390 = vmatmul.msk.bf16.gmra.mxu3 %vm700_vm1, %v5268_v59  ;;  %9441 = vmatmul.msk.bf16.gmra.mxu1 %vm700_vm1, %v10044_v63  ;;  %v9524_v23 = vld [vmem:[%s11693_s28] sm:$0xe]  ;;  %v5753_v53 = vshll.u32 %v11799_v50, 16  ;;  %v11810_v26 = vld [vmem:[%s11693_s28 + $0x8] sm:$0xff]  ;;  %v5751_v19 = vor.u32 %v5749_v2, %v5747_v48  ;;  %v5637_v48 = vshll.u32 %v11823_v12, 16 }
 0x2f9   : > { %v9525_v31 = vor.u32 %v10061_v20, %v9524_v23  ;;  %v6009_v34 = vrot.slane %v11810_v26, 1  ;;  %v5632_v18 = vsel %vm915_vm2, %v5627_v14, %v5631_v24 }
 0x2fa   : > { %v4650_v10 = vpop.f32.mrf.mxu2  ;;  %5093 = vst.msk [vmem:[#allocation2] sm:$0xff] %vm632_vm4, %v5083_v4  ;;  %v5755_v28 = vrot.slane %v5753_v53, 1 }
 0x2fb   : > { %v4741_v39 = vpop.f32.mrf.mxu3  ;;  %v6008_v30 = vrot.slane %v9525_v31, 1 }
 0x2fc   : > { %v4927_v35 = vpop.f32.mrf.mxu0  ;;  %v4742_v8 = vadd.f32 %v4741_v39, %v4650_v10  ;;  %v5917_v10 = vrot.slane %v9500_v45, 1  ;;  %v5756_v6 = vsel %vm915_vm2, %v5751_v19, %v5755_v28  ;;  %v4573_v19 = vld [vmem:[#allocation2 + $0x40] sm:$0xff] }
 0x2fd   : > { %v5060_v38 = vpop.f32.mrf.mxu1  ;;  %v6010_v42 = vsel %vm1220_vm3, %v6008_v30, %v6009_v34 }
 0x2fe   : > { %v4763_v41 = vadd.f32 %v4742_v8, %v4567_v36  ;;  %v5061_v29 = vadd.f32 %v5060_v38, %v4927_v35  ;;  %v5919_v62 = vsel %vm1220_vm3, %v5917_v10, %v5918_v11  ;;  %v4570_v38 = vld [vmem:[#allocation2 + $0x28] sm:$0xff] }
 0x2ff   : > { %v4804_v1 = vld [vmem:[#allocation2 + $0x8] sm:$0xff] }
 0x300   : > { %4773 = vst.msk [vmem:[#allocation2 + $0x10] sm:$0xff] %vm632_vm4, %v4763_v41  ;;  %v5084_v37 = vadd.f32 %v5061_v29, %v4804_v1 }
 0x302   : > { %v4652_v43 = vpop.f32.mrf.mxu2  ;;  %5094 = vst.msk [vmem:[#allocation2 + $0x8] sm:$0xff] %vm632_vm4, %v5084_v37 }
 0x303   : > { %v4743_v25 = vpop.f32.mrf.mxu3 }
 0x304   : > { %v4930_v51 = vpop.f32.mrf.mxu0  ;;  %v4744_v27 = vadd.f32 %v4743_v25, %v4652_v43  ;;  %v5633_v43 = vshrl.u32 %v11789_v58, 16 }
 0x305   : > { %v5063_v54 = vpop.f32.mrf.mxu1 }
 0x306   : > { %v4764_v60 = vadd.f32 %v4744_v27, %v4568_v52  ;;  %v5064_v3 = vadd.f32 %v5063_v54, %v4930_v51  ;;  %v11835_v51 = vld [vmem:[%s11687_s24 + $0x10] sm:$0xff]  ;;  %v5635_v52 = vor.u32 %v5633_v43, %v5631_v24  ;;  %v5757_v54 = vshrl.u32 %v11799_v50, 16  ;;  %v11853_v24 = vld [vmem:[%s11687_s24 + $0x20] sm:$0xff] }
 0x307   : > { %9417 = vmatmul.msk.bf16.gmra.mxu0 %vm700_vm1, %v10050_v44  ;;  %9465 = vmatmul.msk.bf16.vlgmr.msra.gmra.mxu2 %vm700_vm1, %v5624_v49  ;;  %v4805_v56 = vld [vmem:[#allocation2 + $0x10] sm:$0xff]  ;;  %v11830_v44 = vld [vmem:[%s11693_s28 + $0x18] sm:$0xff]  ;;  %v5920_v47 = vrot.slane %v11835_v51, 1 }
 0x308   : > { %4774 = vst.msk [vmem:[#allocation2 + $0x18] sm:$0xff] %vm632_vm4, %v4764_v60  ;;  %v5085_v9 = vadd.f32 %v5064_v3, %v4805_v56  ;;  %9442 = vmatmul.msk.bf16.gmra.mxu1 %vm700_vm1, %v10045_v32  ;;  %9490 = vmatmul.msk.bf16.vlgmr.msra.gmra.mxu3 %vm700_vm1, %v5748_v55  ;;  %v4571_v27 = vld [vmem:[#allocation2 + $0x30] sm:$0xff]  ;;  %v5761_v55 = vshll.u32 %v11830_v44, 16  ;;  %v5639_v56 = vrot.slane %v5637_v48, 1  ;;  %v5759_v7 = vor.u32 %v5757_v54, %v5755_v28 }
 0x309   : > { %v11840_v60 = vld [vmem:[%s11693_s28 + $0x10] sm:$0xff]  ;;  %v5921_v45 = vsel %vm1220_vm3, %v5918_v11, %v5920_v47  ;;  %v5645_v11 = vshll.u32 %v11853_v24, 16 }
 0x30a   : > { %v4655_v61 = vpop.f32.mrf.mxu2  ;;  %5095 = vst.msk [vmem:[#allocation2 + $0x10] sm:$0xff] %vm632_vm4, %v5085_v9  ;;  %v5763_v13 = vrot.slane %v5761_v55, 1  ;;  %v5640_v21 = vsel %vm915_vm2, %v5635_v52, %v5639_v56 }
 0x30b   : > { %v4746_v5 = vpop.f32.mrf.mxu3 }
 0x30c   : > { %v4932_v17 = vpop.f32.mrf.mxu0  ;;  %v4747_v63 = vadd.f32 %v4746_v5, %v4655_v61  ;;  %v4572_v5 = vld [vmem:[#allocation2 + $0x38] sm:$0xff]  ;;  %v5764_v2 = vsel %vm915_vm2, %v5759_v7, %v5763_v13  ;;  %v11894_v7 = vld [vmem:[%s11687_s24 + $0x20] sm:$0xff] }
 0x30d   : > { %v5065_v59 = vpop.f32.mrf.mxu1 }
 0x30e   : > { %v4765_v57 = vadd.f32 %v4747_v63, %v4569_v33  ;;  %v5066_v4 = vadd.f32 %v5065_v59, %v4932_v17  ;;  %v6011_v17 = vrot.slane %v11840_v60, 1 }
 0x30f   : > { %v4806_v22 = vld [vmem:[#allocation2 + $0x18] sm:$0xff] }
 0x310   : > { %4775 = vst.msk [vmem:[#allocation2 + $0x20] sm:$0xff] %vm632_vm4, %v4765_v57  ;;  %v5086_v16 = vadd.f32 %v5066_v4, %v4806_v22  ;;  %v6012_v33 = vsel %vm1220_vm3, %v6009_v34, %v6011_v17  ;;  %v5641_v57 = vshrl.u32 %v11823_v12, 16  ;;  %v11860_v4 = vld [vmem:[%s11693_s28 + $0x20] sm:$0xff]  ;;  %v11865_v22 = vld [vmem:[%s11687_s24 + $0x18] sm:$0xff]  ;;  %v5765_v34 = vshrl.u32 %v11830_v44, 16 }
 0x312   : > { %v4657_v35 = vpop.f32.mrf.mxu2  ;;  %5096 = vst.msk [vmem:[#allocation2 + $0x18] sm:$0xff] %vm632_vm4, %v5086_v16  ;;  %v5643_v30 = vor.u32 %v5641_v57, %v5639_v56 }
 0x313   : > { %v4748_v8 = vpop.f32.mrf.mxu3 }
 0x314   : > { %v4935_v39 = vpop.f32.mrf.mxu0  ;;  %v4749_v36 = vadd.f32 %v4748_v8, %v4657_v35 }
 0x315   : > { %v5068_v40 = vpop.f32.mrf.mxu1 }
 0x316   : > { %v4766_v41 = vadd.f32 %v4749_v36, %v4570_v38  ;;  %v5069_v29 = vadd.f32 %v5068_v40, %v4935_v39  ;;  %v5769_v39 = vshll.u32 %v11860_v4, 16  ;;  %v5647_v36 = vrot.slane %v5645_v11, 1  ;;  %v5570_v40 = vld [vmem:[%s11687_s24 + $0x28] sm:$0x1] }
 0x317   : > { %9466 = vmatmul.msk.bf16.gmra.mxu2 %vm700_vm1, %v5632_v18  ;;  %9517 = vmatmul.msk.bf16.vlgmr.msra.gmra.mxu0 %vm700_vm1, %v5919_v62  ;;  %v4807_v15 = vld [vmem:[#allocation2 + $0x20] sm:$0xff]  ;;  %v11870_v18 = vld [vmem:[%s11693_s28 + $0x18] sm:$0xff]  ;;  %v5922_v38 = vrot.slane %v11865_v22, 1 }
 0x318   : > { %4776 = vst.msk [vmem:[#allocation2 + $0x28] sm:$0xff] %vm632_vm4, %v4766_v41  ;;  %v5087_v1 = vadd.f32 %v5069_v29, %v4807_v15  ;;  %9491 = vmatmul.msk.bf16.gmra.mxu3 %vm700_vm1, %v5756_v6  ;;  %9542 = vmatmul.msk.bf16.vlgmr.msra.gmra.mxu1 %vm700_vm1, %v6010_v42  ;;  %v5767_v29 = vor.u32 %v5765_v34, %v5763_v13  ;;  %v5771_v12 = vrot.slane %v5769_v39, 1  ;;  %v6013_v15 = vrot.slane %v11870_v18, 1  ;;  %v9652_v13 = vld [vmem:[%s12928_s7 + $0x5c] sm:$0xf] }
 0x319   : > { %v5648_v43 = vsel %vm915_vm2, %v5643_v30, %v5647_v36  ;;  %v5923_v44 = vsel %vm1220_vm3, %v5920_v47, %v5922_v38  ;;  %v5649_v47 = vshrl.u32 %v11853_v24, 16  ;;  %v5874_v30 = vld [vmem:[%s11687_s24 + $0x28] sm:$0x1] }
 0x31a   : > { %v4660_v37 = vpop.f32.mrf.mxu2  ;;  %5097 = vst.msk [vmem:[#allocation2 + $0x20] sm:$0xff] %vm632_vm4, %v5087_v1  ;;  %v5606_v1 = vunpack.c.l.b16 %v5570_v40  ;;  %v5863_v40 = vld [vmem:[%s11693_s28 + $0x28] sm:$0x1] }
 0x31b   : > { %v4751_v49 = vpop.f32.mrf.mxu3 }
 0x31c   : > { %v4937_v46 = vpop.f32.mrf.mxu0  ;;  %v4752_v25 = vadd.f32 %v4751_v49, %v4660_v37  ;;  %v4574_v49 = vld [vmem:[#allocation2 + $0x48] sm:$0xff]  ;;  %v5612_v52 = vpack.c.b16 %v5606_v1, %v5606_v1 }
 0x31d   : > { %v5070_v32 = vpop.f32.mrf.mxu1 }
 0x31e   : > { %v4767_v58 = vadd.f32 %v4752_v25, %v4571_v27  ;;  %v5071_v3 = vadd.f32 %v5070_v32, %v4937_v46  ;;  %v5559_v46 = vld [vmem:[%s11693_s28 + $0x28] sm:$0x1]  ;;  %v5772_v27 = vsel %vm915_vm2, %v5767_v29, %v5771_v12  ;;  %v6014_v32 = vsel %vm1220_vm3, %v6011_v17, %v6013_v15  ;;  %v9651_v17 = vld [vmem:[%s12927_s6 + $0x5c] sm:$0xf]  ;;  %v9551_v29 = vld [vmem:[%s11687_s24 + $0x4] sm:$0xe] }
 0x31f   : > { %v4808_v0 = vld [vmem:[#allocation2 + $0x28] sm:$0xff]  ;;  %v5730_v54 = vunpack.c.l.b16 %v5559_v46 }
 0x320   : > { %4777 = vst.msk [vmem:[#allocation2 + $0x30] sm:$0xff] %vm632_vm4, %v4767_v58  ;;  %v5088_v9 = vadd.f32 %v5071_v3, %v4808_v0  ;;  %v5653_v0 = vshll.u32 %v5612_v52, 16 }
 0x322   : > { %v4662_v61 = vpop.f32.mrf.mxu2  ;;  %5098 = vst.msk [vmem:[#allocation2 + $0x28] sm:$0xff] %vm632_vm4, %v5088_v9  ;;  %v5736_v9 = vpack.c.b16 %v5730_v54, %v5730_v54 }
 0x323   : > { %v4753_v23 = vpop.f32.mrf.mxu3 }
 0x324   : > { %v4940_v50 = vpop.f32.mrf.mxu0  ;;  %v4754_v20 = vadd.f32 %v4753_v23, %v4662_v61 }
 0x325   : > { %v5073_v63 = vpop.f32.mrf.mxu1 }
 0x326   : > { %v4768_v59 = vadd.f32 %v4754_v20, %v4572_v5  ;;  %v5074_v14 = vadd.f32 %v5073_v63, %v4940_v50  ;;  %v5125_v20 = vld [vmem:[#allocation2] sm:$0xff]  ;;  %v5651_v63 = vor.u32 %v5649_v47, %v5647_v36 }
 0x327   : > { %9467 = vmatmul.msk.bf16.gmra.mxu2 %vm700_vm1, %v5640_v21  ;;  %9518 = vmatmul.msk.bf16.gmra.mxu0 %vm700_vm1, %v5921_v45  ;;  %v4809_v53 = vld [vmem:[#allocation2 + $0x30] sm:$0xff]  ;;  %v6742_v21 = vsel %vm716_vm0, %v9652_v13, 0  ;;  %v6833_v45 = vsel %vm716_vm0, %v9651_v17, 0  ;;  %v9603_v17 = vld [vmem:[%s11687_s24 + $0x4] sm:$0xe] }
 0x328   : > { %4778 = vst.msk [vmem:[#allocation2 + $0x38] sm:$0xff] %vm632_vm4, %v4768_v59  ;;  %v5089_v26 = vadd.f32 %v5074_v14, %v4809_v53  ;;  %9492 = vmatmul.msk.bf16.gmra.mxu3 %vm700_vm1, %v5764_v2  ;;  %9543 = vmatmul.msk.bf16.gmra.mxu1 %vm700_vm1, %v6012_v33  ;;  %v5773_v2 = vshrl.u32 %v11860_v4, 16  ;;  %v5777_v33 = vshll.u32 %v5736_v9, 16  ;;  %v11906_v59 = vld [vmem:[%s11693_s28 + $0x20] sm:$0xff]  ;;  %v5655_v53 = vrot.slane %v5653_v0, 1 }
 0x329   : > { %6751 = vmatpush.bf16.msra.mxu2 %v6742_v21  ;;  %6842 = vmatpush.bf16.msra.mxu3 %v6833_v45 }
 0x32a   : > { %v4665_v31 = vpop.f32.mrf.mxu2  ;;  %5099 = vst.msk [vmem:[#allocation2 + $0x30] sm:$0xff] %vm632_vm4, %v5089_v26  ;;  %v5924_v26 = vrot.slane %v11894_v7, 1  ;;  %v5775_v11 = vor.u32 %v5773_v2, %v5771_v12  ;;  %v10076_v12 = vld [vmem:[%s11687_s24 + $0x4] sm:$0xf0] }
 0x32b   : > { %v4756_v16 = vpop.f32.mrf.mxu3 }
 0x32c   : > { %v4942_v10 = vpop.f32.mrf.mxu0  ;;  %v4757_v35 = vadd.f32 %v4756_v16, %v4665_v31  ;;  %v5779_v16 = vrot.slane %v5777_v33, 1  ;;  %v9628_v33 = vld [vmem:[%s11693_s28 + $0x4] sm:$0xe] }
 0x32d   : > { %v5075_v28 = vpop.f32.mrf.mxu1 }
 0x32e   : > { %v4769_v62 = vadd.f32 %v4757_v35, %v4573_v19  ;;  %v5076_v8 = vadd.f32 %v5075_v28, %v4942_v10  ;;  %v6015_v35 = vrot.slane %v11906_v59, 1  ;;  %v5656_v19 = vsel %vm915_vm2, %v5651_v63, %v5655_v53 }
 0x32f   : > { %v4810_v6 = vld [vmem:[#allocation2 + $0x38] sm:$0xff]  ;;  %v5925_v28 = vsel %vm1220_vm3, %v5922_v38, %v5924_v26  ;;  %v5780_v36 = vsel %vm915_vm2, %v5775_v11, %v5779_v16  ;;  %v5910_v38 = vunpack.c.l.b16 %v5874_v30 }
 0x330   : > { %4779 = vst.msk [vmem:[#allocation2 + $0x40] sm:$0xff] %vm632_vm4, %v4769_v62  ;;  %v5090_v42 = vadd.f32 %v5076_v8, %v4810_v6  ;;  %v5126_v62 = vld [vmem:[#allocation2 + $0x8] sm:$0xff]  ;;  %v6016_v22 = vsel %vm1220_vm3, %v6013_v15, %v6015_v35  ;;  %v9576_v15 = vld [vmem:[%s11693_s28 + $0x4] sm:$0xe] }
 0x332   : > { %v4667_v41 = vpop.f32.mrf.mxu2  ;;  %5100 = vst.msk [vmem:[#allocation2 + $0x38] sm:$0xff] %vm632_vm4, %v5090_v42 }
 0x333   : > { %v4758_v48 = vpop.f32.mrf.mxu3 }
 0x334   : > { %v4945_v37 = vpop.f32.mrf.mxu0  ;;  %v4759_v51 = vadd.f32 %v4758_v48, %v4667_v41  ;;  %v11937_v48 = vld [vmem:[%s11687_s24 + $0xc] sm:$0xff] }
 0x335   : > { %v5078_v25 = vpop.f32.mrf.mxu1  ;;  %v6156_v13 = vrot.slane %v11937_v48, 1  ;;  %v10083_v48 = vld [vmem:[%s11693_s28 + $0x14] sm:$0xff] }
 0x336   : > { %v4770_v55 = vadd.f32 %v4759_v51, %v4574_v49  ;;  %v5079_v60 = vadd.f32 %v5078_v25, %v4945_v37  ;;  %v6001_v37 = vunpack.c.l.b16 %v5863_v40  ;;  %v9552_v51 = vor.u32 %v10076_v12, %v9551_v29  ;;  %v9704_v49 = vld [vmem:[%s12928_s7 + $0x60] sm:$0xf]  ;;  %v11978_v40 = vld [vmem:[%s11687_s24 + $0x14] sm:$0xff] }
 0x337   : > { %9468 = vmatmul.msk.bf16.gmra.mxu2 %vm700_vm1, %v5648_v43  ;;  %9519 = vmatmul.msk.bf16.gmra.mxu0 %vm700_vm1, %v5923_v44  ;;  %v4811_v58 = vld [vmem:[#allocation2 + $0x40] sm:$0xff]  ;;  %v5916_v43 = vpack.c.b16 %v5910_v38, %v5910_v38  ;;  %v10071_v44 = vld [vmem:[%s11693_s28 + $0x4] sm:$0xf0] }
 0x338   : > { %4780 = vst.msk [vmem:[#allocation2 + $0x48] sm:$0xff] %vm632_vm4, %v4770_v55  ;;  %v5091_v3 = vadd.f32 %v5079_v60, %v4811_v58  ;;  %9493 = vmatmul.msk.bf16.gmra.mxu3 %vm700_vm1, %v5772_v27  ;;  %9544 = vmatmul.msk.bf16.gmra.mxu1 %vm700_vm1, %v6014_v32  ;;  %v9703_v25 = vld [vmem:[%s12927_s6 + $0x60] sm:$0xf]  ;;  %v6980_v32 = vsel %vm716_vm0, %v9704_v49, 0  ;;  %v6007_v55 = vpack.c.b16 %v6001_v37, %v6001_v37  ;;  %v5127_v60 = vld [vmem:[#allocation2 + $0x10] sm:$0xff]  ;;  %v6158_v49 = vrot.slane %v11978_v40, 1 }
 0x339   : > { %v7071_v52 = vsel %vm716_vm0, %v9703_v25, 0  ;;  %6989 = vmatpush.bf16.msra.mxu0 %v6980_v32  ;;  %v9577_v47 = vor.u32 %v10071_v44, %v9576_v15  ;;  %v11983_v25 = vld [vmem:[%s11693_s28 + $0x14] sm:$0xff]  ;;  %v10084_v40 = vld [vmem:[%s11693_s28 + $0x1c] sm:$0xff] }
 0x33a   : > { %v5205_v56 = vpop.f32.mrf.mxu2  ;;  %5101 = vst.msk [vmem:[#allocation2 + $0x40] sm:$0xff] %vm632_vm4, %v5091_v3  ;;  %7080 = vmatpush.bf16.msra.mxu1 %v7071_v52  ;;  %v5926_v3 = vrot.slane %v5916_v43, 1 }
 0x33b   : > { %v5296_v50 = vpop.f32.mrf.mxu3 }
 0x33c   : > { %v4947_v61 = vpop.f32.mrf.mxu0  ;;  %v5297_v23 = vadd.f32 %v5296_v50, %v5205_v56  ;;  %v11948_v56 = vld [vmem:[%s11693_s28 + $0xc] sm:$0xff]  ;;  %v10086_v50 = vld [vmem:[%s11687_s24 + $0x4] sm:$0xf0]  ;;  %v5927_v53 = vsel %vm1220_vm3, %v5924_v26, %v5926_v3 }
 0x33d   : > { %v5080_v5 = vpop.f32.mrf.mxu1  ;;  %v6247_v63 = vrot.slane %v11948_v56, 1  ;;  %v9604_v2 = vor.u32 %v10086_v50, %v9603_v17 }
 0x33e   : > { %v5321_v14 = vadd.f32 %v5297_v23, %v5125_v20  ;;  %v5081_v24 = vadd.f32 %v5080_v5, %v4947_v61  ;;  %v6155_v61 = vrot.slane %v9552_v51, 1  ;;  %v6017_v20 = vrot.slane %v6007_v55, 1 }
 0x33f   : > { %v4812_v31 = vld [vmem:[#allocation2 + $0x48] sm:$0xff]  ;;  %v6246_v5 = vrot.slane %v9577_v47, 1  ;;  %v6394_v26 = vshrl.u32 %v9604_v2, 16  ;;  %v6397_v30 = vshll.u32 %v9604_v2, 16 }
 0x340   : > { %5331 = vst.msk [vmem:[#allocation2] sm:$0xff] %vm632_vm4, %v5321_v14  ;;  %v5092_v57 = vadd.f32 %v5081_v24, %v4812_v31  ;;  %v10081_v14 = vld [vmem:[%s11693_s28 + $0x4] sm:$0xf0]  ;;  %v6157_v31 = vsel %vm1220_vm3, %v6155_v61, %v6156_v13 }
 0x341   : > { %v9629_v16 = vor.u32 %v10081_v14, %v9628_v33  ;;  %v6248_v7 = vsel %vm1220_vm3, %v6246_v5, %v6247_v63  ;;  %v6396_v12 = vrot.slane %v6394_v26, 1  ;;  %v5130_v2 = vld [vmem:[#allocation2 + $0x28] sm:$0xff] }
 0x342   : > { %v5207_v10 = vpop.f32.mrf.mxu2  ;;  %5102 = vst.msk [vmem:[#allocation2 + $0x48] sm:$0xff] %vm632_vm4, %v5092_v57  ;;  %v10087_v57 = vld [vmem:[%s11687_s24 + $0xc] sm:$0xff] }
 0x343   : > { %v5298_v34 = vpop.f32.mrf.mxu3  ;;  %v6527_v38 = vshrl.u32 %v9629_v16, 16 }
 0x344   : > { %v5427_v4 = vpop.f32.mrf.mxu0  ;;  %v5299_v39 = vadd.f32 %v5298_v34, %v5207_v10  ;;  %v10082_v34 = vld [vmem:[%s11693_s28 + $0xc] sm:$0xff] }
 0x345   : > { %v5504_v8 = vpop.f32.mrf.mxu1  ;;  %v6529_v44 = vrot.slane %v6527_v38, 1 }
 0x346   : > { %v5322_v6 = vadd.f32 %v5299_v39, %v5126_v62  ;;  %v5505_v42 = vadd.f32 %v5504_v8, %v5427_v4  ;;  %v5128_v4 = vld [vmem:[#allocation2 + $0x18] sm:$0xff]  ;;  %v6402_v8 = vshrl.u32 %v10087_v57, 16 }
 0x347   : > { %9469 = vmatmul.msk.bf16.gmra.mxu2 %vm700_vm1, %v5656_v19  ;;  %9520 = vmatmul.msk.bf16.gmra.mxu0 %vm700_vm1, %v5925_v28  ;;  %v5361_v41 = vld [vmem:[#allocation2] sm:$0xff]  ;;  %v6018_v28 = vsel %vm1220_vm3, %v6015_v35, %v6017_v20 }
 0x348   : > { %5332 = vst.msk [vmem:[#allocation2 + $0x8] sm:$0xff] %vm632_vm4, %v5322_v6  ;;  %v5529_v1 = vadd.f32 %v5505_v42, %v5361_v41  ;;  %9494 = vmatmul.msk.bf16.gmra.mxu3 %vm700_vm1, %v5780_v36  ;;  %9545 = vmatmul.msk.bf16.gmra.mxu1 %vm700_vm1, %v6016_v22  ;;  %v6405_v36 = vshll.u32 %v10087_v57, 16  ;;  %v6530_v6 = vshll.u32 %v9629_v16, 16  ;;  %v6535_v42 = vshrl.u32 %v10082_v34, 16 }
 0x349   : > { %v6538_v41 = vshll.u32 %v10082_v34, 16  ;;  %v6547_v16 = vshll.u32 %v10083_v48, 16  ;;  %v5131_v34 = vld [vmem:[#allocation2 + $0x30] sm:$0xff] }
 0x34a   : > { %v5210_v18 = vpop.f32.mrf.mxu2  ;;  %5539 = vst.msk [vmem:[#allocation2] sm:$0xff] %vm632_vm4, %v5529_v1  ;;  %v6399_v1 = vrot.slane %v6397_v30, 2  ;;  %v6407_v37 = vrot.slane %v6405_v36, 2  ;;  %v6537_v32 = vrot.slane %v6535_v42, 1 }
 0x34b   : > { %v5301_v27 = vpop.f32.mrf.mxu3  ;;  %v6540_v52 = vrot.slane %v6538_v41, 2  ;;  %v6549_v36 = vrot.slane %v6547_v16, 2 }
 0x34c   : > { %v5429_v46 = vpop.f32.mrf.mxu0  ;;  %v5302_v54 = vadd.f32 %v5301_v27, %v5210_v18  ;;  %v6404_v18 = vrot.slane %v6402_v8, 1  ;;  %v6532_v27 = vrot.slane %v6530_v6, 2 }
 0x34d   : > { %v5506_v58 = vpop.f32.mrf.mxu1  ;;  %v6541_v17 = vor.u32 %v6540_v52, %v6537_v32 }
 0x34e   : > { %v5323_v0 = vadd.f32 %v5302_v54, %v5127_v60  ;;  %v5507_v9 = vadd.f32 %v5506_v58, %v5429_v46  ;;  %v5129_v46 = vld [vmem:[#allocation2 + $0x20] sm:$0xff]  ;;  %v6400_v60 = vor.u32 %v6399_v1, %v6396_v12  ;;  %v6408_v58 = vor.u32 %v6407_v37, %v6404_v18 }
 0x34f   : > { %v5362_v21 = vld [vmem:[#allocation2 + $0x8] sm:$0xff]  ;;  %v6533_v61 = vor.u32 %v6532_v27, %v6529_v44 }
 0x350   : > { %5333 = vst.msk [vmem:[#allocation2 + $0x10] sm:$0xff] %vm632_vm4, %v5323_v0  ;;  %v5530_v45 = vadd.f32 %v5507_v9, %v5362_v21  ;;  %v6249_v9 = vrot.slane %v11983_v25, 1  ;;  %v6159_v21 = vsel %vm1220_vm3, %v6156_v13, %v6158_v49 }
 0x352   : > { %v5212_v23 = vpop.f32.mrf.mxu2  ;;  %5540 = vst.msk [vmem:[#allocation2 + $0x8] sm:$0xff] %vm632_vm4, %v5530_v45  ;;  %v6409_v45 = vsel %vm1697_vm5, %v6400_v60, %v6408_v58  ;;  %v6250_v14 = vsel %vm1220_vm3, %v6247_v63, %v6249_v9  ;;  %v6544_v63 = vshrl.u32 %v10083_v48, 16 }
 0x353   : > { %v5303_v10 = vpop.f32.mrf.mxu3 }
 0x354   : > { %v5432_v24 = vpop.f32.mrf.mxu0  ;;  %v5304_v11 = vadd.f32 %v5303_v10, %v5212_v23  ;;  %v10088_v23 = vld [vmem:[%s11687_s24 + $0x14] sm:$0xff]  ;;  %v6546_v8 = vrot.slane %v6544_v63, 1 }
 0x355   : > { %v5509_v19 = vpop.f32.mrf.mxu1  ;;  %v6414_v57 = vshll.u32 %v10088_v23, 16 }
 0x356   : > { %v5324_v39 = vadd.f32 %v5304_v11, %v5128_v4  ;;  %v5510_v62 = vadd.f32 %v5509_v19, %v5432_v24  ;;  %v6542_v24 = vsel %vm1697_vm5, %v6533_v61, %v6541_v17  ;;  %v12007_v19 = vld [vmem:[%s11687_s24 + $0x1c] sm:$0xff]  ;;  %v12015_v12 = vor.u32 %v6549_v36, %v6546_v8 }
 0x357   : > { %9521 = vmatmul.msk.bf16.gmra.mxu0 %vm700_vm1, %v5927_v53  ;;  %9569 = vmatmul.msk.bf16.vlgmr.msrb.gmra.mxu2 %vm700_vm1, %v6157_v31  ;;  %v5363_v22 = vld [vmem:[#allocation2 + $0x10] sm:$0xff]  ;;  %v6411_v31 = vshrl.u32 %v10088_v23, 16 }
 0x358   : > { %5334 = vst.msk [vmem:[#allocation2 + $0x18] sm:$0xff] %vm632_vm4, %v5324_v39  ;;  %v5531_v59 = vadd.f32 %v5510_v62, %v5363_v22  ;;  %9546 = vmatmul.msk.bf16.gmra.mxu1 %vm700_vm1, %v6018_v28  ;;  %9594 = vmatmul.msk.bf16.vlgmr.msrb.gmra.mxu3 %vm700_vm1, %v6248_v7  ;;  %v6416_v7 = vrot.slane %v6414_v57, 2  ;;  %v12010_v62 = vld [vmem:[%s11693_s28 + $0x1c] sm:$0xff]  ;;  %v6551_v27 = vsel %vm1697_vm5, %v6541_v17, %v12015_v12 }
 0x359   : > { %v6413_v28 = vrot.slane %v6411_v31, 1 }
 0x35a   : > { %v5215_v35 = vpop.f32.mrf.mxu2  ;;  %5541 = vst.msk [vmem:[#allocation2 + $0x10] sm:$0xff] %vm632_vm4, %v5531_v59 }
 0x35b   : > { %v5306_v43 = vpop.f32.mrf.mxu3  ;;  %v6417_v38 = vor.u32 %v6416_v7, %v6413_v28  ;;  %v5134_v7 = vld [vmem:[#allocation2 + $0x48] sm:$0xff] }
 0x35c   : > { %v5434_v29 = vpop.f32.mrf.mxu0  ;;  %v5307_v15 = vadd.f32 %v5306_v43, %v5215_v35  ;;  %v6160_v35 = vrot.slane %v12007_v19, 1  ;;  %v10089_v43 = vld [vmem:[%s11687_s24 + $0x1c] sm:$0xff]  ;;  %v6112_v19 = vld [vmem:[%s11687_s24 + $0x2c] sm:$0x1] }
 0x35d   : > { %v5511_v51 = vpop.f32.mrf.mxu1  ;;  %v6418_v37 = vsel %vm1697_vm5, %v6408_v58, %v6417_v38  ;;  %v6420_v52 = vshrl.u32 %v10089_v43, 16 }
 0x35e   : > { %v5325_v54 = vadd.f32 %v5307_v15, %v5129_v46  ;;  %v5512_v55 = vadd.f32 %v5511_v51, %v5434_v29  ;;  %v6251_v29 = vrot.slane %v12010_v62, 1  ;;  %v6161_v18 = vsel %vm1220_vm3, %v6158_v49, %v6160_v35  ;;  %v5132_v46 = vld [vmem:[#allocation2 + $0x38] sm:$0xff]  ;;  %v10085_v62 = vld [vmem:[%s11693_s28 + $0x24] sm:$0xff] }
 0x35f   : > { %v5364_v3 = vld [vmem:[#allocation2 + $0x18] sm:$0xff]  ;;  %v6422_v61 = vrot.slane %v6420_v52, 1 }
 0x360   : > { %5335 = vst.msk [vmem:[#allocation2 + $0x20] sm:$0xff] %vm632_vm4, %v5325_v54  ;;  %v5532_v47 = vadd.f32 %v5512_v55, %v5364_v3  ;;  %v6252_v25 = vsel %vm1220_vm3, %v6249_v9, %v6251_v29  ;;  %v6423_v54 = vshll.u32 %v10089_v43, 16  ;;  %v6553_v3 = vshrl.u32 %v10084_v40, 16  ;;  %v12034_v9 = vld [vmem:[%s11687_s24 + $0x24] sm:$0xff] }
 0x362   : > { %v5217_v0 = vpop.f32.mrf.mxu2  ;;  %5542 = vst.msk [vmem:[#allocation2 + $0x18] sm:$0xff] %vm632_vm4, %v5532_v47  ;;  %v6556_v47 = vshll.u32 %v10084_v40, 16  ;;  %v6425_v17 = vrot.slane %v6423_v54, 2 }
 0x363   : > { %v5308_v20 = vpop.f32.mrf.mxu3 }
 0x364   : > { %v5437_v50 = vpop.f32.mrf.mxu0  ;;  %v5309_v5 = vadd.f32 %v5308_v20, %v5217_v0  ;;  %v12037_v20 = vld [vmem:[%s11693_s28 + $0x24] sm:$0xff]  ;;  %v12040_v48 = vor.u32 %v6425_v17, %v6422_v61 }
 0x365   : > { %v5514_v33 = vpop.f32.mrf.mxu1  ;;  %v6253_v57 = vrot.slane %v12037_v20, 1 }
 0x366   : > { %v5326_v13 = vadd.f32 %v5309_v5, %v5130_v2  ;;  %v5515_v53 = vadd.f32 %v5514_v33, %v5437_v50  ;;  %v6555_v5 = vrot.slane %v6553_v3, 1  ;;  %v6558_v2 = vrot.slane %v6556_v47, 2 }
 0x367   : > { %9570 = vmatmul.msk.bf16.gmra.mxu2 %vm700_vm1, %v6159_v21  ;;  %9621 = vmatmul.msk.bf16.vlgmr.msrb.gmra.mxu0 %vm700_vm1, %v6409_v45  ;;  %v5365_v10 = vld [vmem:[#allocation2 + $0x20] sm:$0xff]  ;;  %v6427_v16 = vsel %vm1697_vm5, %v6417_v38, %v12040_v48 }
 0x368   : > { %5336 = vst.msk [vmem:[#allocation2 + $0x28] sm:$0xff] %vm632_vm4, %v5326_v13  ;;  %v5533_v11 = vadd.f32 %v5515_v53, %v5365_v10  ;;  %9595 = vmatmul.msk.bf16.gmra.mxu3 %vm700_vm1, %v6250_v14  ;;  %9646 = vmatmul.msk.bf16.vlgmr.msrb.gmra.mxu1 %vm700_vm1, %v6542_v24  ;;  %v5133_v45 = vld [vmem:[#allocation2 + $0x40] sm:$0xff]  ;;  %v6162_v24 = vrot.slane %v12034_v9, 1  ;;  %v12044_v10 = vor.u32 %v6558_v2, %v6555_v5 }
 0x36a   : > { %v5220_v56 = vpop.f32.mrf.mxu2  ;;  %5543 = vst.msk [vmem:[#allocation2 + $0x20] sm:$0xff] %vm632_vm4, %v5533_v11  ;;  %v10090_v11 = vld [vmem:[%s11687_s24 + $0x24] sm:$0xff]  ;;  %v6163_v63 = vsel %vm1220_vm3, %v6160_v35, %v6162_v24 }
 0x36b   : > { %v5311_v26 = vpop.f32.mrf.mxu3  ;;  %v6432_v35 = vshll.u32 %v10090_v11, 16 }
 0x36c   : > { %v5439_v4 = vpop.f32.mrf.mxu0  ;;  %v5312_v30 = vadd.f32 %v5311_v26, %v5220_v56 }
 0x36d   : > { %v5516_v39 = vpop.f32.mrf.mxu1 }
 0x36e   : > { %v5327_v22 = vadd.f32 %v5312_v30, %v5131_v34  ;;  %v5517_v59 = vadd.f32 %v5516_v39, %v5439_v4  ;;  %v6254_v30 = vsel %vm1220_vm3, %v6251_v29, %v6253_v57  ;;  %v6560_v34 = vsel %vm1697_vm5, %v12015_v12, %v12044_v10 }
 0x36f   : > { %v5366_v6 = vld [vmem:[#allocation2 + $0x28] sm:$0xff]  ;;  %v6429_v39 = vshrl.u32 %v10090_v11, 16  ;;  %v6562_v12 = vshrl.u32 %v10085_v62, 16 }
 0x370   : > { %5337 = vst.msk [vmem:[#allocation2 + $0x30] sm:$0xff] %vm632_vm4, %v5327_v22  ;;  %v5534_v42 = vadd.f32 %v5517_v59, %v5366_v6  ;;  %v6148_v22 = vunpack.c.l.b16 %v6112_v19  ;;  %v6101_v59 = vld [vmem:[%s11693_s28 + $0x2c] sm:$0x1] }
 0x371   : > { %v6431_v29 = vrot.slane %v6429_v39, 1  ;;  %v6564_v54 = vrot.slane %v6562_v12, 1  ;;  %v5573_v12 = vld [vmem:[#allocation2 + $0x10] sm:$0xff] }
 0x372   : > { %v5222_v41 = vpop.f32.mrf.mxu2  ;;  %5544 = vst.msk [vmem:[#allocation2 + $0x28] sm:$0xff] %vm632_vm4, %v5534_v42  ;;  %v6154_v43 = vpack.c.b16 %v6148_v22, %v6148_v22  ;;  %v12107_v22 = vld [vmem:[%s11687_s24 + $0xc] sm:$0xff] }
 0x373   : > { %v5313_v15 = vpop.f32.mrf.mxu3 }
 0x374   : > { %v5442_v1 = vpop.f32.mrf.mxu0  ;;  %v5314_v44 = vadd.f32 %v5313_v15, %v5222_v41  ;;  %v6239_v41 = vunpack.c.l.b16 %v6101_v59  ;;  %v6434_v15 = vrot.slane %v6432_v35, 2  ;;  %v9808_v35 = vld [vmem:[%s12928_s7 + $0x68] sm:$0xf] }
 0x375   : > { %v5519_v51 = vpop.f32.mrf.mxu1 }
 0x376   : > { %v5328_v32 = vadd.f32 %v5314_v44, %v5132_v46  ;;  %v5520_v49 = vadd.f32 %v5519_v51, %v5442_v1  ;;  %v6565_v1 = vshll.u32 %v10085_v62, 16  ;;  %v9756_v44 = vld [vmem:[%s12928_s7 + $0x64] sm:$0xf]  ;;  %v6245_v52 = vpack.c.b16 %v6239_v41, %v6239_v41 }
 0x377   : > { %9571 = vmatmul.msk.bf16.gmra.mxu2 %vm700_vm1, %v6161_v18  ;;  %9622 = vmatmul.msk.bf16.gmra.mxu0 %vm700_vm1, %v6418_v37  ;;  %v5367_v55 = vld [vmem:[#allocation2 + $0x30] sm:$0xff]  ;;  %v6350_v18 = vld [vmem:[%s11687_s24 + $0x2c] sm:$0x3]  ;;  %v9755_v46 = vld [vmem:[%s12927_s6 + $0x64] sm:$0xf]  ;;  %v12078_v61 = vor.u32 %v6434_v15, %v6431_v29 }
 0x378   : > { %5338 = vst.msk [vmem:[#allocation2 + $0x38] sm:$0xff] %vm632_vm4, %v5328_v32  ;;  %v5535_v60 = vadd.f32 %v5520_v49, %v5367_v55  ;;  %9596 = vmatmul.msk.bf16.gmra.mxu3 %vm700_vm1, %v6252_v25  ;;  %9647 = vmatmul.msk.bf16.gmra.mxu1 %vm700_vm1, %v6551_v27  ;;  %v7260_v25 = vsel %vm716_vm0, %v9756_v44, 0  ;;  %v7393_v27 = vsel %vm716_vm0, %v9755_v46, 0  ;;  %v5571_v32 = vld [vmem:[#allocation2] sm:$0xff]  ;;  %v6567_v55 = vrot.slane %v6565_v1, 2  ;;  %v12118_v15 = vld [vmem:[%s11693_s28 + $0xc] sm:$0xff] }
 0x379   : > { %7269 = vmatpush.bf16.msrb.mxu2 %v7260_v25  ;;  %7402 = vmatpush.bf16.msrb.mxu3 %v7393_v27  ;;  %v9680_v62 = vld [vmem:[%s11693_s28 + $0x4] sm:$0xc]  ;;  %v6716_v27 = vrot.slane %v12107_v22, 2 }
 0x37a   : > { %v5225_v58 = vpop.f32.mrf.mxu2  ;;  %5545 = vst.msk [vmem:[#allocation2 + $0x30] sm:$0xff] %vm632_vm4, %v5535_v60  ;;  %v6386_v60 = vunpack.c.l.b16 %v6350_v18  ;;  %v12081_v5 = vor.u32 %v6567_v55, %v6564_v54  ;;  %v6807_v55 = vrot.slane %v12118_v15, 2 }
 0x37b   : > { %v5316_v50 = vpop.f32.mrf.mxu3 }
 0x37c   : > { %v5444_v0 = vpop.f32.mrf.mxu0  ;;  %v5317_v21 = vadd.f32 %v5316_v50, %v5225_v58  ;;  %v6339_v58 = vld [vmem:[%s11693_s28 + $0x2c] sm:$0x3]  ;;  %v6392_v2 = vpack.c.b16 %v6386_v60, %v6386_v60  ;;  %v6569_v9 = vsel %vm1697_vm5, %v12044_v10, %v12081_v5 }
 0x37d   : > { %v5521_v23 = vpop.f32.mrf.mxu1 }
 0x37e   : > { %v5329_v33 = vadd.f32 %v5317_v21, %v5133_v45  ;;  %v5522_v14 = vadd.f32 %v5521_v23, %v5444_v0  ;;  %v6164_v0 = vrot.slane %v6154_v43, 1  ;;  %v6519_v45 = vunpack.c.l.b16 %v6339_v58 }
 0x37f   : > { %v5368_v13 = vld [vmem:[#allocation2 + $0x38] sm:$0xff]  ;;  %v6255_v23 = vrot.slane %v6245_v52, 1 }
 0x380   : > { %5339 = vst.msk [vmem:[#allocation2 + $0x40] sm:$0xff] %vm632_vm4, %v5329_v33  ;;  %v5536_v53 = vadd.f32 %v5522_v14, %v5368_v13  ;;  %v6165_v14 = vsel %vm1220_vm3, %v6162_v24, %v6164_v0  ;;  %v6436_v13 = vsel %vm1697_vm5, %v12040_v48, %v12078_v61  ;;  %v6525_v11 = vpack.c.b16 %v6519_v45, %v6519_v45 }
 0x381   : > { %v6438_v24 = vshrl.u32 %v6392_v2, 16  ;;  %v6441_v48 = vshll.u32 %v6392_v2, 16 }
 0x382   : > { %v5227_v31 = vpop.f32.mrf.mxu2  ;;  %5546 = vst.msk [vmem:[#allocation2 + $0x38] sm:$0xff] %vm632_vm4, %v5536_v53  ;;  %v6574_v10 = vshll.u32 %v6525_v11, 16 }
 0x383   : > { %v5318_v4 = vpop.f32.mrf.mxu3  ;;  %v6443_v39 = vrot.slane %v6441_v48, 2  ;;  %v5575_v48 = vld [vmem:[#allocation2 + $0x20] sm:$0xff] }
 0x384   : > { %v5447_v56 = vpop.f32.mrf.mxu0  ;;  %v5319_v28 = vadd.f32 %v5318_v4, %v5227_v31  ;;  %v6576_v43 = vrot.slane %v6574_v10, 2 }
 0x385   : > { %v5524_v26 = vpop.f32.mrf.mxu1 }
 0x386   : > { %v5330_v8 = vadd.f32 %v5319_v28, %v5134_v7  ;;  %v5525_v36 = vadd.f32 %v5524_v26, %v5447_v56  ;;  %v5572_v56 = vld [vmem:[#allocation2 + $0x8] sm:$0xff]  ;;  %v9655_v7 = vld [vmem:[%s11687_s24 + $0x4] sm:$0xc] }
 0x387   : > { %9572 = vmatmul.msk.bf16.gmra.mxu2 %vm700_vm1, %v6163_v63  ;;  %9623 = vmatmul.msk.bf16.gmra.mxu0 %vm700_vm1, %v6427_v16  ;;  %v5369_v38 = vld [vmem:[#allocation2 + $0x40] sm:$0xff]  ;;  %v6256_v16 = vsel %vm1220_vm3, %v6253_v57, %v6255_v23  ;;  %v10096_v26 = vld [vmem:[%s11687_s24 + $0x4] sm:$0xf0] }
 0x388   : > { %5340 = vst.msk [vmem:[#allocation2 + $0x48] sm:$0xff] %vm632_vm4, %v5330_v8  ;;  %v5537_v6 = vadd.f32 %v5525_v36, %v5369_v38  ;;  %9597 = vmatmul.msk.bf16.gmra.mxu3 %vm700_vm1, %v6254_v30  ;;  %9648 = vmatmul.msk.bf16.gmra.mxu1 %vm700_vm1, %v6560_v34  ;;  %v6571_v30 = vshrl.u32 %v6525_v11, 16  ;;  %v6440_v34 = vrot.slane %v6438_v24, 1  ;;  %v10091_v8 = vld [vmem:[%s11693_s28 + $0x4] sm:$0xf0]  ;;  %v9656_v59 = vor.u32 %v10096_v26, %v9655_v7  ;;  %v12142_v11 = vld [vmem:[%s11687_s24 + $0x10] sm:$0xff] }
 0x389   : > { %v9807_v38 = vld [vmem:[%s12927_s6 + $0x68] sm:$0xf]  ;;  %v9681_v44 = vor.u32 %v10091_v8, %v9680_v62  ;;  %v12151_v7 = vld [vmem:[%s11693_s28 + $0x10] sm:$0xff]  ;;  %v6954_v10 = vrot.slane %v12142_v11, 2 }
 0x38a   : > { %v5684_v42 = vpop.f32.mrf.mxu2  ;;  %5547 = vst.msk [vmem:[#allocation2 + $0x40] sm:$0xff] %vm632_vm4, %v5537_v6  ;;  %v7631_v41 = vsel %vm716_vm0, %v9807_v38, 0  ;;  %v6444_v18 = vor.u32 %v6443_v39, %v6440_v34  ;;  %v6715_v25 = vrot.slane %v9656_v59, 2  ;;  %v7045_v22 = vrot.slane %v12151_v7, 2 }
 0x38b   : > { %v5808_v51 = vpop.f32.mrf.mxu3  ;;  %7640 = vmatpush.bf16.msrb.mxu1 %v7631_v41  ;;  %v6806_v54 = vrot.slane %v9681_v44, 2  ;;  %v5576_v41 = vld [vmem:[#allocation2 + $0x28] sm:$0xff] }
 0x38c   : > { %v5449_v37 = vpop.f32.mrf.mxu0  ;;  %v5809_v40 = vadd.f32 %v5808_v51, %v5684_v42  ;;  %v7540_v42 = vsel %vm716_vm0, %v9808_v35, 0  ;;  %v6445_v58 = vsel %vm1697_vm5, %v12078_v61, %v6444_v18 }
 0x38d   : > { %v5526_v49 = vpop.f32.mrf.mxu1  ;;  %7549 = vmatpush.bf16.msrb.mxu0 %v7540_v42  ;;  %v6808_v45 = vsel %vm2020_vm6, %v6806_v54, %v6807_v55  ;;  %v12174_v54 = vld [vmem:[%s11693_s28 + $0x18] sm:$0xff] }
 0x38e   : > { %v5833_v3 = vadd.f32 %v5809_v40, %v5571_v32  ;;  %v5527_v47 = vadd.f32 %v5526_v49, %v5449_v37  ;;  %v6573_v37 = vrot.slane %v6571_v30, 1 }
 0x38f   : > { %v5370_v17 = vld [vmem:[#allocation2 + $0x48] sm:$0xff] }
 0x390   : > { %5843 = vst.msk [vmem:[#allocation2] sm:$0xff] %vm632_vm4, %v5833_v3  ;;  %v5538_v50 = vadd.f32 %v5527_v47, %v5370_v17  ;;  %v6577_v52 = vor.u32 %v6576_v43, %v6573_v37  ;;  %v6717_v3 = vsel %vm2020_vm6, %v6715_v25, %v6716_v27  ;;  %v5574_v17 = vld [vmem:[#allocation2 + $0x18] sm:$0xff] }
 0x391   : > { %v10108_v25 = vld [vmem:[%s11687_s24 + $0x18] sm:$0xff] }
 0x392   : > { %v5686_v21 = vpop.f32.mrf.mxu2  ;;  %5548 = vst.msk [vmem:[#allocation2 + $0x48] sm:$0xff] %vm632_vm4, %v5538_v50 }
 0x393   : > { %v5810_v53 = vpop.f32.mrf.mxu3 }
 0x394   : > { %v5955_v33 = vpop.f32.mrf.mxu0  ;;  %v5811_v31 = vadd.f32 %v5810_v53, %v5686_v21  ;;  %v6578_v21 = vsel %vm1697_vm5, %v12081_v5, %v6577_v52  ;;  %v12138_v53 = vld [vmem:[%s11687_s24 + $0x14] sm:$0xff]  ;;  %v12171_v52 = vld [vmem:[%s11693_s28 + $0x1c] sm:$0xff] }
 0x395   : > { %v6046_v63 = vpop.f32.mrf.mxu1 }
 0x396   : > { %v5834_v4 = vadd.f32 %v5811_v31, %v5572_v56  ;;  %v6047_v19 = vadd.f32 %v6046_v63, %v5955_v33  ;;  %v9707_v33 = vld [vmem:[%s11687_s24 + $0x8] sm:$0xc] }
 0x397   : > { %9573 = vmatmul.msk.bf16.gmra.mxu2 %vm700_vm1, %v6165_v14  ;;  %9624 = vmatmul.msk.bf16.gmra.mxu0 %vm700_vm1, %v6436_v13  ;;  %v5875_v28 = vld [vmem:[#allocation2] sm:$0xff]  ;;  %v10106_v14 = vld [vmem:[%s11687_s24 + $0x8] sm:$0xf0]  ;;  %v9732_v63 = vld [vmem:[%s11693_s28 + $0x8] sm:$0xc] }
 0x398   : > { %5844 = vst.msk [vmem:[#allocation2 + $0x8] sm:$0xff] %vm632_vm4, %v5834_v4  ;;  %v6071_v20 = vadd.f32 %v6047_v19, %v5875_v28  ;;  %9598 = vmatmul.msk.bf16.gmra.mxu3 %vm700_vm1, %v6256_v16  ;;  %9649 = vmatmul.msk.bf16.gmra.mxu1 %vm700_vm1, %v6569_v9  ;;  %v9708_v56 = vor.u32 %v10106_v14, %v9707_v33  ;;  %v10101_v16 = vld [vmem:[%s11693_s28 + $0x8] sm:$0xf0]  ;;  %v6718_v19 = vrot.slane %v12138_v53, 2  ;;  %v12148_v28 = vld [vmem:[%s11693_s28 + $0x14] sm:$0xff] }
 0x399   : > { %v9733_v26 = vor.u32 %v10101_v16, %v9732_v63  ;;  %v6809_v8 = vrot.slane %v12148_v28, 2  ;;  %v5578_v14 = vld [vmem:[#allocation2 + $0x38] sm:$0xff]  ;;  %v5579_v28 = vld [vmem:[#allocation2 + $0x40] sm:$0xff] }
 0x39a   : > { %v5689_v57 = vpop.f32.mrf.mxu2  ;;  %6081 = vst.msk [vmem:[#allocation2] sm:$0xff] %vm632_vm4, %v6071_v20  ;;  %v6953_v30 = vrot.slane %v9708_v56, 2  ;;  %v6719_v35 = vsel %vm2020_vm6, %v6716_v27, %v6718_v19 }
 0x39b   : > { %v5813_v6 = vpop.f32.mrf.mxu3 }
 0x39c   : > { %v5957_v36 = vpop.f32.mrf.mxu0  ;;  %v5814_v29 = vadd.f32 %v5813_v6, %v5689_v57  ;;  %v6955_v38 = vsel %vm2020_vm6, %v6953_v30, %v6954_v10 }
 0x39d   : > { %v6048_v1 = vpop.f32.mrf.mxu1 }
 0x39e   : > { %v5835_v46 = vadd.f32 %v5814_v29, %v5573_v12  ;;  %v6049_v51 = vadd.f32 %v6048_v1, %v5957_v36  ;;  %v7044_v36 = vrot.slane %v9733_v26, 2  ;;  %v6810_v12 = vsel %vm2020_vm6, %v6807_v55, %v6809_v8  ;;  %v12197_v26 = vld [vmem:[%s11693_s28 + $0x24] sm:$0xff] }
 0x39f   : > { %v5876_v40 = vld [vmem:[#allocation2 + $0x8] sm:$0xff] }
 0x3a0   : > { %5845 = vst.msk [vmem:[#allocation2 + $0x10] sm:$0xff] %vm632_vm4, %v5835_v46  ;;  %v6072_v32 = vadd.f32 %v6049_v51, %v5876_v40  ;;  %v7046_v1 = vsel %vm2020_vm6, %v7044_v36, %v7045_v22  ;;  %v10099_v51 = vld [vmem:[%s11687_s24 + $0x1c] sm:$0xff]  ;;  %v6813_v36 = vrot.slane %v12197_v26, 2 }
 0x3a2   : > { %v5691_v49 = vpop.f32.mrf.mxu2  ;;  %6082 = vst.msk [vmem:[#allocation2 + $0x8] sm:$0xff] %vm632_vm4, %v6072_v32  ;;  %v5577_v32 = vld [vmem:[#allocation2 + $0x30] sm:$0xff] }
 0x3a3   : > { %v5815_v47 = vpop.f32.mrf.mxu3 }
 0x3a4   : > { %v5960_v60 = vpop.f32.mrf.mxu0  ;;  %v5816_v0 = vadd.f32 %v5815_v47, %v5691_v49 }
 0x3a5   : > { %v6051_v50 = vpop.f32.mrf.mxu1 }
 0x3a6   : > { %v5836_v23 = vadd.f32 %v5816_v0, %v5574_v17  ;;  %v6052_v61 = vadd.f32 %v6051_v50, %v5960_v60  ;;  %v6811_v50 = vrot.slane %v12171_v52, 2 }
 0x3a7   : > { %9625 = vmatmul.msk.bf16.gmra.mxu0 %vm700_vm1, %v6445_v58  ;;  %9673 = vmatmul.msk.bf16.vlgmr.msra.gmra.mxu2 %vm700_vm1, %v6717_v3  ;;  %v5877_v2 = vld [vmem:[#allocation2 + $0x10] sm:$0xff]  ;;  %v6720_v58 = vrot.slane %v10099_v51, 2  ;;  %v6956_v3 = vrot.slane %v10108_v25, 2 }
 0x3a8   : > { %5846 = vst.msk [vmem:[#allocation2 + $0x18] sm:$0xff] %vm632_vm4, %v5836_v23  ;;  %v6073_v13 = vadd.f32 %v6052_v61, %v5877_v2  ;;  %9650 = vmatmul.msk.bf16.gmra.mxu1 %vm700_vm1, %v6578_v21  ;;  %9698 = vmatmul.msk.bf16.vlgmr.msra.gmra.mxu3 %vm700_vm1, %v6808_v45  ;;  %v7047_v21 = vrot.slane %v12174_v54, 2 }
 0x3a9   : > { %v6721_v23 = vsel %vm2020_vm6, %v6718_v19, %v6720_v58  ;;  %v6957_v61 = vsel %vm2020_vm6, %v6954_v10, %v6956_v3 }
 0x3aa   : > { %v5694_v5 = vpop.f32.mrf.mxu2  ;;  %6083 = vst.msk [vmem:[#allocation2 + $0x10] sm:$0xff] %vm632_vm4, %v6073_v13  ;;  %v7048_v53 = vsel %vm2020_vm6, %v7045_v22, %v7047_v21 }
 0x3ab   : > { %v5818_v9 = vpop.f32.mrf.mxu3 }
 0x3ac   : > { %v5962_v31 = vpop.f32.mrf.mxu0  ;;  %v5819_v24 = vadd.f32 %v5818_v9, %v5694_v5  ;;  %v6812_v5 = vsel %vm2020_vm6, %v6809_v8, %v6811_v50 }
 0x3ad   : > { %v6053_v4 = vpop.f32.mrf.mxu1 }
 0x3ae   : > { %v5837_v20 = vadd.f32 %v5819_v24, %v5575_v48  ;;  %v6054_v57 = vadd.f32 %v6053_v4, %v5962_v31  ;;  %v12191_v24 = vld [vmem:[%s11687_s24 + $0x24] sm:$0xff] }
 0x3af   : > { %v5878_v34 = vld [vmem:[#allocation2 + $0x18] sm:$0xff]  ;;  %v12194_v48 = vld [vmem:[%s11687_s24 + $0x20] sm:$0xff]  ;;  %v6722_v10 = vrot.slane %v12191_v24, 2 }
 0x3b0   : > { %5847 = vst.msk [vmem:[#allocation2 + $0x20] sm:$0xff] %vm632_vm4, %v5837_v20  ;;  %v6074_v39 = vadd.f32 %v6054_v57, %v5878_v34  ;;  %v12200_v20 = vld [vmem:[%s11693_s28 + $0x20] sm:$0xff]  ;;  %v6958_v34 = vrot.slane %v12194_v48, 2 }
 0x3b1   : > { %v7049_v22 = vrot.slane %v12200_v20, 2 }
 0x3b2   : > { %v5696_v62 = vpop.f32.mrf.mxu2  ;;  %6084 = vst.msk [vmem:[#allocation2 + $0x18] sm:$0xff] %vm632_vm4, %v6074_v39 }
 0x3b3   : > { %v5820_v6 = vpop.f32.mrf.mxu3 }
 0x3b4   : > { %v5965_v59 = vpop.f32.mrf.mxu0  ;;  %v5821_v42 = vadd.f32 %v5820_v6, %v5696_v62 }
 0x3b5   : > { %v6056_v29 = vpop.f32.mrf.mxu1 }
 0x3b6   : > { %v5838_v18 = vadd.f32 %v5821_v42, %v5576_v41  ;;  %v6057_v37 = vadd.f32 %v6056_v29, %v5965_v59  ;;  %v6672_v42 = vld [vmem:[%s11687_s24 + $0x2c] sm:$0x3] }
 0x3b7   : > { %9674 = vmatmul.msk.bf16.gmra.mxu2 %vm700_vm1, %v6719_v35  ;;  %9725 = vmatmul.msk.bf16.vlgmr.msra.gmra.mxu0 %vm700_vm1, %v6955_v38  ;;  %v5879_v43 = vld [vmem:[#allocation2 + $0x20] sm:$0xff]  ;;  %v6723_v35 = vsel %vm2020_vm6, %v6720_v58, %v6722_v10  ;;  %v6959_v38 = vsel %vm2020_vm6, %v6956_v3, %v6958_v34  ;;  %v5580_v29 = vld [vmem:[#allocation2 + $0x48] sm:$0xff] }
 0x3b8   : > { %5848 = vst.msk [vmem:[#allocation2 + $0x28] sm:$0xff] %vm632_vm4, %v5838_v18  ;;  %v6075_v15 = vadd.f32 %v6057_v37, %v5879_v43  ;;  %9699 = vmatmul.msk.bf16.gmra.mxu3 %vm700_vm1, %v6810_v12  ;;  %9750 = vmatmul.msk.bf16.vlgmr.msra.gmra.mxu1 %vm700_vm1, %v7046_v1  ;;  %v6814_v1 = vsel %vm2020_vm6, %v6811_v50, %v6813_v36  ;;  %v6661_v37 = vld [vmem:[%s11693_s28 + $0x2c] sm:$0x3] }
 0x3b9   : > { %v7050_v18 = vsel %vm2020_vm6, %v7047_v21, %v7049_v22  ;;  %v12226_v3 = vld [vmem:[%s11693_s28 + $0x28] sm:$0xff] }
 0x3ba   : > { %v5699_v44 = vpop.f32.mrf.mxu2  ;;  %6085 = vst.msk [vmem:[#allocation2 + $0x20] sm:$0xff] %vm632_vm4, %v6075_v15  ;;  %v9759_v21 = vld [vmem:[%s11687_s24 + $0x8] sm:$0xc] }
 0x3bb   : > { %v5823_v27 = vpop.f32.mrf.mxu3 }
 0x3bc   : > { %v5967_v46 = vpop.f32.mrf.mxu0  ;;  %v5824_v40 = vadd.f32 %v5823_v27, %v5699_v44  ;;  %v6708_v44 = vunpack.c.l.b16 %v6672_v42  ;;  %v6799_v27 = vunpack.c.l.b16 %v6661_v37 }
 0x3bd   : > { %v6058_v49 = vpop.f32.mrf.mxu1 }
 0x3be   : > { %v5839_v55 = vadd.f32 %v5824_v40, %v5577_v32  ;;  %v6059_v60 = vadd.f32 %v6058_v49, %v5967_v46  ;;  %v6714_v32 = vpack.c.b16 %v6708_v44, %v6708_v44  ;;  %v12223_v49 = vld [vmem:[%s11687_s24 + $0x28] sm:$0xff] }
 0x3bf   : > { %v5880_v47 = vld [vmem:[#allocation2 + $0x28] sm:$0xff]  ;;  %v6960_v50 = vrot.slane %v12223_v49, 2 }
 0x3c0   : > { %5849 = vst.msk [vmem:[#allocation2 + $0x30] sm:$0xff] %vm632_vm4, %v5839_v55  ;;  %v6076_v0 = vadd.f32 %v6059_v60, %v5880_v47  ;;  %v6805_v55 = vpack.c.b16 %v6799_v27, %v6799_v27  ;;  %v6113_v60 = vld [vmem:[#allocation2] sm:$0xff] }
 0x3c2   : > { %v5701_v17 = vpop.f32.mrf.mxu2  ;;  %6086 = vst.msk [vmem:[#allocation2 + $0x28] sm:$0xff] %vm632_vm4, %v6076_v0 }
 0x3c3   : > { %v5825_v2 = vpop.f32.mrf.mxu3 }
 0x3c4   : > { %v5970_v45 = vpop.f32.mrf.mxu0  ;;  %v5826_v33 = vadd.f32 %v5825_v2, %v5701_v17  ;;  %v6724_v17 = vrot.slane %v6714_v32, 2 }
 0x3c5   : > { %v6061_v13 = vpop.f32.mrf.mxu1 }
 0x3c6   : > { %v5840_v31 = vadd.f32 %v5826_v33, %v5578_v14  ;;  %v6062_v11 = vadd.f32 %v6061_v13, %v5970_v45  ;;  %v10116_v45 = vld [vmem:[%s11687_s24 + $0x8] sm:$0xf0]  ;;  %v6815_v33 = vrot.slane %v6805_v55, 2  ;;  %v7051_v14 = vrot.slane %v12226_v3, 2 }
 0x3c7   : > { %9675 = vmatmul.msk.bf16.gmra.mxu2 %vm700_vm1, %v6721_v23  ;;  %9726 = vmatmul.msk.bf16.gmra.mxu0 %vm700_vm1, %v6957_v61  ;;  %v5881_v56 = vld [vmem:[#allocation2 + $0x30] sm:$0xff]  ;;  %v9760_v13 = vor.u32 %v10116_v45, %v9759_v21 }
 0x3c8   : > { %5850 = vst.msk [vmem:[#allocation2 + $0x38] sm:$0xff] %vm632_vm4, %v5840_v31  ;;  %v6077_v63 = vadd.f32 %v6062_v11, %v5881_v56  ;;  %9700 = vmatmul.msk.bf16.gmra.mxu3 %vm700_vm1, %v6812_v5  ;;  %9751 = vmatmul.msk.bf16.gmra.mxu1 %vm700_vm1, %v7048_v53  ;;  %v9784_v5 = vld [vmem:[%s11693_s28 + $0x8] sm:$0xc]  ;;  %v10111_v53 = vld [vmem:[%s11693_s28 + $0x8] sm:$0xf0]  ;;  %v6725_v11 = vsel %vm2020_vm6, %v6722_v10, %v6724_v17 }
 0x3c9   : > { %v6961_v56 = vsel %vm2020_vm6, %v6958_v34, %v6960_v50  ;;  %v6816_v48 = vsel %vm2020_vm6, %v6813_v36, %v6815_v33  ;;  %v7195_v10 = vshll.u32 %v9760_v13, 16  ;;  %v10112_v34 = vld [vmem:[%s11693_s28 + $0x10] sm:$0xff] }
 0x3ca   : > { %v5704_v16 = vpop.f32.mrf.mxu2  ;;  %6087 = vst.msk [vmem:[#allocation2 + $0x30] sm:$0xff] %vm632_vm4, %v6077_v63  ;;  %v6910_v63 = vld [vmem:[%s11687_s24 + $0x30] sm:$0x3] }
 0x3cb   : > { %v5828_v4 = vpop.f32.mrf.mxu3  ;;  %v6946_v26 = vunpack.c.l.b16 %v6910_v63 }
 0x3cc   : > { %v5972_v9 = vpop.f32.mrf.mxu0  ;;  %v5829_v19 = vadd.f32 %v5828_v4, %v5704_v16  ;;  %v10117_v16 = vld [vmem:[%s11687_s24 + $0x10] sm:$0xff]  ;;  %v9785_v4 = vor.u32 %v10111_v53, %v9784_v5 }
 0x3cd   : > { %v6063_v7 = vpop.f32.mrf.mxu1  ;;  %v7203_v36 = vshll.u32 %v10117_v16, 16 }
 0x3ce   : > { %v5841_v57 = vadd.f32 %v5829_v19, %v5579_v28  ;;  %v6064_v30 = vadd.f32 %v6063_v7, %v5972_v9  ;;  %v6114_v19 = vld [vmem:[#allocation2 + $0x8] sm:$0xff]  ;;  %v7052_v7 = vsel %vm2020_vm6, %v7049_v22, %v7051_v14  ;;  %v7325_v22 = vshrl.u32 %v9785_v4, 16 }
 0x3cf   : > { %v5882_v39 = vld [vmem:[#allocation2 + $0x38] sm:$0xff]  ;;  %v7328_v42 = vshll.u32 %v9785_v4, 16 }
 0x3d0   : > { %5851 = vst.msk [vmem:[#allocation2 + $0x40] sm:$0xff] %vm632_vm4, %v5841_v57  ;;  %v6078_v62 = vadd.f32 %v6064_v30, %v5882_v39  ;;  %v6899_v57 = vld [vmem:[%s11693_s28 + $0x30] sm:$0x3]  ;;  %v7192_v30 = vshrl.u32 %v9760_v13, 16 }
 0x3d1   : > { %v7330_v32 = vrot.slane %v7328_v42, 3  ;;  %v12290_v42 = vld [vmem:[%s11693_s28 + $0x10] sm:$0xff] }
 0x3d2   : > { %v5706_v8 = vpop.f32.mrf.mxu2  ;;  %6088 = vst.msk [vmem:[#allocation2 + $0x38] sm:$0xff] %vm632_vm4, %v6078_v62 }
 0x3d3   : > { %v5830_v6 = vpop.f32.mrf.mxu3 }
 0x3d4   : > { %v5975_v59 = vpop.f32.mrf.mxu0  ;;  %v5831_v41 = vadd.f32 %v5830_v6, %v5706_v8  ;;  %v7200_v8 = vshrl.u32 %v10117_v16, 16  ;;  %v6952_v6 = vpack.c.b16 %v6946_v26, %v6946_v26 }
 0x3d5   : > { %v6066_v12 = vpop.f32.mrf.mxu1 }
 0x3d6   : > { %v5842_v43 = vadd.f32 %v5831_v41, %v5580_v29  ;;  %v6067_v15 = vadd.f32 %v6066_v12, %v5975_v59  ;;  %v7333_v41 = vshrl.u32 %v10112_v34, 16  ;;  %v7336_v29 = vshll.u32 %v10112_v34, 16  ;;  %v12283_v34 = vld [vmem:[%s11687_s24 + $0x10] sm:$0xff] }
 0x3d7   : > { %9676 = vmatmul.msk.bf16.gmra.mxu2 %vm700_vm1, %v6723_v35  ;;  %9727 = vmatmul.msk.bf16.gmra.mxu0 %vm700_vm1, %v6959_v38  ;;  %v5883_v46 = vld [vmem:[#allocation2 + $0x40] sm:$0xff]  ;;  %v7037_v38 = vunpack.c.l.b16 %v6899_v57  ;;  %v7202_v37 = vrot.slane %v7200_v8, 2  ;;  %v10121_v8 = vld [vmem:[%s11693_s28 + $0x8] sm:$0xf0] }
 0x3d8   : > { %5852 = vst.msk [vmem:[#allocation2 + $0x48] sm:$0xff] %vm632_vm4, %v5842_v43  ;;  %v6079_v51 = vadd.f32 %v6067_v15, %v5883_v46  ;;  %9701 = vmatmul.msk.bf16.gmra.mxu3 %vm700_vm1, %v6814_v1  ;;  %9752 = vmatmul.msk.bf16.gmra.mxu1 %vm700_vm1, %v7050_v18  ;;  %v7194_v1 = vrot.slane %v7192_v30, 2  ;;  %v7197_v18 = vrot.slane %v7195_v10, 3  ;;  %v7205_v43 = vrot.slane %v7203_v36, 3 }
 0x3d9   : > { %v7043_v46 = vpack.c.b16 %v7037_v38, %v7037_v38 }
 0x3da   : > { %v6193_v25 = vpop.f32.mrf.mxu2  ;;  %6089 = vst.msk [vmem:[#allocation2 + $0x40] sm:$0xff] %vm632_vm4, %v6079_v51  ;;  %v7327_v51 = vrot.slane %v7325_v22, 2 }
 0x3db   : > { %v6284_v52 = vpop.f32.mrf.mxu3  ;;  %v7053_v45 = vrot.slane %v7043_v46, 2 }
 0x3dc   : > { %v5977_v40 = vpop.f32.mrf.mxu0  ;;  %v6285_v54 = vadd.f32 %v6284_v52, %v6193_v25  ;;  %v6115_v25 = vld [vmem:[#allocation2 + $0x10] sm:$0xff]  ;;  %v7335_v52 = vrot.slane %v7333_v41, 2 }
 0x3dd   : > { %v6068_v58 = vpop.f32.mrf.mxu1  ;;  %v7054_v63 = vsel %vm2020_vm6, %v7051_v14, %v7053_v45 }
 0x3de   : > { %v6309_v47 = vadd.f32 %v6285_v54, %v6113_v60  ;;  %v6069_v0 = vadd.f32 %v6068_v58, %v5977_v40  ;;  %v6962_v40 = vrot.slane %v6952_v6, 2  ;;  %v7338_v54 = vrot.slane %v7336_v29, 3 }
 0x3df   : > { %v5884_v23 = vld [vmem:[#allocation2 + $0x48] sm:$0xff]  ;;  %v7198_v58 = vor.u32 %v7197_v18, %v7194_v1  ;;  %v7514_v18 = vrot.slane %v12283_v34, 3 }
 0x3e0   : > { %6319 = vst.msk [vmem:[#allocation2] sm:$0xff] %vm632_vm4, %v6309_v47  ;;  %v6080_v61 = vadd.f32 %v6069_v0, %v5884_v23  ;;  %v12256_v47 = vor.u32 %v7205_v43, %v7202_v37  ;;  %v7331_v23 = vor.u32 %v7330_v32, %v7327_v51  ;;  %v6963_v13 = vsel %vm2020_vm6, %v6960_v50, %v6962_v40  ;;  %v10119_v32 = vld [vmem:[%s11687_s24 + $0x20] sm:$0xff] }
 0x3e1   : > { %v7605_v51 = vrot.slane %v12290_v42, 3  ;;  %v7218_v45 = vshrl.u32 %v10119_v32, 16  ;;  %v10115_v42 = vld [vmem:[%s11693_s28 + $0x28] sm:$0xff] }
 0x3e2   : > { %v6195_v2 = vpop.f32.mrf.mxu2  ;;  %6090 = vst.msk [vmem:[#allocation2 + $0x48] sm:$0xff] %vm632_vm4, %v6080_v61  ;;  %v12259_v61 = vor.u32 %v7338_v54, %v7335_v52  ;;  %v7207_v5 = vsel %vm2497_vm7, %v7198_v58, %v12256_v47 }
 0x3e3   : > { %v6286_v9 = vpop.f32.mrf.mxu3 }
 0x3e4   : > { %v6473_v31 = vpop.f32.mrf.mxu0  ;;  %v6287_v24 = vadd.f32 %v6286_v9, %v6195_v2  ;;  %v10118_v2 = vld [vmem:[%s11687_s24 + $0x18] sm:$0xff]  ;;  %v7340_v49 = vsel %vm2497_vm7, %v7331_v23, %v12259_v61  ;;  %v7221_v23 = vshll.u32 %v10119_v32, 16  ;;  %v6121_v32 = vld [vmem:[#allocation2 + $0x40] sm:$0xff] }
 0x3e5   : > { %v6606_v28 = vpop.f32.mrf.mxu1  ;;  %v7209_v50 = vshrl.u32 %v10118_v2, 16  ;;  %v7212_v16 = vshll.u32 %v10118_v2, 16  ;;  %v10113_v9 = vld [vmem:[%s11693_s28 + $0x18] sm:$0xff] }
 0x3e6   : > { %v6310_v39 = vadd.f32 %v6287_v24, %v6114_v19  ;;  %v6607_v62 = vadd.f32 %v6606_v28, %v6473_v31  ;;  %v9811_v19 = vld [vmem:[%s11687_s24 + $0x8] sm:$0x8]  ;;  %v10126_v28 = vld [vmem:[%s11687_s24 + $0x8] sm:$0xf0]  ;;  %v7342_v57 = vshrl.u32 %v10113_v9, 16  ;;  %v7345_v30 = vshll.u32 %v10113_v9, 16 }
 0x3e7   : > { %9677 = vmatmul.msk.bf16.gmra.mxu2 %vm700_vm1, %v6725_v11  ;;  %9728 = vmatmul.msk.bf16.gmra.mxu0 %vm700_vm1, %v6961_v56  ;;  %v6351_v59 = vld [vmem:[#allocation2] sm:$0xff]  ;;  %v6116_v11 = vld [vmem:[#allocation2 + $0x18] sm:$0xff]  ;;  %v7214_v26 = vrot.slane %v7212_v16, 3 }
 0x3e8   : > { %6320 = vst.msk [vmem:[#allocation2 + $0x8] sm:$0xff] %vm632_vm4, %v6310_v39  ;;  %v6631_v35 = vadd.f32 %v6607_v62, %v6351_v59  ;;  %9702 = vmatmul.msk.bf16.gmra.mxu3 %vm700_vm1, %v6816_v48  ;;  %9753 = vmatmul.msk.bf16.gmra.mxu1 %vm700_vm1, %v7052_v7  ;;  %v7211_v7 = vrot.slane %v7209_v50, 2  ;;  %v9812_v39 = vor.u32 %v10126_v28, %v9811_v19  ;;  %v9836_v62 = vld [vmem:[%s11693_s28 + $0x8] sm:$0x8]  ;;  %v7344_v22 = vrot.slane %v7342_v57, 2  ;;  %v6119_v50 = vld [vmem:[#allocation2 + $0x30] sm:$0xff] }
 0x3e9   : > { %v7347_v6 = vrot.slane %v7345_v30, 3  ;;  %v9837_v41 = vor.u32 %v10121_v8, %v9836_v62 }
 0x3ea   : > { %v6198_v20 = vpop.f32.mrf.mxu2  ;;  %6641 = vst.msk [vmem:[#allocation2] sm:$0xff] %vm632_vm4, %v6631_v35  ;;  %v6117_v35 = vld [vmem:[#allocation2 + $0x20] sm:$0xff]  ;;  %v12287_v38 = vor.u32 %v7214_v26, %v7211_v7  ;;  %v7513_v1 = vrot.slane %v9812_v39, 3 }
 0x3eb   : > { %v6289_v15 = vpop.f32.mrf.mxu3  ;;  %v7604_v46 = vrot.slane %v9837_v41, 3 }
 0x3ec   : > { %v6475_v12 = vpop.f32.mrf.mxu0  ;;  %v6290_v44 = vadd.f32 %v6289_v15, %v6198_v20  ;;  %v7515_v40 = vsel %vm2820_vm8, %v7513_v1, %v7514_v18 }
 0x3ed   : > { %v6608_v27 = vpop.f32.mrf.mxu1 }
 0x3ee   : > { %v6311_v55 = vadd.f32 %v6290_v44, %v6115_v25  ;;  %v6609_v60 = vadd.f32 %v6608_v27, %v6475_v12  ;;  %v7348_v44 = vor.u32 %v7347_v6, %v7344_v22  ;;  %v7216_v27 = vsel %vm2497_vm7, %v12256_v47, %v12287_v38 }
 0x3ef   : > { %v6352_v0 = vld [vmem:[#allocation2 + $0x8] sm:$0xff] }
 0x3f0   : > { %6321 = vst.msk [vmem:[#allocation2 + $0x10] sm:$0xff] %vm632_vm4, %v6311_v55  ;;  %v6632_v17 = vadd.f32 %v6609_v60, %v6352_v0  ;;  %v6118_v55 = vld [vmem:[#allocation2 + $0x28] sm:$0xff]  ;;  %v7349_v58 = vsel %vm2497_vm7, %v12259_v61, %v7348_v44  ;;  %v7606_v0 = vsel %vm2820_vm8, %v7604_v46, %v7605_v51 }
 0x3f2   : > { %v6200_v21 = vpop.f32.mrf.mxu2  ;;  %6642 = vst.msk [vmem:[#allocation2 + $0x8] sm:$0xff] %vm632_vm4, %v6632_v17  ;;  %v10114_v17 = vld [vmem:[%s11693_s28 + $0x20] sm:$0xff] }
 0x3f3   : > { %v6291_v53 = vpop.f32.mrf.mxu3 }
 0x3f4   : > { %v6478_v33 = vpop.f32.mrf.mxu0  ;;  %v6292_v31 = vadd.f32 %v6291_v53, %v6200_v21 }
 0x3f5   : > { %v6611_v56 = vpop.f32.mrf.mxu1 }
 0x3f6   : > { %v6312_v24 = vadd.f32 %v6292_v31, %v6116_v11  ;;  %v6612_v48 = vadd.f32 %v6611_v56, %v6478_v33  ;;  %v7220_v31 = vrot.slane %v7218_v45, 2  ;;  %v7223_v11 = vrot.slane %v7221_v23, 3  ;;  %v12312_v56 = vld [vmem:[%s11687_s24 + $0x18] sm:$0xff]  ;;  %v7137_v45 = vld [vmem:[%s11693_s28 + $0x30] sm:$0x7] }
 0x3f7   : > { %9729 = vmatmul.msk.bf16.gmra.mxu0 %vm700_vm1, %v6963_v13  ;;  %9777 = vmatmul.msk.bf16.vlgmr.msrb.gmra.mxu2 %vm700_vm1, %v7207_v5  ;;  %v6353_v4 = vld [vmem:[#allocation2 + $0x10] sm:$0xff]  ;;  %v7351_v13 = vshrl.u32 %v10114_v17, 16  ;;  %v7354_v5 = vshll.u32 %v10114_v17, 16 }
 0x3f8   : > { %6322 = vst.msk [vmem:[#allocation2 + $0x18] sm:$0xff] %vm632_vm4, %v6312_v24  ;;  %v6633_v3 = vadd.f32 %v6612_v48, %v6353_v4  ;;  %9754 = vmatmul.msk.bf16.gmra.mxu1 %vm700_vm1, %v7054_v63  ;;  %9802 = vmatmul.msk.bf16.vlgmr.msrb.gmra.mxu3 %vm700_vm1, %v7340_v49  ;;  %v12315_v48 = vld [vmem:[%s11693_s28 + $0x18] sm:$0xff]  ;;  %v12317_v28 = vor.u32 %v7223_v11, %v7220_v31 }
 0x3f9   : > { %v7353_v9 = vrot.slane %v7351_v13, 2  ;;  %v7356_v24 = vrot.slane %v7354_v5, 3  ;;  %v7607_v30 = vrot.slane %v12315_v48, 3  ;;  %v7317_v5 = vunpack.c.l.b16 %v7137_v45 }
 0x3fa   : > { %v6203_v14 = vpop.f32.mrf.mxu2  ;;  %6643 = vst.msk [vmem:[#allocation2 + $0x10] sm:$0xff] %vm632_vm4, %v6633_v3  ;;  %v7516_v3 = vrot.slane %v12312_v56, 3  ;;  %v7225_v39 = vsel %vm2497_vm7, %v12287_v38, %v12317_v28 }
 0x3fb   : > { %v6294_v36 = vpop.f32.mrf.mxu3  ;;  %v12321_v57 = vor.u32 %v7356_v24, %v7353_v9  ;;  %v7608_v22 = vsel %vm2820_vm8, %v7605_v51, %v7607_v30  ;;  %v12345_v51 = vld [vmem:[%s11687_s24 + $0x20] sm:$0xff] }
 0x3fc   : > { %v6480_v10 = vpop.f32.mrf.mxu0  ;;  %v6295_v59 = vadd.f32 %v6294_v36, %v6203_v14  ;;  %v7517_v62 = vsel %vm2820_vm8, %v7514_v18, %v7516_v3 }
 0x3fd   : > { %v6613_v20 = vpop.f32.mrf.mxu1 }
 0x3fe   : > { %v6313_v29 = vadd.f32 %v6295_v59, %v6117_v35  ;;  %v6614_v12 = vadd.f32 %v6613_v20, %v6480_v10  ;;  %v10120_v10 = vld [vmem:[%s11687_s24 + $0x28] sm:$0xff]  ;;  %v6120_v59 = vld [vmem:[#allocation2 + $0x38] sm:$0xff]  ;;  %v7358_v20 = vsel %vm2497_vm7, %v7348_v44, %v12321_v57  ;;  %v7363_v44 = vshll.u32 %v10115_v42, 16 }
 0x3ff   : > { %v6354_v37 = vld [vmem:[#allocation2 + $0x18] sm:$0xff]  ;;  %v7227_v38 = vshrl.u32 %v10120_v10, 16  ;;  %v7230_v6 = vshll.u32 %v10120_v10, 16 }
 0x400   : > { %6323 = vst.msk [vmem:[#allocation2 + $0x20] sm:$0xff] %vm632_vm4, %v6313_v29  ;;  %v6634_v43 = vadd.f32 %v6614_v12, %v6354_v37 }
 0x401   : > { %v7229_v37 = vrot.slane %v7227_v38, 2  ;;  %v10125_v38 = vld [vmem:[%s11693_s28 + $0x28] sm:$0xff] }
 0x402   : > { %v6205_v15 = vpop.f32.mrf.mxu2  ;;  %6644 = vst.msk [vmem:[#allocation2 + $0x18] sm:$0xff] %vm632_vm4, %v6634_v43  ;;  %v7232_v43 = vrot.slane %v7230_v6, 3 }
 0x403   : > { %v6296_v52 = vpop.f32.mrf.mxu3 }
 0x404   : > { %v6483_v25 = vpop.f32.mrf.mxu0  ;;  %v6297_v54 = vadd.f32 %v6296_v52, %v6205_v15  ;;  %v7360_v15 = vshrl.u32 %v10115_v42, 16 }
 0x405   : > { %v6616_v60 = vpop.f32.mrf.mxu1 }
 0x406   : > { %v6314_v21 = vadd.f32 %v6297_v54, %v6118_v55  ;;  %v6617_v47 = vadd.f32 %v6616_v60, %v6483_v25  ;;  %v12348_v54 = vor.u32 %v7232_v43, %v7229_v37  ;;  %v7362_v55 = vrot.slane %v7360_v15, 2 }
 0x407   : > { %9778 = vmatmul.msk.bf16.gmra.mxu2 %vm700_vm1, %v7216_v27  ;;  %9829 = vmatmul.msk.bf16.vlgmr.msrb.gmra.mxu0 %vm700_vm1, %v7515_v40  ;;  %v6355_v2 = vld [vmem:[#allocation2 + $0x20] sm:$0xff]  ;;  %v7148_v27 = vld [vmem:[%s11687_s24 + $0x30] sm:$0x7]  ;;  %v7365_v60 = vrot.slane %v7363_v44, 3  ;;  %v7611_v43 = vrot.slane %v10125_v38, 3 }
 0x408   : > { %6324 = vst.msk [vmem:[#allocation2 + $0x28] sm:$0xff] %vm632_vm4, %v6314_v21  ;;  %v6635_v33 = vadd.f32 %v6617_v47, %v6355_v2  ;;  %9803 = vmatmul.msk.bf16.gmra.mxu3 %vm700_vm1, %v7349_v58  ;;  %9854 = vmatmul.msk.bf16.vlgmr.msrb.gmra.mxu1 %vm700_vm1, %v7606_v0  ;;  %v12351_v58 = vld [vmem:[%s11693_s28 + $0x20] sm:$0xff]  ;;  %v7518_v21 = vrot.slane %v12345_v51, 3  ;;  %v7184_v47 = vunpack.c.l.b16 %v7148_v27  ;;  %v7234_v31 = vsel %vm2497_vm7, %v12317_v28, %v12348_v54 }
 0x409   : > { %v7609_v13 = vrot.slane %v12351_v58, 3 }
 0x40a   : > { %v6208_v61 = vpop.f32.mrf.mxu2  ;;  %6645 = vst.msk [vmem:[#allocation2 + $0x20] sm:$0xff] %vm632_vm4, %v6635_v33  ;;  %v7519_v11 = vsel %vm2820_vm8, %v7516_v3, %v7518_v21 }
 0x40b   : > { %v6299_v63 = vpop.f32.mrf.mxu3  ;;  %v7610_v56 = vsel %vm2820_vm8, %v7607_v30, %v7609_v13 }
 0x40c   : > { %v6485_v53 = vpop.f32.mrf.mxu0  ;;  %v6300_v49 = vadd.f32 %v6299_v63, %v6208_v61  ;;  %v7366_v61 = vor.u32 %v7365_v60, %v7362_v55  ;;  %v7190_v63 = vpack.c.b16 %v7184_v47, %v7184_v47  ;;  %v7612_v55 = vsel %vm2820_vm8, %v7609_v13, %v7611_v43  ;;  %v6675_v13 = vld [vmem:[#allocation2 + $0x10] sm:$0xff] }
 0x40d   : > { %v6618_v16 = vpop.f32.mrf.mxu1 }
 0x40e   : > { %v6315_v4 = vadd.f32 %v6300_v49, %v6119_v50  ;;  %v6619_v19 = vadd.f32 %v6618_v16, %v6485_v53  ;;  %v6122_v16 = vld [vmem:[#allocation2 + $0x48] sm:$0xff]  ;;  %v7367_v24 = vsel %vm2497_vm7, %v12321_v57, %v7366_v61  ;;  %v7236_v3 = vshrl.u32 %v7190_v63, 16 }
 0x40f   : > { %v6356_v14 = vld [vmem:[#allocation2 + $0x28] sm:$0xff] }
 0x410   : > { %6325 = vst.msk [vmem:[#allocation2 + $0x30] sm:$0xff] %vm632_vm4, %v6315_v4  ;;  %v6636_v7 = vadd.f32 %v6619_v19, %v6356_v14  ;;  %v7323_v4 = vpack.c.b16 %v7317_v5, %v7317_v5  ;;  %v7239_v14 = vshll.u32 %v7190_v63, 16 }
 0x412   : > { %v6210_v26 = vpop.f32.mrf.mxu2  ;;  %6646 = vst.msk [vmem:[#allocation2 + $0x28] sm:$0xff] %vm632_vm4, %v6636_v7  ;;  %v7369_v10 = vshrl.u32 %v7323_v4, 16  ;;  %v7372_v48 = vshll.u32 %v7323_v4, 16 }
 0x413   : > { %v6301_v8 = vpop.f32.mrf.mxu3 }
 0x414   : > { %v6488_v34 = vpop.f32.mrf.mxu0  ;;  %v6302_v36 = vadd.f32 %v6301_v8, %v6210_v26 }
 0x415   : > { %v6621_v35 = vpop.f32.mrf.mxu1 }
 0x416   : > { %v6316_v41 = vadd.f32 %v6302_v36, %v6120_v59  ;;  %v6622_v29 = vadd.f32 %v6621_v35, %v6488_v34  ;;  %v7238_v34 = vrot.slane %v7236_v3, 2  ;;  %v6673_v59 = vld [vmem:[#allocation2] sm:$0xff] }
 0x417   : > { %9779 = vmatmul.msk.bf16.gmra.mxu2 %vm700_vm1, %v7225_v39  ;;  %9830 = vmatmul.msk.bf16.gmra.mxu0 %vm700_vm1, %v7517_v62  ;;  %v6357_v12 = vld [vmem:[#allocation2 + $0x30] sm:$0xff]  ;;  %v7241_v39 = vrot.slane %v7239_v14, 3  ;;  %v10130_v62 = vld [vmem:[%s11687_s24 + $0x28] sm:$0xff] }
 0x418   : > { %6326 = vst.msk [vmem:[#allocation2 + $0x38] sm:$0xff] %vm632_vm4, %v6316_v41  ;;  %v6637_v1 = vadd.f32 %v6622_v29, %v6357_v12  ;;  %9804 = vmatmul.msk.bf16.gmra.mxu3 %vm700_vm1, %v7358_v20  ;;  %9855 = vmatmul.msk.bf16.gmra.mxu1 %vm700_vm1, %v7608_v22  ;;  %v7371_v20 = vrot.slane %v7369_v10, 2  ;;  %v7374_v22 = vrot.slane %v7372_v48, 3  ;;  %v7520_v29 = vrot.slane %v10130_v62, 3  ;;  %v6677_v62 = vld [vmem:[#allocation2 + $0x20] sm:$0xff] }
 0x419   : > { %v7242_v41 = vor.u32 %v7241_v39, %v7238_v34 }
 0x41a   : > { %v6213_v18 = vpop.f32.mrf.mxu2  ;;  %6647 = vst.msk [vmem:[#allocation2 + $0x30] sm:$0xff] %vm632_vm4, %v6637_v1  ;;  %v7375_v37 = vor.u32 %v7374_v22, %v7371_v20 }
 0x41b   : > { %v6304_v25 = vpop.f32.mrf.mxu3  ;;  %v7243_v44 = vsel %vm2497_vm7, %v12348_v54, %v7242_v41  ;;  %v6678_v41 = vld [vmem:[#allocation2 + $0x28] sm:$0xff] }
 0x41c   : > { %v6490_v46 = vpop.f32.mrf.mxu0  ;;  %v6305_v40 = vadd.f32 %v6304_v25, %v6213_v18  ;;  %v7470_v25 = vld [vmem:[%s11687_s24 + $0x30] sm:$0x7]  ;;  %s10138_s24 = smul.u32 80, %s12987_s14 }
 0x41d   : > { %v6623_v52 = vpop.f32.mrf.mxu1  ;;  %v7506_v54 = vunpack.c.l.b16 %v7470_v25 }
 0x41e   : > { %v6317_v0 = vadd.f32 %v6305_v40, %v6121_v32  ;;  %v6624_v17 = vadd.f32 %v6623_v52, %v6490_v46  ;;  %v7521_v46 = vsel %vm2820_vm8, %v7518_v21, %v7520_v29  ;;  %v6674_v40 = vld [vmem:[#allocation2 + $0x8] sm:$0xff]  ;;  %v7376_v52 = vsel %vm2497_vm7, %v7366_v61, %v7375_v37 }
 0x41f   : > { %v6358_v23 = vld [vmem:[#allocation2 + $0x38] sm:$0xff]  ;;  %v7512_v58 = vpack.c.b16 %v7506_v54, %v7506_v54 }
 0x420   : > { %6327 = vst.msk [vmem:[#allocation2 + $0x40] sm:$0xff] %vm632_vm4, %v6317_v0  ;;  %v6638_v2 = vadd.f32 %v6624_v17, %v6358_v23  ;;  %v7459_v17 = vld [vmem:[%s11693_s28 + $0x30] sm:$0x7]  ;;  %s10137_s28 = smul.u32 10, %s12993_s13 }
 0x421   : > { %v7597_v23 = vunpack.c.l.b16 %v7459_v17  ;;  %v7522_v63 = vrot.slane %v7512_v58, 3 }
 0x422   : > { %v6215_v33 = vpop.f32.mrf.mxu2  ;;  %6648 = vst.msk [vmem:[#allocation2 + $0x38] sm:$0xff] %vm632_vm4, %v6638_v2  ;;  %s614_s29 = sadd.s32 %s10138_s24, %s10137_s28  ;;  %s630_s28 = scalar_lea.vmem %s12931_s10, %s622_s11 }
 0x423   : > { %v6306_v49 = vpop.f32.mrf.mxu3  ;;  %s8454_s27 = sshll.u32 %s614_s29, 3 }
 0x424   : > { %v6493_v53 = vpop.f32.mrf.mxu0  ;;  %v6307_v50 = vadd.f32 %v6306_v49, %v6215_v33  ;;  %s12494_s21 = scalar_lea.vmem %s12929_s8, %s8454_s27 }
 0x425   : > { %v6626_v9 = vpop.f32.mrf.mxu1 }
 0x426   : > { %v6318_v19 = vadd.f32 %v6307_v50, %v6122_v16  ;;  %v6627_v28 = vadd.f32 %v6626_v9, %v6493_v53  ;;  %v7603_v53 = vpack.c.b16 %v7597_v23, %v7597_v23 }
 0x427   : > { %9780 = vmatmul.msk.bf16.gmra.mxu2 %vm700_vm1, %v7234_v31  ;;  %9831 = vmatmul.msk.bf16.gmra.mxu0 %vm700_vm1, %v7519_v11  ;;  %v6359_v7 = vld [vmem:[#allocation2 + $0x40] sm:$0xff] }
 0x428   : > { %6328 = vst.msk [vmem:[#allocation2 + $0x48] sm:$0xff] %vm632_vm4, %v6318_v19  ;;  %v6639_v26 = vadd.f32 %v6627_v28, %v6359_v7  ;;  %9805 = vmatmul.msk.bf16.gmra.mxu3 %vm700_vm1, %v7367_v24  ;;  %9856 = vmatmul.msk.bf16.gmra.mxu1 %vm700_vm1, %v7610_v56  ;;  %v7613_v9 = vrot.slane %v7603_v53, 3  ;;  %v7523_v56 = vsel %vm2820_vm8, %v7520_v29, %v7522_v63  ;;  %v6676_v28 = vld [vmem:[#allocation2 + $0x18] sm:$0xff] }
 0x42a   : > { %v6753_v57 = vpop.f32.mrf.mxu2  ;;  %6649 = vst.msk [vmem:[#allocation2 + $0x40] sm:$0xff] %vm632_vm4, %v6639_v26  ;;  %v7614_v14 = vsel %vm2820_vm8, %v7611_v43, %v7613_v9 }
 0x42b   : > { %v6844_v8 = vpop.f32.mrf.mxu3 }
 0x42c   : > { %v6495_v30 = vpop.f32.mrf.mxu0  ;;  %v6845_v36 = vadd.f32 %v6844_v8, %v6753_v57 }
 0x42d   : > { %v6628_v35 = vpop.f32.mrf.mxu1 }
 0x42e   : > { %v6869_v6 = vadd.f32 %v6845_v36, %v6673_v59  ;;  %v6629_v42 = vadd.f32 %v6628_v35, %v6495_v30 }
 0x42f   : > { %v6360_v12 = vld [vmem:[#allocation2 + $0x48] sm:$0xff] }
 0x430   : > { %6879 = vst.msk [vmem:[#allocation2] sm:$0xff] %vm632_vm4, %v6869_v6  ;;  %v6640_v1 = vadd.f32 %v6629_v42, %v6360_v12 }
 0x432   : > { %v6755_v18 = vpop.f32.mrf.mxu2  ;;  %6650 = vst.msk [vmem:[#allocation2 + $0x48] sm:$0xff] %vm632_vm4, %v6640_v1 }
 0x433   : > { %v6846_v51 = vpop.f32.mrf.mxu3 }
 0x434   : > { %v6991_v15 = vpop.f32.mrf.mxu0  ;;  %v6847_v27 = vadd.f32 %v6846_v51, %v6755_v18  ;;  %v6679_v51 = vld [vmem:[#allocation2 + $0x30] sm:$0xff] }
 0x435   : > { %v7082_v32 = vpop.f32.mrf.mxu1 }
 0x436   : > { %v6870_v60 = vadd.f32 %v6847_v27, %v6674_v40  ;;  %v7083_v0 = vadd.f32 %v7082_v32, %v6991_v15  ;;  %v7707_v27 = vlaneseq }
 0x437   : > { %9781 = vmatmul.msk.bf16.gmra.mxu2 %vm700_vm1, %v7243_v44  ;;  %9832 = vmatmul.msk.bf16.gmra.mxu0 %vm700_vm1, %v7521_v46  ;;  %v6911_v21 = vld [vmem:[#allocation2] sm:$0xff] }
 0x438   : > { %6880 = vst.msk [vmem:[#allocation2 + $0x8] sm:$0xff] %vm632_vm4, %v6870_v60  ;;  %v7107_v47 = vadd.f32 %v7083_v0, %v6911_v21  ;;  %9806 = vmatmul.msk.bf16.gmra.mxu3 %vm700_vm1, %v7376_v52  ;;  %9857 = vmatmul.msk.bf16.gmra.mxu1 %vm700_vm1, %v7612_v55  ;;  %v12409_v0 = vshrl.u32 %v7707_v27, 7 }
 0x43a   : > { %v6758_v45 = vpop.f32.mrf.mxu2  ;;  %7117 = vst.msk [vmem:[#allocation2] sm:$0xff] %vm632_vm4, %v7107_v47  ;;  %v6680_v47 = vld [vmem:[#allocation2 + $0x38] sm:$0xff]  ;;  %v7721_v23 = vand.u32 65535, %v12409_v0 }
 0x43b   : > { %v6849_v33 = vpop.f32.mrf.mxu3 }
 0x43c   : > { %v6993_v2 = vpop.f32.mrf.mxu0  ;;  %v6850_v61 = vadd.f32 %v6849_v33, %v6758_v45  ;;  %v12415_v53 = vmul.u32 52428, %v7721_v23 }
 0x43d   : > { %v7084_v5 = vpop.f32.mrf.mxu1 }
 0x43e   : > { %v6871_v31 = vadd.f32 %v6850_v61, %v6675_v13  ;;  %v7085_v11 = vadd.f32 %v7084_v5, %v6993_v2  ;;  %v7722_v5 = vshrl.u32 %v12409_v0, 16 }
 0x43f   : > { %v6912_v49 = vld [vmem:[#allocation2 + $0x8] sm:$0xff] }
 0x440   : > { %6881 = vst.msk [vmem:[#allocation2 + $0x10] sm:$0xff] %vm632_vm4, %v6871_v31  ;;  %v7108_v50 = vadd.f32 %v7085_v11, %v6912_v49  ;;  %v12419_v11 = vadd.s32 8, %v12409_v0  ;;  %v12422_v49 = vadd.s32 16, %v12409_v0 }
 0x442   : > { %v6760_v16 = vpop.f32.mrf.mxu2  ;;  %7118 = vst.msk [vmem:[#allocation2 + $0x8] sm:$0xff] %vm632_vm4, %v7108_v50 }
 0x443   : > { %v6851_v4 = vpop.f32.mrf.mxu3 }
 0x444   : > { %v6996_v24 = vpop.f32.mrf.mxu0  ;;  %v6852_v19 = vadd.f32 %v6851_v4, %v6760_v16  ;;  %v6681_v16 = vld [vmem:[#allocation2 + $0x40] sm:$0xff]  ;;  %v7728_v4 = vshll.u32 %v12415_v53, 16 }
 0x445   : > { %v7087_v3 = vpop.f32.mrf.mxu1 }
 0x446   : > { %v6872_v7 = vadd.f32 %v6852_v19, %v6676_v28  ;;  %v7088_v26 = vadd.f32 %v7087_v3, %v6996_v24  ;;  %v7724_v24 = vmul.u32 52429, %v7721_v23  ;;  %v7750_v3 = vand.u32 65535, %v12419_v11 }
 0x447   : > { %9833 = vmatmul.msk.bf16.gmra.mxu0 %vm700_vm1, %v7523_v56  ;;  %v6913_v57 = vld [vmem:[#allocation2 + $0x10] sm:$0xff]  ;;  %v12424_v56 = vmul.u32 52429, %v7722_v5 }
 0x448   : > { %6882 = vst.msk [vmem:[#allocation2 + $0x18] sm:$0xff] %vm632_vm4, %v6872_v7  ;;  %v7109_v10 = vadd.f32 %v7088_v26, %v6913_v57  ;;  %9858 = vmatmul.msk.bf16.gmra.mxu1 %vm700_vm1, %v7614_v14  ;;  %v7779_v7 = vand.u32 65535, %v12422_v49  ;;  %vm7732_vm9 = vc.u32 %v7724_v24, %v7728_v4 }
 0x44a   : > { %v6763_v48 = vpop.f32.mrf.mxu2  ;;  %7119 = vst.msk [vmem:[#allocation2 + $0x10] sm:$0xff] %vm632_vm4, %v7109_v10  ;;  %v7730_v10 = vshll.u32 %v12424_v56, 16 }
 0x44b   : > { %v6854_v34 = vpop.f32.mrf.mxu3 }
 0x44c   : > { %v6998_v30 = vpop.f32.mrf.mxu0  ;;  %v6855_v39 = vadd.f32 %v6854_v34, %v6763_v48  ;;  %v7734_v48 = vadd.s32 %v7728_v4, %v7724_v24  ;;  %v7751_v34 = vshrl.u32 %v12419_v11, 16 }
 0x44d   : > { %v7089_v8 = vpop.f32.mrf.mxu1 }
 0x44e   : > { %v6873_v36 = vadd.f32 %v6855_v39, %v6677_v62  ;;  %v7090_v59 = vadd.f32 %v7089_v8, %v6998_v30  ;;  %v12433_v39 = vmul.u32 52428, %v7750_v3  ;;  %v7780_v8 = vshrl.u32 %v12422_v49, 16 }
 0x44f   : > { %v6914_v35 = vld [vmem:[#allocation2 + $0x18] sm:$0xff]  ;;  %vm7736_vm10 = vc.u32 %v7734_v48, %v7730_v10  ;;  %v7150_v48 = vld [vmem:[#allocation2 + $0x8] sm:$0xff] }
 0x450   : > { %6883 = vst.msk [vmem:[#allocation2 + $0x20] sm:$0xff] %vm632_vm4, %v6873_v36  ;;  %v7110_v20 = vadd.f32 %v7090_v59, %v6914_v35  ;;  %v12436_v36 = vmul.u32 52428, %v7779_v7  ;;  %v7727_v35 = vmul.u32 52428, %v7722_v5  ;;  %v7758_v10 = vshrl.u32 %v12433_v39, 16 }
 0x452   : > { %v6765_v22 = vpop.f32.mrf.mxu2  ;;  %7120 = vst.msk [vmem:[#allocation2 + $0x18] sm:$0xff] %vm632_vm4, %v7110_v20  ;;  %v6682_v20 = vld [vmem:[#allocation2 + $0x48] sm:$0xff] }
 0x453   : > { %v6856_v6 = vpop.f32.mrf.mxu3 }
 0x454   : > { %v7001_v38 = vpop.f32.mrf.mxu0  ;;  %v6857_v42 = vadd.f32 %v6856_v6, %v6765_v22 }
 0x455   : > { %v7092_v29 = vpop.f32.mrf.mxu1 }
 0x456   : > { %v6874_v12 = vadd.f32 %v6857_v42, %v6678_v41  ;;  %v7093_v1 = vadd.f32 %v7092_v29, %v7001_v38  ;;  %v10222_v38 = vmov 0   ;;  %v7753_v42 = vmul.u32 52429, %v7750_v3 }
 0x457   : > { %v6915_v18 = vld [vmem:[#allocation2 + $0x20] sm:$0xff]  ;;  %v7733_v6 = vsel %vm7732_vm9, 1, %v10222_v38 }
 0x458   : > { %6884 = vst.msk [vmem:[#allocation2 + $0x28] sm:$0xff] %vm632_vm4, %v6874_v12  ;;  %v7111_v37 = vadd.f32 %v7093_v1, %v6915_v18  ;;  %v12439_v12 = vmul.u32 52429, %v7751_v34  ;;  %v7757_v1 = vshll.u32 %v12433_v39, 16  ;;  %v12480_v39 = vadd.s32 32, %v12409_v0 }
 0x45a   : > { %v6768_v43 = vpop.f32.mrf.mxu2  ;;  %7121 = vst.msk [vmem:[#allocation2 + $0x20] sm:$0xff] %vm632_vm4, %v7111_v37  ;;  %v7782_v37 = vmul.u32 52429, %v7779_v7  ;;  %vm7761_vm11 = vc.u32 %v7753_v42, %v7757_v1 }
 0x45b   : > { %v6859_v44 = vpop.f32.mrf.mxu3 }
 0x45c   : > { %v7003_v15 = vpop.f32.mrf.mxu0  ;;  %v6860_v46 = vadd.f32 %v6859_v44, %v6768_v43  ;;  %v12442_v43 = vmul.u32 52429, %v7780_v8 }
 0x45d   : > { %v7094_v25 = vpop.f32.mrf.mxu1 }
 0x45e   : > { %v6875_v40 = vadd.f32 %v6860_v46, %v6679_v51  ;;  %v7095_v32 = vadd.f32 %v7094_v25, %v7003_v15  ;;  %v7786_v15 = vshll.u32 %v12436_v36, 16  ;;  %v7735_v51 = vadd.s32 %v7733_v6, %v7727_v35 }
 0x45f   : > { %v6916_v52 = vld [vmem:[#allocation2 + $0x28] sm:$0xff]  ;;  %v7737_v25 = vsel %vm7736_vm10, 1, %v10222_v38 }
 0x460   : > { %6885 = vst.msk [vmem:[#allocation2 + $0x30] sm:$0xff] %vm632_vm4, %v6875_v40  ;;  %v7112_v55 = vadd.f32 %v7095_v32, %v6916_v52  ;;  %v7759_v40 = vshll.u32 %v12439_v12, 16  ;;  %v12450_v32 = vadd.s32 24, %v12409_v0  ;;  %vm7790_vm12 = vc.u32 %v7782_v37, %v7786_v15 }
 0x461   : > { %v7791_v5 = vsel %vm7790_vm12, 1, %v10222_v38 }
 0x462   : > { %v6770_v60 = vpop.f32.mrf.mxu2  ;;  %7122 = vst.msk [vmem:[#allocation2 + $0x28] sm:$0xff] %vm632_vm4, %v7112_v55  ;;  %v7763_v55 = vadd.s32 %v7757_v1, %v7753_v42 }
 0x463   : > { %v6861_v17 = vpop.f32.mrf.mxu3 }
 0x464   : > { %v7006_v54 = vpop.f32.mrf.mxu0  ;;  %v6862_v21 = vadd.f32 %v6861_v17, %v6770_v60  ;;  %v7788_v60 = vshll.u32 %v12442_v43, 16  ;;  %vm7765_vm13 = vc.u32 %v7763_v55, %v7759_v40 }
 0x465   : > { %v7097_v45 = vpop.f32.mrf.mxu1 }
 0x466   : > { %v6876_v2 = vadd.f32 %v6862_v21, %v6680_v47  ;;  %v7098_v58 = vadd.f32 %v7097_v45, %v7006_v54  ;;  %v7792_v54 = vadd.s32 %v7786_v15, %v7782_v37  ;;  %v7729_v21 = vshrl.u32 %v12415_v53, 16  ;;  %v7149_v45 = vld [vmem:[#allocation2] sm:$0xff] }
 0x467   : > { %v6917_v33 = vld [vmem:[#allocation2 + $0x30] sm:$0xff]  ;;  %v7739_v47 = vadd.s32 %v7737_v25, %v7735_v51  ;;  %v7789_v37 = vshrl.u32 %v12442_v43, 16 }
 0x468   : > { %6886 = vst.msk [vmem:[#allocation2 + $0x38] sm:$0xff] %vm632_vm4, %v6876_v2  ;;  %v7113_v61 = vadd.f32 %v7098_v58, %v6917_v33  ;;  %v7756_v2 = vmul.u32 52428, %v7751_v34  ;;  %v7762_v58 = vsel %vm7761_vm11, 1, %v10222_v38  ;;  %v7785_v33 = vmul.u32 52428, %v7780_v8 }
 0x469   : > { %vm7794_vm14 = vc.u32 %v7792_v54, %v7788_v60  ;;  %v7151_v60 = vld [vmem:[#allocation2 + $0x10] sm:$0xff] }
 0x46a   : > { %v6773_v13 = vpop.f32.mrf.mxu2  ;;  %7123 = vst.msk [vmem:[#allocation2 + $0x30] sm:$0xff] %vm632_vm4, %v7113_v61  ;;  %v7764_v24 = vadd.s32 %v7762_v58, %v7756_v2  ;;  %v7793_v4 = vadd.s32 %v7791_v5, %v7785_v33  ;;  %v7795_v3 = vsel %vm7794_vm14, 1, %v10222_v38 }
 0x46b   : > { %v6864_v63 = vpop.f32.mrf.mxu3 }
 0x46c   : > { %v7008_v31 = vpop.f32.mrf.mxu0  ;;  %v6865_v50 = vadd.f32 %v6864_v63, %v6773_v13  ;;  %v7797_v8 = vadd.s32 %v7795_v3, %v7793_v4 }
 0x46d   : > { %v7099_v9 = vpop.f32.mrf.mxu1 }
 0x46e   : > { %v6877_v19 = vadd.f32 %v6865_v50, %v6681_v16  ;;  %v7100_v28 = vadd.f32 %v7099_v9, %v7008_v31  ;;  %v7808_v31 = vand.u32 65535, %v12450_v32  ;;  %v7731_v16 = vshrl.u32 %v12424_v56, 16 }
 0x46f   : > { %v6918_v14 = vld [vmem:[#allocation2 + $0x38] sm:$0xff]  ;;  %v7740_v9 = vadd.s32 %v7739_v47, %v7729_v21 }
 0x470   : > { %6887 = vst.msk [vmem:[#allocation2 + $0x40] sm:$0xff] %vm632_vm4, %v6877_v19  ;;  %v7114_v26 = vadd.f32 %v7100_v28, %v6918_v14  ;;  %v7766_v28 = vsel %vm7765_vm13, 1, %v10222_v38  ;;  %v7809_v14 = vshrl.u32 %v12450_v32, 16  ;;  %v12469_v7 = vmul.u32 52428, %v7808_v31 }
 0x471   : > { %v7768_v34 = vadd.s32 %v7766_v28, %v7764_v24 }
 0x472   : > { %v6775_v57 = vpop.f32.mrf.mxu2  ;;  %7124 = vst.msk [vmem:[#allocation2 + $0x38] sm:$0xff] %vm632_vm4, %v7114_v26  ;;  %v7815_v6 = vshll.u32 %v12469_v7, 16  ;;  %v7816_v28 = vshrl.u32 %v12469_v7, 16 }
 0x473   : > { %v6866_v62 = vpop.f32.mrf.mxu3 }
 0x474   : > { %v7011_v30 = vpop.f32.mrf.mxu0  ;;  %v6867_v59 = vadd.f32 %v6866_v62, %v6775_v57  ;;  %v7741_v57 = vadd.s32 %v7740_v9, %v7731_v16  ;;  %v7787_v62 = vshrl.u32 %v12436_v36, 16  ;;  %v7760_v36 = vshrl.u32 %v12439_v12, 16 }
 0x475   : > { %v7102_v22 = vpop.f32.mrf.mxu1  ;;  %v7837_v12 = vand.u32 65535, %v12480_v39  ;;  %v12508_v16 = vadd.s32 48, %v12409_v0 }
 0x476   : > { %v6878_v41 = vadd.f32 %v6867_v59, %v6682_v20  ;;  %v7103_v29 = vadd.f32 %v7102_v22, %v7011_v30  ;;  %v7811_v59 = vmul.u32 52429, %v7808_v31  ;;  %v12475_v22 = vmul.u32 52429, %v7809_v14 }
 0x477   : > { %v6919_v18 = vld [vmem:[#allocation2 + $0x40] sm:$0xff]  ;;  %v7742_v1 = vshrl.u32 %v7741_v57, 3  ;;  %v12499_v5 = vmul.u32 52428, %v7837_v12  ;;  %v7840_v3 = vmul.u32 52429, %v7837_v12  ;;  %v7895_v7 = vand.u32 65535, %v12508_v16 }
 0x478   : > { %6888 = vst.msk [vmem:[#allocation2 + $0x48] sm:$0xff] %vm632_vm4, %v6878_v41  ;;  %v7115_v44 = vadd.f32 %v7103_v29, %v6919_v18  ;;  %v7769_v18 = vadd.s32 %v7768_v34, %v7758_v10  ;;  %vm7819_vm15 = vc.u32 %v7811_v59, %v7815_v6  ;;  %v7821_v51 = vadd.s32 %v7815_v6, %v7811_v59 }
 0x479   : > { %v7743_v55 = vmul.u32 10, %v7742_v1 }
 0x47a   : > { %v7271_v46 = vpop.f32.mrf.mxu2  ;;  %7125 = vst.msk [vmem:[#allocation2 + $0x40] sm:$0xff] %vm632_vm4, %v7115_v44  ;;  %v7798_v44 = vadd.s32 %v7797_v8, %v7787_v62  ;;  %v7770_v54 = vadd.s32 %v7769_v18, %v7760_v36  ;;  %v7152_v62 = vld [vmem:[#allocation2 + $0x18] sm:$0xff] }
 0x47b   : > { %v7404_v52 = vpop.f32.mrf.mxu3 }
 0x47c   : > { %v7013_v27 = vpop.f32.mrf.mxu0  ;;  %v7405_v17 = vadd.f32 %v7404_v52, %v7271_v46  ;;  %v7817_v46 = vshll.u32 %v12475_v22, 16  ;;  %v7814_v52 = vmul.u32 52428, %v7809_v14 }
 0x47d   : > { %v7104_v23 = vpop.f32.mrf.mxu1 }
 0x47e   : > { %v7429_v61 = vadd.f32 %v7405_v17, %v7149_v45  ;;  %v7105_v13 = vadd.f32 %v7104_v23, %v7013_v27  ;;  %v12487_v27 = vadd.s32 40, %v12409_v0  ;;  %v7820_v17 = vsel %vm7819_vm15, 1, %v10222_v38 }
 0x47f   : > { %v6920_v63 = vld [vmem:[#allocation2 + $0x48] sm:$0xff]  ;;  %v7799_v45 = vadd.s32 %v7798_v44, %v7789_v37  ;;  %vm7823_vm0 = vc.u32 %v7821_v51, %v7817_v46 }
 0x480   : > { %7439 = vst.msk [vmem:[#allocation2] sm:$0xff] %vm632_vm4, %v7429_v61  ;;  %v7116_v53 = vadd.f32 %v7105_v13, %v6920_v63  ;;  %v7866_v2 = vand.u32 65535, %v12487_v27  ;;  %v7822_v61 = vadd.s32 %v7820_v17, %v7814_v52  ;;  %v7838_v13 = vshrl.u32 %v12480_v39, 16 }
 0x481   : > { %v12504_v63 = vsub.s32 %v12409_v0, %v7743_v55  ;;  %v7800_v24 = vshrl.u32 %v7799_v45, 3  ;;  %v7867_v4 = vshrl.u32 %v12487_v27, 16 }
 0x482   : > { %v7273_v50 = vpop.f32.mrf.mxu2  ;;  %7126 = vst.msk [vmem:[#allocation2 + $0x48] sm:$0xff] %vm632_vm4, %v7116_v53  ;;  %v7771_v53 = vshrl.u32 %v7770_v54, 3  ;;  %v12516_v14 = vmul.u32 52428, %v7866_v2  ;;  %v12521_v10 = vmul.u32 52429, %v7838_v13 }
 0x483   : > { %v7406_v26 = vpop.f32.mrf.mxu3  ;;  %v12528_v6 = vmul.u32 52429, %v7867_v4  ;;  %vm8008_vm12 = vcmp.ne.s32.totalorder %v12504_v63, 0  ;;  %vm8018_vm13 = vcmp.lt.s32.totalorder %v12504_v63, 0 }
 0x484   : > { %v7551_v19 = vpop.f32.mrf.mxu0  ;;  %v7407_v56 = vadd.f32 %v7406_v26, %v7273_v50  ;;  %v7824_v50 = vsel %vm7823_vm0, 1, %v10222_v38  ;;  %v12519_v26 = vadd.s32 56, %v12409_v0  ;;  %v7772_v34 = vmul.u32 10, %v7771_v53 }
 0x485   : > { %v7642_v30 = vpop.f32.mrf.mxu1  ;;  %v7826_v57 = vadd.s32 %v7824_v50, %v7822_v61  ;;  %v7873_v1 = vshll.u32 %v12516_v14, 16  ;;  %v7846_v44 = vshll.u32 %v12521_v10, 16  ;;  %v7875_v54 = vshll.u32 %v12528_v6, 16 }
 0x486   : > { %v7430_v35 = vadd.f32 %v7407_v56, %v7150_v48  ;;  %v7643_v20 = vadd.f32 %v7642_v30, %v7551_v19  ;;  %v7844_v48 = vshll.u32 %v12499_v5, 16  ;;  %v12525_v30 = vadd.s32 10, %v12504_v63 }
 0x487   : > { %v7471_v42 = vld [vmem:[#allocation2] sm:$0xff]  ;;  %v7924_v36 = vand.u32 65535, %v12519_v26  ;;  %v12548_v12 = vsub.s32 %v12419_v11, %v7772_v34  ;;  %v7925_v11 = vshrl.u32 %v12519_v26, 16 }
 0x488   : > { %7440 = vst.msk [vmem:[#allocation2 + $0x8] sm:$0xff] %vm632_vm4, %v7430_v35  ;;  %v7667_v41 = vadd.f32 %v7643_v20, %v7471_v42  ;;  %v7801_v20 = vmul.u32 10, %v7800_v24  ;;  %v7850_v46 = vadd.s32 %v7844_v48, %v7840_v3  ;;  %vm12535_vm1 = vc.u32 %v7840_v3, %v7844_v48 }
 0x489   : > { %v12563_v45 = vmul.u32 52428, %v7924_v36  ;;  %v7927_v48 = vmul.u32 52429, %v7924_v36  ;;  %v12585_v34 = vmul.u32 52429, %v7925_v11  ;;  %vm8009_vm14 = vcmp.ne.s32.totalorder %v12548_v12, 0 }
 0x48a   : > { %v7276_v29 = vpop.f32.mrf.mxu2  ;;  %7677 = vst.msk [vmem:[#allocation2] sm:$0xff] %vm632_vm4, %v7667_v41  ;;  %v7818_v41 = vshrl.u32 %v12475_v22, 16  ;;  %v7896_v22 = vshrl.u32 %v12508_v16, 16  ;;  %v12552_v55 = vsub.s32 %v12422_v49, %v7801_v20  ;;  %vm12570_vm3 = vc.u32 %v7850_v46, %v7846_v44 }
 0x48b   : > { %v7409_v25 = vpop.f32.mrf.mxu3  ;;  %v7933_v51 = vshll.u32 %v12585_v34, 16  ;;  %vm8019_vm15 = vcmp.lt.s32.totalorder %v12548_v12, 0 }
 0x48c   : > { %v7553_v15 = vpop.f32.mrf.mxu0  ;;  %v7410_v40 = vadd.f32 %v7409_v25, %v7276_v29  ;;  %v7869_v29 = vmul.u32 52429, %v7866_v2  ;;  %v12540_v25 = vmul.u32 52428, %v7895_v7  ;;  %v7849_v2 = vsel %vm12535_vm1, 1, %v10222_v38 }
 0x48d   : > { %v7644_v43 = vpop.f32.mrf.mxu1  ;;  %v12574_v53 = vmul.u32 52429, %v7896_v22  ;;  %v7901_v46 = vmul.u32 52428, %v7896_v22  ;;  %vm8010_vm0 = vcmp.ne.s32.totalorder %v12552_v55, 0 }
 0x48e   : > { %v7431_v21 = vadd.f32 %v7410_v40, %v7151_v60  ;;  %v7645_v47 = vadd.f32 %v7644_v43, %v7553_v15  ;;  %v7827_v15 = vadd.s32 %v7826_v57, %v7816_v28  ;;  %v12543_v40 = vadd.s32 64, %v12409_v0 }
 0x48f   : > { %v7472_v23 = vld [vmem:[#allocation2 + $0x8] sm:$0xff]  ;;  %v7843_v43 = vmul.u32 52428, %v7838_v13  ;;  %vm12558_vm2 = vc.u32 %v7869_v29, %v7873_v1  ;;  %v7898_v13 = vmul.u32 52429, %v7895_v7  ;;  %v7902_v50 = vshll.u32 %v12540_v25, 16 }
 0x490   : > { %7441 = vst.msk [vmem:[#allocation2 + $0x10] sm:$0xff] %vm632_vm4, %v7431_v21  ;;  %v7668_v58 = vadd.f32 %v7645_v47, %v7472_v23  ;;  %v7879_v47 = vadd.s32 %v7873_v1, %v7869_v29  ;;  %v12565_v49 = vadd.s32 %v7827_v15, %v7818_v41  ;;  %v7872_v28 = vmul.u32 52428, %v7867_v4 }
 0x491   : > { %v12501_v31 = vld [vmem:[#allocation2] sm:$0xff]  ;;  %v7878_v3 = vsel %vm12558_vm2, 1, %v10222_v38  ;;  %v7845_v4 = vshrl.u32 %v12499_v5, 16  ;;  %vm12594_vm6 = vc.u32 %v7898_v13, %v7902_v50  ;;  %v7908_v29 = vadd.s32 %v7902_v50, %v7898_v13 }
 0x492   : > { %v7278_v33 = vpop.f32.mrf.mxu2  ;;  %7697 = vst.msk [vmem:[%s12494_s21] sm:$0xff] %vm632_vm4, %v12501_v31  ;;  %vm12581_vm5 = vc.u32 %v7879_v47, %v7875_v54  ;;  %v7853_v5 = vsel %vm12570_vm3, 1, %v10222_v38  ;;  %v7907_v54 = vsel %vm12594_vm6, 1, %v10222_v38  ;;  %v7154_v47 = vld [vmem:[#allocation2 + $0x28] sm:$0xff]  ;;  %v7903_v41 = vshrl.u32 %v12540_v25, 16  ;;  %vm12679_vm3 = vmand %vm8018_vm13, %vm8008_vm12 }
 0x493   : > { %7678 = vst.msk [vmem:[#allocation2 + $0x8] sm:$0xff] %vm632_vm4, %v7668_v58  ;;  %v7411_v19 = vpop.f32.mrf.mxu3  ;;  %v7874_v58 = vshrl.u32 %v12516_v14, 16  ;;  %vm8020_vm2 = vcmp.lt.s32.totalorder %v12552_v55, 0 }
 0x494   : > { %v7556_v9 = vpop.f32.mrf.mxu0  ;;  %v7412_v56 = vadd.f32 %v7411_v19, %v7278_v33  ;;  %v7153_v33 = vld [vmem:[#allocation2 + $0x20] sm:$0xff] }
 0x495   : > { %v7647_v8 = vpop.f32.mrf.mxu1 }
 0x496   : > { %v7432_v59 = vadd.f32 %v7412_v56, %v7152_v62  ;;  %v7648_v35 = vadd.f32 %v7647_v8, %v7556_v9  ;;  %v7953_v9 = vand.u32 65535, %v12543_v40  ;;  %v7931_v62 = vshll.u32 %v12563_v45, 16 }
 0x497   : > { %v7473_v42 = vld [vmem:[#allocation2 + $0x10] sm:$0xff] }
 0x498   : > { %7442 = vst.msk [vmem:[#allocation2 + $0x18] sm:$0xff] %vm632_vm4, %v7432_v59  ;;  %v7669_v18 = vadd.f32 %v7648_v35, %v7473_v42  ;;  %v7851_v59 = vadd.s32 %v7849_v2, %v7843_v43  ;;  %v7954_v35 = vshrl.u32 %v12543_v40, 16  ;;  %v7904_v42 = vshll.u32 %v12574_v53, 16 }
 0x499   : > { %v12598_v1 = vmul.u32 52428, %v7953_v9  ;;  %vm7935_vm7 = vc.u32 %v7927_v48, %v7931_v62 }
 0x49a   : > { %v7281_v37 = vpop.f32.mrf.mxu2  ;;  %v12545_v52 = vld [vmem:[#allocation2 + $0x8] sm:$0xff]  ;;  %7679 = vst.msk [vmem:[#allocation2 + $0x10] sm:$0xff] %vm632_vm4, %v7669_v18  ;;  %v7880_v18 = vadd.s32 %v7878_v3, %v7872_v28  ;;  %v12609_v15 = vmul.u32 52429, %v7954_v35  ;;  %v7855_v2 = vadd.s32 %v7853_v5, %v7851_v59  ;;  %vm7910_vm8 = vc.u32 %v7908_v29, %v7904_v42 }
 0x49b   : > { %7698 = vst.msk [vmem:[%s12494_s21 + $0x8] sm:$0xff] %vm632_vm4, %v12545_v52  ;;  %v7414_v17 = vpop.f32.mrf.mxu3  ;;  %v7960_v21 = vshll.u32 %v12598_v1, 16  ;;  %v7936_v13 = vsel %vm7935_vm7, 1, %v10222_v38  ;;  %v7909_v28 = vadd.s32 %v7907_v54, %v7901_v46  ;;  %v7959_v3 = vmul.u32 52428, %v7954_v35 }
 0x49c   : > { %v7558_v60 = vpop.f32.mrf.mxu0  ;;  %v7415_v23 = vadd.f32 %v7414_v17, %v7281_v37  ;;  %v7882_v37 = vsel %vm12581_vm5, 1, %v10222_v38  ;;  %v7956_v17 = vmul.u32 52429, %v7953_v9  ;;  %v7962_v50 = vshll.u32 %v12609_v15, 16  ;;  %vm12687_vm5 = vmand %vm8019_vm15, %vm8009_vm14 }
 0x49d   : > { %v7649_v61 = vpop.f32.mrf.mxu1  ;;  %v7856_v35 = vadd.s32 %v7855_v2, %v7845_v4  ;;  %v7829_v46 = vshrl.u32 %v12565_v49, 3  ;;  %v7905_v2 = vshrl.u32 %v12574_v53, 16  ;;  %v7934_v53 = vshrl.u32 %v12585_v34, 16 }
 0x49e   : > { %v7433_v24 = vadd.f32 %v7415_v23, %v7153_v33  ;;  %v7650_v19 = vadd.f32 %v7649_v61, %v7558_v60  ;;  %v7937_v60 = vadd.s32 %v7931_v62, %v7927_v48  ;;  %v7930_v33 = vmul.u32 52428, %v7925_v11 }
 0x49f   : > { %v7474_v56 = vld [vmem:[#allocation2 + $0x18] sm:$0xff]  ;;  %v7911_v11 = vsel %vm7910_vm8, 1, %v10222_v38  ;;  %vm7964_vm10 = vc.u32 %v7956_v17, %v7960_v21  ;;  %v7966_v57 = vadd.s32 %v7960_v21, %v7956_v17  ;;  %v7847_v48 = vshrl.u32 %v12521_v10, 16 }
 0x4a0   : > { %7443 = vst.msk [vmem:[#allocation2 + $0x20] sm:$0xff] %vm632_vm4, %v7433_v24  ;;  %v7670_v8 = vadd.f32 %v7650_v19, %v7474_v56  ;;  %v7884_v19 = vadd.s32 %v7882_v37, %v7880_v18  ;;  %vm12620_vm9 = vc.u32 %v7937_v60, %v7933_v51  ;;  %v7938_v62 = vadd.s32 %v7936_v13, %v7930_v33  ;;  %v7155_v51 = vld [vmem:[#allocation2 + $0x30] sm:$0xff] }
 0x4a1   : > { %v12591_v20 = vld [vmem:[#allocation2 + $0x10] sm:$0xff]  ;;  %v7940_v29 = vsel %vm12620_vm9, 1, %v10222_v38  ;;  %vm7968_vm11 = vc.u32 %v7966_v57, %v7962_v50  ;;  %v7913_v10 = vadd.s32 %v7911_v11, %v7909_v28  ;;  %v7876_v18 = vshrl.u32 %v12528_v6, 16  ;;  %vm12708_vm9 = vmand %vm8020_vm2, %vm8010_vm0 }
 0x4a2   : > { %v7283_v7 = vpop.f32.mrf.mxu2  ;;  %7699 = vst.msk [vmem:[%s12494_s21 + $0x10] sm:$0xff] %vm632_vm4, %v12591_v20  ;;  %v7885_v37 = vadd.s32 %v7884_v19, %v7874_v58  ;;  %v7942_v54 = vadd.s32 %v7940_v29, %v7938_v62  ;;  %v7857_v21 = vadd.s32 %v7856_v35, %v7847_v48  ;;  %v7961_v6 = vshrl.u32 %v12598_v1, 16  ;;  %v7156_v29 = vld [vmem:[#allocation2 + $0x38] sm:$0xff] }
 0x4a3   : > { %7680 = vst.msk [vmem:[#allocation2 + $0x18] sm:$0xff] %vm632_vm4, %v7670_v8  ;;  %v7416_v44 = vpop.f32.mrf.mxu3  ;;  %v7965_v8 = vsel %vm7964_vm10, 1, %v10222_v38  ;;  %v8039_v9 = vadd.s32 10, %v12548_v12  ;;  %v7963_v48 = vshrl.u32 %v12609_v15, 16 }
 0x4a4   : > { %v7561_v36 = vpop.f32.mrf.mxu0  ;;  %v7417_v43 = vadd.f32 %v7416_v44, %v7283_v7  ;;  %v12629_v7 = vadd.s32 72, %v12409_v0  ;;  %v7969_v44 = vsel %vm7968_vm11, 1, %v10222_v38  ;;  %v7886_v49 = vadd.s32 %v7885_v37, %v7876_v18 }
 0x4a5   : > { %v7652_v23 = vpop.f32.mrf.mxu1 }
 0x4a6   : > { %v7434_v22 = vadd.f32 %v7417_v43, %v7154_v47  ;;  %v7653_v61 = vadd.f32 %v7652_v23, %v7561_v36  ;;  %v7967_v36 = vadd.s32 %v7965_v8, %v7959_v3  ;;  %v7982_v4 = vand.u32 65535, %v12629_v7 }
 0x4a7   : > { %v7475_v24 = vld [vmem:[#allocation2 + $0x20] sm:$0xff]  ;;  %v7983_v5 = vshrl.u32 %v12629_v7, 16  ;;  %v7932_v43 = vshrl.u32 %v12563_v45, 16  ;;  %v7858_v3 = vshrl.u32 %v7857_v21, 3  ;;  %v7887_v8 = vshrl.u32 %v7886_v49, 3 }
 0x4a8   : > { %7444 = vst.msk [vmem:[#allocation2 + $0x28] sm:$0xff] %vm632_vm4, %v7434_v22  ;;  %v7671_v56 = vadd.f32 %v7653_v61, %v7475_v24  ;;  %v12650_v17 = vmul.u32 52428, %v7982_v4  ;;  %v7914_v22 = vadd.s32 %v7913_v10, %v7903_v41  ;;  %v7971_v58 = vadd.s32 %v7969_v44, %v7967_v36 }
 0x4a9   : > { %v12654_v61 = vmul.u32 52429, %v7983_v5  ;;  %v7985_v50 = vmul.u32 52429, %v7982_v4  ;;  %v7830_v24 = vmul.u32 10, %v7829_v46  ;;  %v7943_v28 = vadd.s32 %v7942_v54, %v7932_v43 }
 0x4aa   : > { %v7286_v14 = vpop.f32.mrf.mxu2  ;;  %v12631_v59 = vld [vmem:[#allocation2 + $0x18] sm:$0xff]  ;;  %7681 = vst.msk [vmem:[#allocation2 + $0x20] sm:$0xff] %vm632_vm4, %v7671_v56  ;;  %v7989_v1 = vshll.u32 %v12650_v17, 16  ;;  %v7915_v57 = vadd.s32 %v7914_v22, %v7905_v2  ;;  %v7972_v34 = vadd.s32 %v7971_v58, %v7961_v6  ;;  %v7859_v4 = vmul.u32 10, %v7858_v3 }
 0x4ab   : > { %7700 = vst.msk [vmem:[%s12494_s21 + $0x18] sm:$0xff] %vm632_vm4, %v12631_v59  ;;  %v7419_v0 = vpop.f32.mrf.mxu3  ;;  %v7991_v62 = vshll.u32 %v12654_v61, 16  ;;  %v12672_v41 = vsub.s32 %v12450_v32, %v7830_v24  ;;  %v7944_v10 = vadd.s32 %v7943_v28, %v7934_v53  ;;  %v7888_v43 = vmul.u32 10, %v7887_v8 }
 0x4ac   : > { %v7563_v42 = vpop.f32.mrf.mxu0  ;;  %v7420_v25 = vadd.f32 %v7419_v0, %v7286_v14  ;;  %v7988_v14 = vmul.u32 52428, %v7983_v5  ;;  %vm7993_vm1 = vc.u32 %v7985_v50, %v7989_v1  ;;  %v7916_v44 = vshrl.u32 %v7915_v57, 3 }
 0x4ad   : > { %v7654_v60 = vpop.f32.mrf.mxu1  ;;  %v7994_v36 = vsel %vm7993_vm1, 1, %v10222_v38  ;;  %v7973_v46 = vadd.s32 %v7972_v34, %v7963_v48  ;;  %vm8011_vm7 = vcmp.ne.s32.totalorder %v12672_v41, 0  ;;  %vm8021_vm8 = vcmp.lt.s32.totalorder %v12672_v41, 0 }
 0x4ae   : > { %v7435_v47 = vadd.f32 %v7420_v25, %v7155_v51  ;;  %v7655_v23 = vadd.f32 %v7654_v60, %v7563_v42  ;;  %v7995_v42 = vadd.s32 %v7989_v1, %v7985_v50  ;;  %v7996_v18 = vadd.s32 %v7994_v36, %v7988_v14  ;;  %vm12727_vm10 = vmand %vm8021_vm8, %vm8011_vm7  ;;  %v7157_v1 = vld [vmem:[#allocation2 + $0x40] sm:$0xff] }
 0x4af   : > { %v7476_v33 = vld [vmem:[#allocation2 + $0x28] sm:$0xff]  ;;  %v7990_v51 = vshrl.u32 %v12650_v17, 16  ;;  %v8040_v60 = vadd.s32 10, %v12552_v55  ;;  %v8048_v17 = vsel %vm12679_vm3, %v12525_v30, %v12504_v63  ;;  %v8041_v22 = vadd.s32 10, %v12672_v41 }
 0x4b0   : > { %7445 = vst.msk [vmem:[#allocation2 + $0x30] sm:$0xff] %vm632_vm4, %v7435_v47  ;;  %v7672_v45 = vadd.f32 %v7655_v23, %v7476_v33  ;;  %vm7997_vm6 = vc.u32 %v7995_v42, %v7991_v62  ;;  %v7945_v23 = vshrl.u32 %v7944_v10, 3  ;;  %v8049_v33 = vsel %vm12687_vm5, %v8039_v9, %v12548_v12 }
 0x4b1   : > { %v12658_v19 = vld [vmem:[#allocation2 + $0x20] sm:$0xff]  ;;  %v7998_v47 = vsel %vm7997_vm6, 1, %v10222_v38  ;;  %v12714_v6 = vsub.s32 %v12480_v39, %v7859_v4  ;;  %v7917_v30 = vmul.u32 10, %v7916_v44  ;;  %v7992_v49 = vshrl.u32 %v12654_v61, 16 }
 0x4b2   : > { %v7288_v13 = vpop.f32.mrf.mxu2  ;;  %7701 = vst.msk [vmem:[%s12494_s21 + $0x20] sm:$0xff] %vm632_vm4, %v12658_v19  ;;  %v8000_v2 = vadd.s32 %v7998_v47, %v7996_v18  ;;  %v12732_v50 = vsub.s32 %v12487_v27, %v7888_v43  ;;  %vm12734_vm11 = vcmp.lt.s32.totalorder %v8048_v17, 8  ;;  %vm12738_vm12 = vcmp.lt.s32.totalorder %v8049_v33, 8 }
 0x4b3   : > { %7682 = vst.msk [vmem:[#allocation2 + $0x28] sm:$0xff] %vm632_vm4, %v7672_v45  ;;  %v7421_v11 = vpop.f32.mrf.mxu3  ;;  %v7974_v45 = vshrl.u32 %v7973_v46, 3  ;;  %v8050_v61 = vsel %vm12708_vm9, %v8040_v60, %v12552_v55  ;;  %v7946_v3 = vmul.u32 10, %v7945_v23  ;;  %vm8012_vm13 = vcmp.ne.s32.totalorder %v12714_v6, 0  ;;  %v7158_v46 = vld [vmem:[#allocation2 + $0x48] sm:$0xff] }
 0x4b4   : > { %v7566_v56 = vpop.f32.mrf.mxu0  ;;  %v7422_v35 = vadd.f32 %v7421_v11, %v7288_v13  ;;  %v8001_v13 = vadd.s32 %v8000_v2, %v7990_v51  ;;  %vm8022_vm14 = vcmp.lt.s32.totalorder %v12714_v6, 0  ;;  %v8051_v14 = vsel %vm12727_vm10, %v8041_v22, %v12672_v41 }
 0x4b5   : > { %v7657_v0 = vpop.f32.mrf.mxu1  ;;  %v12751_v11 = vsub.s32 %v12508_v16, %v7917_v30  ;;  %v7975_v48 = vmul.u32 10, %v7974_v45  ;;  %v8042_v34 = vadd.s32 10, %v12714_v6  ;;  %vm8013_vm15 = vcmp.ne.s32.totalorder %v12732_v50, 0  ;;  %vm12767_vm1 = vmand %vm8022_vm14, %vm8012_vm13 }
 0x4b6   : > { %v7436_v5 = vadd.f32 %v7422_v35, %v7156_v29  ;;  %v7658_v25 = vadd.f32 %v7657_v0, %v7566_v56  ;;  %v8002_v55 = vadd.s32 %v8001_v13, %v7992_v49  ;;  %vm8023_vm0 = vcmp.lt.s32.totalorder %v12732_v50, 0 }
 0x4b7   : > { %v7477_v37 = vld [vmem:[#allocation2 + $0x30] sm:$0xff]  ;;  %v8088_v8 = vsel %vm12734_vm11, %v12501_v31, 0.0  ;;  %v8089_v16 = vsel %vm12738_vm12, %v12545_v52, 0.0  ;;  %v12774_v41 = vsub.s32 %v12519_v26, %v7946_v3  ;;  %vm12776_vm2 = vcmp.lt.s32.totalorder %v8050_v61, 8  ;;  %vm12790_vm5 = vmand %vm8023_vm0, %vm8013_vm15 }
 0x4b8   : > { %7446 = vst.msk [vmem:[#allocation2 + $0x38] sm:$0xff] %vm632_vm4, %v7436_v5  ;;  %v7673_v54 = vadd.f32 %v7658_v25, %v7477_v37  ;;  %vm12780_vm3 = vcmp.lt.s32.totalorder %v8051_v14, 8  ;;  %v8043_v0 = vadd.s32 10, %v12732_v50  ;;  %vm8014_vm6 = vcmp.ne.s32.totalorder %v12751_v11, 0 }
 0x4b9   : > { %vm8024_vm7 = vcmp.lt.s32.totalorder %v12751_v11, 0  ;;  %v12798_v15 = vsub.s32 %v12543_v40, %v7975_v48  ;;  %v8003_v4 = vshrl.u32 %v8002_v55, 3  ;;  %v8125_v5 = vmul.f32 %v8088_v8, %v8088_v8 }
 0x4ba   : > { %v7291_v21 = vpop.f32.mrf.mxu2  ;;  %v12716_v58 = vld [vmem:[#allocation2 + $0x28] sm:$0xff]  ;;  %7683 = vst.msk [vmem:[#allocation2 + $0x30] sm:$0xff] %vm632_vm4, %v7673_v54  ;;  %v8099_v25 = vsel %vm632_vm4, %v8089_v16, 0.0  ;;  %v8052_v18 = vsel %vm12767_vm1, %v8042_v34, %v12714_v6  ;;  %v8126_v37 = vmul.f32 %v8089_v16, %v8089_v16  ;;  %v8044_v44 = vadd.s32 10, %v12751_v11  ;;  %vm12817_vm10 = vmand %vm8024_vm7, %vm8014_vm6 }
 0x4bb   : > { %7702 = vst.msk [vmem:[%s12494_s21 + $0x28] sm:$0xff] %vm632_vm4, %v12716_v58  ;;  %v7424_v12 = vpop.f32.mrf.mxu3  ;;  %vm8015_vm8 = vcmp.ne.s32.totalorder %v12774_v41, 0  ;;  %vm8025_vm9 = vcmp.lt.s32.totalorder %v12774_v41, 0  ;;  %v8090_v40 = vsel %vm12776_vm2, %v12591_v20, 0.0  ;;  %v8053_v60 = vsel %vm12790_vm5, %v8043_v0, %v12732_v50 }
 0x4bc   : > { %v7568_v63 = vpop.f32.mrf.mxu0  ;;  %v7425_v24 = vadd.f32 %v7424_v12, %v7291_v21  ;;  %v8045_v47 = vadd.s32 10, %v12774_v41  ;;  %vm8016_vm11 = vcmp.ne.s32.totalorder %v12798_v15, 0  ;;  %vm8026_vm12 = vcmp.lt.s32.totalorder %v12798_v15, 0  ;;  %vm12836_vm14 = vmand %vm8025_vm9, %vm8015_vm8 }
 0x4bd   : > { %v7659_v9 = vpop.f32.mrf.mxu1  ;;  %v8004_v20 = vmul.u32 10, %v8003_v4  ;;  %v8098_v2 = vsel %vm632_vm4, %v8088_v8, 0.0  ;;  %v8091_v17 = vsel %vm12780_vm3, %v12631_v59, 0.0  ;;  %vm12828_vm13 = vcmp.lt.s32.totalorder %v8052_v18, 8  ;;  %vm12853_vm0 = vmand %vm8026_vm12, %vm8016_vm11 }
 0x4be   : > { %v7437_v27 = vadd.f32 %v7425_v24, %v7157_v1  ;;  %v7660_v56 = vadd.f32 %v7659_v9, %v7568_v63  ;;  %v8136_v6 = vsel %vm632_vm4, %v8126_v37, 0.0  ;;  %v8127_v63 = vmul.f32 %v8090_v40, %v8090_v40 }
 0x4bf   : > { %v7478_v57 = vld [vmem:[#allocation2 + $0x38] sm:$0xff]  ;;  %v8054_v59 = vsel %vm12817_vm10, %v8044_v44, %v12751_v11  ;;  %v8046_v30 = vadd.s32 10, %v12798_v15  ;;  %v8135_v12 = vsel %vm632_vm4, %v8125_v5, 0.0  ;;  %v8100_v45 = vadd.f32 %v8099_v25, %v8098_v2 }
 0x4c0   : > { %7447 = vst.msk [vmem:[#allocation2 + $0x40] sm:$0xff] %vm632_vm4, %v7437_v27  ;;  %v7674_v62 = vadd.f32 %v7660_v56, %v7478_v57  ;;  %v8101_v49 = vsel %vm632_vm4, %v8090_v40, 0.0  ;;  %vm8063_vm15 = vcmp.lt.s32.totalorder %v8053_v60, 8  ;;  %v8128_v50 = vmul.f32 %v8091_v17, %v8091_v17 }
 0x4c1   : > { %v12771_v42 = vld [vmem:[#allocation2 + $0x30] sm:$0xff]  ;;  %v8092_v24 = vsel %vm12828_vm13, %v12658_v19, 0.0  ;;  %v8055_v53 = vsel %vm12836_vm14, %v8045_v47, %v12774_v41  ;;  %v8005_v61 = vsub.s32 %v12629_v7, %v8004_v20  ;;  %v8137_v1 = vadd.f32 %v8136_v6, %v8135_v12 }
 0x4c2   : > { %v7293_v29 = vpop.f32.mrf.mxu2  ;;  %7703 = vst.msk [vmem:[%s12494_s21 + $0x30] sm:$0xff] %vm632_vm4, %v12771_v42  ;;  %vm8064_vm1 = vcmp.lt.s32.totalorder %v8054_v59, 8  ;;  %v8102_v9 = vadd.f32 %v8101_v49, %v8100_v45  ;;  %v8138_v3 = vsel %vm632_vm4, %v8127_v63, 0.0  ;;  %v8093_v27 = vsel %vm8063_vm15, %v12716_v58, 0.0 }
 0x4c3   : > { %7684 = vst.msk [vmem:[#allocation2 + $0x38] sm:$0xff] %vm632_vm4, %v7674_v62  ;;  %v7426_v36 = vpop.f32.mrf.mxu3  ;;  %v8056_v19 = vsel %vm12853_vm0, %v8046_v30, %v12798_v15  ;;  %v8103_v14 = vsel %vm632_vm4, %v8091_v17, 0.0  ;;  %v8129_v11 = vmul.f32 %v8092_v24, %v8092_v24  ;;  %vm8065_vm2 = vcmp.lt.s32.totalorder %v8055_v53, 8 }
 0x4c4   : > { %v7571_v10 = vpop.f32.mrf.mxu0  ;;  %v7427_v32 = vadd.f32 %v7426_v36, %v7293_v29  ;;  %v8140_v48 = vsel %vm632_vm4, %v8128_v50, 0.0  ;;  %v8094_v7 = vsel %vm8064_vm1, %v12771_v42, 0.0  ;;  %vm8017_vm3 = vcmp.ne.s32.totalorder %v8005_v61, 0 }
 0x4c5   : > { %v7662_v51 = vpop.f32.mrf.mxu1  ;;  %vm8027_vm5 = vcmp.lt.s32.totalorder %v8005_v61, 0  ;;  %v8105_v58 = vsel %vm632_vm4, %v8092_v24, 0.0  ;;  %v8130_v34 = vmul.f32 %v8093_v27, %v8093_v27  ;;  %vm8066_vm6 = vcmp.lt.s32.totalorder %v8056_v19, 8 }
 0x4c6   : > { %v7438_v54 = vadd.f32 %v7427_v32, %v7158_v46  ;;  %v7663_v21 = vadd.f32 %v7662_v51, %v7571_v10  ;;  %v8139_v8 = vadd.f32 %v8138_v3, %v8137_v1  ;;  %v8104_v16 = vadd.f32 %v8103_v14, %v8102_v9  ;;  %vm12880_vm7 = vmand %vm8027_vm5, %vm8017_vm3 }
 0x4c7   : > { %v7479_v23 = vld [vmem:[#allocation2 + $0x40] sm:$0xff]  ;;  %v8047_v29 = vadd.s32 10, %v8005_v61  ;;  %v8142_v31 = vsel %vm632_vm4, %v8129_v11, 0.0  ;;  %v8107_v52 = vsel %vm632_vm4, %v8093_v27, 0.0  ;;  %v8131_v0 = vmul.f32 %v8094_v7, %v8094_v7 }
 0x4c8   : > { %7448 = vst.msk [vmem:[#allocation2 + $0x48] sm:$0xff] %vm632_vm4, %v7438_v54  ;;  %v7675_v22 = vadd.f32 %v7663_v21, %v7479_v23  ;;  %v8141_v10 = vadd.f32 %v8140_v48, %v8139_v8  ;;  %v8106_v26 = vadd.f32 %v8105_v58, %v8104_v16  ;;  %v8144_v15 = vsel %vm632_vm4, %v8130_v34, 0.0 }
 0x4c9   : > { %v8109_v4 = vsel %vm632_vm4, %v8094_v7, 0.0  ;;  %v8057_v32 = vsel %vm12880_vm7, %v8047_v29, %v8005_v61  ;;  %v8146_v37 = vsel %vm632_vm4, %v8131_v0, 0.0  ;;  %vm8123_vm9 = vcmask 122880  }
 0x4ca   : > { %v7694_v13 = vld [vmem:[#allocation2 + $0x38] sm:$0xff]  ;;  %7685 = vst.msk [vmem:[#allocation2 + $0x40] sm:$0xff] %vm632_vm4, %v7675_v22  ;;  %v8143_v25 = vadd.f32 %v8142_v31, %v8141_v10  ;;  %v8108_v18 = vadd.f32 %v8107_v52, %v8106_v26  ;;  %vm8067_vm8 = vcmp.lt.s32.totalorder %v8057_v32, 8 }
 0x4cb   : > { %7704 = vst.msk [vmem:[%s12494_s21 + $0x38] sm:$0xff] %vm632_vm4, %v7694_v13  ;;  %v8095_v35 = vsel %vm8065_vm2, %v7694_v13, 0.0 }
 0x4cc   : > { %v7573_v28 = vpop.f32.mrf.mxu0  ;;  %v8132_v5 = vmul.f32 %v8095_v35, %v8095_v35  ;;  %v8111_v44 = vsel %vm632_vm4, %v8095_v35, 0.0  ;;  %v8145_v51 = vadd.f32 %v8144_v15, %v8143_v25  ;;  %v8110_v40 = vadd.f32 %v8109_v4, %v8108_v18 }
 0x4cd   : > { %v7664_v56 = vpop.f32.mrf.mxu1 }
 0x4ce   : > { %v7665_v57 = vadd.f32 %v7664_v56, %v7573_v28  ;;  %v8148_v60 = vsel %vm632_vm4, %v8132_v5, 0.0  ;;  %v8147_v54 = vadd.f32 %v8146_v37, %v8145_v51  ;;  %v8112_v21 = vadd.f32 %v8111_v44, %v8110_v40 }
 0x4cf   : > { %v7480_v55 = vld [vmem:[#allocation2 + $0x48] sm:$0xff] }
 0x4d0   : > { %v7676_v62 = vadd.f32 %v7665_v57, %v7480_v55  ;;  %v8149_v20 = vadd.f32 %v8148_v60, %v8147_v54 }
 0x4d1   : > { %v7695_v41 = vld [vmem:[#allocation2 + $0x40] sm:$0xff] }
 0x4d2   : > { %7705 = vst.msk [vmem:[%s12494_s21 + $0x40] sm:$0xff] %vm632_vm4, %v7695_v41  ;;  %v8096_v36 = vsel %vm8066_vm6, %v7695_v41, 0.0 }
 0x4d3   : > { %7686 = vst.msk [vmem:[#allocation2 + $0x48] sm:$0xff] %vm632_vm4, %v7676_v62  ;;  %v8133_v46 = vmul.f32 %v8096_v36, %v8096_v36  ;;  %v8113_v43 = vsel %vm632_vm4, %v8096_v36, 0.0 }
 0x4d4   : > { %v8114_v2 = vadd.f32 %v8113_v43, %v8112_v21 }
 0x4d5   : > { %v8150_v47 = vsel %vm632_vm4, %v8133_v46, 0.0 }
 0x4d6   : > { %v8151_v22 = vadd.f32 %v8150_v47, %v8149_v20 }
 0x4da   : > { %v7696_v23 = vld [vmem:[#allocation2 + $0x48] sm:$0xff] }
 0x4db   : > { %7706 = vst.msk [vmem:[%s12494_s21 + $0x48] sm:$0xff] %vm632_vm4, %v7696_v23  ;;  %v8097_v17 = vsel %vm8067_vm8, %v7696_v23, 0.0 }
 0x4dc   : > { %v8115_v33 = vsel %vm632_vm4, %v8097_v17, 0.0  ;;  %v8134_v38 = vmul.f32 %v8097_v17, %v8097_v17 }
 0x4dd   : > { %v8116_v6 = vadd.f32 %v8115_v33, %v8114_v2 }
 0x4de   : > { %v8152_v63 = vsel %vm632_vm4, %v8134_v38, 0.0 }
 0x4df   : > { %v8117_v59 = vrot.slane %v8116_v6, 4  ;;  %v8153_v30 = vadd.f32 %v8152_v63, %v8151_v22 }
 0x4e1   : > { %v8118_v12 = vadd.f32 %v8117_v59, %v8116_v6  ;;  %v8154_v45 = vrot.slane %v8153_v30, 4 }
 0x4e3   : > { %v8119_v49 = vrot.slane %v8118_v12, 2  ;;  %v8155_v13 = vadd.f32 %v8154_v45, %v8153_v30 }
 0x4e5   : > { %v8120_v39 = vadd.f32 %v8119_v49, %v8118_v12  ;;  %v8156_v50 = vrot.slane %v8155_v13, 2 }
 0x4e7   : > { %v8121_v24 = vrot.slane %v8120_v39, 1  ;;  %v8157_v53 = vadd.f32 %v8156_v50, %v8155_v13 }
 0x4e9   : > { %v8122_v28 = vadd.f32 %v8121_v24, %v8120_v39  ;;  %v8158_v61 = vrot.slane %v8157_v53, 1 }
 0x4eb   : > { %8124 = vst.msk [vmem:[%s623_s23] sm:$0x1] %vm8123_vm9, %v8122_v28  ;;  %v8159_v1 = vadd.f32 %v8158_v61, %v8157_v53 }
 0x4ed   : > { %8160 = vst.msk [vmem:[%s630_s28] sm:$0x1] %vm8123_vm9, %v8159_v1 }
 0x4ee PF: > { %s21_s17 = sadd.s32 1, %s10219_s17   ;;  %s12976_s13 = smov %s10211_s15 }
 0x4ef   : > { %p18_p10 = scmp.ge.s32.totalorder %s21_s17, 18   ;;  %s12977_s14 = smov %s10215_s16 }
 0x4f0   : > { %s12978_s15 = smov %s12981_s18  ;;  %s12979_s16 = smov %s12985_s19 }
 0x4f1   :  { %20 = sbr.rel (!%p18_p10) target bundleno = 3 (0x3), region = 173 }

</bundles_post_ra>
